<compile_context>
chip_gen: v5e
topology: v5e:2x2
jax: 0.10.0
libtpu: 0.0.40
codegen_flags: <defaults>
</compile_context>

<pallas_src>
import functools

import jax
import jax.numpy as jnp
from jax.experimental import pallas as pl
from jax.experimental.pallas import tpu as pltpu

LANE = 128          # lane-dense channel padding target
K_STEM_PAD = 32     # stem contraction dim 27 -> 32
C_SE_PAD = 8        # SE bottleneck 4 -> 8
C_HEAD_LOGICAL = 64 # logical head channels exposed to the caller
VMEM_LIMIT = 32 * 1024 * 1024   # explicit scoped-VMEM budget (safe on v5e/v6e/v7x)


# ----------------------------- helpers ------------------------------------- #

def _silu(x):
    return x * jax.nn.sigmoid(x)


def _apply_act(x, act):
    if act == "silu":
        return _silu(x)
    if act == "sigmoid":
        return jax.nn.sigmoid(x)
    return x


def _round_up(x, m):
    return ((x + m - 1) // m) * m


def _pad_to(a, shape):
    return jnp.pad(a, [(0, t - s) for s, t in zip(a.shape, shape)])


def _compiler_params():
    return pltpu.CompilerParams(
        dimension_semantics=("parallel",),
        vmem_limit_bytes=VMEM_LIMIT,
    )


# ----------------------------- Pallas kernels ------------------------------ #

def _matmul_bias_act_kernel(x_ref, w_ref, b_ref, o_ref, *, act):
    # bf16 operands on the MXU, f32 accumulate, f32 activation, bf16 store.
    acc = jnp.dot(x_ref[...], w_ref[...], preferred_element_type=jnp.float32)
    acc = acc + b_ref[...]
    o_ref[...] = _apply_act(acc, act).astype(o_ref.dtype)


def _mbconv_fused_kernel(hp_ref, xres_ref, dww_ref, dwb_ref,
                         se1w_ref, se1b_ref, se2w_ref, se2b_ref,
                         projw_ref, projb_ref, o_ref, *, H, W):
    """Fused: depthwise 3x3 + SiLU + squeeze-excitation + project 1x1 + residual.

    hp_ref:   (1, H+2, W+2, C)  spatially zero-padded expanded activation (bf16)
    xres_ref: (1, H*W, C)       residual (block input, bf16)
    o_ref:    (1, H*W, C)       projected output (bf16)
    """
    C = dww_ref.shape[1]
    hp = hp_ref[0]                              # (H+2, W+2, C)
    dww = dww_ref[...].reshape(9, 1, C)         # per-tap (1, C) rows

    # Depthwise 3x3 as 9 unrolled VPU FMAs over shifted halo slices (no im2col).
    acc = jnp.zeros((H, W, C), jnp.float32)
    for di in range(3):
        for dj in range(3):
            tap = hp[di:di + H, dj:dj + W, :].astype(jnp.float32)
            acc = acc + tap * dww[di * 3 + dj]
    acc = acc + dwb_ref[...]                    # (1, C) broadcast
    h = _silu(acc)                              # f32
    h2 = h.reshape(H * W, C)

    # Squeeze-excitation fused in-kernel (tiny matmuls, f32 math, f32 sigmoid).
    s = jnp.mean(h2, axis=0, keepdims=True)                              # (1, C)
    s = _silu(jnp.dot(s, se1w_ref[...],
                      preferred_element_type=jnp.float32) + se1b_ref[...])
    s = jax.nn.sigmoid(jnp.dot(s, se2w_ref[...],
                               preferred_element_type=jnp.float32) + se2b_ref[...])
    gated = h2 * s                                                       # (H*W, C)

    # Project 1x1 (linear) on the MXU + residual add in f32.
    proj = jnp.dot(gated.astype(jnp.bfloat16), projw_ref[...],
                   preferred_element_type=jnp.float32) + projb_ref[...]
    out = proj + xres_ref[0].astype(jnp.float32)
    o_ref[0] = out.astype(o_ref.dtype)


def _gap_kernel(x_ref, o_ref):
    # (1, HW, C) -> (1, 1, C) mean over spatial positions, f32 accumulate.
    hw = x_ref.shape[1]
    s = jnp.sum(x_ref[...].astype(jnp.float32), axis=1, keepdims=True)
    o_ref[...] = (s * (1.0 / hw)).astype(o_ref.dtype)


# ----------------------------- Pallas wrappers ----------------------------- #

def matmul_bias_act(x, w, b, act="none", block_m=256):
    """o = act(x @ w + b), tiled over rows with double-buffered BlockSpecs.

    block_m=256 keeps the demo multi-tile; raise to 512-2048 for production M.
    """
    M, K = x.shape
    Kw, N = w.shape
    assert K == Kw
    Mp = _round_up(M, block_m)
    if Mp != M:
        x = jnp.pad(x, ((0, Mp - M), (0, 0)))
    grid = (pl.cdiv(Mp, block_m),)
    out = pl.pallas_call(
        functools.partial(_matmul_bias_act_kernel, act=act),
        out_shape=jax.ShapeDtypeStruct((Mp, N), jnp.bfloat16),
        grid=grid,
        in_specs=[
            pl.BlockSpec((block_m, K), lambda i: (i, 0)),   # activations: tiled
            pl.BlockSpec((K, N), lambda i: (0, 0)),          # weight: resident
            pl.BlockSpec((1, N), lambda i: (0, 0)),          # bias: resident
        ],
        out_specs=pl.BlockSpec((block_m, N), lambda i: (i, 0)),
        compiler_params=_compiler_params(),
    )(x.astype(jnp.bfloat16), w.astype(jnp.bfloat16),
      b.reshape(1, N).astype(jnp.float32))
    return out[:M]


def mbconv_dw_se_project(h_nhwc, x_res, dw_w, dw_b, se1_w, se1_b,
                         se2_w, se2_b, proj_w, proj_b):
    """Fused MBConv tail, one grid step per batch element (megacore-parallel)."""
    N, H, W, C = h_nhwc.shape
    Cse = se1_w.shape[1]
    CP = proj_w.shape[1]
    assert CP == C  # both padded to LANE
    # Single spatially-padded copy (1.27x) instead of a 9x im2col tensor.
    hp = jnp.pad(h_nhwc, ((0, 0), (1, 1), (1, 1), (0, 0))).astype(jnp.bfloat16)
    x_res3 = x_res.reshape(N, H * W, CP).astype(jnp.bfloat16)
    return pl.pallas_call(
        functools.partial(_mbconv_fused_kernel, H=H, W=W),
        out_shape=jax.ShapeDtypeStruct((N, H * W, CP), jnp.bfloat16),
        grid=(N,),
        in_specs=[
            pl.BlockSpec((1, H + 2, W + 2, C), lambda i: (i, 0, 0, 0)),
            pl.BlockSpec((1, H * W, CP), lambda i: (i, 0, 0)),
            pl.BlockSpec((9, C), lambda i: (0, 0)),
            pl.BlockSpec((1, C), lambda i: (0, 0)),
            pl.BlockSpec((C, Cse), lambda i: (0, 0)),
            pl.BlockSpec((1, Cse), lambda i: (0, 0)),
            pl.BlockSpec((Cse, C), lambda i: (0, 0)),
            pl.BlockSpec((1, C), lambda i: (0, 0)),
            pl.BlockSpec((C, CP), lambda i: (0, 0)),
            pl.BlockSpec((1, CP), lambda i: (0, 0)),
        ],
        out_specs=pl.BlockSpec((1, H * W, CP), lambda i: (i, 0, 0)),
        compiler_params=_compiler_params(),
    )(hp, x_res3,
      dw_w.astype(jnp.float32), dw_b.reshape(1, C).astype(jnp.float32),
      se1_w.astype(jnp.float32), se1_b.reshape(1, Cse).astype(jnp.float32),
      se2_w.astype(jnp.float32), se2_b.reshape(1, C).astype(jnp.float32),
      proj_w.astype(jnp.bfloat16), proj_b.reshape(1, CP).astype(jnp.float32))


def global_avg_pool(x):
    """x: (N, HW, C) -> (N, C) f32 mean over spatial positions."""
    N, HW, C = x.shape
    out = pl.pallas_call(
        _gap_kernel,
        out_shape=jax.ShapeDtypeStruct((N, 1, C), jnp.float32),
        grid=(N,),
        in_specs=[pl.BlockSpec((1, HW, C), lambda i: (i, 0, 0))],
        out_specs=pl.BlockSpec((1, 1, C), lambda i: (i, 0, 0)),
        compiler_params=_compiler_params(),
    )(x)
    return out[:, 0, :]


# ----------------------------- Parameters ---------------------------------- #

def init_params(key):
    """Representative backbone weights, zero-padded to lane-dense shapes.

    Zero padding in weights/biases keeps padded channels exactly 0 through
    SiLU / SE gating / residual, so results equal the unpadded network.
    """
    ks = jax.random.split(key, 14)
    s = 0.1
    r = lambda k, shp: s * jax.random.normal(k, shp, jnp.float32)
    return {
        # stem 3x3/s2: 3 -> 16, patch-K 27 padded to 32, Cout padded to 128
        "stem_w": _pad_to(r(ks[0], (27, 16)), (K_STEM_PAD, LANE)),
        "stem_b": _pad_to(r(ks[1], (16,)), (LANE,)),
        # MBConv expand 1x1: 16 -> 64 (padded 128 -> 128)
        "exp_w": _pad_to(r(ks[2], (16, 64)), (LANE, LANE)),
        "exp_b": _pad_to(r(ks[3], (64,)), (LANE,)),
        # depthwise 3x3 on 64 channels (padded 128)
        "dw_w": _pad_to(r(ks[4], (9, 64)), (9, LANE)),
        "dw_b": _pad_to(r(ks[5], (64,)), (LANE,)),
        # squeeze-excitation 64 -> 4 -> 64 (padded 128 -> 8 -> 128)
        "se1_w": _pad_to(r(ks[6], (64, 4)), (LANE, C_SE_PAD)),
        "se1_b": _pad_to(r(ks[7], (4,)), (C_SE_PAD,)),
        "se2_w": _pad_to(r(ks[8], (4, 64)), (C_SE_PAD, LANE)),
        "se2_b": _pad_to(r(ks[9], (64,)), (LANE,)),
        # project 1x1: 64 -> 16 (padded 128 -> 128)
        "proj_w": _pad_to(r(ks[10], (64, 16)), (LANE, LANE)),
        "proj_b": _pad_to(r(ks[11], (16,)), (LANE,)),
        # head 1x1 conv: 16 -> 64 (padded 128 -> 128)
        "head_w": _pad_to(r(ks[12], (16, 64)), (LANE, LANE)),
        "head_b": _pad_to(r(ks[13], (64,)), (LANE,)),
    }


# ----------------------------- Model forward ------------------------------- #

def simple_model_forward(x_nchw, params):
    x_nchw = x_nchw.astype(jnp.float32)
    N = x_nchw.shape[0]

    # --- Stem: 3x3 conv stride 2 + SiLU (BN folded). im2col via XLA patches,
    #     then a tiled Pallas matmul (bf16 MXU, f32 accumulate). ---
    patches = jax.lax.conv_general_dilated_patches(
        x_nchw, filter_shape=(3, 3), window_strides=(2, 2),
        padding=((1, 1), (1, 1)),
        dimension_numbers=("NCHW", "OIHW", "NCHW"))
    _, K, Ho, Wo = patches.shape                      # K = 3*3*Cin = 27
    p2 = jnp.transpose(patches, (0, 2, 3, 1)).reshape(N * Ho * Wo, K)
    p2 = jnp.pad(p2, ((0, 0), (0, K_STEM_PAD - K)))   # K 27 -> 32
    y = matmul_bias_act(p2, params["stem_w"], params["stem_b"], act="silu")
    H, W = Ho, Wo
    M = N * H * W
    C1P = y.shape[-1]                                 # 128 (lane-padded)

    # --- MBConv block ---
    # expand 1x1 + SiLU (tiled matmul)
    h = matmul_bias_act(y, params["exp_w"], params["exp_b"], act="silu")
    # fused depthwise 3x3 + SiLU + SE + project 1x1 + residual (one kernel/batch)
    x2 = mbconv_dw_se_project(
        h.reshape(N, H, W, -1), y.reshape(N, H * W, C1P),
        params["dw_w"], params["dw_b"],
        params["se1_w"], params["se1_b"], params["se2_w"], params["se2_b"],
        params["proj_w"], params["proj_b"])           # (N, H*W, 128) bf16

    # --- Head 1x1 conv + SiLU (end of extract_features) ---
    feat = matmul_bias_act(x2.reshape(M, C1P), params["head_w"],
                           params["head_b"], act="silu")

    # --- AdaptiveAvgPool2d(1) ---
    pooled = global_avg_pool(feat.reshape(N, H * W, -1))     # (N, 128) f32
    pooled = pooled[:, :C_HEAD_LOGICAL]                      # drop zero padding
    return pooled.reshape(N, C_HEAD_LOGICAL, 1, 1)           # NCHW (N, C, 1, 1)


# --------------------------------- main ------------------------------------ #

if __name__ == "__main__":
    key = jax.random.PRNGKey(0)
    k_in, k_param = jax.random.split(key)

    # small deterministic NCHW image batch (RGB)
    x = jax.random.normal(k_in, (2, 3, 32, 32), jnp.float32)
    params = init_params(k_param)

    fwd = jax.jit(simple_model_forward)
    out = jax.block_until_ready(fwd(x, params))

    assert out.shape == (2, 64, 1, 1), out.shape
    assert out.dtype == jnp.float32
    assert bool(jnp.all(jnp.isfinite(out)))
    print("KERNEL_OK")
</pallas_src>

<mosaic_0001>
module attributes {stable_mosaic.version = 11 : i64} {
  func.func @_matmul_bias_act_kernel(%arg0: i32, %arg1: memref<256x32xbf16, #tpu.memory_space<vmem>>, %arg2: memref<32x128xbf16, #tpu.memory_space<vmem>>, %arg3: memref<1x128xf32, #tpu.memory_space<vmem>>, %arg4: memref<256x128xbf16, #tpu.memory_space<vmem>>) attributes {dimension_semantics = [#tpu.dimension_semantics<parallel>], iteration_bounds = array<i64: 2>, scalar_prefetch = 0 : i64, scratch_operands = 0 : i64, tpu.core_type = #tpu.core_type<tc>, window_params = [{transform_indices = @transform_0, window_bounds = array<i64: 256, 32>}, {pipeline_mode = #tpu.pipeline_mode<synchronous>, transform_indices = @transform_1, window_bounds = array<i64: 32, 128>}, {pipeline_mode = #tpu.pipeline_mode<synchronous>, transform_indices = @transform_2, window_bounds = array<i64: 1, 128>}, {transform_indices = @transform_3, window_bounds = array<i64: 256, 128>}]} {
    %c0 = arith.constant 0 : index
    %c0_0 = arith.constant 0 : index
    %0 = vector.load %arg1[%c0, %c0_0] : memref<256x32xbf16, #tpu.memory_space<vmem>>, vector<256x32xbf16>
    %c0_1 = arith.constant 0 : index
    %c0_2 = arith.constant 0 : index
    %1 = vector.load %arg2[%c0_1, %c0_2] : memref<32x128xbf16, #tpu.memory_space<vmem>>, vector<32x128xbf16>
    %cst = arith.constant dense<0.000000e+00> : vector<256x128xf32>
    %2 = tpu.matmul %0, %1, %cst {dimension_numbers = #tpu.dot_dimension_numbers<[1], [0], [0], [1], [0, 0, 1, 1], [], []>} : vector<256x32xbf16>, vector<32x128xbf16>, vector<256x128xf32> -> vector<256x128xf32>
    %c0_3 = arith.constant 0 : index
    %c0_4 = arith.constant 0 : index
    %3 = vector.load %arg3[%c0_3, %c0_4] : memref<1x128xf32, #tpu.memory_space<vmem>>, vector<1x128xf32>
    %4 = vector.broadcast %3 : vector<1x128xf32> to vector<256x128xf32>
    %5 = arith.addf %2, %4 : vector<256x128xf32>
    %6 = arith.negf %5 : vector<256x128xf32>
    %7 = math.exp %6 : vector<256x128xf32>
    %cst_5 = arith.constant 1.000000e+00 : f32
    %8 = vector.broadcast %cst_5 : f32 to vector<256x128xf32>
    %9 = arith.addf %8, %7 : vector<256x128xf32>
    %10 = arith.divf %8, %9 : vector<256x128xf32>
    %11 = arith.mulf %5, %10 : vector<256x128xf32>
    %12 = arith.truncf %11 : vector<256x128xf32> to vector<256x128xbf16>
    %c0_6 = arith.constant 0 : index
    %c0_7 = arith.constant 0 : index
    %13 = vector.load %arg4[%c0_6, %c0_7] : memref<256x128xbf16, #tpu.memory_space<vmem>>, vector<256x128xbf16>
    tpu.vector_store %arg4[%c0_6, %c0_7], %12 {strides = array<i32>} : memref<256x128xbf16, #tpu.memory_space<vmem>>, vector<256x128xbf16>,
    return
  }
  func.func @transform_0(%arg0: i32) -> (i32, i32) {
    %c0_i32 = arith.constant 0 : i32
    %c0_i32_0 = arith.constant 0 : i32
    return %arg0, %c0_i32 : i32, i32
  }
  func.func @transform_1(%arg0: i32) -> (i32, i32) {
    %c0_i32 = arith.constant 0 : i32
    %c0_i32_0 = arith.constant 0 : i32
    %c0_i32_1 = arith.constant 0 : i32
    return %c0_i32, %c0_i32_0 : i32, i32
  }
  func.func @transform_2(%arg0: i32) -> (i32, i32) {
    %c0_i32 = arith.constant 0 : i32
    %c0_i32_0 = arith.constant 0 : i32
    %c0_i32_1 = arith.constant 0 : i32
    return %c0_i32, %c0_i32_0 : i32, i32
  }
  func.func @transform_3(%arg0: i32) -> (i32, i32) {
    %c0_i32 = arith.constant 0 : i32
    %c0_i32_0 = arith.constant 0 : i32
    return %arg0, %c0_i32 : i32, i32
  }
}

module attributes {stable_mosaic.version = 11 : i64} {
  func.func @_matmul_bias_act_kernel(%arg0: i32, %arg1: memref<256x128xbf16, #tpu.memory_space<vmem>>, %arg2: memref<128x128xbf16, #tpu.memory_space<vmem>>, %arg3: memref<1x128xf32, #tpu.memory_space<vmem>>, %arg4: memref<256x128xbf16, #tpu.memory_space<vmem>>) attributes {dimension_semantics = [#tpu.dimension_semantics<parallel>], iteration_bounds = array<i64: 2>, scalar_prefetch = 0 : i64, scratch_operands = 0 : i64, tpu.core_type = #tpu.core_type<tc>, window_params = [{transform_indices = @transform_0, window_bounds = array<i64: 256, 128>}, {pipeline_mode = #tpu.pipeline_mode<synchronous>, transform_indices = @transform_1, window_bounds = array<i64: 128, 128>}, {pipeline_mode = #tpu.pipeline_mode<synchronous>, transform_indices = @transform_2, window_bounds = array<i64: 1, 128>}, {transform_indices = @transform_3, window_bounds = array<i64: 256, 128>}]} {
    %c0 = arith.constant 0 : index
    %c0_0 = arith.constant 0 : index
    %0 = vector.load %arg1[%c0, %c0_0] : memref<256x128xbf16, #tpu.memory_space<vmem>>, vector<256x128xbf16>
    %c0_1 = arith.constant 0 : index
    %c0_2 = arith.constant 0 : index
    %1 = vector.load %arg2[%c0_1, %c0_2] : memref<128x128xbf16, #tpu.memory_space<vmem>>, vector<128x128xbf16>
    %cst = arith.constant dense<0.000000e+00> : vector<256x128xf32>
    %2 = tpu.matmul %0, %1, %cst {dimension_numbers = #tpu.dot_dimension_numbers<[1], [0], [0], [1], [0, 0, 1, 1], [], []>} : vector<256x128xbf16>, vector<128x128xbf16>, vector<256x128xf32> -> vector<256x128xf32>
    %c0_3 = arith.constant 0 : index
    %c0_4 = arith.constant 0 : index
    %3 = vector.load %arg3[%c0_3, %c0_4] : memref<1x128xf32, #tpu.memory_space<vmem>>, vector<1x128xf32>
    %4 = vector.broadcast %3 : vector<1x128xf32> to vector<256x128xf32>
    %5 = arith.addf %2, %4 : vector<256x128xf32>
    %6 = arith.negf %5 : vector<256x128xf32>
    %7 = math.exp %6 : vector<256x128xf32>
    %cst_5 = arith.constant 1.000000e+00 : f32
    %8 = vector.broadcast %cst_5 : f32 to vector<256x128xf32>
    %9 = arith.addf %8, %7 : vector<256x128xf32>
    %10 = arith.divf %8, %9 : vector<256x128xf32>
    %11 = arith.mulf %5, %10 : vector<256x128xf32>
    %12 = arith.truncf %11 : vector<256x128xf32> to vector<256x128xbf16>
    %c0_6 = arith.constant 0 : index
    %c0_7 = arith.constant 0 : index
    %13 = vector.load %arg4[%c0_6, %c0_7] : memref<256x128xbf16, #tpu.memory_space<vmem>>, vector<256x128xbf16>
    tpu.vector_store %arg4[%c0_6, %c0_7], %12 {strides = array<i32>} : memref<256x128xbf16, #tpu.memory_space<vmem>>, vector<256x128xbf16>,
    return
  }
  func.func @transform_0(%arg0: i32) -> (i32, i32) {
    %c0_i32 = arith.constant 0 : i32
    %c0_i32_0 = arith.constant 0 : i32
    return %arg0, %c0_i32 : i32, i32
  }
  func.func @transform_1(%arg0: i32) -> (i32, i32) {
    %c0_i32 = arith.constant 0 : i32
    %c0_i32_0 = arith.constant 0 : i32
    %c0_i32_1 = arith.constant 0 : i32
    return %c0_i32, %c0_i32_0 : i32, i32
  }
  func.func @transform_2(%arg0: i32) -> (i32, i32) {
    %c0_i32 = arith.constant 0 : i32
    %c0_i32_0 = arith.constant 0 : i32
    %c0_i32_1 = arith.constant 0 : i32
    return %c0_i32, %c0_i32_0 : i32, i32
  }
  func.func @transform_3(%arg0: i32) -> (i32, i32) {
    %c0_i32 = arith.constant 0 : i32
    %c0_i32_0 = arith.constant 0 : i32
    return %arg0, %c0_i32 : i32, i32
  }
}

module attributes {stable_mosaic.version = 11 : i64} {
  func.func @_mbconv_fused_kernel(%arg0: i32, %arg1: memref<1x18x18x128xbf16, #tpu.memory_space<vmem>>, %arg2: memref<1x256x128xbf16, #tpu.memory_space<vmem>>, %arg3: memref<9x128xf32, #tpu.memory_space<vmem>>, %arg4: memref<1x128xf32, #tpu.memory_space<vmem>>, %arg5: memref<128x8xf32, #tpu.memory_space<vmem>>, %arg6: memref<1x8xf32, #tpu.memory_space<vmem>>, %arg7: memref<8x128xf32, #tpu.memory_space<vmem>>, %arg8: memref<1x128xf32, #tpu.memory_space<vmem>>, %arg9: memref<128x128xbf16, #tpu.memory_space<vmem>>, %arg10: memref<1x128xf32, #tpu.memory_space<vmem>>, %arg11: memref<1x256x128xbf16, #tpu.memory_space<vmem>>) attributes {dimension_semantics = [#tpu.dimension_semantics<parallel>], iteration_bounds = array<i64: 2>, scalar_prefetch = 0 : i64, scratch_operands = 0 : i64, tpu.core_type = #tpu.core_type<tc>, window_params = [{transform_indices = @transform_0, window_bounds = array<i64: 1, 18, 18, 128>}, {transform_indices = @transform_1, window_bounds = array<i64: 1, 256, 128>}, {pipeline_mode = #tpu.pipeline_mode<synchronous>, transform_indices = @transform_2, window_bounds = array<i64: 9, 128>}, {pipeline_mode = #tpu.pipeline_mode<synchronous>, transform_indices = @transform_3, window_bounds = array<i64: 1, 128>}, {pipeline_mode = #tpu.pipeline_mode<synchronous>, transform_indices = @transform_4, window_bounds = array<i64: 128, 8>}, {pipeline_mode = #tpu.pipeline_mode<synchronous>, transform_indices = @transform_5, window_bounds = array<i64: 1, 8>}, {pipeline_mode = #tpu.pipeline_mode<synchronous>, transform_indices = @transform_6, window_bounds = array<i64: 8, 128>}, {pipeline_mode = #tpu.pipeline_mode<synchronous>, transform_indices = @transform_7, window_bounds = array<i64: 1, 128>}, {pipeline_mode = #tpu.pipeline_mode<synchronous>, transform_indices = @transform_8, window_bounds = array<i64: 128, 128>}, {pipeline_mode = #tpu.pipeline_mode<synchronous>, transform_indices = @transform_9, window_bounds = array<i64: 1, 128>}, {transform_indices = @transform_10, window_bounds = array<i64: 1, 256, 128>}]} {
    %c0 = arith.constant 0 : index
    %c0_0 = arith.constant 0 : index
    %c0_1 = arith.constant 0 : index
    %c0_2 = arith.constant 0 : index
    %0 = vector.load %arg1[%c0, %c0_0, %c0_1, %c0_2] : memref<1x18x18x128xbf16, #tpu.memory_space<vmem>>, vector<1x18x18x128xbf16>
    %1 = vector.shape_cast %0 : vector<1x18x18x128xbf16> to vector<18x18x128xbf16>
    %c0_3 = arith.constant 0 : index
    %c0_4 = arith.constant 0 : index
    %2 = vector.load %arg3[%c0_3, %c0_4] : memref<9x128xf32, #tpu.memory_space<vmem>>, vector<9x128xf32>
    %3 = vector.shape_cast %2 : vector<9x128xf32> to vector<9x1x128xf32>
    %cst = arith.constant 0.000000e+00 : f32
    %4 = vector.broadcast %cst : f32 to vector<16x16x128xf32>
    %5 = vector.extract_strided_slice %1 {offsets = [0, 0, 0], sizes = [16, 16, 128], strides = [1, 1, 1]} : vector<18x18x128xbf16> to vector<16x16x128xbf16>
    %6 = arith.extf %5 : vector<16x16x128xbf16> to vector<16x16x128xf32>
    %7 = vector.extract_strided_slice %3 {offsets = [0, 0, 0], sizes = [1, 1, 128], strides = [1, 1, 1]} : vector<9x1x128xf32> to vector<1x1x128xf32>
    %8 = vector.shape_cast %7 : vector<1x1x128xf32> to vector<1x128xf32>
    %9 = vector.shape_cast %8 : vector<1x128xf32> to vector<1x1x128xf32>
    %10 = vector.broadcast %9 : vector<1x1x128xf32> to vector<16x16x128xf32>
    %11 = arith.mulf %6, %10 : vector<16x16x128xf32>
    %12 = arith.addf %4, %11 : vector<16x16x128xf32>
    %13 = vector.extract_strided_slice %1 {offsets = [0, 1, 0], sizes = [16, 16, 128], strides = [1, 1, 1]} : vector<18x18x128xbf16> to vector<16x16x128xbf16>
    %14 = arith.extf %13 : vector<16x16x128xbf16> to vector<16x16x128xf32>
    %15 = vector.extract_strided_slice %3 {offsets = [1, 0, 0], sizes = [1, 1, 128], strides = [1, 1, 1]} : vector<9x1x128xf32> to vector<1x1x128xf32>
    %16 = vector.shape_cast %15 : vector<1x1x128xf32> to vector<1x128xf32>
    %17 = vector.shape_cast %16 : vector<1x128xf32> to vector<1x1x128xf32>
    %18 = vector.broadcast %17 : vector<1x1x128xf32> to vector<16x16x128xf32>
    %19 = arith.mulf %14, %18 : vector<16x16x128xf32>
    %20 = arith.addf %12, %19 : vector<16x16x128xf32>
    %21 = vector.extract_strided_slice %1 {offsets = [0, 2, 0], sizes = [16, 16, 128], strides = [1, 1, 1]} : vector<18x18x128xbf16> to vector<16x16x128xbf16>
    %22 = arith.extf %21 : vector<16x16x128xbf16> to vector<16x16x128xf32>
    %23 = vector.extract_strided_slice %3 {offsets = [2, 0, 0], sizes = [1, 1, 128], strides = [1, 1, 1]} : vector<9x1x128xf32> to vector<1x1x128xf32>
    %24 = vector.shape_cast %23 : vector<1x1x128xf32> to vector<1x128xf32>
    %25 = vector.shape_cast %24 : vector<1x128xf32> to vector<1x1x128xf32>
    %26 = vector.broadcast %25 : vector<1x1x128xf32> to vector<16x16x128xf32>
    %27 = arith.mulf %22, %26 : vector<16x16x128xf32>
    %28 = arith.addf %20, %27 : vector<16x16x128xf32>
    %29 = vector.extract_strided_slice %1 {offsets = [1, 0, 0], sizes = [16, 16, 128], strides = [1, 1, 1]} : vector<18x18x128xbf16> to vector<16x16x128xbf16>
    %30 = arith.extf %29 : vector<16x16x128xbf16> to vector<16x16x128xf32>
    %31 = vector.extract_strided_slice %3 {offsets = [3, 0, 0], sizes = [1, 1, 128], strides = [1, 1, 1]} : vector<9x1x128xf32> to vector<1x1x128xf32>
    %32 = vector.shape_cast %31 : vector<1x1x128xf32> to vector<1x128xf32>
    %33 = vector.shape_cast %32 : vector<1x128xf32> to vector<1x1x128xf32>
    %34 = vector.broadcast %33 : vector<1x1x128xf32> to vector<16x16x128xf32>
    %35 = arith.mulf %30, %34 : vector<16x16x128xf32>
    %36 = arith.addf %28, %35 : vector<16x16x128xf32>
    %37 = vector.extract_strided_slice %1 {offsets = [1, 1, 0], sizes = [16, 16, 128], strides = [1, 1, 1]} : vector<18x18x128xbf16> to vector<16x16x128xbf16>
    %38 = arith.extf %37 : vector<16x16x128xbf16> to vector<16x16x128xf32>
    %39 = vector.extract_strided_slice %3 {offsets = [4, 0, 0], sizes = [1, 1, 128], strides = [1, 1, 1]} : vector<9x1x128xf32> to vector<1x1x128xf32>
    %40 = vector.shape_cast %39 : vector<1x1x128xf32> to vector<1x128xf32>
    %41 = vector.shape_cast %40 : vector<1x128xf32> to vector<1x1x128xf32>
    %42 = vector.broadcast %41 : vector<1x1x128xf32> to vector<16x16x128xf32>
    %43 = arith.mulf %38, %42 : vector<16x16x128xf32>
    %44 = arith.addf %36, %43 : vector<16x16x128xf32>
    %45 = vector.extract_strided_slice %1 {offsets = [1, 2, 0], sizes = [16, 16, 128], strides = [1, 1, 1]} : vector<18x18x128xbf16> to vector<16x16x128xbf16>
    %46 = arith.extf %45 : vector<16x16x128xbf16> to vector<16x16x128xf32>
    %47 = vector.extract_strided_slice %3 {offsets = [5, 0, 0], sizes = [1, 1, 128], strides = [1, 1, 1]} : vector<9x1x128xf32> to vector<1x1x128xf32>
    %48 = vector.shape_cast %47 : vector<1x1x128xf32> to vector<1x128xf32>
    %49 = vector.shape_cast %48 : vector<1x128xf32> to vector<1x1x128xf32>
    %50 = vector.broadcast %49 : vector<1x1x128xf32> to vector<16x16x128xf32>
    %51 = arith.mulf %46, %50 : vector<16x16x128xf32>
    %52 = arith.addf %44, %51 : vector<16x16x128xf32>
    %53 = vector.extract_strided_slice %1 {offsets = [2, 0, 0], sizes = [16, 16, 128], strides = [1, 1, 1]} : vector<18x18x128xbf16> to vector<16x16x128xbf16>
    %54 = arith.extf %53 : vector<16x16x128xbf16> to vector<16x16x128xf32>
    %55 = vector.extract_strided_slice %3 {offsets = [6, 0, 0], sizes = [1, 1, 128], strides = [1, 1, 1]} : vector<9x1x128xf32> to vector<1x1x128xf32>
    %56 = vector.shape_cast %55 : vector<1x1x128xf32> to vector<1x128xf32>
    %57 = vector.shape_cast %56 : vector<1x128xf32> to vector<1x1x128xf32>
    %58 = vector.broadcast %57 : vector<1x1x128xf32> to vector<16x16x128xf32>
    %59 = arith.mulf %54, %58 : vector<16x16x128xf32>
    %60 = arith.addf %52, %59 : vector<16x16x128xf32>
    %61 = vector.extract_strided_slice %1 {offsets = [2, 1, 0], sizes = [16, 16, 128], strides = [1, 1, 1]} : vector<18x18x128xbf16> to vector<16x16x128xbf16>
    %62 = arith.extf %61 : vector<16x16x128xbf16> to vector<16x16x128xf32>
    %63 = vector.extract_strided_slice %3 {offsets = [7, 0, 0], sizes = [1, 1, 128], strides = [1, 1, 1]} : vector<9x1x128xf32> to vector<1x1x128xf32>
    %64 = vector.shape_cast %63 : vector<1x1x128xf32> to vector<1x128xf32>
    %65 = vector.shape_cast %64 : vector<1x128xf32> to vector<1x1x128xf32>
    %66 = vector.broadcast %65 : vector<1x1x128xf32> to vector<16x16x128xf32>
    %67 = arith.mulf %62, %66 : vector<16x16x128xf32>
    %68 = arith.addf %60, %67 : vector<16x16x128xf32>
    %69 = vector.extract_strided_slice %1 {offsets = [2, 2, 0], sizes = [16, 16, 128], strides = [1, 1, 1]} : vector<18x18x128xbf16> to vector<16x16x128xbf16>
    %70 = arith.extf %69 : vector<16x16x128xbf16> to vector<16x16x128xf32>
    %71 = vector.extract_strided_slice %3 {offsets = [8, 0, 0], sizes = [1, 1, 128], strides = [1, 1, 1]} : vector<9x1x128xf32> to vector<1x1x128xf32>
    %72 = vector.shape_cast %71 : vector<1x1x128xf32> to vector<1x128xf32>
    %73 = vector.shape_cast %72 : vector<1x128xf32> to vector<1x1x128xf32>
    %74 = vector.broadcast %73 : vector<1x1x128xf32> to vector<16x16x128xf32>
    %75 = arith.mulf %70, %74 : vector<16x16x128xf32>
    %76 = arith.addf %68, %75 : vector<16x16x128xf32>
    %c0_5 = arith.constant 0 : index
    %c0_6 = arith.constant 0 : index
    %77 = vector.load %arg4[%c0_5, %c0_6] : memref<1x128xf32, #tpu.memory_space<vmem>>, vector<1x128xf32>
    %78 = vector.shape_cast %77 : vector<1x128xf32> to vector<1x1x128xf32>
    %79 = vector.broadcast %78 : vector<1x1x128xf32> to vector<16x16x128xf32>
    %80 = arith.addf %76, %79 : vector<16x16x128xf32>
    %81 = arith.negf %80 : vector<16x16x128xf32>
    %82 = math.exp %81 : vector<16x16x128xf32>
    %cst_7 = arith.constant 1.000000e+00 : f32
    %83 = vector.broadcast %cst_7 : f32 to vector<16x16x128xf32>
    %84 = arith.addf %83, %82 : vector<16x16x128xf32>
    %85 = arith.divf %83, %84 : vector<16x16x128xf32>
    %86 = arith.mulf %80, %85 : vector<16x16x128xf32>
    %87 = vector.shape_cast %86 : vector<16x16x128xf32> to vector<256x128xf32>
    %cst_8 = arith.constant dense<0.000000e+00> : vector<128xf32>
    %88 = vector.multi_reduction <add>, %87, %cst_8 [0] : vector<256x128xf32> to vector<128xf32>
    %89 = vector.shape_cast %88 : vector<128xf32> to vector<1x128xf32>
    %cst_9 = arith.constant 2.560000e+02 : f32
    %90 = vector.broadcast %cst_9 : f32 to vector<1x128xf32>
    %91 = arith.divf %89, %90 : vector<1x128xf32>
    %c0_10 = arith.constant 0 : index
    %c0_11 = arith.constant 0 : index
    %92 = vector.load %arg5[%c0_10, %c0_11] : memref<128x8xf32, #tpu.memory_space<vmem>>, vector<128x8xf32>
    %cst_12 = arith.constant dense<0.000000e+00> : vector<1x8xf32>
    %93 = tpu.matmul %91, %92, %cst_12 {dimension_numbers = #tpu.dot_dimension_numbers<[1], [0], [0], [1], [0, 0, 1, 1], [], []>} : vector<1x128xf32>, vector<128x8xf32>, vector<1x8xf32> -> vector<1x8xf32>
    %c0_13 = arith.constant 0 : index
    %c0_14 = arith.constant 0 : index
    %94 = vector.load %arg6[%c0_13, %c0_14] : memref<1x8xf32, #tpu.memory_space<vmem>>, vector<1x8xf32>
    %95 = arith.addf %93, %94 : vector<1x8xf32>
    %96 = arith.negf %95 : vector<1x8xf32>
    %97 = math.exp %96 : vector<1x8xf32>
    %cst_15 = arith.constant 1.000000e+00 : f32
    %98 = vector.broadcast %cst_15 : f32 to vector<1x8xf32>
    %99 = arith.addf %98, %97 : vector<1x8xf32>
    %100 = arith.divf %98, %99 : vector<1x8xf32>
    %101 = arith.mulf %95, %100 : vector<1x8xf32>
    %c0_16 = arith.constant 0 : index
    %c0_17 = arith.constant 0 : index
    %102 = vector.load %arg7[%c0_16, %c0_17] : memref<8x128xf32, #tpu.memory_space<vmem>>, vector<8x128xf32>
    %cst_18 = arith.constant dense<0.000000e+00> : vector<1x128xf32>
    %103 = tpu.matmul %101, %102, %cst_18 {dimension_numbers = #tpu.dot_dimension_numbers<[1], [0], [0], [1], [0, 0, 1, 1], [], []>} : vector<1x8xf32>, vector<8x128xf32>, vector<1x128xf32> -> vector<1x128xf32>
    %c0_19 = arith.constant 0 : index
    %c0_20 = arith.constant 0 : index
    %104 = vector.load %arg8[%c0_19, %c0_20] : memref<1x128xf32, #tpu.memory_space<vmem>>, vector<1x128xf32>
    %105 = arith.addf %103, %104 : vector<1x128xf32>
    %106 = arith.negf %105 : vector<1x128xf32>
    %107 = math.exp %106 : vector<1x128xf32>
    %cst_21 = arith.constant 1.000000e+00 : f32
    %108 = vector.broadcast %cst_21 : f32 to vector<1x128xf32>
    %109 = arith.addf %108, %107 : vector<1x128xf32>
    %110 = arith.divf %108, %109 : vector<1x128xf32>
    %111 = vector.broadcast %110 : vector<1x128xf32> to vector<256x128xf32>
    %112 = arith.mulf %87, %111 : vector<256x128xf32>
    %113 = arith.truncf %112 : vector<256x128xf32> to vector<256x128xbf16>
    %c0_22 = arith.constant 0 : index
    %c0_23 = arith.constant 0 : index
    %114 = vector.load %arg9[%c0_22, %c0_23] : memref<128x128xbf16, #tpu.memory_space<vmem>>, vector<128x128xbf16>
    %cst_24 = arith.constant dense<0.000000e+00> : vector<256x128xf32>
    %115 = tpu.matmul %113, %114, %cst_24 {dimension_numbers = #tpu.dot_dimension_numbers<[1], [0], [0], [1], [0, 0, 1, 1], [], []>} : vector<256x128xbf16>, vector<128x128xbf16>, vector<256x128xf32> -> vector<256x128xf32>
    %c0_25 = arith.constant 0 : index
    %c0_26 = arith.constant 0 : index
    %116 = vector.load %arg10[%c0_25, %c0_26] : memref<1x128xf32, #tpu.memory_space<vmem>>, vector<1x128xf32>
    %117 = vector.broadcast %116 : vector<1x128xf32> to vector<256x128xf32>
    %118 = arith.addf %115, %117 : vector<256x128xf32>
    %c0_27 = arith.constant 0 : index
    %c0_28 = arith.constant 0 : index
    %c0_29 = arith.constant 0 : index
    %119 = vector.load %arg2[%c0_27, %c0_28, %c0_29] : memref<1x256x128xbf16, #tpu.memory_space<vmem>>, vector<1x256x128xbf16>
    %120 = vector.shape_cast %119 : vector<1x256x128xbf16> to vector<256x128xbf16>
    %121 = arith.extf %120 : vector<256x128xbf16> to vector<256x128xf32>
    %122 = arith.addf %118, %121 : vector<256x128xf32>
    %123 = arith.truncf %122 : vector<256x128xf32> to vector<256x128xbf16>
    %c0_30 = arith.constant 0 : index
    %c0_31 = arith.constant 0 : index
    %c0_32 = arith.constant 0 : index
    %124 = vector.load %arg11[%c0_30, %c0_31, %c0_32] : memref<1x256x128xbf16, #tpu.memory_space<vmem>>, vector<1x256x128xbf16>
    %125 = vector.shape_cast %124 : vector<1x256x128xbf16> to vector<256x128xbf16>
    %126 = vector.shape_cast %123 : vector<256x128xbf16> to vector<1x256x128xbf16>
    tpu.vector_store %arg11[%c0_30, %c0_31, %c0_32], %126 {strides = array<i32>} : memref<1x256x128xbf16, #tpu.memory_space<vmem>>, vector<1x256x128xbf16>,
    return
  }
  func.func @transform_0(%arg0: i32) -> (i32, i32, i32, i32) {
    %c0_i32 = arith.constant 0 : i32
    %c0_i32_0 = arith.constant 0 : i32
    %c0_i32_1 = arith.constant 0 : i32
    %c0_i32_2 = arith.constant 0 : i32
    return %arg0, %c0_i32, %c0_i32_0, %c0_i32_1 : i32, i32, i32, i32
  }
  func.func @transform_1(%arg0: i32) -> (i32, i32, i32) {
    %c0_i32 = arith.constant 0 : i32
    %c0_i32_0 = arith.constant 0 : i32
    %c0_i32_1 = arith.constant 0 : i32
    return %arg0, %c0_i32, %c0_i32_0 : i32, i32, i32
  }
  func.func @transform_2(%arg0: i32) -> (i32, i32) {
    %c0_i32 = arith.constant 0 : i32
    %c0_i32_0 = arith.constant 0 : i32
    %c0_i32_1 = arith.constant 0 : i32
    return %c0_i32, %c0_i32_0 : i32, i32
  }
  func.func @transform_3(%arg0: i32) -> (i32, i32) {
    %c0_i32 = arith.constant 0 : i32
    %c0_i32_0 = arith.constant 0 : i32
    %c0_i32_1 = arith.constant 0 : i32
    return %c0_i32, %c0_i32_0 : i32, i32
  }
  func.func @transform_4(%arg0: i32) -> (i32, i32) {
    %c0_i32 = arith.constant 0 : i32
    %c0_i32_0 = arith.constant 0 : i32
    %c0_i32_1 = arith.constant 0 : i32
    return %c0_i32, %c0_i32_0 : i32, i32
  }
  func.func @transform_5(%arg0: i32) -> (i32, i32) {
    %c0_i32 = arith.constant 0 : i32
    %c0_i32_0 = arith.constant 0 : i32
    %c0_i32_1 = arith.constant 0 : i32
    return %c0_i32, %c0_i32_0 : i32, i32
  }
  func.func @transform_6(%arg0: i32) -> (i32, i32) {
    %c0_i32 = arith.constant 0 : i32
    %c0_i32_0 = arith.constant 0 : i32
    %c0_i32_1 = arith.constant 0 : i32
    return %c0_i32, %c0_i32_0 : i32, i32
  }
  func.func @transform_7(%arg0: i32) -> (i32, i32) {
    %c0_i32 = arith.constant 0 : i32
    %c0_i32_0 = arith.constant 0 : i32
    %c0_i32_1 = arith.constant 0 : i32
    return %c0_i32, %c0_i32_0 : i32, i32
  }
  func.func @transform_8(%arg0: i32) -> (i32, i32) {
    %c0_i32 = arith.constant 0 : i32
    %c0_i32_0 = arith.constant 0 : i32
    %c0_i32_1 = arith.constant 0 : i32
    return %c0_i32, %c0_i32_0 : i32, i32
  }
  func.func @transform_9(%arg0: i32) -> (i32, i32) {
    %c0_i32 = arith.constant 0 : i32
    %c0_i32_0 = arith.constant 0 : i32
    %c0_i32_1 = arith.constant 0 : i32
    return %c0_i32, %c0_i32_0 : i32, i32
  }
  func.func @transform_10(%arg0: i32) -> (i32, i32, i32) {
    %c0_i32 = arith.constant 0 : i32
    %c0_i32_0 = arith.constant 0 : i32
    %c0_i32_1 = arith.constant 0 : i32
    return %arg0, %c0_i32, %c0_i32_0 : i32, i32, i32
  }
}

module attributes {stable_mosaic.version = 11 : i64} {
  func.func @_gap_kernel(%arg0: i32, %arg1: memref<1x256x128xbf16, #tpu.memory_space<vmem>>, %arg2: memref<1x1x128xf32, #tpu.memory_space<vmem>>) attributes {dimension_semantics = [#tpu.dimension_semantics<parallel>], iteration_bounds = array<i64: 2>, scalar_prefetch = 0 : i64, scratch_operands = 0 : i64, tpu.core_type = #tpu.core_type<tc>, window_params = [{transform_indices = @transform_0, window_bounds = array<i64: 1, 256, 128>}, {transform_indices = @transform_1, window_bounds = array<i64: 1, 1, 128>}]} {
    %c0 = arith.constant 0 : index
    %c0_0 = arith.constant 0 : index
    %c0_1 = arith.constant 0 : index
    %0 = vector.load %arg1[%c0, %c0_0, %c0_1] : memref<1x256x128xbf16, #tpu.memory_space<vmem>>, vector<1x256x128xbf16>
    %1 = arith.extf %0 : vector<1x256x128xbf16> to vector<1x256x128xf32>
    %cst = arith.constant dense<0.000000e+00> : vector<1x128xf32>
    %2 = vector.multi_reduction <add>, %1, %cst [1] : vector<1x256x128xf32> to vector<1x128xf32>
    %3 = vector.shape_cast %2 : vector<1x128xf32> to vector<1x1x128xf32>
    %cst_2 = arith.constant 3.906250e-03 : f32
    %4 = vector.broadcast %cst_2 : f32 to vector<1x1x128xf32>
    %5 = arith.mulf %3, %4 : vector<1x1x128xf32>
    %c0_3 = arith.constant 0 : index
    %c0_4 = arith.constant 0 : index
    %c0_5 = arith.constant 0 : index
    %6 = vector.load %arg2[%c0_3, %c0_4, %c0_5] : memref<1x1x128xf32, #tpu.memory_space<vmem>>, vector<1x1x128xf32>
    tpu.vector_store %arg2[%c0_3, %c0_4, %c0_5], %5 {strides = array<i32>} : memref<1x1x128xf32, #tpu.memory_space<vmem>>, vector<1x1x128xf32>,
    return
  }
  func.func @transform_0(%arg0: i32) -> (i32, i32, i32) {
    %c0_i32 = arith.constant 0 : i32
    %c0_i32_0 = arith.constant 0 : i32
    %c0_i32_1 = arith.constant 0 : i32
    return %arg0, %c0_i32, %c0_i32_0 : i32, i32, i32
  }
  func.func @transform_1(%arg0: i32) -> (i32, i32, i32) {
    %c0_i32 = arith.constant 0 : i32
    %c0_i32_0 = arith.constant 0 : i32
    %c0_i32_1 = arith.constant 0 : i32
    return %arg0, %c0_i32, %c0_i32_0 : i32, i32, i32
  }
}

</mosaic_0001>

<bundles_post_ra>
// kernel: simple_model_forward.5
= control target key start
LH: loop header
LB: loop body
LE: loop exit
PB: predicated region body
PF: predicated region fallthrough
CT: control target
= control target key end

     0   :  { %s1621_s12 = smov 0   ;;  %s2506_s0 = inlined_call_operand.vmem [shape: bf16[512,32], index: 0, kind: input, shape index: {}]   ;;  %s2507_s1 = inlined_call_operand.vmem [shape: bf16[32,128], index: 1, kind: input, shape index: {}]   ;;  %s2508_s2 = inlined_call_operand.vmem [shape: f32[1,128], index: 2, kind: input, shape index: {}]   ;;  %s2509_s3 = inlined_call_operand.vmem [shape: bf16[512,128], index: 3, kind: output, shape index: {}]  }
   0x1 LB: > { %s1205_s13 = sadd.s32 4294967295, %s1599_s12   ;;  %p1209_p0 = scmp.ge.s32.totalorder %s1599_s12, 1  ;;  %s1599_s12 = sphi %s1621_s12, %s13_s12  }
   0x2   : > { %p138_p1 = scmp.lt.s32.totalorder %s1599_s12, 3 }
   0x4   : > { %p139_p2 = pnand %p1209_p0, %p138_p1 }
   0x5   : > { %s1210_s16 = sshll.u32 (!%p139_p2), %s1205_s13, 5 }
   0x6   : > { %142 = sbr.rel (%p139_p2) target bundleno = 310 (0x136), region = 32  ;;  %p163_p3 = scmp.lt.s32.totalorder (!%p139_p2), %s1210_s16, 63 }
   0xb   : > { %v1353_v0 = vld [vmem:[%s2507_s1 + $0x8] sm:$0xff]  ;;  %v1352_v1 = vld [vmem:[%s2507_s1] sm:$0xff]  ;;  %s2583_s16 = smov (!%p163_p3, %s1210_s16), 63  ;;  %vm307_vm0 = vcmask 261120  }
   0xc   : > { %362 = vmatpush.bf16.msra.mxu0 %v1353_v0  ;;  %1449 = vmatpush.bf16.msra.mxu1 %v1353_v0  ;;  %s1211_s19 = sshll.u32 %s2583_s16, 2  ;;  %v1680_v18 = vld [vmem:[%s2508_s2] ss:$0 sm:$0xff] }
   0xd   : > { %1450 = vmatpush.bf16.msra.mxu2 %v1353_v0  ;;  %1451 = vmatpush.bf16.msra.mxu3 %v1353_v0  ;;  %s1643_s22 = scalar_lea.vmem %s2506_s0, %s1211_s19  ;;  %s1902_s27 = scalar_lea.vmem %s2509_s3, %s1211_s19 }
   0xe   : > { %v1336_v2 = vld [vmem:[%s1643_s22] sm:$0xff]  ;;  %v1337_v6 = vld [vmem:[%s1643_s22 + $0x8] sm:$0xff]  ;;  %v1338_v10 = vld [vmem:[%s1643_s22 + $0x10] sm:$0xff] }
   0xf   : > { %v1340_v3 = vld [vmem:[%s1643_s22 + $0x20] sm:$0xff]  ;;  %v1341_v7 = vld [vmem:[%s1643_s22 + $0x28] sm:$0xff]  ;;  %v1342_v11 = vld [vmem:[%s1643_s22 + $0x30] sm:$0xff] }
  0x10   : > { %363 = vmatpush.bf16.msra.mxu0 %v1352_v1  ;;  %1452 = vmatpush.bf16.msra.mxu1 %v1352_v1  ;;  %v1344_v4 = vld [vmem:[%s1643_s22 + $0x40] sm:$0xff]  ;;  %v1345_v8 = vld [vmem:[%s1643_s22 + $0x48] sm:$0xff]  ;;  %v1346_v12 = vld [vmem:[%s1643_s22 + $0x50] sm:$0xff] }
  0x11   : > { %1453 = vmatpush.bf16.msra.mxu2 %v1352_v1  ;;  %1454 = vmatpush.bf16.msra.mxu3 %v1352_v1  ;;  %v1348_v5 = vld [vmem:[%s1643_s22 + $0x60] sm:$0xff]  ;;  %v1349_v9 = vld [vmem:[%s1643_s22 + $0x68] sm:$0xff]  ;;  %v1350_v13 = vld [vmem:[%s1643_s22 + $0x70] sm:$0xff] }
  0x12   : > { %v1339_v14 = vld [vmem:[%s1643_s22 + $0x18] sm:$0xff] }
  0x13   : > { %1286 = vmatmul.msk.bf16.vlgmr.msra.gmra.mxu0 %vm307_vm0, %v1336_v2  ;;  %1290 = vmatmul.msk.bf16.vlgmr.msra.gmra.mxu1 %vm307_vm0, %v1340_v3  ;;  %v1343_v15 = vld [vmem:[%s1643_s22 + $0x38] sm:$0xff] }
  0x14   : > { %1294 = vmatmul.msk.bf16.vlgmr.msra.gmra.mxu2 %vm307_vm0, %v1344_v4  ;;  %1298 = vmatmul.msk.bf16.vlgmr.msra.gmra.mxu3 %vm307_vm0, %v1348_v5  ;;  %v1347_v16 = vld [vmem:[%s1643_s22 + $0x58] sm:$0xff] }
  0x15   : > { %v1351_v17 = vld [vmem:[%s1643_s22 + $0x78] sm:$0xff] }
  0x23   : > { %1287 = vmatmul.msk.bf16.gmra.mxu0 %vm307_vm0, %v1337_v6  ;;  %1291 = vmatmul.msk.bf16.gmra.mxu1 %vm307_vm0, %v1341_v7 }
  0x24   : > { %1295 = vmatmul.msk.bf16.gmra.mxu2 %vm307_vm0, %v1345_v8  ;;  %1299 = vmatmul.msk.bf16.gmra.mxu3 %vm307_vm0, %v1349_v9 }
  0x33   : > { %1288 = vmatmul.msk.bf16.gmra.mxu0 %vm307_vm0, %v1338_v10  ;;  %1292 = vmatmul.msk.bf16.gmra.mxu1 %vm307_vm0, %v1342_v11 }
  0x34   : > { %1296 = vmatmul.msk.bf16.gmra.mxu2 %vm307_vm0, %v1346_v12  ;;  %1300 = vmatmul.msk.bf16.gmra.mxu3 %vm307_vm0, %v1350_v13 }
  0x43   : > { %1289 = vmatmul.msk.bf16.gmra.mxu0 %vm307_vm0, %v1339_v14  ;;  %1293 = vmatmul.msk.bf16.gmra.mxu1 %vm307_vm0, %v1343_v15 }
  0x44   : > { %1297 = vmatmul.msk.bf16.gmra.mxu2 %vm307_vm0, %v1347_v16  ;;  %1301 = vmatmul.msk.bf16.gmra.mxu3 %vm307_vm0, %v1351_v17 }
  0x90   : > { %v365_v19 = vpop.f32.mrf.mxu0  ;;  %v385_v20 = vpop.f32.mrf.mxu1 }
  0x91   : > { %v1683_v21 = vadd.f32 %v1680_v18, %v365_v19  ;;  %v1686_v22 = vadd.f32 %v1680_v18, %v385_v20 }
  0x93   : > { %v1302_v23 = vmul.f32 -1.442695, %v1683_v21  ;;  %v1310_v24 = vmul.f32 -1.442695, %v1686_v22 }
  0x95   : > { %1464 = vpow2.f32 %v1302_v23 }
  0x96   : > { %1466 = vpow2.f32 %v1310_v24 }
  0x97   : > { %v405_v25 = vpop.f32.mrf.mxu2  ;;  %v425_v26 = vpop.f32.mrf.mxu3 }
  0x98   : > { %v1691_v27 = vadd.f32 %v1680_v18, %v405_v25  ;;  %v1694_v28 = vadd.f32 %v1680_v18, %v425_v26  ;;  %v367_v29 = vpop.f32.mrf.mxu0  ;;  %v387_v30 = vpop.f32.mrf.mxu1 }
  0x99   : > { %v1697_v31 = vadd.f32 %v1680_v18, %v367_v29  ;;  %v1700_v32 = vadd.f32 %v1680_v18, %v387_v30 }
  0x9a   : > { %v1318_v33 = vmul.f32 -1.442695, %v1691_v27  ;;  %v1326_v34 = vmul.f32 -1.442695, %v1694_v28 }
  0x9b   : > { %v1465_v35 = vpop.eup %1464  ;;  %v1303_v38 = vmul.f32 -1.442695, %v1697_v31  ;;  %v1311_v40 = vmul.f32 -1.442695, %v1700_v32 }
  0x9c   : > { %v1467_v36 = vpop.eup %1466  ;;  %v1704_v37 = vadd.f32 1.0, %v1465_v35  ;;  %1468 = vpow2.f32 %v1318_v33 }
  0x9d   : > { %v1707_v39 = vadd.f32 1.0, %v1467_v36  ;;  %1470 = vpow2.f32 %v1326_v34 }
  0x9e   : > { %1472 = vrcp.f32 %v1704_v37  ;;  %v582_v53 = vand.u32 2147483647, %v1704_v37  ;;  %v584_v54 = vand.u32 2147483648, %v1704_v37  ;;  %vm578_vm1 = vweird.f32 %v1704_v37 }
  0x9f   : > { %1474 = vrcp.f32 %v1707_v39  ;;  %v407_v41 = vpop.f32.mrf.mxu2  ;;  %v427_v42 = vpop.f32.mrf.mxu3  ;;  %vm698_vm2 = vweird.f32 %v1707_v39  ;;  %v702_v62 = vand.u32 2147483647, %v1707_v39  ;;  %v704_v63 = vand.u32 2147483648, %v1707_v39 }
  0xa0   : > { %1476 = vpow2.f32 %v1303_v38  ;;  %v1713_v43 = vadd.f32 %v1680_v18, %v407_v41  ;;  %v1716_v45 = vadd.f32 %v1680_v18, %v427_v42  ;;  %v370_v55 = vpop.f32.mrf.mxu0  ;;  %v390_v56 = vpop.f32.mrf.mxu1  ;;  %vm1747_vm3 = vcmp.eq.f32.partialorder %v582_v53, 8.507059e+37 }
  0xa1   : > { %1478 = vpow2.f32 %v1311_v40  ;;  %v1741_v1 = vadd.f32 %v1680_v18, %v370_v55  ;;  %v1744_v2 = vadd.f32 %v1680_v18, %v390_v56  ;;  %v585_v5 = vor.u32 1.1754944e-38, %v584_v54 }
  0xa2   : > { %v1469_v44 = vpop.eup %1468  ;;  %v1319_v50 = vmul.f32 -1.442695, %v1713_v43  ;;  %v1327_v59 = vmul.f32 -1.442695, %v1716_v45  ;;  %vm1761_vm5 = vcmp.eq.f32.partialorder %v702_v62, 8.507059e+37  ;;  %v705_v15 = vor.u32 1.1754944e-38, %v704_v63 }
  0xa3   : > { %v1471_v46 = vpop.eup %1470  ;;  %v1718_v47 = vadd.f32 1.0, %v1469_v44  ;;  %v1304_v17 = vmul.f32 -1.442695, %v1741_v1  ;;  %v1772_v19 = vmul.f32 -1.442695, %v1744_v2 }
  0xa4   : > { %v1720_v48 = vpop.eup %1472  ;;  %v1722_v49 = vadd.f32 1.0, %v1471_v46 }
  0xa5   : > { %v1725_v51 = vpop.eup %1474  ;;  %v574_v52 = vmul.f32 %v1720_v48, %v1704_v37  ;;  %1480 = vrcp.f32 %v1718_v47  ;;  %vm579_vm4 = vweird.f32 %v1720_v48  ;;  %v822_v9 = vand.u32 2147483647, %v1718_v47 }
  0xa6   : > { %v1477_v57 = vpop.eup %1476  ;;  %v694_v58 = vmul.f32 %v1725_v51, %v1707_v39  ;;  %1482 = vrcp.f32 %v1722_v49  ;;  %v824_v13 = vand.u32 2147483648, %v1718_v47  ;;  %v944_v14 = vand.u32 2147483648, %v1722_v49  ;;  %vm1784_vm8 = vmor %vm578_vm1, %vm579_vm4 }
  0xa7   : > { %v1479_v60 = vpop.eup %1478  ;;  %v575_v61 = vsub.f32 1.0, %v574_v52  ;;  %1484 = vpow2.f32 %v1319_v50  ;;  %v1751_v6 = vadd.f32 1.0, %v1477_v57  ;;  %v410_v20 = vpop.f32.mrf.mxu2  ;;  %vm699_vm6 = vweird.f32 %v1725_v51 }
  0xa8   : > { %v695_v0 = vsub.f32 1.0, %v694_v58  ;;  %v1753_v7 = vadd.f32 1.0, %v1479_v60  ;;  %1486 = vpow2.f32 %v1327_v59  ;;  %vm818_vm7 = vweird.f32 %v1718_v47  ;;  %vm1809_vm11 = vmor %vm698_vm2, %vm699_vm6 }
  0xa9   : > { %v576_v3 = vmul.f32 %v1720_v48, %v575_v61  ;;  %1488 = vrcp.f32 %v1751_v6  ;;  %v942_v33 = vand.u32 2147483647, %v1722_v49  ;;  %v597_v34 = vand.u32 2147483647, %v1751_v6 }
  0xaa   : > { %v696_v8 = vmul.f32 %v1725_v51, %v695_v0  ;;  %1490 = vrcp.f32 %v1753_v7  ;;  %vm1795_vm9 = vcmp.eq.f32.partialorder %v822_v9, 8.507059e+37  ;;  %v825_v37 = vor.u32 1.1754944e-38, %v824_v13 }
  0xab   : > { %v1758_v10 = vpop.eup %1480  ;;  %v577_v11 = vadd.f32 %v1720_v48, %v576_v3  ;;  %vm938_vm10 = vweird.f32 %v1722_v49  ;;  %v1800_v38 = vor.u32 1.1754944e-38, %v944_v14  ;;  %v1803_v40 = vadd.f32 %v1680_v18, %v410_v20 }
  0xac   : > { %v814_v16 = vmul.f32 %v1758_v10, %v1718_v47  ;;  %v1774_v23 = vpop.eup %1482  ;;  %v697_v24 = vadd.f32 %v1725_v51, %v696_v8  ;;  %vm819_vm12 = vweird.f32 %v1758_v10  ;;  %vm593_vm13 = vweird.f32 %v1751_v6 }
  0xad   : > { %v1485_v25 = vpop.eup %1484  ;;  %v934_v30 = vmul.f32 %v1774_v23, %v1722_v49  ;;  %v581_v35 = vsel %vm1784_vm8, %v1720_v48, %v577_v11  ;;  %v599_v52 = vand.u32 2147483648, %v1751_v6  ;;  %1492 = vpow2.f32 %v1304_v17  ;;  %vm1846_vm0 = vmor %vm818_vm7, %vm819_vm12 }
  0xae   : > { %v815_v29 = vsub.f32 1.0, %v814_v16  ;;  %v1487_v41 = vpop.eup %1486  ;;  %v701_v50 = vsel %vm1809_vm11, %v1725_v51, %v697_v24  ;;  %v1820_v53 = vadd.f32 1.0, %v1485_v25  ;;  %v586_v39 = vsel %vm1747_vm3, %v585_v5, %v581_v35 }
  0xaf   : > { %v935_v46 = vsub.f32 1.0, %v934_v30  ;;  %v1489_v48 = vpop.eup %1488  ;;  %vm1827_vm14 = vcmp.eq.f32.partialorder %v597_v34, 8.507059e+37  ;;  %vm1831_vm15 = vcmp.eq.f32.partialorder %v942_v33, 8.507059e+37  ;;  %v717_v59 = vand.u32 2147483647, %v1753_v7 }
  0xb0   : > { %v816_v44 = vmul.f32 %v1758_v10, %v815_v29  ;;  %v589_v56 = vmul.f32 %v1489_v48, %v1751_v6  ;;  %v1491_v58 = vpop.eup %1490  ;;  %v719_v60 = vand.u32 2147483648, %v1753_v7  ;;  %1494 = vrcp.f32 %v1820_v53 }
  0xb1   : > { %v936_v55 = vmul.f32 %v1774_v23, %v935_v46  ;;  %v1838_v61 = vadd.f32 1.0, %v1487_v41  ;;  %v706_v62 = vsel %vm1761_vm5, %v705_v15, %v701_v50  ;;  %v709_v3 = vmul.f32 %v1491_v58, %v1753_v7  ;;  %v372_v41 = vpop.f32.mrf.mxu0 }
  0xb2   : > { %v817_v54 = vadd.f32 %v1758_v10, %v816_v44  ;;  %v590_v0 = vsub.f32 1.0, %v589_v56  ;;  %vm713_vm1 = vweird.f32 %v1753_v7  ;;  %v1053_v4 = vmul.f32 %v586_v39, %v1683_v21 }
  0xb3   : > { %v937_v8 = vadd.f32 %v1774_v23, %v936_v55  ;;  %vm939_vm2 = vweird.f32 %v1774_v23  ;;  %vm594_vm3 = vweird.f32 %v1489_v48  ;;  %v600_v9 = vor.u32 1.1754944e-38, %v599_v52  ;;  %v1493_v12 = vpop.eup %1492 }
  0xb4   : > { %v821_v5 = vsel %vm1846_vm0, %v1758_v10, %v817_v54  ;;  %v591_v47 = vmul.f32 %v1489_v48, %v590_v0  ;;  %v710_v11 = vsub.f32 1.0, %v709_v3  ;;  %v1061_v13 = vmul.f32 %v706_v62, %v1686_v22  ;;  %vm1868_vm5 = vmor %vm938_vm10, %vm939_vm2  ;;  %v412_v62 = vpop.f32.mrf.mxu2 }
  0xb5   : > { %vm1859_vm4 = vcmp.eq.f32.partialorder %v717_v59, 8.507059e+37  ;;  %v720_v21 = vor.u32 1.1754944e-38, %v719_v60  ;;  %1496 = vrcp.f32 %v1838_v61  ;;  %v826_v10 = vsel %vm1795_vm9, %v825_v37, %v821_v5  ;;  %vm595_vm7 = vmor %vm593_vm13, %vm594_vm3 }
  0xb6   : > { %v592_v16 = vadd.f32 %v1489_v48, %v591_v47  ;;  %v711_v17 = vmul.f32 %v1491_v58, %v710_v11  ;;  %vm714_vm6 = vweird.f32 %v1491_v58  ;;  %v1495_v22 = vpop.eup %1494  ;;  %v941_v20 = vsel %vm1868_vm5, %v1774_v23, %v937_v8 }
  0xb7   : > { %vm833_vm8 = vweird.f32 %v1820_v53  ;;  %v1879_v24 = vadd.f32 1.0, %v1493_v12  ;;  %1498 = vpow2.f32 %v1772_v19  ;;  %v829_v26 = vmul.f32 %v1495_v22, %v1820_v53  ;;  %vm715_vm9 = vmor %vm713_vm1, %vm714_vm6  ;;  %v430_v19 = vpop.f32.mrf.mxu3 }
  0xb8   : > { %v596_v49 = vsel %vm595_vm7, %v1489_v48, %v592_v16  ;;  %v712_v25 = vadd.f32 %v1491_v58, %v711_v17  ;;  %v837_v29 = vand.u32 2147483647, %v1820_v53  ;;  %v1885_v30 = vmul.f32 %v826_v10, %v1691_v27 }
  0xb9   : > { %v601_v6 = vsel %vm1827_vm14, %v600_v9, %v596_v49  ;;  %v839_v23 = vand.u32 2147483648, %v1820_v53  ;;  %1500 = vrcp.f32 %v1879_v24  ;;  %v946_v33 = vsel %vm1831_vm15, %v1800_v38, %v941_v20  ;;  %v375_v49 = vpop.f32.mrf.mxu0 }
  0xba   : > { %v1054_v34 = vmul.f32 %v601_v6, %v1697_v31  ;;  %v716_v35 = vsel %vm715_vm9, %v1491_v58, %v712_v25  ;;  %v830_v27 = vsub.f32 1.0, %v829_v26  ;;  %vm834_vm10 = vweird.f32 %v1495_v22 }
  0xbb   : > { %v1497_v36 = vpop.eup %1496  ;;  %v721_v7 = vsel %vm1859_vm4, %v720_v21, %v716_v35  ;;  %v957_v37 = vand.u32 2147483647, %v1838_v61  ;;  %v1320_v38 = vmul.f32 -1.442695, %v1803_v40  ;;  %vm1910_vm11 = vcmp.eq.f32.partialorder %v837_v29, 8.507059e+37  ;;  %vm835_vm12 = vmor %vm833_vm8, %vm834_vm10 }
  0xbc   : > { %v1357_v31 = vpack.c.bf16 %v1054_v34, %v1053_v4  ;;  %v1062_v42 = vmul.f32 %v721_v7, %v1700_v32  ;;  %v831_v44 = vmul.f32 %v1495_v22, %v830_v27  ;;  %v949_v46 = vmul.f32 %v1497_v36, %v1838_v61  ;;  %v392_v32 = vpop.f32.mrf.mxu1 }
  0xbd   : > { %v1499_v48 = vpop.eup %1498  ;;  %v840_v52 = vor.u32 1.1754944e-38, %v839_v23  ;;  %v959_v39 = vand.u32 2147483648, %v1838_v61  ;;  %1502 = vpow2.f32 %v1320_v38  ;;  %vm953_vm13 = vweird.f32 %v1838_v61 }
  0xbe   : > { %1358 = vst [vmem:[%s1902_s27] sm:$0xff] %v1357_v31   ;;  %v1377_v54 = vpack.c.bf16 %v1062_v42, %v1061_v13  ;;  %v832_v55 = vadd.f32 %v1495_v22, %v831_v44  ;;  %v950_v56 = vsub.f32 1.0, %v949_v46  ;;  %v1916_v57 = vadd.f32 1.0, %v1499_v48 }
  0xbf   : > { %v1918_v58 = vpop.eup %1500  ;;  %vm1924_vm14 = vcmp.eq.f32.partialorder %v957_v37, 8.507059e+37  ;;  %v1929_v59 = vadd.f32 %v1680_v18, %v430_v19  ;;  %v1932_v60 = vadd.f32 %v1680_v18, %v372_v41  ;;  %vm954_vm15 = vweird.f32 %v1497_v36  ;;  %v432_v15 = vpop.f32.mrf.mxu3 }
  0xc0   : > { %1437 = vst [vmem:[%s1902_s27 + $0x20] sm:$0xff] %v1377_v54   ;;  %v836_v63 = vsel %vm835_vm12, %v1495_v22, %v832_v55  ;;  %v951_v0 = vmul.f32 %v1497_v36, %v950_v56  ;;  %v604_v53 = vmul.f32 %v1918_v58, %v1879_v24  ;;  %v960_v4 = vor.u32 1.1754944e-38, %v959_v39  ;;  %vm955_vm0 = vmor %vm953_vm13, %vm954_vm15 }
  0xc1   : > { %v841_v3 = vsel %vm1910_vm11, %v840_v52, %v836_v63  ;;  %1504 = vrcp.f32 %v1916_v57  ;;  %v1941_v5 = vadd.f32 %v1680_v18, %v392_v32  ;;  %v1945_v11 = vadd.f32 %v1680_v18, %v412_v62  ;;  %v415_v32 = vpop.f32.mrf.mxu2 }
  0xc2   : > { %v1070_v8 = vmul.f32 %v841_v3, %v1713_v43  ;;  %v952_v47 = vadd.f32 %v1497_v36, %v951_v0  ;;  %v605_v9 = vsub.f32 1.0, %v604_v53  ;;  %v1077_v13 = vmul.f32 %v946_v33, %v1694_v28  ;;  %v377_v53 = vpop.f32.mrf.mxu0 }
  0xc3   : > { %v1503_v12 = vpop.eup %1502  ;;  %v612_v14 = vand.u32 2147483647, %v1879_v24  ;;  %v1328_v21 = vmul.f32 -1.442695, %v1929_v59  ;;  %v1305_v10 = vmul.f32 -1.442695, %v1932_v60  ;;  %v1965_v29 = vadd.f32 %v1680_v18, %v432_v15 }
  0xc4   : > { %v1397_v43 = vpack.c.bf16 %v1070_v8, %v1885_v30  ;;  %v956_v16 = vsel %vm955_vm0, %v1497_v36, %v952_v47  ;;  %v606_v17 = vmul.f32 %v1918_v58, %v605_v9  ;;  %v614_v22 = vand.u32 2147483648, %v1879_v24  ;;  %v395_v34 = vpop.f32.mrf.mxu1 }
  0xc5   : > { %v961_v28 = vsel %vm1924_vm14, %v960_v4, %v956_v16  ;;  %v1958_v20 = vadd.f32 1.0, %v1503_v12  ;;  %1506 = vpow2.f32 %v1328_v21  ;;  %v1313_v61 = vmul.f32 -1.442695, %v1941_v5 }
  0xc6   : > { %1441 = vst [vmem:[%s1902_s27 + $0x40] sm:$0xff] %v1397_v43   ;;  %v1078_v25 = vmul.f32 %v961_v28, %v1716_v45  ;;  %1508 = vpow2.f32 %v1305_v10  ;;  %v1321_v26 = vmul.f32 -1.442695, %v1945_v11  ;;  %v607_v6 = vadd.f32 %v1918_v58, %v606_v17 }
  0xc7   : > { %v1967_v30 = vpop.eup %1504  ;;  %vm608_vm1 = vweird.f32 %v1879_v24  ;;  %vm609_vm2 = vweird.f32 %v1918_v58  ;;  %1510 = vrcp.f32 %v1958_v20  ;;  %vm1975_vm3 = vcmp.eq.f32.partialorder %v612_v14, 8.507059e+37 }
  0xc8   : > { %v1417_v23 = vpack.c.bf16 %v1078_v25, %v1077_v13  ;;  %v724_v45 = vmul.f32 %v1967_v30, %v1916_v57  ;;  %v732_v33 = vand.u32 2147483647, %v1916_v57  ;;  %1512 = vpow2.f32 %v1313_v61  ;;  %vm1981_vm4 = vmor %vm608_vm1, %vm609_vm2 }
  0xc9   : > { %v615_v24 = vor.u32 1.1754944e-38, %v614_v22  ;;  %1514 = vpow2.f32 %v1321_v26  ;;  %v1329_v36 = vmul.f32 -1.442695, %v1965_v29  ;;  %v611_v37 = vsel %vm1981_vm4, %v1918_v58, %v607_v6  ;;  %v435_v58 = vpop.f32.mrf.mxu3 }
  0xca   : > { %1445 = vst [vmem:[%s1902_s27 + $0x60] sm:$0xff] %v1417_v23   ;;  %v725_v27 = vsub.f32 1.0, %v724_v45  ;;  %v734_v38 = vand.u32 2147483648, %v1916_v57  ;;  %v852_v41 = vand.u32 2147483647, %v1958_v20  ;;  %v1992_v31 = vadd.f32 %v1680_v18, %v375_v49  ;;  %v380_v4 = vpop.f32.mrf.mxu0 }
  0xcb   : > { %v1507_v7 = vpop.eup %1506  ;;  %v854_v46 = vand.u32 2147483648, %v1958_v20  ;;  %1516 = vpow2.f32 %v1329_v36  ;;  %vm728_vm5 = vweird.f32 %v1916_v57  ;;  %vm729_vm6 = vweird.f32 %v1967_v30 }
  0xcc   : > { %v1509_v42 = vpop.eup %1508  ;;  %v726_v44 = vmul.f32 %v1967_v30, %v725_v27  ;;  %v1996_v48 = vadd.f32 1.0, %v1507_v7  ;;  %vm2000_vm7 = vcmp.eq.f32.partialorder %v732_v33, 8.507059e+37  ;;  %v616_v54 = vsel %vm1975_vm3, %v615_v24, %v611_v37  ;;  %vm2020_vm8 = vmor %vm728_vm5, %vm729_vm6  ;;  %v397_v22 = vpop.f32.mrf.mxu1 }
  0xcd   : > { %v1511_v50 = vpop.eup %1510  ;;  %v2004_v39 = vadd.f32 1.0, %v1509_v42  ;;  %v735_v62 = vor.u32 1.1754944e-38, %v734_v38  ;;  %v1306_v63 = vmul.f32 -1.442695, %v1992_v31  ;;  %v2014_v0 = vadd.f32 %v1680_v18, %v395_v34 }
  0xce   : > { %v727_v55 = vadd.f32 %v1967_v30, %v726_v44  ;;  %v844_v56 = vmul.f32 %v1511_v50, %v1958_v20  ;;  %1518 = vrcp.f32 %v1996_v48  ;;  %v1513_v51 = vpop.eup %1512  ;;  %vm848_vm9 = vweird.f32 %v1958_v20 }
  0xcf   : > { %1520 = vrcp.f32 %v2004_v39  ;;  %v1515_v3 = vpop.eup %1514  ;;  %vm2025_vm10 = vcmp.eq.f32.partialorder %v852_v41, 8.507059e+37  ;;  %v855_v9 = vor.u32 1.1754944e-38, %v854_v46  ;;  %v2030_v12 = vmul.f32 %v616_v54, %v1741_v1 }
  0xd0   : > { %v845_v8 = vsub.f32 1.0, %v844_v56  ;;  %v731_v13 = vsel %vm2020_vm8, %v1967_v30, %v727_v55  ;;  %v2036_v57 = vadd.f32 %v1680_v18, %v415_v32  ;;  %v2039_v14 = vadd.f32 %v1680_v18, %v435_v58 }
  0xd1   : > { %v1517_v21 = vpop.eup %1516  ;;  %vm849_vm11 = vweird.f32 %v1511_v50  ;;  %v2041_v15 = vadd.f32 1.0, %v1513_v51  ;;  %v2044_v43 = vadd.f32 %v1680_v18, %v377_v53  ;;  %v974_v1 = vand.u32 2147483648, %v1996_v48 }
  0xd2   : > { %v846_v10 = vmul.f32 %v1511_v50, %v845_v8  ;;  %v2047_v16 = vadd.f32 1.0, %v1515_v3  ;;  %1522 = vpow2.f32 %v1306_v63  ;;  %v1314_v17 = vmul.f32 -1.442695, %v2014_v0  ;;  %vm850_vm12 = vmor %vm848_vm9, %vm849_vm11 }
  0xd3   : > { %v736_v61 = vsel %vm2000_vm7, %v735_v62, %v731_v13  ;;  %v627_v25 = vand.u32 2147483647, %v2004_v39  ;;  %1524 = vrcp.f32 %v2041_v15  ;;  %v629_v6 = vand.u32 2147483648, %v2004_v39 }
  0xd4   : > { %v2050_v28 = vpop.eup %1518  ;;  %v847_v49 = vadd.f32 %v1511_v50, %v846_v10  ;;  %1526 = vrcp.f32 %v2047_v16  ;;  %v2062_v23 = vadd.f32 1.0, %v1517_v21  ;;  %v972_v19 = vand.u32 2147483647, %v1996_v48 }
  0xd5   : > { %v1521_v26 = vpop.eup %1520  ;;  %v964_v30 = vmul.f32 %v2050_v28, %v1996_v48  ;;  %v2067_v34 = vadd.f32 %v1680_v18, %v397_v22  ;;  %vm623_vm13 = vweird.f32 %v2004_v39  ;;  %v747_v20 = vand.u32 2147483647, %v2041_v15 }
  0xd6   : > { %v851_v45 = vsel %vm850_vm12, %v1511_v50, %v847_v49  ;;  %v619_v33 = vmul.f32 %v1521_v26, %v2004_v39  ;;  %v749_v24 = vand.u32 2147483648, %v2041_v15  ;;  %v2073_v27 = vmul.f32 %v736_v61, %v1744_v2 }
  0xd7   : > { %v965_v35 = vsub.f32 1.0, %v964_v30  ;;  %v856_v36 = vsel %vm2025_vm10, %v855_v9, %v851_v45  ;;  %vm968_vm14 = vweird.f32 %v1996_v48  ;;  %v2078_v7 = vor.u32 1.1754944e-38, %v974_v1 }
  0xd8   : > { %v620_v37 = vsub.f32 1.0, %v619_v33  ;;  %v1523_v38 = vpop.eup %1522  ;;  %vm2080_vm15 = vcmp.eq.f32.partialorder %v627_v25, 8.507059e+37  ;;  %v630_v42 = vor.u32 1.1754944e-38, %v629_v6  ;;  %vm743_vm0 = vweird.f32 %v2041_v15 }
  0xd9   : > { %1528 = vrcp.f32 %v2062_v23  ;;  %v1525_v2 = vpop.eup %1524  ;;  %v966_v44 = vmul.f32 %v2050_v28, %v965_v35  ;;  %vm969_vm1 = vweird.f32 %v2050_v28  ;;  %vm624_vm2 = vweird.f32 %v1521_v26 }
  0xda   : > { %v621_v46 = vmul.f32 %v1521_v26, %v620_v37  ;;  %v1527_v50 = vpop.eup %1526  ;;  %v2089_v52 = vmul.f32 %v856_v36, %v1803_v40  ;;  %v739_v54 = vmul.f32 %v1525_v2, %v2041_v15  ;;  %vm2092_vm3 = vcmp.eq.f32.partialorder %v747_v20, 8.507059e+37  ;;  %vm625_vm5 = vmor %vm623_vm13, %vm624_vm2 }
  0xdb   : > { %v750_v56 = vor.u32 1.1754944e-38, %v749_v24  ;;  %vm863_vm4 = vweird.f32 %v2047_v16  ;;  %v859_v58 = vmul.f32 %v1527_v50, %v2047_v16  ;;  %v867_v51 = vand.u32 2147483647, %v2047_v16  ;;  %vm2120_vm9 = vmor %vm968_vm14, %vm969_vm1 }
  0xdc   : > { %v622_v32 = vadd.f32 %v1521_v26, %v621_v46  ;;  %v869_v62 = vand.u32 2147483648, %v2047_v16  ;;  %v740_v40 = vsub.f32 1.0, %v739_v54  ;;  %v987_v63 = vand.u32 2147483647, %v2062_v23 }
  0xdd   : > { %v2103_v53 = vadd.f32 1.0, %v1523_v38  ;;  %1530 = vpow2.f32 %v1314_v17  ;;  %v967_v3 = vadd.f32 %v2050_v28, %v966_v44  ;;  %vm2106_vm6 = vcmp.eq.f32.partialorder %v972_v19, 8.507059e+37 }
  0xde   : > { %v626_v8 = vsel %vm625_vm5, %v1521_v26, %v622_v32  ;;  %v860_v47 = vsub.f32 1.0, %v859_v58  ;;  %v1322_v9 = vmul.f32 -1.442695, %v2036_v57  ;;  %v741_v21 = vmul.f32 %v1525_v2, %v740_v40 }
  0xdf   : > { %v1529_v13 = vpop.eup %1528  ;;  %v631_v39 = vsel %vm2080_vm15, %v630_v42, %v626_v8  ;;  %vm744_vm7 = vweird.f32 %v1525_v2  ;;  %1532 = vrcp.f32 %v2103_v53  ;;  %vm864_vm8 = vweird.f32 %v1527_v50 }
  0xe0   : > { %v1056_v10 = vmul.f32 %v631_v39, %v1932_v60  ;;  %v861_v1 = vmul.f32 %v1527_v50, %v860_v47  ;;  %v979_v17 = vmul.f32 %v1529_v13, %v2062_v23  ;;  %v742_v61 = vadd.f32 %v1525_v2, %v741_v21  ;;  %vm745_vm11 = vmor %vm743_vm0, %vm744_vm7 }
  0xe1   : > { %vm2124_vm10 = vcmp.eq.f32.partialorder %v867_v51, 8.507059e+37  ;;  %v870_v25 = vor.u32 1.1754944e-38, %v869_v62  ;;  %v989_v60 = vand.u32 2147483648, %v2062_v23  ;;  %1534 = vpow2.f32 %v1322_v9  ;;  %vm865_vm12 = vmor %vm863_vm4, %vm864_vm8 }
  0xe2   : > { %v1362_v26 = vpack.c.bf16 %v1056_v10, %v2030_v12  ;;  %v862_v30 = vadd.f32 %v1527_v50, %v861_v1  ;;  %v980_v48 = vsub.f32 1.0, %v979_v17  ;;  %v971_v45 = vsel %vm2120_vm9, %v2050_v28, %v967_v3 }
  0xe3   : > { %v1531_v6 = vpop.eup %1530  ;;  %v746_v19 = vsel %vm745_vm11, %v1525_v2, %v742_v61  ;;  %vm984_vm13 = vweird.f32 %v1529_v13  ;;  %v1330_v33 = vmul.f32 -1.442695, %v2039_v14  ;;  %v1307_v16 = vmul.f32 -1.442695, %v2044_v43 }
  0xe4   : > { %1434 = vst [vmem:[%s1902_s27 + $0x8] sm:$0xff] %v1362_v26   ;;  %v751_v12 = vsel %vm2092_vm3, %v750_v56, %v746_v19  ;;  %v866_v15 = vsel %vm865_vm12, %v1527_v50, %v862_v30  ;;  %v981_v35 = vmul.f32 %v1529_v13, %v980_v48  ;;  %v2142_v20 = vadd.f32 1.0, %v1531_v6  ;;  %v417_v56 = vpop.f32.mrf.mxu2  ;;  %v400_v6 = vpop.f32.mrf.mxu1 }
  0xe5   : > { %v2144_v24 = vpop.eup %1532  ;;  %v1064_v28 = vmul.f32 %v751_v12, %v1941_v5  ;;  %v871_v36 = vsel %vm2124_vm10, %v870_v25, %v866_v15  ;;  %1536 = vpow2.f32 %v1330_v33  ;;  %vm983_vm14 = vweird.f32 %v2062_v23 }
  0xe6   : > { %v1072_v37 = vmul.f32 %v871_v36, %v1945_v11  ;;  %v982_v38 = vadd.f32 %v1529_v13, %v981_v35  ;;  %v634_v41 = vmul.f32 %v2144_v24, %v2103_v53  ;;  %v976_v5 = vsel %vm2106_vm6, %v2078_v7, %v971_v45  ;;  %vm985_vm15 = vmor %vm983_vm14, %vm984_vm13 }
  0xe7   : > { %v1382_v42 = vpack.c.bf16 %v1064_v28, %v2073_v27  ;;  %v990_v2 = vor.u32 1.1754944e-38, %v989_v60  ;;  %1538 = vrcp.f32 %v2142_v20  ;;  %v1535_v44 = vpop.eup %1534  ;;  %vm988_vm0 = vcmp.eq.f32.partialorder %v987_v63, 8.507059e+37 }
  0xe8   : > { %v1402_v11 = vpack.c.bf16 %v1072_v37, %v2089_v52  ;;  %v986_v46 = vsel %vm985_vm15, %v1529_v13, %v982_v38  ;;  %v635_v23 = vsub.f32 1.0, %v634_v41  ;;  %v2162_v54 = vadd.f32 1.0, %v1535_v44 }
  0xe9   : > { %1438 = vst [vmem:[%s1902_s27 + $0x28] sm:$0xff] %v1382_v42   ;;  %v991_v50 = vsel %vm988_vm0, %v990_v2, %v986_v46  ;;  %1540 = vpow2.f32 %v1307_v16  ;;  %v1079_v7 = vmul.f32 %v976_v5, %v1929_v59  ;;  %v1315_v55 = vmul.f32 -1.442695, %v2067_v34  ;;  %v437_v59 = vpop.f32.mrf.mxu3 }
  0xea   : > { %1442 = vst [vmem:[%s1902_s27 + $0x48] sm:$0xff] %v1402_v11   ;;  %v1080_v27 = vmul.f32 %v991_v50, %v1965_v29  ;;  %v636_v52 = vmul.f32 %v2144_v24, %v635_v23  ;;  %v2175_v40 = vadd.f32 %v1680_v18, %v417_v56  ;;  %vm638_vm1 = vweird.f32 %v2103_v53 }
  0xeb   : > { %v1537_v32 = vpop.eup %1536  ;;  %1542 = vpow2.f32 %v1315_v55  ;;  %vm639_vm2 = vweird.f32 %v2144_v24  ;;  %v2187_v13 = vadd.f32 %v1680_v18, %v437_v59  ;;  %v642_v39 = vand.u32 2147483647, %v2103_v53 }
  0xec   : > { %v1422_v58 = vpack.c.bf16 %v1080_v27, %v1079_v7  ;;  %1544 = vrcp.f32 %v2162_v54  ;;  %v2172_v62 = vadd.f32 1.0, %v1537_v32  ;;  %v637_v3 = vadd.f32 %v2144_v24, %v636_v52  ;;  %vm2201_vm3 = vmor %vm638_vm1, %vm639_vm2 }
  0xed   : > { %v2169_v51 = vpop.eup %1538  ;;  %v1323_v9 = vmul.f32 -1.442695, %v2175_v40  ;;  %v644_v21 = vand.u32 2147483648, %v2103_v53  ;;  %v762_v1 = vand.u32 2147483647, %v2142_v20  ;;  %v2195_v17 = vadd.f32 %v1680_v18, %v380_v4 }
  0xee   : > { %1446 = vst [vmem:[%s1902_s27 + $0x68] sm:$0xff] %v1422_v58   ;;  %v754_v29 = vmul.f32 %v2169_v51, %v2142_v20  ;;  %1546 = vrcp.f32 %v2172_v62  ;;  %v764_v49 = vand.u32 2147483648, %v2142_v20  ;;  %v641_v60 = vsel %vm2201_vm3, %v2144_v24, %v637_v3  ;;  %v420_v58 = vpop.f32.mrf.mxu2 }
  0xef   : > { %v1541_v63 = vpop.eup %1540  ;;  %v1331_v30 = vmul.f32 -1.442695, %v2187_v13  ;;  %vm643_vm4 = vcmp.eq.f32.partialorder %v642_v39, 8.507059e+37  ;;  %v645_v48 = vor.u32 1.1754944e-38, %v644_v21  ;;  %vm758_vm5 = vweird.f32 %v2142_v20 }
  0xf0   : > { %v755_v8 = vsub.f32 1.0, %v754_v29  ;;  %v2183_v47 = vadd.f32 1.0, %v1541_v63  ;;  %v884_v53 = vand.u32 2147483648, %v2162_v54  ;;  %vm2215_vm6 = vcmp.eq.f32.partialorder %v762_v1, 8.507059e+37 }
  0xf1   : > { %v1543_v10 = vpop.eup %1542  ;;  %v1308_v33 = vmul.f32 -1.442695, %v2195_v17  ;;  %v646_v15 = vsel %vm643_vm4, %v645_v48, %v641_v60  ;;  %vm759_vm7 = vweird.f32 %v2169_v51  ;;  %v765_v35 = vor.u32 1.1754944e-38, %v764_v49  ;;  %v440_v59 = vpop.f32.mrf.mxu3 }
  0xf2   : > { %1548 = vrcp.f32 %v2183_v47  ;;  %v2197_v22 = vpop.eup %1544  ;;  %v2206_v25 = vadd.f32 1.0, %v1543_v10  ;;  %v756_v26 = vmul.f32 %v2169_v51, %v755_v8  ;;  %v882_v24 = vand.u32 2147483647, %v2162_v54  ;;  %vm2247_vm8 = vmor %vm758_vm5, %vm759_vm7 }
  0xf3   : > { %1550 = vpow2.f32 %v1323_v9  ;;  %v874_v19 = vmul.f32 %v2197_v22, %v2162_v54  ;;  %v657_v16 = vand.u32 2147483647, %v2183_v47  ;;  %v2230_v37 = vadd.f32 %v1680_v18, %v400_v6 }
  0xf4   : > { %1552 = vrcp.f32 %v2206_v25  ;;  %v2223_v12 = vpop.eup %1546  ;;  %v757_v36 = vadd.f32 %v2169_v51, %v756_v26  ;;  %v2232_v38 = vor.u32 1.1754944e-38, %v884_v53  ;;  %v1002_v41 = vand.u32 2147483647, %v2172_v62 }
  0xf5   : > { %1554 = vpow2.f32 %v1331_v30  ;;  %v659_v42 = vand.u32 2147483648, %v2183_v47  ;;  %v875_v44 = vsub.f32 1.0, %v874_v19  ;;  %v994_v11 = vmul.f32 %v2223_v12, %v2172_v62 }
  0xf6   : > { %1556 = vpow2.f32 %v1308_v33  ;;  %v1316_v46 = vmul.f32 -1.442695, %v2230_v37  ;;  %v2241_v23 = vmul.f32 %v646_v15, %v1992_v31  ;;  %v1004_v7 = vand.u32 2147483648, %v2172_v62 }
  0xf7   : > { %v761_v32 = vsel %vm2247_vm8, %v2169_v51, %v757_v36  ;;  %vm878_vm9 = vweird.f32 %v2162_v54  ;;  %vm879_vm10 = vweird.f32 %v2197_v22  ;;  %vm653_vm11 = vweird.f32 %v2183_v47 }
  0xf8   : > { %v1549_v28 = vpop.eup %1548  ;;  %vm2260_vm12 = vcmp.eq.f32.partialorder %v657_v16, 8.507059e+37  ;;  %1558 = vpow2.f32 %v1316_v46  ;;  %v876_v51 = vmul.f32 %v2197_v22, %v875_v44  ;;  %v995_v63 = vsub.f32 1.0, %v994_v11  ;;  %v382_v16 = vpop.f32.mrf.mxu0 }
  0xf9   : > { %v649_v5 = vmul.f32 %v1549_v28, %v2183_v47  ;;  %v1551_v2 = vpop.eup %1550  ;;  %vm654_vm13 = vweird.f32 %v1549_v28  ;;  %vm999_vm14 = vweird.f32 %v2223_v12  ;;  %v660_v3 = vor.u32 1.1754944e-38, %v659_v42 }
  0xfa   : > { %v2252_v55 = vadd.f32 1.0, %v1551_v2  ;;  %v1553_v56 = vpop.eup %1552  ;;  %v766_v4 = vsel %vm2215_vm6, %v765_v35, %v761_v32  ;;  %v777_v39 = vand.u32 2147483647, %v2206_v25  ;;  %vm998_vm15 = vweird.f32 %v2172_v62  ;;  %vm655_vm0 = vmor %vm653_vm11, %vm654_vm13 }
  0xfb   : > { %v650_v27 = vsub.f32 1.0, %v649_v5  ;;  %v769_v52 = vmul.f32 %v1553_v56, %v2206_v25  ;;  %v1555_v29 = vpop.eup %1554  ;;  %v779_v10 = vand.u32 2147483648, %v2206_v25  ;;  %v2279_v61 = vadd.f32 %v1680_v18, %v420_v58  ;;  %vm2304_vm6 = vmor %vm878_vm9, %vm879_vm10  ;;  %v402_v5 = vpop.f32.mrf.mxu1 }
  0xfc   : > { %1560 = vrcp.f32 %v2252_v55  ;;  %v1557_v21 = vpop.eup %1556  ;;  %v2276_v1 = vadd.f32 1.0, %v1555_v29  ;;  %v2282_v49 = vadd.f32 %v1680_v18, %v440_v59  ;;  %vm2284_vm1 = vcmp.eq.f32.partialorder %v882_v24, 8.507059e+37  ;;  %vm2338_vm9 = vmor %vm998_vm15, %vm999_vm14 }
  0xfd   : > { %v651_v20 = vmul.f32 %v1549_v28, %v650_v27  ;;  %v770_v9 = vsub.f32 1.0, %v769_v52  ;;  %vm774_vm2 = vweird.f32 %v1553_v56  ;;  %v2288_v48 = vadd.f32 1.0, %v1557_v21 }
  0xfe   : > { %v877_v47 = vadd.f32 %v2197_v22, %v876_v51  ;;  %v996_v53 = vmul.f32 %v2223_v12, %v995_v63  ;;  %1562 = vrcp.f32 %v2276_v1  ;;  %v1559_v18 = vpop.eup %1558  ;;  %v1065_v45 = vmul.f32 %v766_v4, %v2014_v0 }
  0xff   : > { %v652_v8 = vadd.f32 %v1549_v28, %v651_v20  ;;  %v771_v30 = vmul.f32 %v1553_v56, %v770_v9  ;;  %vm773_vm3 = vweird.f32 %v2206_v25  ;;  %vm778_vm5 = vcmp.eq.f32.partialorder %v777_v39, 8.507059e+37 }
 0x100   : > { %vm775_vm4 = vmor %vm773_vm3, %vm774_vm2  ;;  %v780_v35 = vor.u32 1.1754944e-38, %v779_v10  ;;  %1564 = vrcp.f32 %v2288_v48  ;;  %v1324_v24 = vmul.f32 -1.442695, %v2279_v61  ;;  %v1332_v36 = vmul.f32 -1.442695, %v2282_v49 }
 0x101   : > { %v656_v26 = vsel %vm655_vm0, %v1549_v28, %v652_v8  ;;  %v772_v33 = vadd.f32 %v1553_v56, %v771_v30  ;;  %v881_v42 = vsel %vm2304_vm6, %v2197_v22, %v877_v47  ;;  %v997_v2 = vadd.f32 %v2223_v12, %v996_v53 }
 0x102   : > { %v661_v6 = vsel %vm2260_vm12, %v660_v3, %v656_v26  ;;  %v1561_v15 = vpop.eup %1560  ;;  %v897_v44 = vand.u32 2147483647, %v2252_v55  ;;  %vm2318_vm7 = vcmp.eq.f32.partialorder %v1002_v41, 8.507059e+37  ;;  %v899_v50 = vand.u32 2147483648, %v2252_v55 }
 0x103   : > { %v1058_v19 = vmul.f32 %v661_v6, %v2044_v43  ;;  %v776_v25 = vsel %vm775_vm4, %v1553_v56, %v772_v33  ;;  %v889_v28 = vmul.f32 %v1561_v15, %v2252_v55  ;;  %v2325_v27 = vadd.f32 1.0, %v1559_v18  ;;  %v1592_v56 = vld [vmem:[%s2508_s2] ss:$0 sm:$0xff]  ;;  %v422_v33 = vpop.f32.mrf.mxu2 }
 0x104   : > { %v781_v54 = vsel %vm778_vm5, %v780_v35, %v776_v25  ;;  %v1563_v22 = vpop.eup %1562  ;;  %vm894_vm8 = vweird.f32 %v1561_v15  ;;  %1566 = vpow2.f32 %v1324_v24  ;;  %v2330_v41 = vadd.f32 %v1592_v56, %v382_v16 }
 0x105   : > { %v1367_v43 = vpack.c.bf16 %v1058_v19, %v2241_v23  ;;  %v1066_v46 = vmul.f32 %v781_v54, %v2067_v34  ;;  %v890_v23 = vsub.f32 1.0, %v889_v28  ;;  %v2332_v32 = vadd.f32 %v1592_v56, %v402_v5 }
 0x106   : > { %v1009_v52 = vmul.f32 %v1563_v22, %v2276_v1  ;;  %1568 = vpow2.f32 %v1332_v36  ;;  %v2343_v58 = vpop.eup %1564  ;;  %v886_v59 = vsel %vm2284_vm1, %v2232_v38, %v881_v42  ;;  %v1001_v29 = vsel %vm2338_vm9, %v2223_v12, %v997_v2 }
 0x107   : > { %1435 = vst [vmem:[%s1902_s27 + $0x10] sm:$0xff] %v1367_v43   ;;  %v1387_v31 = vpack.c.bf16 %v1066_v46, %v1065_v45  ;;  %v891_v20 = vmul.f32 %v1561_v15, %v890_v23  ;;  %vm893_vm10 = vweird.f32 %v2252_v55  ;;  %1570 = vrcp.f32 %v2325_v27 }
 0x108   : > { %vm898_vm11 = vcmp.eq.f32.partialorder %v897_v44, 8.507059e+37  ;;  %v1010_v63 = vsub.f32 1.0, %v1009_v52  ;;  %v1017_v3 = vand.u32 2147483647, %v2276_v1  ;;  %vm895_vm12 = vmor %vm893_vm10, %vm894_vm8  ;;  %v900_v4 = vor.u32 1.1754944e-38, %v899_v50 }
 0x109   : > { %1439 = vst [vmem:[%s1902_s27 + $0x30] sm:$0xff] %v1387_v31   ;;  %v892_v51 = vadd.f32 %v1561_v15, %v891_v20  ;;  %v1019_v8 = vand.u32 2147483648, %v2276_v1  ;;  %v1309_v38 = vmul.f32 -1.442695, %v2330_v41  ;;  %v1317_v9 = vmul.f32 -1.442695, %v2332_v32 }
 0x10a   : > { %v1011_v39 = vmul.f32 %v1563_v22, %v1010_v63  ;;  %vm1014_vm13 = vweird.f32 %v1563_v22  ;;  %v664_v55 = vmul.f32 %v2343_v58, %v2288_v48  ;;  %v1567_v21 = vpop.eup %1566  ;;  %v1073_v10 = vmul.f32 %v886_v59, %v2036_v57 }
 0x10b   : > { %v896_v12 = vsel %vm895_vm12, %v1561_v15, %v892_v51  ;;  %v1005_v60 = vor.u32 1.1754944e-38, %v1004_v7  ;;  %1572 = vpow2.f32 %v1309_v38  ;;  %vm1013_vm14 = vweird.f32 %v2276_v1 }
 0x10c   : > { %v901_v26 = vsel %vm898_vm11, %v900_v4, %v896_v12  ;;  %v1569_v30 = vpop.eup %1568  ;;  %v1012_v53 = vadd.f32 %v1563_v22, %v1011_v39  ;;  %1574 = vpow2.f32 %v1317_v9  ;;  %vm1015_vm15 = vmor %vm1013_vm14, %vm1014_vm13  ;;  %vm1018_vm0 = vcmp.eq.f32.partialorder %v1017_v3, 8.507059e+37 }
 0x10d   : > { %v1074_v47 = vmul.f32 %v901_v26, %v2175_v40  ;;  %v2366_v6 = vpop.eup %1570  ;;  %v1006_v18 = vsel %vm2318_vm7, %v1005_v60, %v1001_v29  ;;  %v1020_v57 = vor.u32 1.1754944e-38, %v1019_v8  ;;  %v665_v45 = vsub.f32 1.0, %v664_v55  ;;  %v442_v40 = vpop.f32.mrf.mxu3 }
 0x10e   : > { %v1016_v7 = vsel %vm1015_vm15, %v1563_v22, %v1012_v53  ;;  %v2370_v19 = vadd.f32 1.0, %v1567_v21  ;;  %v784_v1 = vmul.f32 %v2366_v6, %v2325_v27  ;;  %v1081_v35 = vmul.f32 %v1006_v18, %v2039_v14 }
 0x10f   : > { %v1407_v62 = vpack.c.bf16 %v1074_v47, %v1073_v10  ;;  %v1021_v15 = vsel %vm1018_vm0, %v1020_v57, %v1016_v7  ;;  %v2377_v0 = vadd.f32 1.0, %v1569_v30  ;;  %v2379_v25 = vadd.f32 %v1592_v56, %v422_v33 }
 0x110   : > { %v1082_v24 = vmul.f32 %v1021_v15, %v2187_v13  ;;  %v2381_v28 = vadd.f32 %v1592_v56, %v442_v40  ;;  %v666_v5 = vmul.f32 %v2343_v58, %v665_v45  ;;  %1576 = vrcp.f32 %v2370_v19 }
 0x111   : > { %1443 = vst [vmem:[%s1902_s27 + $0x50] sm:$0xff] %v1407_v62   ;;  %v1573_v43 = vpop.eup %1572  ;;  %v785_v2 = vsub.f32 1.0, %v784_v1  ;;  %1578 = vrcp.f32 %v2377_v0  ;;  %vm668_vm1 = vweird.f32 %v2288_v48  ;;  %v674_v13 = vand.u32 2147483648, %v2288_v48 }
 0x112   : > { %v1575_v36 = vpop.eup %1574  ;;  %v1427_v16 = vpack.c.bf16 %v1082_v24, %v1081_v35  ;;  %v2385_v42 = vadd.f32 1.0, %v1573_v43  ;;  %v1325_v54 = vmul.f32 -1.442695, %v2379_v25  ;;  %v667_v44 = vadd.f32 %v2343_v58, %v666_v5 }
 0x113   : > { %v2387_v14 = vadd.f32 1.0, %v1575_v36  ;;  %vm669_vm2 = vweird.f32 %v2343_v58  ;;  %v1333_v11 = vmul.f32 -1.442695, %v2381_v28  ;;  %v786_v46 = vmul.f32 %v2366_v6, %v785_v2 }
 0x114   : > { %1447 = vst [vmem:[%s1902_s27 + $0x70] sm:$0xff] %v1427_v16   ;;  %1580 = vrcp.f32 %v2385_v42  ;;  %v672_v50 = vand.u32 2147483647, %v2288_v48  ;;  %vm2403_vm3 = vmor %vm668_vm1, %vm669_vm2  ;;  %v792_v56 = vand.u32 2147483647, %v2325_v27  ;;  %v794_v34 = vand.u32 2147483648, %v2325_v27 }
 0x115   : > { %1582 = vrcp.f32 %v2387_v14  ;;  %v671_v20 = vsel %vm2403_vm3, %v2343_v58, %v667_v44  ;;  %v675_v52 = vor.u32 1.1754944e-38, %v674_v13  ;;  %v787_v48 = vadd.f32 %v2366_v6, %v786_v46 }
 0x116   : > { %v2400_v23 = vpop.eup %1576  ;;  %1584 = vpow2.f32 %v1325_v54  ;;  %vm788_vm4 = vweird.f32 %v2325_v27  ;;  %vm789_vm5 = vweird.f32 %v2366_v6  ;;  %vm673_vm6 = vcmp.eq.f32.partialorder %v672_v50, 8.507059e+37 }
 0x117   : > { %v2409_v31 = vpop.eup %1578  ;;  %1586 = vpow2.f32 %v1333_v11  ;;  %v904_v29 = vmul.f32 %v2400_v23, %v2370_v19  ;;  %v676_v3 = vsel %vm673_vm6, %v675_v52, %v671_v20  ;;  %vm2420_vm7 = vcmp.eq.f32.partialorder %v792_v56, 8.507059e+37  ;;  %vm2425_vm8 = vmor %vm788_vm4, %vm789_vm5 }
 0x118   : > { %v795_v58 = vor.u32 1.1754944e-38, %v794_v34  ;;  %v1024_v27 = vmul.f32 %v2409_v31, %v2377_v0  ;;  %vm683_vm9 = vweird.f32 %v2385_v42  ;;  %v687_v12 = vand.u32 2147483647, %v2385_v42 }
 0x119   : > { %v791_v55 = vsel %vm2425_vm8, %v2366_v6, %v787_v48  ;;  %v905_v21 = vsub.f32 1.0, %v904_v29  ;;  %v689_v10 = vand.u32 2147483648, %v2385_v42  ;;  %v809_v47 = vand.u32 2147483648, %v2387_v14 }
 0x11a   : > { %v1581_v59 = vpop.eup %1580  ;;  %v807_v57 = vand.u32 2147483647, %v2387_v14  ;;  %v1025_v7 = vsub.f32 1.0, %v1024_v27  ;;  %vm803_vm12 = vweird.f32 %v2387_v14  ;;  %v796_v6 = vsel %vm2420_vm7, %v795_v58, %v791_v55 }
 0x11b   : > { %v1583_v51 = vpop.eup %1582  ;;  %v679_v63 = vmul.f32 %v1581_v59, %v2385_v42  ;;  %vm684_vm10 = vweird.f32 %v1581_v59  ;;  %v690_v33 = vor.u32 1.1754944e-38, %v689_v10  ;;  %v906_v15 = vmul.f32 %v2400_v23, %v905_v21 }
 0x11c   : > { %v799_v8 = vmul.f32 %v1583_v51, %v2387_v14  ;;  %v1585_v39 = vpop.eup %1584  ;;  %vm804_vm11 = vweird.f32 %v1583_v51  ;;  %vm685_vm13 = vmor %vm683_vm9, %vm684_vm10  ;;  %vm688_vm14 = vcmp.eq.f32.partialorder %v687_v12, 8.507059e+37  ;;  %v810_v35 = vor.u32 1.1754944e-38, %v809_v47 }
 0x11d   : > { %v680_v9 = vsub.f32 1.0, %v679_v63  ;;  %v1587_v26 = vpop.eup %1586  ;;  %v2438_v53 = vadd.f32 1.0, %v1585_v39  ;;  %vm805_vm15 = vmor %vm803_vm12, %vm804_vm11  ;;  %v912_v24 = vand.u32 2147483647, %v2370_v19  ;;  %vm808_vm0 = vcmp.eq.f32.partialorder %v807_v57, 8.507059e+37 }
 0x11e   : > { %v800_v60 = vsub.f32 1.0, %v799_v8  ;;  %v2441_v62 = vadd.f32 1.0, %v1587_v26  ;;  %v1059_v16 = vmul.f32 %v676_v3, %v2195_v17  ;;  %v1026_v5 = vmul.f32 %v2409_v31, %v1025_v7 }
 0x11f   : > { %v681_v30 = vmul.f32 %v1581_v59, %v680_v9  ;;  %1588 = vrcp.f32 %v2438_v53  ;;  %v1067_v14 = vmul.f32 %v796_v6, %v2230_v37  ;;  %v914_v13 = vand.u32 2147483648, %v2370_v19 }
 0x120   : > { %v801_v18 = vmul.f32 %v1583_v51, %v800_v60  ;;  %1590 = vrcp.f32 %v2441_v62  ;;  %v907_v11 = vadd.f32 %v2400_v23, %v906_v15  ;;  %vm909_vm1 = vweird.f32 %v2400_v23 }
 0x121   : > { %v682_v45 = vadd.f32 %v1581_v59, %v681_v30  ;;  %vm908_vm2 = vweird.f32 %v2370_v19  ;;  %vm2463_vm3 = vcmp.eq.f32.partialorder %v912_v24, 8.507059e+37  ;;  %v1027_v37 = vadd.f32 %v2409_v31, %v1026_v5 }
 0x122   : > { %v802_v40 = vadd.f32 %v1583_v51, %v801_v18  ;;  %vm1029_vm4 = vweird.f32 %v2409_v31  ;;  %vm2471_vm5 = vmor %vm908_vm2, %vm909_vm1  ;;  %v915_v34 = vor.u32 1.1754944e-38, %v914_v13  ;;  %v1032_v19 = vand.u32 2147483647, %v2377_v0 }
 0x123   : > { %v686_v1 = vsel %vm685_vm13, %v1581_v59, %v682_v45  ;;  %v1034_v20 = vand.u32 2147483648, %v2377_v0  ;;  %v911_v59 = vsel %vm2471_vm5, %v2400_v23, %v907_v11  ;;  %vm1028_vm6 = vweird.f32 %v2377_v0 }
 0x124   : > { %v691_v43 = vsel %vm688_vm14, %v690_v33, %v686_v1  ;;  %v806_v36 = vsel %vm805_vm15, %v1583_v51, %v802_v40  ;;  %v929_v48 = vand.u32 2147483648, %v2438_v53  ;;  %vm2483_vm7 = vmor %vm1028_vm6, %vm1029_vm4  ;;  %v927_v3 = vand.u32 2147483647, %v2438_v53 }
 0x125   : > { %v1060_v42 = vmul.f32 %v691_v43, %v2330_v41  ;;  %v811_v2 = vsel %vm808_vm0, %v810_v35, %v806_v36  ;;  %v1589_v44 = vpop.eup %1588  ;;  %v1049_v4 = vand.u32 2147483648, %v2441_v62  ;;  %v1031_v58 = vsel %vm2483_vm7, %v2409_v31, %v1027_v37 }
 0x126   : > { %v1068_v54 = vmul.f32 %v811_v2, %v2332_v32  ;;  %v1591_v17 = vpop.eup %1590  ;;  %v919_v41 = vmul.f32 %v1589_v44, %v2438_v53  ;;  %vm924_vm8 = vweird.f32 %v1589_v44  ;;  %v1047_v0 = vand.u32 2147483647, %v2441_v62 }
 0x127   : > { %v1372_v46 = vpack.c.bf16 %v1060_v42, %v1059_v16  ;;  %v1039_v32 = vmul.f32 %v1591_v17, %v2441_v62  ;;  %vm1044_vm9 = vweird.f32 %v1591_v17  ;;  %vm1033_vm10 = vcmp.eq.f32.partialorder %v1032_v19, 8.507059e+37 }
 0x128   : > { %v1392_v50 = vpack.c.bf16 %v1068_v54, %v1067_v14  ;;  %v920_v52 = vsub.f32 1.0, %v919_v41  ;;  %v1035_v8 = vor.u32 1.1754944e-38, %v1034_v20  ;;  %vm923_vm11 = vweird.f32 %v2438_v53 }
 0x129   : > { %1436 = vst [vmem:[%s1902_s27 + $0x18] sm:$0xff] %v1372_v46   ;;  %v1040_v29 = vsub.f32 1.0, %v1039_v32  ;;  %v916_v27 = vsel %vm2463_vm3, %v915_v34, %v911_v59  ;;  %vm925_vm12 = vmor %vm923_vm11, %vm924_vm8  ;;  %v930_v9 = vor.u32 1.1754944e-38, %v929_v48  ;;  %vm1043_vm13 = vweird.f32 %v2441_v62 }
 0x12a   : > { %1440 = vst [vmem:[%s1902_s27 + $0x38] sm:$0xff] %v1392_v50   ;;  %v921_v63 = vmul.f32 %v1589_v44, %v920_v52  ;;  %v1036_v39 = vsel %vm1033_vm10, %v1035_v8, %v1031_v58  ;;  %vm928_vm14 = vcmp.eq.f32.partialorder %v927_v3, 8.507059e+37  ;;  %vm1045_vm15 = vmor %vm1043_vm13, %vm1044_vm9  ;;  %v1050_v55 = vor.u32 1.1754944e-38, %v1049_v4 }
 0x12b   : > { %v1041_v23 = vmul.f32 %v1591_v17, %v1040_v29  ;;  %vm1048_vm0 = vcmp.eq.f32.partialorder %v1047_v0, 8.507059e+37  ;;  %v1075_v60 = vmul.f32 %v916_v27, %v2279_v61  ;;  %v1083_v47 = vmul.f32 %v1036_v39, %v2282_v49 }
 0x12c   : > { %v922_v38 = vadd.f32 %v1589_v44, %v921_v63 }
 0x12d   : > { %v1042_v12 = vadd.f32 %v1591_v17, %v1041_v23 }
 0x12e   : > { %v926_v31 = vsel %vm925_vm12, %v1589_v44, %v922_v38 }
 0x12f   : > { %v931_v21 = vsel %vm928_vm14, %v930_v9, %v926_v31  ;;  %v1046_v10 = vsel %vm1045_vm15, %v1591_v17, %v1042_v12 }
 0x130   : > { %v1076_v26 = vmul.f32 %v931_v21, %v2379_v25  ;;  %v1051_v30 = vsel %vm1048_vm0, %v1050_v55, %v1046_v10 }
 0x131   : > { %v1084_v53 = vmul.f32 %v1051_v30, %v2381_v28 }
 0x132   : > { %v1412_v18 = vpack.c.bf16 %v1076_v26, %v1075_v60 }
 0x133   : > { %v1432_v57 = vpack.c.bf16 %v1084_v53, %v1083_v47 }
 0x134   : > { %1444 = vst [vmem:[%s1902_s27 + $0x58] sm:$0xff] %v1412_v18  }
 0x135   : > { %1448 = vst [vmem:[%s1902_s27 + $0x78] sm:$0xff] %v1432_v57  }
 0x136 PF: > { %s13_s12 = sadd.s32 1, %s1599_s12  }
 0x137   : > { %p10_p4 = scmp.ge.s32.totalorder %s13_s12, 4  }
 0x139   :  { %12 = sbr.rel (!%p10_p4) target bundleno = 1 (0x1), region = 62 }

// kernel: simple_model_forward.6
= control target key start
LH: loop header
LB: loop body
LE: loop exit
PB: predicated region body
PF: predicated region fallthrough
CT: control target
= control target key end

     0   :  { %s1667_s12 = smov 0   ;;  %s2554_s0 = inlined_call_operand.vmem [shape: bf16[512,128], index: 0, kind: input, shape index: {}]   ;;  %s2555_s1 = inlined_call_operand.vmem [shape: bf16[128,128], index: 1, kind: input, shape index: {}]   ;;  %s2556_s2 = inlined_call_operand.vmem [shape: f32[1,128], index: 2, kind: input, shape index: {}]   ;;  %s2557_s3 = inlined_call_operand.vmem [shape: bf16[512,128], index: 3, kind: output, shape index: {}]  }
   0x1 LB: > { %s1219_s13 = sadd.s32 4294967295, %s1645_s12   ;;  %p1223_p0 = scmp.ge.s32.totalorder %s1645_s12, 1  ;;  %s1645_s12 = sphi %s1667_s12, %s13_s12  }
   0x2   : > { %p138_p1 = scmp.lt.s32.totalorder %s1645_s12, 3 }
   0x4   : > { %p139_p2 = pnand %p1223_p0, %p138_p1 }
   0x5   : > { %s1224_s22 = sshll.u32 (!%p139_p2), %s1219_s13, 5 }
   0x6   : > { %142 = sbr.rel (%p139_p2) target bundleno = 334 (0x14e), region = 32  ;;  %p163_p3 = scmp.lt.s32.totalorder (!%p139_p2), %s1224_s22, 63 }
   0xb   : > { %v1381_v0 = vld [vmem:[%s2555_s1 + $0x38] sm:$0xff]  ;;  %v1380_v1 = vld [vmem:[%s2555_s1 + $0x30] sm:$0xff]  ;;  %v1379_v2 = vld [vmem:[%s2555_s1 + $0x28] sm:$0xff]  ;;  %s2631_s22 = smov (!%p163_p3, %s1224_s22), 63 }
   0xc   : > { %370 = vmatpush.bf16.msra.mxu0 %v1381_v0  ;;  %1477 = vmatpush.bf16.msra.mxu1 %v1381_v0  ;;  %v1378_v3 = vld [vmem:[%s2555_s1 + $0x20] sm:$0xff]  ;;  %v1377_v4 = vld [vmem:[%s2555_s1 + $0x18] sm:$0xff]  ;;  %v1376_v5 = vld [vmem:[%s2555_s1 + $0x10] sm:$0xff]  ;;  %s1225_s29 = sshll.u32 %s2631_s22, 2 }
   0xd   : > { %1478 = vmatpush.bf16.msra.mxu2 %v1381_v0  ;;  %1479 = vmatpush.bf16.msra.mxu3 %v1381_v0  ;;  %v1375_v6 = vld [vmem:[%s2555_s1 + $0x8] sm:$0xff]  ;;  %v1374_v7 = vld [vmem:[%s2555_s1] sm:$0xff]  ;;  %s1707_s7 = scalar_lea.vmem %s2554_s0, %s1225_s29  ;;  %s1950_s13 = scalar_lea.vmem %s2557_s3, %s1225_s29 }
   0xe   : > { %v1358_v8 = vld [vmem:[%s1707_s7] sm:$0xff]  ;;  %v1359_v12 = vld [vmem:[%s1707_s7 + $0x8] sm:$0xff]  ;;  %v1360_v16 = vld [vmem:[%s1707_s7 + $0x10] sm:$0xff] }
   0xf   : > { %v1362_v9 = vld [vmem:[%s1707_s7 + $0x20] sm:$0xff]  ;;  %v1363_v13 = vld [vmem:[%s1707_s7 + $0x28] sm:$0xff]  ;;  %v1364_v17 = vld [vmem:[%s1707_s7 + $0x30] sm:$0xff] }
  0x10   : > { %371 = vmatpush.bf16.msra.mxu0 %v1380_v1  ;;  %1480 = vmatpush.bf16.msra.mxu1 %v1380_v1  ;;  %v1366_v10 = vld [vmem:[%s1707_s7 + $0x40] sm:$0xff]  ;;  %v1367_v14 = vld [vmem:[%s1707_s7 + $0x48] sm:$0xff]  ;;  %v1368_v18 = vld [vmem:[%s1707_s7 + $0x50] sm:$0xff] }
  0x11   : > { %1481 = vmatpush.bf16.msra.mxu2 %v1380_v1  ;;  %1482 = vmatpush.bf16.msra.mxu3 %v1380_v1  ;;  %v1370_v11 = vld [vmem:[%s1707_s7 + $0x60] sm:$0xff]  ;;  %v1371_v15 = vld [vmem:[%s1707_s7 + $0x68] sm:$0xff]  ;;  %v1372_v19 = vld [vmem:[%s1707_s7 + $0x70] sm:$0xff] }
  0x12   : > { %v1361_v20 = vld [vmem:[%s1707_s7 + $0x18] sm:$0xff]  ;;  %v1728_v24 = vld [vmem:[%s2556_s2] ss:$0 sm:$0xff] }
  0x13   : > { %v1365_v21 = vld [vmem:[%s1707_s7 + $0x38] sm:$0xff] }
  0x14   : > { %372 = vmatpush.bf16.msra.mxu0 %v1379_v2  ;;  %1483 = vmatpush.bf16.msra.mxu1 %v1379_v2  ;;  %v1369_v22 = vld [vmem:[%s1707_s7 + $0x58] sm:$0xff] }
  0x15   : > { %1484 = vmatpush.bf16.msra.mxu2 %v1379_v2  ;;  %1485 = vmatpush.bf16.msra.mxu3 %v1379_v2  ;;  %v1373_v23 = vld [vmem:[%s1707_s7 + $0x78] sm:$0xff] }
  0x18   : > { %373 = vmatpush.bf16.msra.mxu0 %v1378_v3  ;;  %1486 = vmatpush.bf16.msra.mxu1 %v1378_v3 }
  0x19   : > { %1487 = vmatpush.bf16.msra.mxu2 %v1378_v3  ;;  %1488 = vmatpush.bf16.msra.mxu3 %v1378_v3 }
  0x1c   : > { %374 = vmatpush.bf16.msra.mxu0 %v1377_v4  ;;  %1489 = vmatpush.bf16.msra.mxu1 %v1377_v4 }
  0x1d   : > { %1490 = vmatpush.bf16.msra.mxu2 %v1377_v4  ;;  %1491 = vmatpush.bf16.msra.mxu3 %v1377_v4 }
  0x20   : > { %375 = vmatpush.bf16.msra.mxu0 %v1376_v5  ;;  %1492 = vmatpush.bf16.msra.mxu1 %v1376_v5 }
  0x21   : > { %1493 = vmatpush.bf16.msra.mxu2 %v1376_v5  ;;  %1494 = vmatpush.bf16.msra.mxu3 %v1376_v5 }
  0x24   : > { %376 = vmatpush.bf16.msra.mxu0 %v1375_v6  ;;  %1495 = vmatpush.bf16.msra.mxu1 %v1375_v6 }
  0x25   : > { %1496 = vmatpush.bf16.msra.mxu2 %v1375_v6  ;;  %1497 = vmatpush.bf16.msra.mxu3 %v1375_v6 }
  0x28   : > { %377 = vmatpush.bf16.msra.mxu0 %v1374_v7  ;;  %1498 = vmatpush.bf16.msra.mxu1 %v1374_v7 }
  0x29   : > { %1499 = vmatpush.bf16.msra.mxu2 %v1374_v7  ;;  %1500 = vmatpush.bf16.msra.mxu3 %v1374_v7 }
  0x2b   : > { %378 = vmatmul.bf16.vlgmr.msra.gmra.mxu0 %v1358_v8  ;;  %398 = vmatmul.bf16.vlgmr.msra.gmra.mxu1 %v1362_v9 }
  0x2c   : > { %418 = vmatmul.bf16.vlgmr.msra.gmra.mxu2 %v1366_v10  ;;  %438 = vmatmul.bf16.vlgmr.msra.gmra.mxu3 %v1370_v11 }
  0x3b   : > { %383 = vmatmul.bf16.gmra.mxu0 %v1359_v12  ;;  %403 = vmatmul.bf16.gmra.mxu1 %v1363_v13 }
  0x3c   : > { %423 = vmatmul.bf16.gmra.mxu2 %v1367_v14  ;;  %443 = vmatmul.bf16.gmra.mxu3 %v1371_v15 }
  0x4b   : > { %388 = vmatmul.bf16.gmra.mxu0 %v1360_v16  ;;  %408 = vmatmul.bf16.gmra.mxu1 %v1364_v17 }
  0x4c   : > { %428 = vmatmul.bf16.gmra.mxu2 %v1368_v18  ;;  %448 = vmatmul.bf16.gmra.mxu3 %v1372_v19 }
  0x5b   : > { %393 = vmatmul.bf16.gmra.mxu0 %v1361_v20  ;;  %413 = vmatmul.bf16.gmra.mxu1 %v1365_v21 }
  0x5c   : > { %433 = vmatmul.bf16.gmra.mxu2 %v1369_v22  ;;  %453 = vmatmul.bf16.gmra.mxu3 %v1373_v23 }
  0xa8   : > { %v379_v25 = vpop.f32.mrf.mxu0  ;;  %v399_v26 = vpop.f32.mrf.mxu1 }
  0xa9   : > { %v1731_v27 = vadd.f32 %v1728_v24, %v379_v25  ;;  %v1734_v28 = vadd.f32 %v1728_v24, %v399_v26 }
  0xab   : > { %v1324_v29 = vmul.f32 -1.442695, %v1731_v27  ;;  %v1332_v30 = vmul.f32 -1.442695, %v1734_v28 }
  0xad   : > { %1510 = vpow2.f32 %v1324_v29 }
  0xae   : > { %1512 = vpow2.f32 %v1332_v30 }
  0xaf   : > { %v419_v31 = vpop.f32.mrf.mxu2  ;;  %v439_v32 = vpop.f32.mrf.mxu3 }
  0xb0   : > { %v1739_v33 = vadd.f32 %v1728_v24, %v419_v31  ;;  %v1742_v34 = vadd.f32 %v1728_v24, %v439_v32  ;;  %v381_v35 = vpop.f32.mrf.mxu0  ;;  %v401_v36 = vpop.f32.mrf.mxu1 }
  0xb1   : > { %v1745_v37 = vadd.f32 %v1728_v24, %v381_v35  ;;  %v1748_v38 = vadd.f32 %v1728_v24, %v401_v36 }
  0xb2   : > { %v1340_v39 = vmul.f32 -1.442695, %v1739_v33  ;;  %v1348_v40 = vmul.f32 -1.442695, %v1742_v34 }
  0xb3   : > { %v1511_v41 = vpop.eup %1510  ;;  %v1325_v44 = vmul.f32 -1.442695, %v1745_v37  ;;  %v1333_v46 = vmul.f32 -1.442695, %v1748_v38 }
  0xb4   : > { %v1513_v42 = vpop.eup %1512  ;;  %v1752_v43 = vadd.f32 1.0, %v1511_v41  ;;  %1514 = vpow2.f32 %v1340_v39 }
  0xb5   : > { %v1755_v45 = vadd.f32 1.0, %v1513_v42  ;;  %1516 = vpow2.f32 %v1348_v40 }
  0xb6   : > { %1518 = vrcp.f32 %v1752_v43  ;;  %v596_v59 = vand.u32 2147483647, %v1752_v43  ;;  %v598_v60 = vand.u32 2147483648, %v1752_v43  ;;  %vm592_vm0 = vweird.f32 %v1752_v43 }
  0xb7   : > { %1520 = vrcp.f32 %v1755_v45  ;;  %v421_v47 = vpop.f32.mrf.mxu2  ;;  %v441_v48 = vpop.f32.mrf.mxu3  ;;  %vm712_vm1 = vweird.f32 %v1755_v45  ;;  %v716_v4 = vand.u32 2147483647, %v1755_v45  ;;  %v718_v5 = vand.u32 2147483648, %v1755_v45 }
  0xb8   : > { %1522 = vpow2.f32 %v1325_v44  ;;  %v1761_v49 = vadd.f32 %v1728_v24, %v421_v47  ;;  %v1764_v51 = vadd.f32 %v1728_v24, %v441_v48  ;;  %v384_v61 = vpop.f32.mrf.mxu0  ;;  %v404_v62 = vpop.f32.mrf.mxu1  ;;  %vm1795_vm2 = vcmp.eq.f32.partialorder %v596_v59, 8.507059e+37 }
  0xb9   : > { %1524 = vpow2.f32 %v1333_v46  ;;  %v1789_v7 = vadd.f32 %v1728_v24, %v384_v61  ;;  %v1792_v8 = vadd.f32 %v1728_v24, %v404_v62  ;;  %v599_v11 = vor.u32 1.1754944e-38, %v598_v60 }
  0xba   : > { %v1515_v50 = vpop.eup %1514  ;;  %v1341_v56 = vmul.f32 -1.442695, %v1761_v49  ;;  %v1349_v1 = vmul.f32 -1.442695, %v1764_v51  ;;  %vm1809_vm4 = vcmp.eq.f32.partialorder %v716_v4, 8.507059e+37  ;;  %v719_v21 = vor.u32 1.1754944e-38, %v718_v5 }
  0xbb   : > { %v1517_v52 = vpop.eup %1516  ;;  %v1766_v53 = vadd.f32 1.0, %v1515_v50  ;;  %v1326_v23 = vmul.f32 -1.442695, %v1789_v7  ;;  %v1820_v25 = vmul.f32 -1.442695, %v1792_v8 }
  0xbc   : > { %v1768_v54 = vpop.eup %1518  ;;  %v1770_v55 = vadd.f32 1.0, %v1517_v52 }
  0xbd   : > { %v1773_v57 = vpop.eup %1520  ;;  %v588_v58 = vmul.f32 %v1768_v54, %v1752_v43  ;;  %1526 = vrcp.f32 %v1766_v53  ;;  %vm593_vm3 = vweird.f32 %v1768_v54  ;;  %v836_v15 = vand.u32 2147483647, %v1766_v53 }
  0xbe   : > { %v1523_v63 = vpop.eup %1522  ;;  %v708_v0 = vmul.f32 %v1773_v57, %v1755_v45  ;;  %1528 = vrcp.f32 %v1770_v55  ;;  %v838_v19 = vand.u32 2147483648, %v1766_v53  ;;  %v958_v20 = vand.u32 2147483648, %v1770_v55  ;;  %vm1832_vm7 = vmor %vm592_vm0, %vm593_vm3 }
  0xbf   : > { %v1525_v2 = vpop.eup %1524  ;;  %v589_v3 = vsub.f32 1.0, %v588_v58  ;;  %1530 = vpow2.f32 %v1341_v56  ;;  %v1799_v12 = vadd.f32 1.0, %v1523_v63  ;;  %v424_v26 = vpop.f32.mrf.mxu2  ;;  %vm713_vm5 = vweird.f32 %v1773_v57 }
  0xc0   : > { %v709_v6 = vsub.f32 1.0, %v708_v0  ;;  %v1801_v13 = vadd.f32 1.0, %v1525_v2  ;;  %1532 = vpow2.f32 %v1349_v1  ;;  %vm832_vm6 = vweird.f32 %v1766_v53  ;;  %vm1857_vm10 = vmor %vm712_vm1, %vm713_vm5 }
  0xc1   : > { %v590_v9 = vmul.f32 %v1768_v54, %v589_v3  ;;  %1534 = vrcp.f32 %v1799_v12  ;;  %v956_v39 = vand.u32 2147483647, %v1770_v55  ;;  %v611_v40 = vand.u32 2147483647, %v1799_v12 }
  0xc2   : > { %v710_v14 = vmul.f32 %v1773_v57, %v709_v6  ;;  %1536 = vrcp.f32 %v1801_v13  ;;  %vm1843_vm8 = vcmp.eq.f32.partialorder %v836_v15, 8.507059e+37  ;;  %v839_v43 = vor.u32 1.1754944e-38, %v838_v19 }
  0xc3   : > { %v1806_v16 = vpop.eup %1526  ;;  %v591_v17 = vadd.f32 %v1768_v54, %v590_v9  ;;  %vm952_vm9 = vweird.f32 %v1770_v55  ;;  %v1848_v44 = vor.u32 1.1754944e-38, %v958_v20  ;;  %v1851_v46 = vadd.f32 %v1728_v24, %v424_v26 }
  0xc4   : > { %v828_v22 = vmul.f32 %v1806_v16, %v1766_v53  ;;  %v1822_v29 = vpop.eup %1528  ;;  %v711_v30 = vadd.f32 %v1773_v57, %v710_v14  ;;  %vm833_vm11 = vweird.f32 %v1806_v16  ;;  %vm607_vm12 = vweird.f32 %v1799_v12 }
  0xc5   : > { %v1531_v31 = vpop.eup %1530  ;;  %v948_v36 = vmul.f32 %v1822_v29, %v1770_v55  ;;  %v595_v41 = vsel %vm1832_vm7, %v1768_v54, %v591_v17  ;;  %v613_v58 = vand.u32 2147483648, %v1799_v12  ;;  %1538 = vpow2.f32 %v1326_v23  ;;  %vm1894_vm15 = vmor %vm832_vm6, %vm833_vm11 }
  0xc6   : > { %v829_v35 = vsub.f32 1.0, %v828_v22  ;;  %v1533_v47 = vpop.eup %1532  ;;  %v715_v56 = vsel %vm1857_vm10, %v1773_v57, %v711_v30  ;;  %v1868_v59 = vadd.f32 1.0, %v1531_v31  ;;  %v600_v45 = vsel %vm1795_vm2, %v599_v11, %v595_v41 }
  0xc7   : > { %v949_v52 = vsub.f32 1.0, %v948_v36  ;;  %v1535_v54 = vpop.eup %1534  ;;  %vm1875_vm13 = vcmp.eq.f32.partialorder %v611_v40, 8.507059e+37  ;;  %vm1879_vm14 = vcmp.eq.f32.partialorder %v956_v39, 8.507059e+37  ;;  %v731_v1 = vand.u32 2147483647, %v1801_v13 }
  0xc8   : > { %v830_v50 = vmul.f32 %v1806_v16, %v829_v35  ;;  %v603_v62 = vmul.f32 %v1535_v54, %v1799_v12  ;;  %v1537_v0 = vpop.eup %1536  ;;  %v733_v2 = vand.u32 2147483648, %v1801_v13  ;;  %1540 = vrcp.f32 %v1868_v59 }
  0xc9   : > { %v950_v61 = vmul.f32 %v1822_v29, %v949_v52  ;;  %v1886_v3 = vadd.f32 1.0, %v1533_v47  ;;  %v720_v4 = vsel %vm1809_vm4, %v719_v21, %v715_v56  ;;  %v723_v9 = vmul.f32 %v1537_v0, %v1801_v13  ;;  %v386_v47 = vpop.f32.mrf.mxu0 }
  0xca   : > { %v831_v60 = vadd.f32 %v1806_v16, %v830_v50  ;;  %v604_v6 = vsub.f32 1.0, %v603_v62  ;;  %vm727_vm0 = vweird.f32 %v1801_v13  ;;  %v1067_v10 = vmul.f32 %v600_v45, %v1731_v27 }
  0xcb   : > { %v951_v14 = vadd.f32 %v1822_v29, %v950_v61  ;;  %vm953_vm1 = vweird.f32 %v1822_v29  ;;  %vm608_vm2 = vweird.f32 %v1535_v54  ;;  %v614_v15 = vor.u32 1.1754944e-38, %v613_v58  ;;  %v1539_v18 = vpop.eup %1538 }
  0xcc   : > { %v835_v11 = vsel %vm1894_vm15, %v1806_v16, %v831_v60  ;;  %v605_v53 = vmul.f32 %v1535_v54, %v604_v6  ;;  %v724_v17 = vsub.f32 1.0, %v723_v9  ;;  %v1075_v19 = vmul.f32 %v720_v4, %v1734_v28  ;;  %vm1916_vm4 = vmor %vm952_vm9, %vm953_vm1  ;;  %v426_v4 = vpop.f32.mrf.mxu2 }
  0xcd   : > { %vm1907_vm3 = vcmp.eq.f32.partialorder %v731_v1, 8.507059e+37  ;;  %v734_v27 = vor.u32 1.1754944e-38, %v733_v2  ;;  %1542 = vrcp.f32 %v1886_v3  ;;  %v840_v16 = vsel %vm1843_vm8, %v839_v43, %v835_v11  ;;  %vm609_vm6 = vmor %vm607_vm12, %vm608_vm2 }
  0xce   : > { %v606_v22 = vadd.f32 %v1535_v54, %v605_v53  ;;  %v725_v23 = vmul.f32 %v1537_v0, %v724_v17  ;;  %vm728_vm5 = vweird.f32 %v1537_v0  ;;  %v1541_v28 = vpop.eup %1540  ;;  %v955_v26 = vsel %vm1916_vm4, %v1822_v29, %v951_v14 }
  0xcf   : > { %vm847_vm7 = vweird.f32 %v1868_v59  ;;  %v1927_v30 = vadd.f32 1.0, %v1539_v18  ;;  %1544 = vpow2.f32 %v1820_v25  ;;  %v843_v32 = vmul.f32 %v1541_v28, %v1868_v59  ;;  %vm729_vm8 = vmor %vm727_vm0, %vm728_vm5  ;;  %v444_v25 = vpop.f32.mrf.mxu3 }
  0xd0   : > { %v610_v55 = vsel %vm609_vm6, %v1535_v54, %v606_v22  ;;  %v726_v31 = vadd.f32 %v1537_v0, %v725_v23  ;;  %v851_v35 = vand.u32 2147483647, %v1868_v59  ;;  %v1933_v36 = vmul.f32 %v840_v16, %v1739_v33 }
  0xd1   : > { %v615_v12 = vsel %vm1875_vm13, %v614_v15, %v610_v55  ;;  %v853_v29 = vand.u32 2147483648, %v1868_v59  ;;  %1546 = vrcp.f32 %v1927_v30  ;;  %v960_v39 = vsel %vm1879_vm14, %v1848_v44, %v955_v26  ;;  %v389_v55 = vpop.f32.mrf.mxu0 }
  0xd2   : > { %v1068_v40 = vmul.f32 %v615_v12, %v1745_v37  ;;  %v730_v41 = vsel %vm729_vm8, %v1537_v0, %v726_v31  ;;  %v844_v33 = vsub.f32 1.0, %v843_v32  ;;  %vm848_vm9 = vweird.f32 %v1541_v28 }
  0xd3   : > { %v1543_v42 = vpop.eup %1542  ;;  %v735_v13 = vsel %vm1907_vm3, %v734_v27, %v730_v41  ;;  %v971_v43 = vand.u32 2147483647, %v1886_v3  ;;  %v1342_v44 = vmul.f32 -1.442695, %v1851_v46  ;;  %vm1958_vm10 = vcmp.eq.f32.partialorder %v851_v35, 8.507059e+37  ;;  %vm849_vm11 = vmor %vm847_vm7, %vm848_vm9 }
  0xd4   : > { %v1385_v37 = vpack.c.bf16 %v1068_v40, %v1067_v10  ;;  %v1076_v48 = vmul.f32 %v735_v13, %v1748_v38  ;;  %v845_v50 = vmul.f32 %v1541_v28, %v844_v33  ;;  %v963_v52 = vmul.f32 %v1543_v42, %v1886_v3  ;;  %v406_v38 = vpop.f32.mrf.mxu1 }
  0xd5   : > { %v1545_v54 = vpop.eup %1544  ;;  %v854_v58 = vor.u32 1.1754944e-38, %v853_v29  ;;  %v973_v45 = vand.u32 2147483648, %v1886_v3  ;;  %1548 = vpow2.f32 %v1342_v44  ;;  %vm967_vm12 = vweird.f32 %v1886_v3 }
  0xd6   : > { %1386 = vst [vmem:[%s1950_s13] sm:$0xff] %v1385_v37   ;;  %v1405_v60 = vpack.c.bf16 %v1076_v48, %v1075_v19  ;;  %v846_v61 = vadd.f32 %v1541_v28, %v845_v50  ;;  %v964_v62 = vsub.f32 1.0, %v963_v52  ;;  %v1964_v63 = vadd.f32 1.0, %v1545_v54 }
  0xd7   : > { %v1966_v0 = vpop.eup %1546  ;;  %vm1972_vm13 = vcmp.eq.f32.partialorder %v971_v43, 8.507059e+37  ;;  %v1977_v1 = vadd.f32 %v1728_v24, %v444_v25  ;;  %v1980_v2 = vadd.f32 %v1728_v24, %v386_v47  ;;  %vm968_vm14 = vweird.f32 %v1543_v42  ;;  %v446_v21 = vpop.f32.mrf.mxu3 }
  0xd8   : > { %1465 = vst [vmem:[%s1950_s13 + $0x20] sm:$0xff] %v1405_v60   ;;  %v850_v5 = vsel %vm849_vm11, %v1541_v28, %v846_v61  ;;  %v965_v6 = vmul.f32 %v1543_v42, %v964_v62  ;;  %v618_v59 = vmul.f32 %v1966_v0, %v1927_v30  ;;  %v974_v10 = vor.u32 1.1754944e-38, %v973_v45  ;;  %vm969_vm15 = vmor %vm967_vm12, %vm968_vm14 }
  0xd9   : > { %v855_v9 = vsel %vm1958_vm10, %v854_v58, %v850_v5  ;;  %1550 = vrcp.f32 %v1964_v63  ;;  %v1989_v11 = vadd.f32 %v1728_v24, %v406_v38  ;;  %v1993_v17 = vadd.f32 %v1728_v24, %v426_v4  ;;  %v429_v38 = vpop.f32.mrf.mxu2 }
  0xda   : > { %v1084_v14 = vmul.f32 %v855_v9, %v1761_v49  ;;  %v966_v53 = vadd.f32 %v1543_v42, %v965_v6  ;;  %v619_v15 = vsub.f32 1.0, %v618_v59  ;;  %v1091_v19 = vmul.f32 %v960_v39, %v1742_v34  ;;  %v391_v59 = vpop.f32.mrf.mxu0 }
  0xdb   : > { %v1549_v18 = vpop.eup %1548  ;;  %v626_v20 = vand.u32 2147483647, %v1927_v30  ;;  %v1350_v27 = vmul.f32 -1.442695, %v1977_v1  ;;  %v1327_v16 = vmul.f32 -1.442695, %v1980_v2  ;;  %v2013_v35 = vadd.f32 %v1728_v24, %v446_v21 }
  0xdc   : > { %v1425_v49 = vpack.c.bf16 %v1084_v14, %v1933_v36  ;;  %v970_v22 = vsel %vm969_vm15, %v1543_v42, %v966_v53  ;;  %v620_v23 = vmul.f32 %v1966_v0, %v619_v15  ;;  %v628_v28 = vand.u32 2147483648, %v1927_v30  ;;  %v409_v40 = vpop.f32.mrf.mxu1 }
  0xdd   : > { %v975_v34 = vsel %vm1972_vm13, %v974_v10, %v970_v22  ;;  %v2006_v26 = vadd.f32 1.0, %v1549_v18  ;;  %1552 = vpow2.f32 %v1350_v27  ;;  %v1335_v3 = vmul.f32 -1.442695, %v1989_v11 }
  0xde   : > { %1469 = vst [vmem:[%s1950_s13 + $0x40] sm:$0xff] %v1425_v49   ;;  %v1092_v31 = vmul.f32 %v975_v34, %v1764_v51  ;;  %1554 = vpow2.f32 %v1327_v16  ;;  %v1343_v32 = vmul.f32 -1.442695, %v1993_v17  ;;  %v621_v12 = vadd.f32 %v1966_v0, %v620_v23 }
  0xdf   : > { %v2015_v36 = vpop.eup %1550  ;;  %vm622_vm0 = vweird.f32 %v1927_v30  ;;  %vm623_vm1 = vweird.f32 %v1966_v0  ;;  %1556 = vrcp.f32 %v2006_v26  ;;  %vm2023_vm2 = vcmp.eq.f32.partialorder %v626_v20, 8.507059e+37 }
  0xe0   : > { %v1445_v29 = vpack.c.bf16 %v1092_v31, %v1091_v19  ;;  %v738_v51 = vmul.f32 %v2015_v36, %v1964_v63  ;;  %v746_v39 = vand.u32 2147483647, %v1964_v63  ;;  %1558 = vpow2.f32 %v1335_v3  ;;  %vm2029_vm3 = vmor %vm622_vm0, %vm623_vm1 }
  0xe1   : > { %v629_v30 = vor.u32 1.1754944e-38, %v628_v28  ;;  %1560 = vpow2.f32 %v1343_v32  ;;  %v1351_v42 = vmul.f32 -1.442695, %v2013_v35  ;;  %v625_v43 = vsel %vm2029_vm3, %v1966_v0, %v621_v12  ;;  %v449_v0 = vpop.f32.mrf.mxu3 }
  0xe2   : > { %1473 = vst [vmem:[%s1950_s13 + $0x60] sm:$0xff] %v1445_v29   ;;  %v739_v33 = vsub.f32 1.0, %v738_v51  ;;  %v748_v44 = vand.u32 2147483648, %v1964_v63  ;;  %v866_v47 = vand.u32 2147483647, %v2006_v26  ;;  %v2040_v37 = vadd.f32 %v1728_v24, %v389_v55  ;;  %v394_v10 = vpop.f32.mrf.mxu0 }
  0xe3   : > { %v1553_v13 = vpop.eup %1552  ;;  %v868_v52 = vand.u32 2147483648, %v2006_v26  ;;  %1562 = vpow2.f32 %v1351_v42  ;;  %vm742_vm4 = vweird.f32 %v1964_v63  ;;  %vm743_vm5 = vweird.f32 %v2015_v36 }
  0xe4   : > { %v1555_v48 = vpop.eup %1554  ;;  %v740_v50 = vmul.f32 %v2015_v36, %v739_v33  ;;  %v2044_v54 = vadd.f32 1.0, %v1553_v13  ;;  %vm2048_vm6 = vcmp.eq.f32.partialorder %v746_v39, 8.507059e+37  ;;  %v630_v60 = vsel %vm2023_vm2, %v629_v30, %v625_v43  ;;  %vm2068_vm7 = vmor %vm742_vm4, %vm743_vm5  ;;  %v411_v28 = vpop.f32.mrf.mxu1 }
  0xe5   : > { %v1557_v56 = vpop.eup %1556  ;;  %v2052_v45 = vadd.f32 1.0, %v1555_v48  ;;  %v749_v4 = vor.u32 1.1754944e-38, %v748_v44  ;;  %v1328_v5 = vmul.f32 -1.442695, %v2040_v37  ;;  %v2062_v6 = vadd.f32 %v1728_v24, %v409_v40 }
  0xe6   : > { %v741_v61 = vadd.f32 %v2015_v36, %v740_v50  ;;  %v858_v62 = vmul.f32 %v1557_v56, %v2006_v26  ;;  %1564 = vrcp.f32 %v2044_v54  ;;  %v1559_v57 = vpop.eup %1558  ;;  %vm862_vm8 = vweird.f32 %v2006_v26 }
  0xe7   : > { %1566 = vrcp.f32 %v2052_v45  ;;  %v1561_v9 = vpop.eup %1560  ;;  %vm2073_vm9 = vcmp.eq.f32.partialorder %v866_v47, 8.507059e+37  ;;  %v869_v15 = vor.u32 1.1754944e-38, %v868_v52  ;;  %v2078_v18 = vmul.f32 %v630_v60, %v1789_v7 }
  0xe8   : > { %v859_v14 = vsub.f32 1.0, %v858_v62  ;;  %v745_v19 = vsel %vm2068_vm7, %v2015_v36, %v741_v61  ;;  %v2084_v63 = vadd.f32 %v1728_v24, %v429_v38  ;;  %v2087_v20 = vadd.f32 %v1728_v24, %v449_v0 }
  0xe9   : > { %v1563_v27 = vpop.eup %1562  ;;  %vm863_vm10 = vweird.f32 %v1557_v56  ;;  %v2089_v21 = vadd.f32 1.0, %v1559_v57  ;;  %v2092_v49 = vadd.f32 %v1728_v24, %v391_v59  ;;  %v988_v7 = vand.u32 2147483648, %v2044_v54 }
  0xea   : > { %v860_v16 = vmul.f32 %v1557_v56, %v859_v14  ;;  %v2095_v22 = vadd.f32 1.0, %v1561_v9  ;;  %1568 = vpow2.f32 %v1328_v5  ;;  %v1336_v23 = vmul.f32 -1.442695, %v2062_v6  ;;  %vm864_vm11 = vmor %vm862_vm8, %vm863_vm10 }
  0xeb   : > { %v750_v3 = vsel %vm2048_vm6, %v749_v4, %v745_v19  ;;  %v641_v31 = vand.u32 2147483647, %v2052_v45  ;;  %1570 = vrcp.f32 %v2089_v21  ;;  %v643_v12 = vand.u32 2147483648, %v2052_v45 }
  0xec   : > { %v2098_v34 = vpop.eup %1564  ;;  %v861_v55 = vadd.f32 %v1557_v56, %v860_v16  ;;  %1572 = vrcp.f32 %v2095_v22  ;;  %v2110_v29 = vadd.f32 1.0, %v1563_v27  ;;  %v986_v25 = vand.u32 2147483647, %v2044_v54 }
  0xed   : > { %v1567_v32 = vpop.eup %1566  ;;  %v978_v36 = vmul.f32 %v2098_v34, %v2044_v54  ;;  %v2115_v40 = vadd.f32 %v1728_v24, %v411_v28  ;;  %vm637_vm12 = vweird.f32 %v2052_v45  ;;  %v761_v26 = vand.u32 2147483647, %v2089_v21 }
  0xee   : > { %v865_v51 = vsel %vm864_vm11, %v1557_v56, %v861_v55  ;;  %v633_v39 = vmul.f32 %v1567_v32, %v2052_v45  ;;  %v763_v30 = vand.u32 2147483648, %v2089_v21  ;;  %v2121_v33 = vmul.f32 %v750_v3, %v1792_v8 }
  0xef   : > { %v979_v41 = vsub.f32 1.0, %v978_v36  ;;  %v870_v42 = vsel %vm2073_vm9, %v869_v15, %v865_v51  ;;  %vm982_vm13 = vweird.f32 %v2044_v54  ;;  %v2126_v13 = vor.u32 1.1754944e-38, %v988_v7 }
  0xf0   : > { %v634_v43 = vsub.f32 1.0, %v633_v39  ;;  %v1569_v44 = vpop.eup %1568  ;;  %vm2128_vm14 = vcmp.eq.f32.partialorder %v641_v31, 8.507059e+37  ;;  %v644_v48 = vor.u32 1.1754944e-38, %v643_v12  ;;  %vm757_vm15 = vweird.f32 %v2089_v21 }
  0xf1   : > { %1574 = vrcp.f32 %v2110_v29  ;;  %v1571_v8 = vpop.eup %1570  ;;  %v980_v50 = vmul.f32 %v2098_v34, %v979_v41  ;;  %vm983_vm0 = vweird.f32 %v2098_v34  ;;  %vm638_vm1 = vweird.f32 %v1567_v32 }
  0xf2   : > { %v635_v52 = vmul.f32 %v1567_v32, %v634_v43  ;;  %v1573_v56 = vpop.eup %1572  ;;  %v2137_v58 = vmul.f32 %v870_v42, %v1851_v46  ;;  %v753_v60 = vmul.f32 %v1571_v8, %v2089_v21  ;;  %vm2140_vm2 = vcmp.eq.f32.partialorder %v761_v26, 8.507059e+37  ;;  %vm639_vm4 = vmor %vm637_vm12, %vm638_vm1 }
  0xf3   : > { %v764_v62 = vor.u32 1.1754944e-38, %v763_v30  ;;  %vm877_vm3 = vweird.f32 %v2095_v22  ;;  %v873_v0 = vmul.f32 %v1573_v56, %v2095_v22  ;;  %v881_v57 = vand.u32 2147483647, %v2095_v22  ;;  %vm2168_vm8 = vmor %vm982_vm13, %vm983_vm0 }
  0xf4   : > { %v636_v38 = vadd.f32 %v1567_v32, %v635_v52  ;;  %v883_v4 = vand.u32 2147483648, %v2095_v22  ;;  %v754_v46 = vsub.f32 1.0, %v753_v60  ;;  %v1001_v5 = vand.u32 2147483647, %v2110_v29 }
  0xf5   : > { %v2151_v59 = vadd.f32 1.0, %v1569_v44  ;;  %1576 = vpow2.f32 %v1336_v23  ;;  %v981_v9 = vadd.f32 %v2098_v34, %v980_v50  ;;  %vm2154_vm5 = vcmp.eq.f32.partialorder %v986_v25, 8.507059e+37 }
  0xf6   : > { %v640_v14 = vsel %vm639_vm4, %v1567_v32, %v636_v38  ;;  %v874_v53 = vsub.f32 1.0, %v873_v0  ;;  %v1344_v15 = vmul.f32 -1.442695, %v2084_v63  ;;  %v755_v27 = vmul.f32 %v1571_v8, %v754_v46 }
  0xf7   : > { %v1575_v19 = vpop.eup %1574  ;;  %v645_v45 = vsel %vm2128_vm14, %v644_v48, %v640_v14  ;;  %vm758_vm6 = vweird.f32 %v1571_v8  ;;  %1578 = vrcp.f32 %v2151_v59  ;;  %vm878_vm7 = vweird.f32 %v1573_v56 }
  0xf8   : > { %v1070_v16 = vmul.f32 %v645_v45, %v1980_v2  ;;  %v875_v7 = vmul.f32 %v1573_v56, %v874_v53  ;;  %v993_v23 = vmul.f32 %v1575_v19, %v2110_v29  ;;  %v756_v3 = vadd.f32 %v1571_v8, %v755_v27  ;;  %vm759_vm10 = vmor %vm757_vm15, %vm758_vm6 }
  0xf9   : > { %vm2172_vm9 = vcmp.eq.f32.partialorder %v881_v57, 8.507059e+37  ;;  %v884_v31 = vor.u32 1.1754944e-38, %v883_v4  ;;  %v1003_v2 = vand.u32 2147483648, %v2110_v29  ;;  %1580 = vpow2.f32 %v1344_v15  ;;  %vm879_vm11 = vmor %vm877_vm3, %vm878_vm7 }
  0xfa   : > { %v1390_v32 = vpack.c.bf16 %v1070_v16, %v2078_v18  ;;  %v876_v36 = vadd.f32 %v1573_v56, %v875_v7  ;;  %v994_v54 = vsub.f32 1.0, %v993_v23  ;;  %v985_v51 = vsel %vm2168_vm8, %v2098_v34, %v981_v9 }
  0xfb   : > { %v1577_v12 = vpop.eup %1576  ;;  %v760_v25 = vsel %vm759_vm10, %v1571_v8, %v756_v3  ;;  %vm998_vm12 = vweird.f32 %v1575_v19  ;;  %v1352_v39 = vmul.f32 -1.442695, %v2087_v20  ;;  %v1329_v22 = vmul.f32 -1.442695, %v2092_v49 }
  0xfc   : > { %1462 = vst [vmem:[%s1950_s13 + $0x8] sm:$0xff] %v1390_v32   ;;  %v765_v18 = vsel %vm2140_vm2, %v764_v62, %v760_v25  ;;  %v880_v21 = vsel %vm879_vm11, %v1573_v56, %v876_v36  ;;  %v995_v41 = vmul.f32 %v1575_v19, %v994_v54  ;;  %v2190_v26 = vadd.f32 1.0, %v1577_v12  ;;  %v431_v62 = vpop.f32.mrf.mxu2  ;;  %v414_v12 = vpop.f32.mrf.mxu1 }
  0xfd   : > { %v2192_v30 = vpop.eup %1578  ;;  %v1078_v34 = vmul.f32 %v765_v18, %v1989_v11  ;;  %v885_v42 = vsel %vm2172_vm9, %v884_v31, %v880_v21  ;;  %1582 = vpow2.f32 %v1352_v39  ;;  %vm997_vm13 = vweird.f32 %v2110_v29 }
  0xfe   : > { %v1086_v43 = vmul.f32 %v885_v42, %v1993_v17  ;;  %v996_v44 = vadd.f32 %v1575_v19, %v995_v41  ;;  %v648_v47 = vmul.f32 %v2192_v30, %v2151_v59  ;;  %v990_v11 = vsel %vm2154_vm5, %v2126_v13, %v985_v51  ;;  %vm999_vm14 = vmor %vm997_vm13, %vm998_vm12 }
  0xff   : > { %v1410_v48 = vpack.c.bf16 %v1078_v34, %v2121_v33  ;;  %v1004_v8 = vor.u32 1.1754944e-38, %v1003_v2  ;;  %1584 = vrcp.f32 %v2190_v26  ;;  %v1581_v50 = vpop.eup %1580  ;;  %vm1002_vm15 = vcmp.eq.f32.partialorder %v1001_v5, 8.507059e+37 }
 0x100   : > { %v1430_v17 = vpack.c.bf16 %v1086_v43, %v2137_v58  ;;  %v1000_v52 = vsel %vm999_vm14, %v1575_v19, %v996_v44  ;;  %v649_v29 = vsub.f32 1.0, %v648_v47  ;;  %v2210_v60 = vadd.f32 1.0, %v1581_v50 }
 0x101   : > { %1466 = vst [vmem:[%s1950_s13 + $0x28] sm:$0xff] %v1410_v48   ;;  %v1005_v56 = vsel %vm1002_vm15, %v1004_v8, %v1000_v52  ;;  %1586 = vpow2.f32 %v1329_v22  ;;  %v1093_v13 = vmul.f32 %v990_v11, %v1977_v1  ;;  %v1337_v61 = vmul.f32 -1.442695, %v2115_v40  ;;  %v451_v1 = vpop.f32.mrf.mxu3 }
 0x102   : > { %1470 = vst [vmem:[%s1950_s13 + $0x48] sm:$0xff] %v1430_v17   ;;  %v1094_v33 = vmul.f32 %v1005_v56, %v2013_v35  ;;  %v650_v58 = vmul.f32 %v2192_v30, %v649_v29  ;;  %v2223_v46 = vadd.f32 %v1728_v24, %v431_v62  ;;  %vm652_vm0 = vweird.f32 %v2151_v59 }
 0x103   : > { %v1583_v38 = vpop.eup %1582  ;;  %1588 = vpow2.f32 %v1337_v61  ;;  %vm653_vm1 = vweird.f32 %v2192_v30  ;;  %v2235_v19 = vadd.f32 %v1728_v24, %v451_v1  ;;  %v656_v45 = vand.u32 2147483647, %v2151_v59 }
 0x104   : > { %v1450_v0 = vpack.c.bf16 %v1094_v33, %v1093_v13  ;;  %1590 = vrcp.f32 %v2210_v60  ;;  %v2220_v4 = vadd.f32 1.0, %v1583_v38  ;;  %v651_v9 = vadd.f32 %v2192_v30, %v650_v58  ;;  %vm2249_vm2 = vmor %vm652_vm0, %vm653_vm1 }
 0x105   : > { %v2217_v57 = vpop.eup %1584  ;;  %v1345_v15 = vmul.f32 -1.442695, %v2223_v46  ;;  %v658_v27 = vand.u32 2147483648, %v2151_v59  ;;  %v776_v7 = vand.u32 2147483647, %v2190_v26  ;;  %v2243_v23 = vadd.f32 %v1728_v24, %v394_v10 }
 0x106   : > { %1474 = vst [vmem:[%s1950_s13 + $0x68] sm:$0xff] %v1450_v0   ;;  %v768_v35 = vmul.f32 %v2217_v57, %v2190_v26  ;;  %1592 = vrcp.f32 %v2220_v4  ;;  %v778_v55 = vand.u32 2147483648, %v2190_v26  ;;  %v655_v2 = vsel %vm2249_vm2, %v2192_v30, %v651_v9  ;;  %v434_v0 = vpop.f32.mrf.mxu2 }
 0x107   : > { %v1587_v5 = vpop.eup %1586  ;;  %v1353_v36 = vmul.f32 -1.442695, %v2235_v19  ;;  %vm657_vm3 = vcmp.eq.f32.partialorder %v656_v45, 8.507059e+37  ;;  %v659_v54 = vor.u32 1.1754944e-38, %v658_v27  ;;  %vm772_vm4 = vweird.f32 %v2190_v26 }
 0x108   : > { %v769_v14 = vsub.f32 1.0, %v768_v35  ;;  %v2231_v53 = vadd.f32 1.0, %v1587_v5  ;;  %v898_v59 = vand.u32 2147483648, %v2210_v60  ;;  %vm2263_vm5 = vcmp.eq.f32.partialorder %v776_v7, 8.507059e+37 }
 0x109   : > { %v1589_v16 = vpop.eup %1588  ;;  %v1330_v39 = vmul.f32 -1.442695, %v2243_v23  ;;  %v660_v21 = vsel %vm657_vm3, %v659_v54, %v655_v2  ;;  %vm773_vm6 = vweird.f32 %v2217_v57  ;;  %v779_v41 = vor.u32 1.1754944e-38, %v778_v55  ;;  %v454_v1 = vpop.f32.mrf.mxu3 }
 0x10a   : > { %1594 = vrcp.f32 %v2231_v53  ;;  %v2245_v28 = vpop.eup %1590  ;;  %v2254_v31 = vadd.f32 1.0, %v1589_v16  ;;  %v770_v32 = vmul.f32 %v2217_v57, %v769_v14  ;;  %v896_v30 = vand.u32 2147483647, %v2210_v60  ;;  %vm2295_vm7 = vmor %vm772_vm4, %vm773_vm6 }
 0x10b   : > { %1596 = vpow2.f32 %v1345_v15  ;;  %v888_v25 = vmul.f32 %v2245_v28, %v2210_v60  ;;  %v671_v22 = vand.u32 2147483647, %v2231_v53  ;;  %v2278_v43 = vadd.f32 %v1728_v24, %v414_v12 }
 0x10c   : > { %1598 = vrcp.f32 %v2254_v31  ;;  %v2271_v18 = vpop.eup %1592  ;;  %v771_v42 = vadd.f32 %v2217_v57, %v770_v32  ;;  %v2280_v44 = vor.u32 1.1754944e-38, %v898_v59  ;;  %v1016_v47 = vand.u32 2147483647, %v2220_v4 }
 0x10d   : > { %1600 = vpow2.f32 %v1353_v36  ;;  %v673_v48 = vand.u32 2147483648, %v2231_v53  ;;  %v889_v50 = vsub.f32 1.0, %v888_v25  ;;  %v1008_v17 = vmul.f32 %v2271_v18, %v2220_v4 }
 0x10e   : > { %1602 = vpow2.f32 %v1330_v39  ;;  %v1338_v52 = vmul.f32 -1.442695, %v2278_v43  ;;  %v2289_v29 = vmul.f32 %v660_v21, %v2040_v37  ;;  %v1018_v13 = vand.u32 2147483648, %v2220_v4 }
 0x10f   : > { %v775_v38 = vsel %vm2295_vm7, %v2217_v57, %v771_v42  ;;  %vm892_vm8 = vweird.f32 %v2210_v60  ;;  %vm893_vm9 = vweird.f32 %v2245_v28  ;;  %vm667_vm10 = vweird.f32 %v2231_v53 }
 0x110   : > { %v1595_v34 = vpop.eup %1594  ;;  %vm2308_vm11 = vcmp.eq.f32.partialorder %v671_v22, 8.507059e+37  ;;  %1604 = vpow2.f32 %v1338_v52  ;;  %v890_v57 = vmul.f32 %v2245_v28, %v889_v50  ;;  %v1009_v5 = vsub.f32 1.0, %v1008_v17  ;;  %v396_v22 = vpop.f32.mrf.mxu0 }
 0x111   : > { %v663_v11 = vmul.f32 %v1595_v34, %v2231_v53  ;;  %v1597_v8 = vpop.eup %1596  ;;  %vm668_vm12 = vweird.f32 %v1595_v34  ;;  %vm1013_vm13 = vweird.f32 %v2271_v18  ;;  %v674_v9 = vor.u32 1.1754944e-38, %v673_v48 }
 0x112   : > { %v2300_v61 = vadd.f32 1.0, %v1597_v8  ;;  %v1599_v62 = vpop.eup %1598  ;;  %v780_v10 = vsel %vm2263_vm5, %v779_v41, %v775_v38  ;;  %v791_v45 = vand.u32 2147483647, %v2254_v31  ;;  %vm1012_vm14 = vweird.f32 %v2220_v4  ;;  %vm669_vm15 = vmor %vm667_vm10, %vm668_vm12 }
 0x113   : > { %v664_v33 = vsub.f32 1.0, %v663_v11  ;;  %v783_v58 = vmul.f32 %v1599_v62, %v2254_v31  ;;  %v1601_v35 = vpop.eup %1600  ;;  %v793_v16 = vand.u32 2147483648, %v2254_v31  ;;  %v2327_v3 = vadd.f32 %v1728_v24, %v434_v0  ;;  %vm2352_vm5 = vmor %vm892_vm8, %vm893_vm9  ;;  %v416_v11 = vpop.f32.mrf.mxu1 }
 0x114   : > { %1606 = vrcp.f32 %v2300_v61  ;;  %v1603_v27 = vpop.eup %1602  ;;  %v2324_v7 = vadd.f32 1.0, %v1601_v35  ;;  %v2330_v55 = vadd.f32 %v1728_v24, %v454_v1  ;;  %vm2332_vm0 = vcmp.eq.f32.partialorder %v896_v30, 8.507059e+37  ;;  %vm2386_vm8 = vmor %vm1012_vm14, %vm1013_vm13 }
 0x115   : > { %v665_v26 = vmul.f32 %v1595_v34, %v664_v33  ;;  %v784_v15 = vsub.f32 1.0, %v783_v58  ;;  %vm788_vm1 = vweird.f32 %v1599_v62  ;;  %v2336_v54 = vadd.f32 1.0, %v1603_v27 }
 0x116   : > { %v891_v53 = vadd.f32 %v2245_v28, %v890_v57  ;;  %v1010_v59 = vmul.f32 %v2271_v18, %v1009_v5  ;;  %1608 = vrcp.f32 %v2324_v7  ;;  %v1605_v24 = vpop.eup %1604  ;;  %v1079_v51 = vmul.f32 %v780_v10, %v2062_v6 }
 0x117   : > { %v666_v14 = vadd.f32 %v1595_v34, %v665_v26  ;;  %v785_v36 = vmul.f32 %v1599_v62, %v784_v15  ;;  %vm787_vm2 = vweird.f32 %v2254_v31  ;;  %vm792_vm4 = vcmp.eq.f32.partialorder %v791_v45, 8.507059e+37 }
 0x118   : > { %vm789_vm3 = vmor %vm787_vm2, %vm788_vm1  ;;  %v794_v41 = vor.u32 1.1754944e-38, %v793_v16  ;;  %1610 = vrcp.f32 %v2336_v54  ;;  %v1346_v30 = vmul.f32 -1.442695, %v2327_v3  ;;  %v1354_v42 = vmul.f32 -1.442695, %v2330_v55 }
 0x119   : > { %v670_v32 = vsel %vm669_vm15, %v1595_v34, %v666_v14  ;;  %v786_v39 = vadd.f32 %v1599_v62, %v785_v36  ;;  %v895_v48 = vsel %vm2352_vm5, %v2245_v28, %v891_v53  ;;  %v1011_v8 = vadd.f32 %v2271_v18, %v1010_v59 }
 0x11a   : > { %v675_v12 = vsel %vm2308_vm11, %v674_v9, %v670_v32  ;;  %v1607_v21 = vpop.eup %1606  ;;  %v911_v50 = vand.u32 2147483647, %v2300_v61  ;;  %vm2366_vm6 = vcmp.eq.f32.partialorder %v1016_v47, 8.507059e+37  ;;  %v913_v56 = vand.u32 2147483648, %v2300_v61 }
 0x11b   : > { %v1072_v25 = vmul.f32 %v675_v12, %v2092_v49  ;;  %v790_v31 = vsel %vm789_vm3, %v1599_v62, %v786_v39  ;;  %v903_v34 = vmul.f32 %v1607_v21, %v2300_v61  ;;  %v2373_v33 = vadd.f32 1.0, %v1605_v24  ;;  %v1638_v62 = vld [vmem:[%s2556_s2] ss:$0 sm:$0xff]  ;;  %v436_v39 = vpop.f32.mrf.mxu2 }
 0x11c   : > { %v795_v60 = vsel %vm792_vm4, %v794_v41, %v790_v31  ;;  %v1609_v28 = vpop.eup %1608  ;;  %vm908_vm7 = vweird.f32 %v1607_v21  ;;  %1612 = vpow2.f32 %v1346_v30  ;;  %v2378_v47 = vadd.f32 %v1638_v62, %v396_v22 }
 0x11d   : > { %v1395_v49 = vpack.c.bf16 %v1072_v25, %v2289_v29  ;;  %v1080_v52 = vmul.f32 %v795_v60, %v2115_v40  ;;  %v904_v29 = vsub.f32 1.0, %v903_v34  ;;  %v2380_v38 = vadd.f32 %v1638_v62, %v416_v11 }
 0x11e   : > { %v1023_v58 = vmul.f32 %v1609_v28, %v2324_v7  ;;  %1614 = vpow2.f32 %v1354_v42  ;;  %v2391_v0 = vpop.eup %1610  ;;  %v900_v1 = vsel %vm2332_vm0, %v2280_v44, %v895_v48  ;;  %v1015_v35 = vsel %vm2386_vm8, %v2271_v18, %v1011_v8 }
 0x11f   : > { %1463 = vst [vmem:[%s1950_s13 + $0x10] sm:$0xff] %v1395_v49   ;;  %v1415_v37 = vpack.c.bf16 %v1080_v52, %v1079_v51  ;;  %v905_v26 = vmul.f32 %v1607_v21, %v904_v29  ;;  %vm907_vm9 = vweird.f32 %v2300_v61  ;;  %1616 = vrcp.f32 %v2373_v33 }
 0x120   : > { %vm912_vm10 = vcmp.eq.f32.partialorder %v911_v50, 8.507059e+37  ;;  %v1024_v5 = vsub.f32 1.0, %v1023_v58  ;;  %v1031_v9 = vand.u32 2147483647, %v2324_v7  ;;  %vm909_vm11 = vmor %vm907_vm9, %vm908_vm7  ;;  %v914_v10 = vor.u32 1.1754944e-38, %v913_v56 }
 0x121   : > { %1467 = vst [vmem:[%s1950_s13 + $0x30] sm:$0xff] %v1415_v37   ;;  %v906_v57 = vadd.f32 %v1607_v21, %v905_v26  ;;  %v1033_v14 = vand.u32 2147483648, %v2324_v7  ;;  %v1331_v44 = vmul.f32 -1.442695, %v2378_v47  ;;  %v1339_v15 = vmul.f32 -1.442695, %v2380_v38 }
 0x122   : > { %v1025_v45 = vmul.f32 %v1609_v28, %v1024_v5  ;;  %vm1028_vm12 = vweird.f32 %v1609_v28  ;;  %v678_v61 = vmul.f32 %v2391_v0, %v2336_v54  ;;  %v1613_v27 = vpop.eup %1612  ;;  %v1087_v16 = vmul.f32 %v900_v1, %v2084_v63 }
 0x123   : > { %v910_v18 = vsel %vm909_vm11, %v1607_v21, %v906_v57  ;;  %v1019_v2 = vor.u32 1.1754944e-38, %v1018_v13  ;;  %1618 = vpow2.f32 %v1331_v44  ;;  %vm1027_vm13 = vweird.f32 %v2324_v7 }
 0x124   : > { %v915_v32 = vsel %vm912_vm10, %v914_v10, %v910_v18  ;;  %v1615_v36 = vpop.eup %1614  ;;  %v1026_v59 = vadd.f32 %v1609_v28, %v1025_v45  ;;  %1620 = vpow2.f32 %v1339_v15  ;;  %vm1029_vm14 = vmor %vm1027_vm13, %vm1028_vm12  ;;  %vm1032_vm15 = vcmp.eq.f32.partialorder %v1031_v9, 8.507059e+37 }
 0x125   : > { %v1088_v53 = vmul.f32 %v915_v32, %v2223_v46  ;;  %v2414_v12 = vpop.eup %1616  ;;  %v1020_v24 = vsel %vm2366_vm6, %v1019_v2, %v1015_v35  ;;  %v1034_v63 = vor.u32 1.1754944e-38, %v1033_v14  ;;  %v679_v51 = vsub.f32 1.0, %v678_v61  ;;  %v456_v46 = vpop.f32.mrf.mxu3 }
 0x126   : > { %v1030_v13 = vsel %vm1029_vm14, %v1609_v28, %v1026_v59  ;;  %v2418_v25 = vadd.f32 1.0, %v1613_v27  ;;  %v798_v7 = vmul.f32 %v2414_v12, %v2373_v33  ;;  %v1095_v41 = vmul.f32 %v1020_v24, %v2087_v20 }
 0x127   : > { %v1435_v4 = vpack.c.bf16 %v1088_v53, %v1087_v16  ;;  %v1035_v21 = vsel %vm1032_vm15, %v1034_v63, %v1030_v13  ;;  %v2425_v6 = vadd.f32 1.0, %v1615_v36  ;;  %v2427_v31 = vadd.f32 %v1638_v62, %v436_v39 }
 0x128   : > { %v1096_v30 = vmul.f32 %v1035_v21, %v2235_v19  ;;  %v2429_v34 = vadd.f32 %v1638_v62, %v456_v46  ;;  %v680_v11 = vmul.f32 %v2391_v0, %v679_v51  ;;  %1622 = vrcp.f32 %v2418_v25 }
 0x129   : > { %1471 = vst [vmem:[%s1950_s13 + $0x50] sm:$0xff] %v1435_v4   ;;  %v1619_v49 = vpop.eup %1618  ;;  %v799_v8 = vsub.f32 1.0, %v798_v7  ;;  %1624 = vrcp.f32 %v2425_v6  ;;  %vm682_vm0 = vweird.f32 %v2336_v54  ;;  %v688_v19 = vand.u32 2147483648, %v2336_v54 }
 0x12a   : > { %v1621_v42 = vpop.eup %1620  ;;  %v1455_v22 = vpack.c.bf16 %v1096_v30, %v1095_v41  ;;  %v2433_v48 = vadd.f32 1.0, %v1619_v49  ;;  %v1347_v60 = vmul.f32 -1.442695, %v2427_v31  ;;  %v681_v50 = vadd.f32 %v2391_v0, %v680_v11 }
 0x12b   : > { %v2435_v20 = vadd.f32 1.0, %v1621_v42  ;;  %vm683_vm1 = vweird.f32 %v2391_v0  ;;  %v1355_v17 = vmul.f32 -1.442695, %v2429_v34  ;;  %v800_v52 = vmul.f32 %v2414_v12, %v799_v8 }
 0x12c   : > { %1475 = vst [vmem:[%s1950_s13 + $0x70] sm:$0xff] %v1455_v22   ;;  %1626 = vrcp.f32 %v2433_v48  ;;  %v686_v56 = vand.u32 2147483647, %v2336_v54  ;;  %vm2451_vm2 = vmor %vm682_vm0, %vm683_vm1  ;;  %v806_v62 = vand.u32 2147483647, %v2373_v33  ;;  %v808_v40 = vand.u32 2147483648, %v2373_v33 }
 0x12d   : > { %1628 = vrcp.f32 %v2435_v20  ;;  %v685_v26 = vsel %vm2451_vm2, %v2391_v0, %v681_v50  ;;  %v689_v58 = vor.u32 1.1754944e-38, %v688_v19  ;;  %v801_v54 = vadd.f32 %v2414_v12, %v800_v52 }
 0x12e   : > { %v2448_v29 = vpop.eup %1622  ;;  %1630 = vpow2.f32 %v1347_v60  ;;  %vm802_vm3 = vweird.f32 %v2373_v33  ;;  %vm803_vm4 = vweird.f32 %v2414_v12  ;;  %vm687_vm5 = vcmp.eq.f32.partialorder %v686_v56, 8.507059e+37 }
 0x12f   : > { %v2457_v37 = vpop.eup %1624  ;;  %1632 = vpow2.f32 %v1355_v17  ;;  %v918_v35 = vmul.f32 %v2448_v29, %v2418_v25  ;;  %v690_v9 = vsel %vm687_vm5, %v689_v58, %v685_v26  ;;  %vm2468_vm6 = vcmp.eq.f32.partialorder %v806_v62, 8.507059e+37  ;;  %vm2473_vm7 = vmor %vm802_vm3, %vm803_vm4 }
 0x130   : > { %v809_v0 = vor.u32 1.1754944e-38, %v808_v40  ;;  %v1038_v33 = vmul.f32 %v2457_v37, %v2425_v6  ;;  %vm697_vm8 = vweird.f32 %v2433_v48  ;;  %v701_v18 = vand.u32 2147483647, %v2433_v48 }
 0x131   : > { %v805_v61 = vsel %vm2473_vm7, %v2414_v12, %v801_v54  ;;  %v919_v27 = vsub.f32 1.0, %v918_v35  ;;  %v703_v16 = vand.u32 2147483648, %v2433_v48  ;;  %v823_v53 = vand.u32 2147483648, %v2435_v20 }
 0x132   : > { %v1627_v1 = vpop.eup %1626  ;;  %v821_v63 = vand.u32 2147483647, %v2435_v20  ;;  %v1039_v13 = vsub.f32 1.0, %v1038_v33  ;;  %vm817_vm11 = vweird.f32 %v2435_v20  ;;  %v810_v12 = vsel %vm2468_vm6, %v809_v0, %v805_v61 }
 0x133   : > { %v1629_v57 = vpop.eup %1628  ;;  %v693_v5 = vmul.f32 %v1627_v1, %v2433_v48  ;;  %vm698_vm9 = vweird.f32 %v1627_v1  ;;  %v704_v39 = vor.u32 1.1754944e-38, %v703_v16  ;;  %v920_v21 = vmul.f32 %v2448_v29, %v919_v27 }
 0x134   : > { %v813_v14 = vmul.f32 %v1629_v57, %v2435_v20  ;;  %v1631_v45 = vpop.eup %1630  ;;  %vm818_vm10 = vweird.f32 %v1629_v57  ;;  %vm699_vm12 = vmor %vm697_vm8, %vm698_vm9  ;;  %vm702_vm13 = vcmp.eq.f32.partialorder %v701_v18, 8.507059e+37  ;;  %v824_v41 = vor.u32 1.1754944e-38, %v823_v53 }
 0x135   : > { %v694_v15 = vsub.f32 1.0, %v693_v5  ;;  %v1633_v32 = vpop.eup %1632  ;;  %v2486_v59 = vadd.f32 1.0, %v1631_v45  ;;  %vm819_vm14 = vmor %vm817_vm11, %vm818_vm10  ;;  %v926_v30 = vand.u32 2147483647, %v2418_v25  ;;  %vm822_vm15 = vcmp.eq.f32.partialorder %v821_v63, 8.507059e+37 }
 0x136   : > { %v814_v2 = vsub.f32 1.0, %v813_v14  ;;  %v2489_v4 = vadd.f32 1.0, %v1633_v32  ;;  %v1073_v22 = vmul.f32 %v690_v9, %v2243_v23  ;;  %v1040_v11 = vmul.f32 %v2457_v37, %v1039_v13 }
 0x137   : > { %v695_v36 = vmul.f32 %v1627_v1, %v694_v15  ;;  %1634 = vrcp.f32 %v2486_v59  ;;  %v1081_v20 = vmul.f32 %v810_v12, %v2278_v43  ;;  %v928_v19 = vand.u32 2147483648, %v2418_v25 }
 0x138   : > { %v815_v24 = vmul.f32 %v1629_v57, %v814_v2  ;;  %1636 = vrcp.f32 %v2489_v4  ;;  %v921_v17 = vadd.f32 %v2448_v29, %v920_v21  ;;  %vm923_vm0 = vweird.f32 %v2448_v29 }
 0x139   : > { %v696_v51 = vadd.f32 %v1627_v1, %v695_v36  ;;  %vm922_vm1 = vweird.f32 %v2418_v25  ;;  %vm2511_vm2 = vcmp.eq.f32.partialorder %v926_v30, 8.507059e+37  ;;  %v1041_v43 = vadd.f32 %v2457_v37, %v1040_v11 }
 0x13a   : > { %v816_v46 = vadd.f32 %v1629_v57, %v815_v24  ;;  %vm1043_vm3 = vweird.f32 %v2457_v37  ;;  %vm2519_vm4 = vmor %vm922_vm1, %vm923_vm0  ;;  %v929_v40 = vor.u32 1.1754944e-38, %v928_v19  ;;  %v1046_v25 = vand.u32 2147483647, %v2425_v6 }
 0x13b   : > { %v700_v7 = vsel %vm699_vm12, %v1627_v1, %v696_v51  ;;  %v1048_v26 = vand.u32 2147483648, %v2425_v6  ;;  %v925_v1 = vsel %vm2519_vm4, %v2448_v29, %v921_v17  ;;  %vm1042_vm5 = vweird.f32 %v2425_v6 }
 0x13c   : > { %v705_v49 = vsel %vm702_vm13, %v704_v39, %v700_v7  ;;  %v820_v42 = vsel %vm819_vm14, %v1629_v57, %v816_v46  ;;  %v943_v54 = vand.u32 2147483648, %v2486_v59  ;;  %vm2531_vm6 = vmor %vm1042_vm5, %vm1043_vm3  ;;  %v941_v9 = vand.u32 2147483647, %v2486_v59 }
 0x13d   : > { %v1074_v48 = vmul.f32 %v705_v49, %v2378_v47  ;;  %v825_v8 = vsel %vm822_vm15, %v824_v41, %v820_v42  ;;  %v1635_v50 = vpop.eup %1634  ;;  %v1063_v10 = vand.u32 2147483648, %v2489_v4  ;;  %v1045_v0 = vsel %vm2531_vm6, %v2457_v37, %v1041_v43 }
 0x13e   : > { %v1082_v60 = vmul.f32 %v825_v8, %v2380_v38  ;;  %v1637_v23 = vpop.eup %1636  ;;  %v933_v47 = vmul.f32 %v1635_v50, %v2486_v59  ;;  %vm938_vm7 = vweird.f32 %v1635_v50  ;;  %v1061_v6 = vand.u32 2147483647, %v2489_v4 }
 0x13f   : > { %v1400_v52 = vpack.c.bf16 %v1074_v48, %v1073_v22  ;;  %v1053_v38 = vmul.f32 %v1637_v23, %v2489_v4  ;;  %vm1058_vm8 = vweird.f32 %v1637_v23  ;;  %vm1047_vm9 = vcmp.eq.f32.partialorder %v1046_v25, 8.507059e+37 }
 0x140   : > { %v1420_v56 = vpack.c.bf16 %v1082_v60, %v1081_v20  ;;  %v934_v58 = vsub.f32 1.0, %v933_v47  ;;  %v1049_v14 = vor.u32 1.1754944e-38, %v1048_v26  ;;  %vm937_vm10 = vweird.f32 %v2486_v59 }
 0x141   : > { %1464 = vst [vmem:[%s1950_s13 + $0x18] sm:$0xff] %v1400_v52   ;;  %v1054_v35 = vsub.f32 1.0, %v1053_v38  ;;  %v930_v33 = vsel %vm2511_vm2, %v929_v40, %v925_v1  ;;  %vm939_vm11 = vmor %vm937_vm10, %vm938_vm7  ;;  %v944_v15 = vor.u32 1.1754944e-38, %v943_v54  ;;  %vm1057_vm12 = vweird.f32 %v2489_v4 }
 0x142   : > { %1468 = vst [vmem:[%s1950_s13 + $0x38] sm:$0xff] %v1420_v56   ;;  %v935_v5 = vmul.f32 %v1635_v50, %v934_v58  ;;  %v1050_v45 = vsel %vm1047_vm9, %v1049_v14, %v1045_v0  ;;  %vm942_vm13 = vcmp.eq.f32.partialorder %v941_v9, 8.507059e+37  ;;  %vm1059_vm14 = vmor %vm1057_vm12, %vm1058_vm8  ;;  %v1064_v61 = vor.u32 1.1754944e-38, %v1063_v10 }
 0x143   : > { %v1055_v29 = vmul.f32 %v1637_v23, %v1054_v35  ;;  %vm1062_vm15 = vcmp.eq.f32.partialorder %v1061_v6, 8.507059e+37  ;;  %v1089_v2 = vmul.f32 %v930_v33, %v2327_v3  ;;  %v1097_v53 = vmul.f32 %v1050_v45, %v2330_v55 }
 0x144   : > { %v936_v44 = vadd.f32 %v1635_v50, %v935_v5 }
 0x145   : > { %v1056_v18 = vadd.f32 %v1637_v23, %v1055_v29 }
 0x146   : > { %v940_v37 = vsel %vm939_vm11, %v1635_v50, %v936_v44 }
 0x147   : > { %v945_v27 = vsel %vm942_vm13, %v944_v15, %v940_v37  ;;  %v1060_v16 = vsel %vm1059_vm14, %v1637_v23, %v1056_v18 }
 0x148   : > { %v1090_v32 = vmul.f32 %v945_v27, %v2427_v31  ;;  %v1065_v36 = vsel %vm1062_vm15, %v1064_v61, %v1060_v16 }
 0x149   : > { %v1098_v59 = vmul.f32 %v1065_v36, %v2429_v34 }
 0x14a   : > { %v1440_v24 = vpack.c.bf16 %v1090_v32, %v1089_v2 }
 0x14b   : > { %v1460_v63 = vpack.c.bf16 %v1098_v59, %v1097_v53 }
 0x14c   : > { %1472 = vst [vmem:[%s1950_s13 + $0x58] sm:$0xff] %v1440_v24  }
 0x14d   : > { %1476 = vst [vmem:[%s1950_s13 + $0x78] sm:$0xff] %v1460_v63  }
 0x14e PF: > { %s13_s12 = sadd.s32 1, %s1645_s12  }
 0x14f   : > { %p10_p4 = scmp.ge.s32.totalorder %s13_s12, 4  }
 0x151   :  { %12 = sbr.rel (!%p10_p4) target bundleno = 1 (0x1), region = 62 }

// kernel: simple_model_forward.9
= control target key start
LH: loop header
LB: loop body
LE: loop exit
PB: predicated region body
PF: predicated region fallthrough
CT: control target
= control target key end

     0   :  { %6 = vsyncpa [#allocation3], 0  ;;  %s589_s0 = inlined_call_operand.vmem [shape: bf16[2,256,128], index: 0, kind: input, shape index: {}]   ;;  %s590_s1 = inlined_call_operand.hbm [shape: f32[2,1,128], index: 1, kind: output, shape index: {}]  }
   0x1   :  { %8 = vsyncpa [#allocation3 + $0x1], 0  ;;  %s486_s6 = smov 0   ;;  %s488_s7 = smov 0  }
   0x2   :  { %s490_s8 = smov 0   ;;  %s492_s9 = smov 0  }
   0x3 LB: > { %s507_s10 = sadd.s32 4294967295, %s474_s9   ;;  %s285_s11 = sadd.s32 4294967294, %s474_s9   ;;  %s474_s9 = sphi %s492_s9, %s596_s9   ;;  %s470_s8 = sphi %s490_s8, %s595_s8   ;;  %s466_s7 = sphi %s488_s7, %s594_s7   ;;  %s462_s6 = sphi %s486_s6, %s593_s6  }
   0x4   : > { %s511_s12 = sadd.s32 1, %s474_s9   ;;  %s47_s13 = sadd.s32 1, %s470_s8 }
   0x5   : > { %s44_s14 = ssub.s32 %s474_s9, %s511_s12  ;;  %p57_p0 = scmp.ne.s32.totalorder %s470_s8, %s466_s7 }
   0x6   : > { %p45_p1 = scmp.eq.s32.totalorder %s44_s14, 0  ;;  %p58_p2 = scmp.eq.s32.totalorder %s507_s10, 1 }
   0x7   : > { %p63_p3 = scmp.ne.s32.totalorder %s466_s7, %s462_s6  ;;  %p64_p4 = scmp.eq.s32.totalorder %s285_s11, 1 }
   0x8   : > { %s522_s15 = scalar_select %p45_p1, %s470_s8, %s47_s13  }
   0x9   : > { %p524_p5 = por %p58_p2, %p57_p0  ;;  %p528_p6 = por %p64_p4, %p63_p3 }
   0xa   : > { %p288_p7 = scmp.ge.s32.totalorder %s474_s9, 1  ;;  %p90_p8 = scmp.lt.s32.totalorder %s474_s9, 3 }
   0xc   : > { %p91_p9 = pnand %p288_p7, %p90_p8 }
   0xd   : > { %p109_p10 = scmp.lt.s32.totalorder (!%p91_p9), %s507_s10, 1  ;;  %s107_s23 = sand.u32 (!%p91_p9), 1, %s466_s7  }
   0xe   : > { %94 = sbr.rel (%p91_p9) target bundleno = 105 (0x69), region = 24  ;;  %s226_s26 = scalar_lea.hbm (!%p91_p9), %s590_s1, %s507_s10 }
   0xf   : > { %s108_s27 = scalar_lea.vmem (!%p91_p9), [#allocation2], %s107_s23  ;;  %s230_s29 = sshll.u32 (!%p91_p9), %s226_s26, 4  ;;  %s231_s29 = int_to_ptr.hbm [resolvable:$true] %s230_s29 }
  0x10   : > { %s228_s28 = sshll.u32 (!%p91_p9), %s108_s27, 4  ;;  %s218_s30 = scalar_lea.sflag (!%p91_p9), [#allocation3], %s107_s23  ;;  %s229_s28 = int_to_ptr.vmem [resolvable:$true] %s228_s28 }
  0x11   : > { %s426_s2 = sshra.s32 (!%p91_p9), %s231_s29, 4  ;;  %s427_s2 = int_to_ptr.hbm [resolvable:$true] %s426_s2 }
  0x12   : > { %s428_s3 = scalar_lea.hbm (!%p91_p9), %s427_s2, 1  ;;  %p433_p0 = scmp.lt.s32.totalorder (!%p91_p9), %s427_s2, %s590_s1 }
  0x13   : > { %s110_s18 = scalar_select %p109_p10, %s507_s10, 1 }
  0x14   : > { %p429_p11 = scmp.ne.s32.totalorder %s427_s2, %s428_s3  ;;  %s432_s10 = scalar_lea.hbm %s590_s1, 2 }
  0x15   : > { %s293_s19 = sshll.u32 %s110_s18, 7  ;;  %p434_p1 = scmp.lt.s32.totalorder %s432_s10, %s428_s3 }
  0x16   : > { %s539_s22 = scalar_lea.vmem %s589_s0, %s293_s19  ;;  %p430_p12 = pnand %p429_p11, %p524_p5 }
  0x17   : > { %v295_v0 = vld [vmem:[%s539_s22] sm:$0xff]   ;;  %v358_v1 = vld [vmem:[%s539_s22 + $0x8] sm:$0xff]   ;;  %v359_v5 = vld [vmem:[%s539_s22 + $0x10] sm:$0xff]   ;;  %p435_p2 = por %p434_p1, %p433_p0 }
  0x18   : > { %v296_v2 = vunpack.c.l.bf16 %v295_v0  ;;  %v297_v3 = vunpack.c.h.bf16 %v295_v0  ;;  %v300_v4 = vunpack.c.l.bf16 %v358_v1  ;;  %v301_v6 = vunpack.c.h.bf16 %v358_v1  ;;  %v360_v10 = vld [vmem:[%s539_s22 + $0x18] sm:$0xff]   ;;  %v361_v15 = vld [vmem:[%s539_s22 + $0x20] sm:$0xff]   ;;  %v362_v20 = vld [vmem:[%s539_s22 + $0x28] sm:$0xff]   ;;  %p431_p13 = pneg %p430_p12 }
  0x19   : > { %v304_v8 = vunpack.c.l.bf16 %v359_v5  ;;  %v305_v11 = vunpack.c.h.bf16 %v359_v5  ;;  %v308_v13 = vunpack.c.l.bf16 %v360_v10  ;;  %v309_v16 = vunpack.c.h.bf16 %v360_v10  ;;  %v363_v25 = vld [vmem:[%s539_s22 + $0x30] sm:$0xff]   ;;  %v364_v30 = vld [vmem:[%s539_s22 + $0x38] sm:$0xff]   ;;  %v365_v35 = vld [vmem:[%s539_s22 + $0x40] sm:$0xff]  }
  0x1a   : > { %v178_v7 = vadd.f32 %v297_v3, %v296_v2  ;;  %v312_v18 = vunpack.c.l.bf16 %v361_v15  ;;  %v313_v21 = vunpack.c.h.bf16 %v361_v15  ;;  %v316_v23 = vunpack.c.l.bf16 %v362_v20  ;;  %v366_v40 = vld [vmem:[%s539_s22 + $0x48] sm:$0xff]   ;;  %v367_v45 = vld [vmem:[%s539_s22 + $0x50] sm:$0xff]   ;;  %v368_v50 = vld [vmem:[%s539_s22 + $0x58] sm:$0xff]   ;;  %p436_p3 = pnand %p435_p2, %p431_p13 }
  0x1b   : > { %v317_v26 = vunpack.c.h.bf16 %v362_v20  ;;  %v320_v28 = vunpack.c.l.bf16 %v363_v25  ;;  %v321_v31 = vunpack.c.h.bf16 %v363_v25  ;;  %v324_v33 = vunpack.c.l.bf16 %v364_v30  ;;  %v369_v55 = vld [vmem:[%s539_s22 + $0x60] sm:$0xff]   ;;  %v370_v60 = vld [vmem:[%s539_s22 + $0x68] sm:$0xff]   ;;  %v371_v1 = vld [vmem:[%s539_s22 + $0x70] sm:$0xff]  }
  0x1c   : > { %v179_v9 = vadd.f32 %v300_v4, %v178_v7  ;;  %v325_v36 = vunpack.c.h.bf16 %v364_v30  ;;  %v328_v38 = vunpack.c.l.bf16 %v365_v35  ;;  %v329_v41 = vunpack.c.h.bf16 %v365_v35 }
  0x1d   : > { %v332_v43 = vunpack.c.l.bf16 %v366_v40  ;;  %v333_v46 = vunpack.c.h.bf16 %v366_v40  ;;  %v336_v48 = vunpack.c.l.bf16 %v367_v45  ;;  %v337_v51 = vunpack.c.h.bf16 %v367_v45 }
  0x1e   : > { %v180_v12 = vadd.f32 %v301_v6, %v179_v9  ;;  %v340_v53 = vunpack.c.l.bf16 %v368_v50  ;;  %v341_v56 = vunpack.c.h.bf16 %v368_v50  ;;  %v344_v58 = vunpack.c.l.bf16 %v369_v55  ;;  %v372_v6 = vld [vmem:[%s539_s22 + $0x78] sm:$0xff]  }
  0x1f   : > { %v345_v61 = vunpack.c.h.bf16 %v369_v55  ;;  %v348_v63 = vunpack.c.l.bf16 %v370_v60  ;;  %v349_v2 = vunpack.c.h.bf16 %v370_v60  ;;  %v352_v4 = vunpack.c.l.bf16 %v371_v1 }
  0x20   : > { %v181_v14 = vadd.f32 %v304_v8, %v180_v12  ;;  %v353_v7 = vunpack.c.h.bf16 %v371_v1  ;;  %v356_v9 = vunpack.c.l.bf16 %v372_v6 }
  0x22   : > { %v182_v17 = vadd.f32 %v305_v11, %v181_v14  ;;  %v357_v11 = vunpack.c.h.bf16 %v372_v6 }
  0x24   : > { %v183_v19 = vadd.f32 %v308_v13, %v182_v17 }
  0x26   : > { %v184_v22 = vadd.f32 %v309_v16, %v183_v19 }
  0x28   : > { %v185_v24 = vadd.f32 %v312_v18, %v184_v22 }
  0x2a   : > { %v186_v27 = vadd.f32 %v313_v21, %v185_v24 }
  0x2c   : > { %v187_v29 = vadd.f32 %v316_v23, %v186_v27 }
  0x2e   : > { %v188_v32 = vadd.f32 %v317_v26, %v187_v29 }
  0x30   : > { %v189_v34 = vadd.f32 %v320_v28, %v188_v32 }
  0x32   : > { %v190_v37 = vadd.f32 %v321_v31, %v189_v34 }
  0x34   : > { %v191_v39 = vadd.f32 %v324_v33, %v190_v37 }
  0x36   : > { %v192_v42 = vadd.f32 %v325_v36, %v191_v39 }
  0x38   : > { %v193_v44 = vadd.f32 %v328_v38, %v192_v42 }
  0x3a   : > { %v194_v47 = vadd.f32 %v329_v41, %v193_v44 }
  0x3c   : > { %v195_v49 = vadd.f32 %v332_v43, %v194_v47 }
  0x3e   : > { %v196_v52 = vadd.f32 %v333_v46, %v195_v49 }
  0x40   : > { %v197_v54 = vadd.f32 %v336_v48, %v196_v52 }
  0x42   : > { %v198_v57 = vadd.f32 %v337_v51, %v197_v54 }
  0x44   : > { %v199_v59 = vadd.f32 %v340_v53, %v198_v57 }
  0x46   : > { %v200_v62 = vadd.f32 %v341_v56, %v199_v59 }
  0x48   : > { %v201_v0 = vadd.f32 %v344_v58, %v200_v62 }
  0x4a   : > { %v202_v3 = vadd.f32 %v345_v61, %v201_v0 }
  0x4c   : > { %v203_v5 = vadd.f32 %v348_v63, %v202_v3 }
  0x4e   : > { %v204_v8 = vadd.f32 %v349_v2, %v203_v5 }
  0x50   : > { %v205_v10 = vadd.f32 %v352_v4, %v204_v8 }
  0x52   : > { %v206_v12 = vadd.f32 %v353_v7, %v205_v10 }
  0x54   : > { %v207_v13 = vadd.f32 %v356_v9, %v206_v12 }
  0x56   : > { %v208_v14 = vadd.f32 %v357_v11, %v207_v13 }
  0x58   : > { %v209_v15 = vrot.slane %v208_v14, 4 }
  0x5a   : > { %v210_v16 = vadd.f32 %v209_v15, %v208_v14 }
  0x5c   : > { %v211_v17 = vrot.slane %v210_v16, 2 }
  0x5e   : > { %v212_v18 = vadd.f32 %v211_v17, %v210_v16 }
  0x60   : > { %v213_v19 = vrot.slane %v212_v18, 1 }
  0x62   : > { %v214_v20 = vadd.f32 %v213_v19, %v212_v18 }
  0x64   : > { %v215_v21 = vmul.f32 0.00390625, %v214_v20 }
  0x66   : > { %216 = vst [vmem:[%s108_s27] sm:$0x1] %v215_v21 }
  0x67   : > { %439 = shalt.err (!%p436_p3)
}
  0x68   : > { %373 = dma.vmem_to_hbm [thread:$0]  (%p524_p5), %s229_s28, 16, %s231_s29, %s218_s30  }
  0x69 PF: > { %p379_p4 = scmp.ge.s32.totalorder %s474_s9, 2  ;;  %s242_s14 = sand.u32 1, %s462_s6  }
  0x6a   : > { %s243_s18 = scalar_lea.sflag [#allocation3], %s242_s14 }
  0x6b   : > { %p376_p7 = pnand %p379_p4, %p528_p6 }
  0x6d   : > { %p377_p8 = pneg %p376_p7 }
  0x6f   : > { %457 = dma.done.wait (%p377_p8), %s243_s18, 16  }
  0x70   : > { %459 = vsyncadd (%p377_p8), %s243_s18, 4294967280  ;;  %p11_p9 = scmp.ge.s32.totalorder %s511_s12, 4   ;;  %s593_s6 = smov %s466_s7 }
  0x71   : > { %s594_s7 = smov %s470_s8  ;;  %s595_s8 = smov %s522_s15 }
  0x72   : > { %s596_s9 = smov %s511_s12  ;;  %13 = sbr.rel (!%p11_p9) target bundleno = 3 (0x3), region = 59 }
  0x77   :  { %248 = vsyncpa [#allocation3], 1 }
  0x78   :  { %250 = vsyncpa [#allocation3 + $0x1], 1 }

// kernel: simple_model_forward.7
= control target key start
LH: loop header
LB: loop body
LE: loop exit
PB: predicated region body
PF: predicated region fallthrough
CT: control target
= control target key end

     0   :  { %s3936_s13 = smov 0   ;;  %s8290_s0 = inlined_call_operand.vmem [shape: bf16[2,18,18,128], index: 0, kind: input, shape index: {}]   ;;  %s8291_s1 = inlined_call_operand.vmem [shape: bf16[2,256,128], index: 1, kind: input, shape index: {}]   ;;  %s8292_s2 = inlined_call_operand.vmem [shape: f32[9,128], index: 2, kind: input, shape index: {}]   ;;  %s8293_s3 = inlined_call_operand.vmem [shape: f32[1,128], index: 3, kind: input, shape index: {}]   ;;  %s8294_s4 = inlined_call_operand.vmem [shape: f32[128,8], index: 4, kind: input, shape index: {}]   ;;  %s8295_s5 = inlined_call_operand.vmem [shape: f32[1,8], index: 5, kind: input, shape index: {}]   ;;  %s8296_s6 = inlined_call_operand.vmem [shape: f32[8,128], index: 6, kind: input, shape index: {}]   ;;  %s8297_s7 = inlined_call_operand.vmem [shape: f32[1,128], index: 7, kind: input, shape index: {}]   ;;  %s8298_s8 = inlined_call_operand.vmem [shape: bf16[128,128], index: 8, kind: input, shape index: {}]   ;;  %s8299_s9 = inlined_call_operand.vmem [shape: f32[1,128], index: 9, kind: input, shape index: {}]   ;;  %s8300_s10 = inlined_call_operand.vmem [shape: bf16[2,256,128], index: 10, kind: output, shape index: {}]  }
   0x1 LB: > { %s3389_s14 = sadd.s32 4294967295, %s3878_s13   ;;  %p3393_p0 = scmp.ge.s32.totalorder %s3878_s13, 1  ;;  %s3878_s13 = sphi %s3936_s13, %s20_s13  }
   0x2   : > { %p322_p1 = scmp.lt.s32.totalorder %s3878_s13, 3 }
   0x4   : > { %p323_p2 = pnand %p3393_p0, %p322_p1 }
   0x6   : > { %326 = sbr.rel (%p323_p2) target bundleno = 1104 (0x450), region = 60 }
   0xb   : > { %v2869_v0 = vld [vmem:[%s8294_s4 + $0x78] sm:$0xff]  ;;  %v2868_v1 = vld [vmem:[%s8294_s4 + $0x70] sm:$0xff]  ;;  %v2867_v2 = vld [vmem:[%s8294_s4 + $0x68] sm:$0xff]  ;;  %p365_p3 = scmp.lt.s32.totalorder %s3389_s14, 1  ;;  %vm646_vm0 = vcmask 1046528   ;;  %vm888_vm1 = vcmask 1045504  }
   0xc   : > { %2871 = vmatpush.msra.mxu0 %v2869_v0  ;;  %v2866_v3 = vld [vmem:[%s8294_s4 + $0x60] sm:$0xff]  ;;  %v2865_v4 = vld [vmem:[%s8294_s4 + $0x58] sm:$0xff]  ;;  %v2864_v5 = vld [vmem:[%s8294_s4 + $0x50] sm:$0xff] }
   0xd   : > { %v2863_v6 = vld [vmem:[%s8294_s4 + $0x48] sm:$0xff]  ;;  %v2862_v7 = vld [vmem:[%s8294_s4 + $0x40] sm:$0xff]  ;;  %v2861_v8 = vld [vmem:[%s8294_s4 + $0x38] sm:$0xff]  ;;  %s9395_s14 = smov (!%p365_p3, %s3389_s14), 1 }
   0xe   : > { %2872 = vmatpush.msra.mxu0 %v2868_v1  ;;  %v2860_v9 = vld [vmem:[%s8294_s4 + $0x30] sm:$0xff]  ;;  %v2859_v10 = vld [vmem:[%s8294_s4 + $0x28] sm:$0xff]  ;;  %v2858_v11 = vld [vmem:[%s8294_s4 + $0x20] sm:$0xff]  ;;  %s3720_s29 = smul.u32 216, %s9395_s14  ;;  %s3468_s27 = sshll.u32 %s9395_s14, 7 }
   0xf   : > { %v2857_v12 = vld [vmem:[%s8294_s4 + $0x18] sm:$0xff]  ;;  %v2856_v13 = vld [vmem:[%s8294_s4 + $0x10] sm:$0xff]  ;;  %v2855_v14 = vld [vmem:[%s8294_s4 + $0x8] sm:$0xff]  ;;  %s8211_s30 = scalar_lea.vmem %s8291_s1, %s3468_s27  ;;  %s8229_s16 = scalar_lea.vmem %s8300_s10, %s3468_s27 }
  0x10   : > { %2873 = vmatpush.msra.mxu0 %v2867_v2  ;;  %v2854_v15 = vld [vmem:[%s8294_s4] sm:$0xff]  ;;  %s4002_s12 = scalar_lea.vmem %s8290_s0, %s3720_s29 }
  0x11   : > { %v3479_v16 = vld [vmem:[%s4002_s12] sm:$0xff]   ;;  %v383_v17 = vld [vmem:[%s4002_s12 + $0xc] sm:$0xff]   ;;  %v4012_v19 = vld [vmem:[%s4002_s12 + $0x8] sm:$0x1] }
  0x12   : > { %2874 = vmatpush.msra.mxu0 %v2866_v3  ;;  %v4009_v18 = vld [vmem:[%s8292_s2] sm:$0xff]  ;;  %8456 = vst [vmem:[#allocation3_spill] sm:$0xff] %v4012_v19  ;;  %v3658_v20 = vld [vmem:[%s4002_s12 + $0x18] sm:$0xff]   ;;  %v385_v21 = vld [vmem:[%s4002_s12 + $0x14] sm:$0x1]  ;;  %v4021_v25 = vunpack.c.l.bf16 %v3479_v16  ;;  %v4023_v26 = vunpack.c.h.bf16 %v3479_v16  ;;  %v4026_v28 = vunpack.c.l.bf16 %v383_v17  ;;  %v4037_v34 = vunpack.c.h.bf16 %v383_v17 }
  0x13   : > { %8455 = vst [vmem:[#allocation2_spill] sm:$0xff] %v4009_v18  ;;  %v389_v22 = vld [vmem:[%s4002_s12 + $0x24] sm:$0xff]   ;;  %v3659_v23 = vld [vmem:[%s4002_s12 + $0x30] sm:$0xff]   ;;  %v4019_v24 = vperm.slane %v4009_v18, 0  ;;  %v395_v27 = vld [vmem:[%s4002_s12 + $0x3c] sm:$0xff]   ;;  %v4029_v29 = vperm.slane %v4009_v18, 1  ;;  %v4031_v30 = vunpack.c.l.bf16 %v3658_v20  ;;  %v4033_v31 = vunpack.c.h.bf16 %v3658_v20 }
  0x14   : > { %2875 = vmatpush.msra.mxu0 %v2865_v4  ;;  %8457 = vst [vmem:[#allocation4_spill] sm:$0xff] %v4021_v25  ;;  %v3660_v32 = vld [vmem:[%s4002_s12 + $0x48] sm:$0xff]   ;;  %v401_v33 = vld [vmem:[%s4002_s12 + $0x54] sm:$0xff]   ;;  %v4040_v36 = vunpack.c.l.bf16 %v3659_v23  ;;  %v4042_v37 = vunpack.c.h.bf16 %v3659_v23  ;;  %v3661_v38 = vld [vmem:[%s4002_s12 + $0x60] sm:$0xff]   ;;  %v4045_v39 = vunpack.c.l.bf16 %v389_v22  ;;  %v4047_v40 = vunpack.c.l.bf16 %v385_v21 }
  0x15   : > { %8458 = vst [vmem:[#allocation5_spill] sm:$0xff] %v4023_v26  ;;  %v407_v41 = vld [vmem:[%s4002_s12 + $0x6c] sm:$0xff]   ;;  %v3662_v42 = vld [vmem:[%s4002_s12 + $0x78] sm:$0xff]   ;;  %v4051_v43 = vunpack.c.h.bf16 %v389_v22  ;;  %v4053_v44 = vunpack.c.l.bf16 %v395_v27  ;;  %v4055_v45 = vunpack.c.h.bf16 %v395_v27  ;;  %v4059_v46 = vmul.f32 %v4021_v25, %v4019_v24  ;;  %v413_v49 = vld [vmem:[%s4002_s12 + $0x84] sm:$0xff]  }
  0x16   : > { %2876 = vmatpush.msra.mxu0 %v2864_v5  ;;  %8459 = vst [vmem:[#allocation6_spill] sm:$0xff] %v4026_v28  ;;  %v4061_v47 = vunpack.c.l.bf16 %v3660_v32  ;;  %v4063_v48 = vunpack.c.h.bf16 %v3660_v32  ;;  %v4066_v50 = vunpack.c.l.bf16 %v401_v33  ;;  %v4070_v51 = vmul.f32 %v4023_v26, %v4019_v24  ;;  %v3663_v54 = vld [vmem:[%s4002_s12 + $0x90] sm:$0xff]   ;;  %v419_v55 = vld [vmem:[%s4002_s12 + $0x9c] sm:$0xff]   ;;  %v3664_v60 = vld [vmem:[%s4002_s12 + $0xa8] sm:$0xff]  }
  0x17   : > { %8460 = vst [vmem:[#allocation7_spill] sm:$0xff] %v4031_v30  ;;  %v4072_v52 = vunpack.c.l.bf16 %v3661_v38  ;;  %v4074_v53 = vunpack.c.h.bf16 %v3661_v38  ;;  %v4078_v56 = vunpack.c.h.bf16 %v401_v33  ;;  %v4082_v57 = vmul.f32 %v4019_v24, %v4026_v28  ;;  %v425_v63 = vld [vmem:[%s4002_s12 + $0xb4] sm:$0xff]   ;;  %v3665_v0 = vld [vmem:[%s4002_s12 + $0xc0] sm:$0xff]  }
  0x18   : > { %2877 = vmatpush.msra.mxu0 %v2863_v6  ;;  %8461 = vst [vmem:[#allocation8_spill] sm:$0xff] %v4033_v31  ;;  %v4084_v58 = vunpack.c.l.bf16 %v3662_v42  ;;  %v4086_v59 = vunpack.c.h.bf16 %v3662_v42  ;;  %v4089_v61 = vunpack.c.l.bf16 %v407_v41  ;;  %v4093_v62 = vmul.f32 %v4019_v24, %v4037_v34  ;;  %v388_v38 = vld [vmem:[%s4002_s12 + $0x20] sm:$0x1] }
  0x19   : > { %8462 = vst [vmem:[#allocation9_spill] sm:$0xff] %v4037_v34  ;;  %v4097_v1 = vunpack.c.h.bf16 %v407_v41  ;;  %v4099_v2 = vunpack.c.l.bf16 %v413_v49  ;;  %v4101_v3 = vunpack.c.h.bf16 %v413_v49  ;;  %v4105_v4 = vmul.f32 %v4031_v30, %v4019_v24  ;;  %v391_v41 = vld [vmem:[%s4002_s12 + $0x2c] sm:$0x1] }
  0x1a   : > { %2878 = vmatpush.msra.mxu0 %v2862_v7  ;;  %8463 = vst [vmem:[#allocation10_spill] sm:$0xff] %v4040_v36  ;;  %v4107_v5 = vunpack.c.l.bf16 %v3663_v54  ;;  %v4109_v6 = vunpack.c.h.bf16 %v3663_v54  ;;  %v4111_v7 = vunpack.c.l.bf16 %v419_v55  ;;  %v4135_v16 = vmul.f32 %v4019_v24, %v4051_v43 }
  0x1b   : > { %8464 = vst [vmem:[#allocation11_spill] sm:$0xff] %v4042_v37  ;;  %v4137_v17 = vunpack.c.h.bf16 %v425_v63  ;;  %v4141_v20 = vmul.f32 %v4040_v36, %v4019_v24  ;;  %v4145_v21 = vmul.f32 %v4042_v37, %v4019_v24  ;;  %v4149_v22 = vmul.f32 %v4019_v24, %v4053_v44 }
  0x1c   : > { %2879 = vmatpush.msra.mxu0 %v2861_v8  ;;  %8465 = vst [vmem:[#allocation12_spill] sm:$0xff] %v4045_v39  ;;  %v4115_v8 = vmul.f32 %v4033_v31, %v4019_v24  ;;  %v4153_v23 = vmul.f32 %v4019_v24, %v4055_v45  ;;  %v4157_v27 = vmul.f32 %v4061_v47, %v4019_v24 }
  0x1d   : > { %8466 = vst [vmem:[#allocation13_spill] sm:$0xff] %v4047_v40  ;;  %v4161_v32 = vmul.f32 %v4063_v48, %v4019_v24  ;;  %v4165_v33 = vmul.f32 %v4019_v24, %v4066_v50  ;;  %v4171_v42 = vmul.f32 %v4019_v24, %v4078_v56  ;;  %v4175_v49 = vmul.f32 %v4072_v52, %v4019_v24 }
  0x1e   : > { %2880 = vmatpush.msra.mxu0 %v2860_v9  ;;  %8467 = vst [vmem:[#allocation14_spill] sm:$0xff] %v4051_v43  ;;  %v4117_v9 = vunpack.c.l.bf16 %v3664_v60  ;;  %v4179_v54 = vmul.f32 %v4074_v53, %v4019_v24  ;;  %v4190_v35 = vmul.f32 %v4019_v24, %v4097_v1  ;;  %v4202_v18 = vmul.f32 %v4019_v24, %v4099_v2 }
  0x1f   : > { %8468 = vst [vmem:[#allocation15_spill] sm:$0xff] %v4053_v44 }
  0x20   : > { %2881 = vmatpush.msra.mxu0 %v2859_v10  ;;  %8469 = vst [vmem:[#allocation16_spill] sm:$0xff] %v4055_v45  ;;  %v4119_v10 = vunpack.c.h.bf16 %v3664_v60  ;;  %v394_v60 = vld [vmem:[%s4002_s12 + $0x38] sm:$0x1] }
  0x21   : > { %8470 = vst [vmem:[#allocation17_spill] sm:$0xff] %v4061_v47 }
  0x22   : > { %2882 = vmatpush.msra.mxu0 %v2858_v11  ;;  %8471 = vst [vmem:[#allocation18_spill] sm:$0xff] %v4063_v48  ;;  %v4121_v11 = vunpack.c.h.bf16 %v419_v55  ;;  %v4183_v55 = vmul.f32 %v4019_v24, %v4089_v61 }
  0x23   : > { %8472 = vst [vmem:[#allocation19_spill] sm:$0xff] %v4066_v50 }
  0x24   : > { %2883 = vmatpush.msra.mxu0 %v2857_v12  ;;  %8473 = vst [vmem:[#allocation20_spill] sm:$0xff] %v4072_v52  ;;  %v4125_v12 = vmul.f32 %v4019_v24, %v4045_v39 }
  0x25   : > { %8474 = vst [vmem:[#allocation21_spill] sm:$0xff] %v4074_v53 }
  0x26   : > { %2884 = vmatpush.msra.mxu0 %v2856_v13  ;;  %8475 = vst [vmem:[#allocation22_spill] sm:$0xff] %v4078_v56  ;;  %v4127_v13 = vunpack.c.l.bf16 %v3665_v0 }
  0x27   : > { %8476 = vst [vmem:[#allocation23_spill] sm:$0xff] %v4084_v58 }
  0x28   : > { %2885 = vmatpush.msra.mxu0 %v2855_v14  ;;  %8477 = vst [vmem:[#allocation24_spill] sm:$0xff] %v4086_v59  ;;  %v4129_v14 = vunpack.c.h.bf16 %v3665_v0  ;;  %v400_v0 = vld [vmem:[%s4002_s12 + $0x50] sm:$0x1] }
  0x29   : > { %8478 = vst [vmem:[#allocation25_spill] sm:$0xff] %v4089_v61 }
  0x2a   : > { %2886 = vmatpush.msra.mxu0 %v2854_v15  ;;  %8479 = vst [vmem:[#allocation26_spill] sm:$0xff] %v4097_v1  ;;  %v4131_v15 = vunpack.c.l.bf16 %v425_v63  ;;  %v397_v63 = vld [vmem:[%s4002_s12 + $0x44] sm:$0x1] }
  0x2b   : > { %8480 = vst [vmem:[#allocation27_spill] sm:$0xff] %v4099_v2 }
  0x2c   : > { %8481 = vst [vmem:[#allocation28_spill] sm:$0xff] %v4101_v3 }
  0x2d   : > { %8482 = vst [vmem:[#allocation29_spill] sm:$0xff] %v4105_v4 }
  0x2e   : > { %8483 = vst [vmem:[#allocation30_spill] sm:$0xff] %v4107_v5 }
  0x2f   : > { %8484 = vst [vmem:[#allocation31_spill] sm:$0xff] %v4109_v6 }
  0x30   : > { %8485 = vst [vmem:[#allocation32_spill] sm:$0xff] %v4111_v7 }
  0x31   : > { %8486 = vst [vmem:[#allocation33_spill] sm:$0xff] %v4115_v8 }
  0x32   : > { %8487 = vst [vmem:[#allocation34_spill] sm:$0xff] %v4117_v9 }
  0x33   : > { %8488 = vst [vmem:[#allocation35_spill] sm:$0xff] %v4119_v10 }
  0x34   : > { %8489 = vst [vmem:[#allocation36_spill] sm:$0xff] %v4121_v11 }
  0x35   : > { %8490 = vst [vmem:[#allocation37_spill] sm:$0xff] %v4125_v12 }
  0x36   : > { %8491 = vst [vmem:[#allocation38_spill] sm:$0xff] %v4127_v13  ;;  %v4198_v13 = vmul.f32 %v4086_v59, %v4019_v24 }
  0x37   : > { %8492 = vst [vmem:[#allocation39_spill] sm:$0xff] %v4129_v14  ;;  %v4194_v14 = vmul.f32 %v4084_v58, %v4019_v24 }
  0x38   : > { %8493 = vst [vmem:[#allocation40_spill] sm:$0xff] %v4131_v15 }
  0x39   : > { %8494 = vst [vmem:[#allocation41_spill] sm:$0xff] %v4135_v16  ;;  %v4255_v16 = vunpack.c.l.bf16 %v397_v63 }
  0x3a   : > { %8495 = vst [vmem:[#allocation42_spill] sm:$0xff] %v4137_v17 }
  0x3b   : > { %8496 = vst [vmem:[#allocation43_spill] sm:$0xff] %v4141_v20  ;;  %v4251_v20 = vunpack.c.l.bf16 %v391_v41 }
  0x3c   : > { %8497 = vst [vmem:[#allocation44_spill] sm:$0xff] %v4145_v21  ;;  %v4247_v21 = vmul.f32 %v4019_v24, %v4137_v17 }
  0x3d   : > { %8498 = vst [vmem:[#allocation45_spill] sm:$0xff] %v4149_v22  ;;  %v427_v22 = vld [vmem:[%s4002_s12 + $0xbc] sm:$0x1] }
  0x3e   : > { %8499 = vst [vmem:[#allocation46_spill] sm:$0xff] %v4153_v23  ;;  %v424_v23 = vld [vmem:[%s4002_s12 + $0xb0] sm:$0x1]  ;;  %v4275_v63 = vunpack.c.l.bf16 %v427_v22  ;;  %v555_v22 = vmul.f32 %v4029_v29, %v4047_v40 }
  0x3f   : > { %8500 = vst [vmem:[#allocation47_spill] sm:$0xff] %v4157_v27  ;;  %v4228_v27 = vmul.f32 %v4019_v24, %v4121_v11 }
  0x40   : > { %8501 = vst [vmem:[#allocation48_spill] sm:$0xff] %v4161_v32  ;;  %v418_v32 = vld [vmem:[%s4002_s12 + $0x98] sm:$0x1] }
  0x41   : > { %8502 = vst [vmem:[#allocation49_spill] sm:$0xff] %v4165_v33  ;;  %v415_v33 = vld [vmem:[%s4002_s12 + $0x8c] sm:$0x1] }
  0x42   : > { %8503 = vst [vmem:[#allocation50_spill] sm:$0xff] %v4171_v42  ;;  %v412_v42 = vld [vmem:[%s4002_s12 + $0x80] sm:$0x1] }
  0x43   : > { %8504 = vst [vmem:[#allocation51_spill] sm:$0xff] %v4175_v49  ;;  %v409_v49 = vld [vmem:[%s4002_s12 + $0x74] sm:$0x1]  ;;  %v4265_v4 = vunpack.c.l.bf16 %v412_v42 }
  0x44   : > { %8505 = vst [vmem:[#allocation52_spill] sm:$0xff] %v4179_v54  ;;  %v406_v54 = vld [vmem:[%s4002_s12 + $0x68] sm:$0x1]  ;;  %v4263_v8 = vunpack.c.l.bf16 %v409_v49  ;;  %v8533_v49 = vunpack.c.l.bf16 %v4012_v19 }
  0x45   : > { %8506 = vst [vmem:[#allocation53_spill] sm:$0xff] %v4183_v55  ;;  %v403_v55 = vld [vmem:[%s4002_s12 + $0x5c] sm:$0x1] }
  0x46   : > { %8507 = vst [vmem:[#allocation54_spill] sm:$0xff] %v4190_v35  ;;  %v4209_v35 = vmul.f32 %v4019_v24, %v4101_v3  ;;  %v4259_v12 = vunpack.c.l.bf16 %v403_v55  ;;  %v550_v55 = vmul.f32 %v4021_v25, %v4029_v29  ;;  %v552_v42 = vmul.f32 %v4029_v29, %v8533_v49 }
  0x47   : > { %8508 = vst [vmem:[#allocation55_spill] sm:$0xff] %v4194_v14  ;;  %v4213_v14 = vmul.f32 %v4107_v5, %v4019_v24  ;;  %v4304_v49 = vmul.f32 %v4029_v29, %v4045_v39  ;;  %v655_v25 = vrot.slane %v555_v22, 1  ;;  %v4456_v22 = vmul.f32 %v4029_v29, %v4275_v63 }
  0x48   : > { %8509 = vst [vmem:[#allocation56_spill] sm:$0xff] %v4198_v13  ;;  %v4217_v13 = vmul.f32 %v4109_v6, %v4019_v24  ;;  %v647_v40 = vrot.slane %v550_v55, 1  ;;  %v4436_v55 = vmul.f32 %v4117_v9, %v4029_v29 }
  0x49   : > { %8510 = vst [vmem:[#allocation57_spill] sm:$0xff] %v4202_v18  ;;  %v4221_v18 = vmul.f32 %v4019_v24, %v4111_v7 }
  0x4a   : > { %8511 = vst [vmem:[#allocation58_spill] sm:$0xff] %v4209_v35  ;;  %v4232_v35 = vmul.f32 %v4117_v9, %v4019_v24 }
  0x4b   : > { %8512 = vst [vmem:[#allocation59_spill] sm:$0xff] %v4213_v14  ;;  %v4236_v14 = vmul.f32 %v4119_v10, %v4019_v24 }
  0x4c   : > { %8513 = vst [vmem:[#allocation60_spill] sm:$0xff] %v4217_v13  ;;  %v4240_v13 = vmul.f32 %v4019_v24, %v4131_v15  ;;  %v4267_v24 = vunpack.c.l.bf16 %v415_v33  ;;  %v4296_v33 = vmul.f32 %v4033_v31, %v4029_v29  ;;  %v4316_v31 = vmul.f32 %v4040_v36, %v4029_v29 }
  0x4d   : > { %8514 = vst [vmem:[#allocation61_spill] sm:$0xff] %v4221_v18  ;;  %v421_v18 = vld [vmem:[%s4002_s12 + $0xa4] sm:$0x1]  ;;  %v4336_v36 = vmul.f32 %v4029_v29, %v4255_v16 }
  0x4e   : > { %8515 = vst [vmem:[#allocation62_spill] sm:$0xff] %v4228_v27  ;;  %v4249_v27 = vunpack.c.l.bf16 %v388_v38  ;;  %v4269_v38 = vunpack.c.l.bf16 %v418_v32  ;;  %v4271_v41 = vunpack.c.l.bf16 %v421_v18  ;;  %v553_v32 = vmul.f32 %v4029_v29, %v4026_v28 }
  0x4f   : > { %8516 = vst [vmem:[#allocation63_spill] sm:$0xff] %v4232_v35  ;;  %v4253_v35 = vunpack.c.l.bf16 %v394_v60  ;;  %v4273_v60 = vunpack.c.l.bf16 %v424_v23  ;;  %v554_v18 = vmul.f32 %v4029_v29, %v4037_v34  ;;  %v4292_v23 = vmul.f32 %v4031_v30, %v4029_v29 }
  0x50   : > { %8517 = vst [vmem:[#allocation64_spill] sm:$0xff] %v4236_v14  ;;  %v4257_v14 = vunpack.c.l.bf16 %v400_v0  ;;  %v4300_v0 = vmul.f32 %v4029_v29, %v4249_v27  ;;  %v4308_v34 = vmul.f32 %v4029_v29, %v4051_v43  ;;  %v4312_v30 = vmul.f32 %v4029_v29, %v4251_v20 }
  0x51   : > { %8518 = vst [vmem:[#allocation65_spill] sm:$0xff] %v4240_v13  ;;  %v4261_v13 = vunpack.c.l.bf16 %v406_v54  ;;  %v551_v54 = vmul.f32 %v4023_v26, %v4029_v29  ;;  %v4324_v39 = vmul.f32 %v4029_v29, %v4253_v35  ;;  %v4328_v43 = vmul.f32 %v4029_v29, %v4053_v44 }
  0x52   : > { %8519 = vst [vmem:[#allocation66_spill] sm:$0xff] %v4249_v27  ;;  %v4320_v27 = vmul.f32 %v4042_v37, %v4029_v29  ;;  %v4340_v37 = vmul.f32 %v4061_v47, %v4029_v29  ;;  %v4348_v44 = vmul.f32 %v4029_v29, %v4257_v14  ;;  %v4360_v47 = vmul.f32 %v4029_v29, %v4259_v12 }
  0x53   : > { %8520 = vst [vmem:[#allocation67_spill] sm:$0xff] %v4251_v20  ;;  %v4332_v20 = vmul.f32 %v4029_v29, %v4055_v45  ;;  %v4352_v45 = vmul.f32 %v4029_v29, %v4066_v50  ;;  %v4372_v50 = vmul.f32 %v4029_v29, %v4261_v13  ;;  %v648_v28 = vrot.slane %v551_v54, 1 }
  0x54   : > { %8521 = vst [vmem:[#allocation68_spill] sm:$0xff] %v4253_v35  ;;  %v4344_v35 = vmul.f32 %v4063_v48, %v4029_v29  ;;  %v4364_v48 = vmul.f32 %v4072_v52, %v4029_v29  ;;  %v4384_v52 = vmul.f32 %v4029_v29, %v4263_v8  ;;  %v652_v19 = vrot.slane %v553_v32, 1 }
  0x55   : > { %8522 = vst [vmem:[#allocation69_spill] sm:$0xff] %v4255_v16  ;;  %v4356_v16 = vmul.f32 %v4029_v29, %v4078_v56  ;;  %v4376_v56 = vmul.f32 %v4029_v29, %v4089_v61  ;;  %v4396_v61 = vmul.f32 %v4029_v29, %v4265_v4  ;;  %v653_v26 = vrot.slane %v554_v18, 1 }
  0x56   : > { %8523 = vst [vmem:[#allocation70_spill] sm:$0xff] %v4257_v14  ;;  %v4368_v14 = vmul.f32 %v4074_v53, %v4029_v29  ;;  %v4388_v53 = vmul.f32 %v4084_v58, %v4029_v29  ;;  %v4408_v58 = vmul.f32 %v4029_v29, %v4267_v24  ;;  %v4440_v54 = vmul.f32 %v4119_v10, %v4029_v29 }
  0x57   : > { %8524 = vst [vmem:[#allocation71_spill] sm:$0xff] %v4259_v12  ;;  %v4380_v12 = vmul.f32 %v4029_v29, %v4097_v1  ;;  %v4400_v1 = vmul.f32 %v4029_v29, %v4099_v2  ;;  %v4420_v2 = vmul.f32 %v4029_v29, %v4269_v38  ;;  %v4448_v32 = vmul.f32 %v4029_v29, %v4131_v15 }
  0x58   : > { %8525 = vst [vmem:[#allocation72_spill] sm:$0xff] %v4261_v13  ;;  %v4392_v13 = vmul.f32 %v4086_v59, %v4029_v29  ;;  %v4412_v59 = vmul.f32 %v4107_v5, %v4029_v29  ;;  %v4428_v5 = vmul.f32 %v4029_v29, %v4121_v11  ;;  %v4452_v18 = vmul.f32 %v4029_v29, %v4137_v17 }
  0x59   : > { %8526 = vst [vmem:[#allocation73_spill] sm:$0xff] %v4263_v8  ;;  %v4404_v8 = vmul.f32 %v4029_v29, %v4101_v3  ;;  %v650_v3 = vrot.slane %v552_v42, 1  ;;  %v4444_v42 = vmul.f32 %v4029_v29, %v4273_v60  ;;  %v4459_v9 = vsel %vm646_vm0, %v647_v40, %v648_v28 }
  0x5a   : > { %8527 = vst [vmem:[#allocation74_spill] sm:$0xff] %v4265_v4  ;;  %v4416_v4 = vmul.f32 %v4109_v6, %v4029_v29  ;;  %v4432_v6 = vmul.f32 %v4029_v29, %v4271_v41  ;;  %v657_v10 = vrot.slane %v4292_v23, 1  ;;  %v4467_v15 = vsel %vm646_vm0, %v652_v19, %v653_v26 }
  0x5b   : > { %8528 = vst [vmem:[#allocation75_spill] sm:$0xff] %v4267_v24  ;;  %v4424_v24 = vmul.f32 %v4029_v29, %v4111_v7  ;;  %v4470_v17 = vsel %vm646_vm0, %v653_v26, %v655_v25  ;;  %v660_v11 = vrot.slane %v4300_v0, 1  ;;  %v662_v29 = vrot.slane %v4304_v49, 1 }
  0x5c   : > { %8529 = vst [vmem:[#allocation76_spill] sm:$0xff] %v4269_v38  ;;  %v663_v40 = vrot.slane %v4308_v34, 1  ;;  %v667_v23 = vrot.slane %v4316_v31, 1  ;;  %v672_v19 = vrot.slane %v4328_v43, 1  ;;  %v675_v25 = vrot.slane %v4336_v36, 1 }
  0x5d   : > { %8530 = vst [vmem:[#allocation77_spill] sm:$0xff] %v4271_v41  ;;  %v4464_v41 = vsel %vm646_vm0, %v648_v28, %v650_v3  ;;  %v670_v28 = vrot.slane %v4324_v39, 1  ;;  %v673_v3 = vrot.slane %v4332_v20, 1  ;;  %v677_v26 = vrot.slane %v4340_v37, 1 }
  0x5e   : > { %8531 = vst [vmem:[#allocation78_spill] sm:$0xff] %v4273_v60  ;;  %v658_v60 = vrot.slane %v4296_v33, 1  ;;  %v668_v33 = vrot.slane %v4320_v27, 1  ;;  %v678_v0 = vrot.slane %v4344_v35, 1  ;;  %v680_v34 = vrot.slane %v4348_v44, 1 }
  0x5f   : > { %8532 = vst [vmem:[#allocation79_spill] sm:$0xff] %v4275_v63  ;;  %v665_v63 = vrot.slane %v4312_v30, 1  ;;  %v682_v31 = vrot.slane %v4352_v45, 1  ;;  %v683_v27 = vrot.slane %v4356_v16, 1  ;;  %v685_v39 = vrot.slane %v4360_v47, 1 }
  0x60   : > { %v659_v30 = vsel %vm646_vm0, %v657_v10, %v658_v60  ;;  %v661_v43 = vsel %vm646_vm0, %v658_v60, %v660_v11  ;;  %v664_v20 = vsel %vm646_vm0, %v662_v29, %v663_v40  ;;  %v687_v36 = vrot.slane %v4364_v48, 1 }
  0x61   : > { %v688_v37 = vrot.slane %v4368_v14, 1  ;;  %v666_v35 = vsel %vm646_vm0, %v663_v40, %v665_v63  ;;  %v669_v44 = vsel %vm646_vm0, %v667_v23, %v668_v33  ;;  %v671_v10 = vsel %vm646_vm0, %v668_v33, %v670_v28 }
  0x62   : > { %v674_v45 = vsel %vm646_vm0, %v672_v19, %v673_v3  ;;  %v676_v16 = vsel %vm646_vm0, %v673_v3, %v675_v25  ;;  %v679_v47 = vsel %vm646_vm0, %v677_v26, %v678_v0  ;;  %v681_v11 = vsel %vm646_vm0, %v678_v0, %v680_v34 }
  0x63   : > { %v690_v60 = vrot.slane %v4372_v50, 1  ;;  %v684_v48 = vsel %vm646_vm0, %v682_v31, %v683_v27  ;;  %v686_v14 = vsel %vm646_vm0, %v683_v27, %v685_v39  ;;  %v692_v63 = vrot.slane %v4376_v56, 1 }
  0x64   : > { %v693_v49 = vrot.slane %v4380_v12, 1  ;;  %v689_v29 = vsel %vm646_vm0, %v687_v36, %v688_v37  ;;  %v695_v40 = vrot.slane %v4384_v52, 1  ;;  %v697_v23 = vrot.slane %v4388_v53, 1 }
  0x65   : > { %v698_v33 = vrot.slane %v4392_v13, 1  ;;  %v700_v28 = vrot.slane %v4396_v61, 1  ;;  %v702_v50 = vrot.slane %v4400_v1, 1  ;;  %v703_v19 = vrot.slane %v4404_v8, 1 }
  0x66   : > { %v705_v3 = vrot.slane %v4408_v58, 1  ;;  %v707_v56 = vrot.slane %v4412_v59, 1  ;;  %v708_v12 = vrot.slane %v4416_v4, 1  ;;  %v710_v25 = vrot.slane %v4420_v2, 1 }
  0x67   : > { %v712_v52 = vrot.slane %v4424_v24, 1  ;;  %v713_v53 = vrot.slane %v4428_v5, 1  ;;  %v715_v13 = vrot.slane %v4432_v6, 1  ;;  %v717_v61 = vrot.slane %v4436_v55, 1 }
  0x68   : > { %v718_v1 = vrot.slane %v4440_v54, 1  ;;  %v691_v8 = vsel %vm646_vm0, %v688_v37, %v690_v60  ;;  %v694_v58 = vsel %vm646_vm0, %v692_v63, %v693_v49  ;;  %v696_v59 = vsel %vm646_vm0, %v693_v49, %v695_v40  ;;  %v8534_v63 = vld [vmem:[#allocation29_spill] sm:$0xff] }
  0x69   : > { %v720_v4 = vrot.slane %v4444_v42, 1  ;;  %v699_v2 = vsel %vm646_vm0, %v697_v23, %v698_v33  ;;  %v722_v24 = vrot.slane %v4448_v32, 1  ;;  %v723_v5 = vrot.slane %v4452_v18, 1  ;;  %v8537_v40 = vld [vmem:[#allocation41_spill] sm:$0xff] }
  0x6a   : > { %v725_v6 = vrot.slane %v4456_v22, 1  ;;  %v701_v55 = vsel %vm646_vm0, %v698_v33, %v700_v28  ;;  %v704_v54 = vsel %vm646_vm0, %v702_v50, %v703_v19  ;;  %v706_v26 = vsel %vm646_vm0, %v703_v19, %v705_v3  ;;  %v8541_v33 = vld [vmem:[#allocation44_spill] sm:$0xff] }
  0x6b   : > { %v709_v0 = vsel %vm646_vm0, %v707_v56, %v708_v12  ;;  %v711_v34 = vsel %vm646_vm0, %v708_v12, %v710_v25  ;;  %v714_v42 = vsel %vm646_vm0, %v712_v52, %v713_v53  ;;  %v716_v31 = vsel %vm646_vm0, %v713_v53, %v715_v13 }
  0x6c   : > { %v719_v32 = vsel %vm646_vm0, %v717_v61, %v718_v1  ;;  %v721_v18 = vsel %vm646_vm0, %v718_v1, %v720_v4  ;;  %v4540_v22 = vadd.f32 %v4459_v9, %v4059_v46  ;;  %v4544_v27 = vadd.f32 %v4464_v41, %v4070_v51  ;;  %v8535_v46 = vld [vmem:[#allocation33_spill] sm:$0xff] }
  0x6d   : > { %v4548_v39 = vadd.f32 %v4467_v15, %v4082_v57  ;;  %v724_v36 = vsel %vm646_vm0, %v722_v24, %v723_v5  ;;  %v726_v37 = vsel %vm646_vm0, %v723_v5, %v725_v6  ;;  %v4554_v60 = vadd.f32 %v4470_v17, %v4093_v62  ;;  %v8536_v51 = vld [vmem:[#allocation37_spill] sm:$0xff]  ;;  %v8539_v15 = vld [vmem:[#allocation43_spill] sm:$0xff] }
  0x6e   : > { %v4557_v49 = vadd.f32 %v659_v30, %v8534_v63  ;;  %v4560_v9 = vadd.f32 %v661_v43, %v8535_v46  ;;  %v4563_v41 = vadd.f32 %v664_v20, %v8536_v51  ;;  %v4566_v57 = vadd.f32 %v666_v35, %v8537_v40  ;;  %v8543_v62 = vld [vmem:[#allocation45_spill] sm:$0xff]  ;;  %v8545_v30 = vld [vmem:[#allocation46_spill] sm:$0xff]  ;;  %v8547_v43 = vld [vmem:[#allocation47_spill] sm:$0xff] }
  0x6f   : > { %v4569_v23 = vadd.f32 %v669_v44, %v8539_v15  ;;  %v4572_v28 = vadd.f32 %v671_v10, %v8541_v33  ;;  %v4575_v17 = vadd.f32 %v674_v45, %v8543_v62  ;;  %v4578_v50 = vadd.f32 %v676_v16, %v8545_v30  ;;  %v8549_v20 = vld [vmem:[#allocation48_spill] sm:$0xff]  ;;  %v8551_v35 = vld [vmem:[#allocation49_spill] sm:$0xff]  ;;  %v8553_v44 = vld [vmem:[#allocation50_spill] sm:$0xff] }
  0x70   : > { %8538 = vst [vmem:[#allocation29_spill] sm:$0xff] %v4566_v57  ;;  %v4581_v19 = vadd.f32 %v679_v47, %v8547_v43  ;;  %v4584_v3 = vadd.f32 %v681_v11, %v8549_v20  ;;  %v4587_v56 = vadd.f32 %v684_v48, %v8551_v35  ;;  %v4590_v12 = vadd.f32 %v686_v14, %v8553_v44  ;;  %v8555_v10 = vld [vmem:[#allocation51_spill] sm:$0xff]  ;;  %v8557_v45 = vld [vmem:[#allocation52_spill] sm:$0xff]  ;;  %v8559_v16 = vld [vmem:[#allocation53_spill] sm:$0xff] }
  0x71   : > { %8540 = vst [vmem:[#allocation33_spill] sm:$0xff] %v4569_v23  ;;  %v4593_v25 = vadd.f32 %v689_v29, %v8555_v10  ;;  %v4596_v52 = vadd.f32 %v691_v8, %v8557_v45  ;;  %v4599_v53 = vadd.f32 %v694_v58, %v8559_v16  ;;  %v8561_v47 = vld [vmem:[#allocation54_spill] sm:$0xff]  ;;  %v8564_v48 = vld [vmem:[#allocation55_spill] sm:$0xff]  ;;  %v8566_v14 = vld [vmem:[#allocation56_spill] sm:$0xff] }
  0x72   : > { %8542 = vst [vmem:[#allocation37_spill] sm:$0xff] %v4572_v28  ;;  %v4602_v13 = vadd.f32 %v696_v59, %v8561_v47  ;;  %v8563_v11 = vld [vmem:[#allocation2_spill] sm:$0xff]  ;;  %v4608_v1 = vadd.f32 %v699_v2, %v8564_v48  ;;  %v4611_v4 = vadd.f32 %v701_v55, %v8566_v14  ;;  %v8568_v29 = vld [vmem:[#allocation57_spill] sm:$0xff]  ;;  %v8572_v58 = vld [vmem:[#allocation59_spill] sm:$0xff] }
  0x73   : > { %8544 = vst [vmem:[#allocation41_spill] sm:$0xff] %v4575_v17  ;;  %v4605_v61 = vperm.slane %v8563_v11, 2  ;;  %v4614_v24 = vadd.f32 %v704_v54, %v8568_v29  ;;  %v8570_v8 = vld [vmem:[#allocation58_spill] sm:$0xff]  ;;  %v4620_v6 = vadd.f32 %v709_v0, %v8572_v58  ;;  %v8574_v59 = vld [vmem:[#allocation60_spill] sm:$0xff]  ;;  %v8576_v46 = vld [vmem:[#allocation61_spill] sm:$0xff]  ;;  %v4641_v0 = vadd.f32 %v726_v37, %v4247_v21 }
  0x74   : > { %8546 = vst [vmem:[#allocation43_spill] sm:$0xff] %v4578_v50  ;;  %v4617_v5 = vadd.f32 %v706_v26, %v8570_v8  ;;  %v4623_v63 = vadd.f32 %v711_v34, %v8574_v59  ;;  %v4626_v51 = vadd.f32 %v714_v42, %v8576_v46  ;;  %v8578_v2 = vld [vmem:[#allocation62_spill] sm:$0xff]  ;;  %v8580_v55 = vld [vmem:[#allocation63_spill] sm:$0xff]  ;;  %v8582_v54 = vld [vmem:[#allocation64_spill] sm:$0xff]  ;;  %v4651_v35 = vperm.slane %v8563_v11, 3 }
  0x75   : > { %8548 = vst [vmem:[#allocation44_spill] sm:$0xff] %v4581_v19  ;;  %v4629_v40 = vadd.f32 %v716_v31, %v8578_v2  ;;  %v4632_v15 = vadd.f32 %v719_v32, %v8580_v55  ;;  %v4635_v33 = vadd.f32 %v721_v18, %v8582_v54  ;;  %v8584_v26 = vld [vmem:[#allocation65_spill] sm:$0xff]  ;;  %v8587_v34 = vld [vmem:[#allocation4_spill] sm:$0xff]  ;;  %v8589_v31 = vld [vmem:[#allocation3_spill] sm:$0xff] }
  0x76   : > { %8550 = vst [vmem:[#allocation45_spill] sm:$0xff] %v4584_v3  ;;  %v4638_v62 = vadd.f32 %v724_v36, %v8584_v26  ;;  %v792_v30 = vmul.f32 %v8587_v34, %v4605_v61  ;;  %v8588_v42 = vld [vmem:[#allocation5_spill] sm:$0xff]  ;;  %v8590_v20 = vunpack.c.l.bf16 %v8589_v31  ;;  %v8592_v18 = vld [vmem:[#allocation6_spill] sm:$0xff]  ;;  %v8595_v45 = vld [vmem:[#allocation7_spill] sm:$0xff] }
  0x77   : > { %8552 = vst [vmem:[#allocation46_spill] sm:$0xff] %v4587_v56  ;;  %v793_v43 = vmul.f32 %v8588_v42, %v4605_v61  ;;  %v795_v36 = vmul.f32 %v4605_v61, %v8592_v18  ;;  %v8593_v44 = vld [vmem:[#allocation9_spill] sm:$0xff]  ;;  %v4665_v16 = vmul.f32 %v8595_v45, %v4605_v61  ;;  %v8596_v47 = vld [vmem:[#allocation8_spill] sm:$0xff]  ;;  %v8597_v14 = vld [vmem:[#allocation66_spill] sm:$0xff] }
  0x78   : > { %8554 = vst [vmem:[#allocation47_spill] sm:$0xff] %v4590_v12  ;;  %v794_v32 = vmul.f32 %v4605_v61, %v8590_v20  ;;  %v4657_v21 = vmul.f32 %v4605_v61, %v8593_v44  ;;  %v8594_v37 = vld [vmem:[#allocation13_spill] sm:$0xff]  ;;  %v4669_v48 = vmul.f32 %v8596_v47, %v4605_v61  ;;  %v4673_v29 = vmul.f32 %v4605_v61, %v8597_v14  ;;  %v8598_v8 = vld [vmem:[#allocation12_spill] sm:$0xff]  ;;  %v8599_v59 = vld [vmem:[#allocation14_spill] sm:$0xff] }
  0x79   : > { %8556 = vst [vmem:[#allocation48_spill] sm:$0xff] %v4593_v25  ;;  %v4661_v10 = vmul.f32 %v4605_v61, %v8594_v37  ;;  %v4677_v58 = vmul.f32 %v4605_v61, %v8598_v8  ;;  %v4681_v46 = vmul.f32 %v4605_v61, %v8599_v59  ;;  %v8600_v2 = vld [vmem:[#allocation67_spill] sm:$0xff]  ;;  %v8601_v54 = vld [vmem:[#allocation10_spill] sm:$0xff]  ;;  %v8603_v31 = vld [vmem:[#allocation68_spill] sm:$0xff]  ;;  %v890_v25 = vrot.slane %v793_v43, 2 }
  0x7a   : > { %8558 = vst [vmem:[#allocation49_spill] sm:$0xff] %v4596_v52  ;;  %v4685_v55 = vmul.f32 %v4605_v61, %v8600_v2  ;;  %v4689_v26 = vmul.f32 %v8601_v54, %v4605_v61  ;;  %v8602_v34 = vld [vmem:[#allocation11_spill] sm:$0xff]  ;;  %v4697_v20 = vmul.f32 %v4605_v61, %v8603_v31  ;;  %v8605_v11 = vld [vmem:[#allocation16_spill] sm:$0xff]  ;;  %v8606_v59 = vld [vmem:[#allocation69_spill] sm:$0xff]  ;;  %v889_v52 = vrot.slane %v792_v30, 2 }
  0x7b   : > { %8560 = vst [vmem:[#allocation50_spill] sm:$0xff] %v4599_v53  ;;  %v4693_v42 = vmul.f32 %v8602_v34, %v4605_v61  ;;  %v8604_v14 = vld [vmem:[#allocation15_spill] sm:$0xff]  ;;  %v4705_v2 = vmul.f32 %v4605_v61, %v8605_v11  ;;  %v4709_v54 = vmul.f32 %v4605_v61, %v8606_v59  ;;  %v8607_v34 = vld [vmem:[#allocation17_spill] sm:$0xff]  ;;  %v8608_v31 = vld [vmem:[#allocation18_spill] sm:$0xff]  ;;  %v895_v19 = vrot.slane %v4657_v21, 2 }
  0x7c   : > { %8562 = vst [vmem:[#allocation51_spill] sm:$0xff] %v4602_v13  ;;  %v4701_v37 = vmul.f32 %v4605_v61, %v8604_v14  ;;  %v4713_v8 = vmul.f32 %v8607_v34, %v4605_v61  ;;  %v4717_v47 = vmul.f32 %v8608_v31, %v4605_v61  ;;  %v8609_v45 = vld [vmem:[#allocation70_spill] sm:$0xff]  ;;  %v8610_v44 = vld [vmem:[#allocation19_spill] sm:$0xff]  ;;  %v8627_v12 = vld [vmem:[#allocation36_spill] sm:$0xff]  ;;  %v897_v28 = vrot.slane %v4661_v10, 2 }
  0x7d   : > { %8565 = vst [vmem:[#allocation52_spill] sm:$0xff] %v4608_v1  ;;  %v4721_v14 = vmul.f32 %v4605_v61, %v8609_v45  ;;  %v4725_v11 = vmul.f32 %v4605_v61, %v8610_v44  ;;  %v8612_v18 = vld [vmem:[#allocation71_spill] sm:$0xff]  ;;  %v8625_v13 = vld [vmem:[#allocation30_spill] sm:$0xff]  ;;  %v4801_v56 = vmul.f32 %v4605_v61, %v8627_v12  ;;  %v8632_v12 = vld [vmem:[#allocation40_spill] sm:$0xff]  ;;  %v4835_v23 = vsel %vm888_vm1, %v889_v52, %v890_v25 }
  0x7e   : > { %8567 = vst [vmem:[#allocation53_spill] sm:$0xff] %v4611_v4  ;;  %v4733_v34 = vmul.f32 %v4605_v61, %v8612_v18  ;;  %v8623_v4 = vld [vmem:[#allocation28_spill] sm:$0xff]  ;;  %v8624_v1 = vld [vmem:[#allocation75_spill] sm:$0xff]  ;;  %v8631_v43 = vld [vmem:[#allocation78_spill] sm:$0xff]  ;;  %v4822_v17 = vmul.f32 %v4605_v61, %v8632_v12  ;;  %v900_v12 = vrot.slane %v4669_v48, 2  ;;  %v902_v57 = vrot.slane %v4673_v29, 2 }
  0x7f   : > { %8569 = vst [vmem:[#allocation54_spill] sm:$0xff] %v4614_v24  ;;  %v8622_v24 = vld [vmem:[#allocation27_spill] sm:$0xff]  ;;  %v907_v10 = vrot.slane %v4685_v55, 2  ;;  %v910_v52 = vrot.slane %v4693_v42, 2  ;;  %v915_v48 = vrot.slane %v4705_v2, 2  ;;  %v917_v29 = vrot.slane %v4709_v54, 2 }
  0x80   : > { %8571 = vst [vmem:[#allocation55_spill] sm:$0xff] %v4617_v5  ;;  %v8621_v5 = vld [vmem:[#allocation74_spill] sm:$0xff]  ;;  %v8626_v53 = vld [vmem:[#allocation31_spill] sm:$0xff]  ;;  %v924_v55 = vrot.slane %v4725_v11, 2  ;;  %v927_v42 = vrot.slane %v4733_v34, 2 }
  0x81   : > { %8573 = vst [vmem:[#allocation56_spill] sm:$0xff] %v4620_v6  ;;  %v8620_v6 = vld [vmem:[#allocation24_spill] sm:$0xff]  ;;  %v8634_v21 = vld [vmem:[#allocation79_spill] sm:$0xff] }
  0x82   : > { %8575 = vst [vmem:[#allocation57_spill] sm:$0xff] %v4623_v63  ;;  %v8619_v63 = vld [vmem:[#allocation23_spill] sm:$0xff] }
  0x83   : > { %8577 = vst [vmem:[#allocation58_spill] sm:$0xff] %v4626_v51  ;;  %v8618_v51 = vld [vmem:[#allocation73_spill] sm:$0xff] }
  0x84   : > { %8579 = vst [vmem:[#allocation59_spill] sm:$0xff] %v4629_v40  ;;  %v8617_v40 = vld [vmem:[#allocation26_spill] sm:$0xff] }
  0x85   : > { %8581 = vst [vmem:[#allocation60_spill] sm:$0xff] %v4632_v15  ;;  %v8616_v15 = vld [vmem:[#allocation25_spill] sm:$0xff]  ;;  %v4753_v18 = vmul.f32 %v4605_v61, %v8617_v40  ;;  %v4773_v40 = vmul.f32 %v4605_v61, %v8622_v24  ;;  %v4793_v24 = vmul.f32 %v4605_v61, %v4269_v38  ;;  %v8629_v38 = vld [vmem:[#allocation34_spill] sm:$0xff] }
  0x86   : > { %8583 = vst [vmem:[#allocation61_spill] sm:$0xff] %v4635_v33  ;;  %v8615_v33 = vld [vmem:[#allocation72_spill] sm:$0xff]  ;;  %v4810_v50 = vmul.f32 %v8629_v38, %v4605_v61  ;;  %v4830_v38 = vmul.f32 %v4605_v61, %v8634_v21  ;;  %v905_v21 = vrot.slane %v4681_v46, 2  ;;  %v922_v46 = vrot.slane %v4721_v14, 2 }
  0x87   : > { %8585 = vst [vmem:[#allocation62_spill] sm:$0xff] %v4638_v62  ;;  %v8614_v62 = vld [vmem:[#allocation21_spill] sm:$0xff]  ;;  %v4745_v44 = vmul.f32 %v4605_v61, %v8615_v33  ;;  %v4765_v33 = vmul.f32 %v8620_v6, %v4605_v61  ;;  %v4785_v6 = vmul.f32 %v8625_v13, %v4605_v61 }
  0x88   : > { %8586 = vst [vmem:[#allocation63_spill] sm:$0xff] %v4641_v0  ;;  %v8613_v0 = vld [vmem:[#allocation20_spill] sm:$0xff]  ;;  %v4741_v45 = vmul.f32 %v8614_v62, %v4605_v61  ;;  %v4761_v62 = vmul.f32 %v8619_v63, %v4605_v61  ;;  %v4781_v63 = vmul.f32 %v4605_v61, %v8624_v1  ;;  %v892_v1 = vrot.slane %v794_v32, 2  ;;  %v8628_v13 = vld [vmem:[#allocation77_spill] sm:$0xff] }
  0x89   : > { %8591 = vst [vmem:[#allocation64_spill] sm:$0xff] %v4651_v35  ;;  %v8611_v35 = vld [vmem:[#allocation22_spill] sm:$0xff]  ;;  %v4737_v31 = vmul.f32 %v8613_v0, %v4605_v61  ;;  %v4757_v0 = vmul.f32 %v4605_v61, %v8618_v51  ;;  %v4777_v51 = vmul.f32 %v4605_v61, %v8623_v4  ;;  %v4797_v4 = vmul.f32 %v4605_v61, %v4111_v7  ;;  %v8630_v7 = vld [vmem:[#allocation35_spill] sm:$0xff] }
  0x8a   : > { %v4729_v59 = vmul.f32 %v4605_v61, %v8611_v35  ;;  %v4749_v35 = vmul.f32 %v4605_v61, %v8616_v15  ;;  %v4769_v15 = vmul.f32 %v4605_v61, %v8621_v5  ;;  %v4789_v5 = vmul.f32 %v8626_v53, %v4605_v61 }
  0x8b   : > { %v4805_v3 = vmul.f32 %v4605_v61, %v8628_v13  ;;  %v894_v53 = vrot.slane %v795_v36, 2  ;;  %v4814_v30 = vmul.f32 %v8630_v7, %v4605_v61  ;;  %v4818_v32 = vmul.f32 %v4605_v61, %v8631_v43  ;;  %v8633_v13 = vld [vmem:[#allocation42_spill] sm:$0xff] }
  0x8c   : > { %v4826_v36 = vmul.f32 %v4605_v61, %v8633_v13  ;;  %v899_v7 = vrot.slane %v4665_v16, 2  ;;  %v4838_v43 = vsel %vm888_vm1, %v890_v25, %v892_v1  ;;  %v904_v61 = vrot.slane %v4677_v58, 2 }
  0x8d   : > { %v4843_v13 = vsel %vm888_vm1, %v894_v53, %v895_v19  ;;  %v909_v16 = vrot.slane %v4689_v26, 2  ;;  %v912_v25 = vrot.slane %v4697_v20, 2  ;;  %v914_v1 = vrot.slane %v4701_v37, 2 }
  0x8e   : > { %v919_v53 = vrot.slane %v4713_v8, 2  ;;  %v920_v58 = vrot.slane %v4717_v47, 2  ;;  %v925_v26 = vrot.slane %v4729_v59, 2  ;;  %v898_v20 = vsel %vm888_vm1, %v895_v19, %v897_v28 }
  0x8f   : > { %v901_v37 = vsel %vm888_vm1, %v899_v7, %v900_v12  ;;  %v929_v2 = vrot.slane %v4737_v31, 2  ;;  %v930_v54 = vrot.slane %v4741_v45, 2  ;;  %v903_v8 = vsel %vm888_vm1, %v900_v12, %v902_v57 }
  0x90   : > { %v906_v47 = vsel %vm888_vm1, %v904_v61, %v905_v21  ;;  %v908_v14 = vsel %vm888_vm1, %v905_v21, %v907_v10  ;;  %v932_v11 = vrot.slane %v4745_v44, 2  ;;  %v911_v59 = vsel %vm888_vm1, %v909_v16, %v910_v52 }
  0x91   : > { %v913_v34 = vsel %vm888_vm1, %v910_v52, %v912_v25  ;;  %v916_v28 = vsel %vm888_vm1, %v914_v1, %v915_v48  ;;  %v918_v7 = vsel %vm888_vm1, %v915_v48, %v917_v29  ;;  %v921_v19 = vsel %vm888_vm1, %v919_v53, %v920_v58 }
  0x92   : > { %v923_v45 = vsel %vm888_vm1, %v920_v58, %v922_v46  ;;  %v926_v57 = vsel %vm888_vm1, %v924_v55, %v925_v26  ;;  %v928_v12 = vsel %vm888_vm1, %v925_v26, %v927_v42  ;;  %v931_v31 = vsel %vm888_vm1, %v929_v2, %v930_v54 }
  0x93   : > { %v934_v44 = vrot.slane %v4749_v35, 2  ;;  %v935_v21 = vrot.slane %v4753_v18, 2  ;;  %v937_v61 = vrot.slane %v4757_v0, 2  ;;  %v933_v10 = vsel %vm888_vm1, %v930_v54, %v932_v11 }
  0x94   : > { %v939_v16 = vrot.slane %v4761_v62, 2  ;;  %v940_v52 = vrot.slane %v4765_v33, 2  ;;  %v942_v25 = vrot.slane %v4769_v15, 2  ;;  %v944_v1 = vrot.slane %v4773_v40, 2 }
  0x95   : > { %v945_v48 = vrot.slane %v4777_v51, 2  ;;  %v947_v29 = vrot.slane %v4781_v63, 2  ;;  %v949_v35 = vrot.slane %v4785_v6, 2  ;;  %v950_v18 = vrot.slane %v4789_v5, 2 }
  0x96   : > { %v952_v0 = vrot.slane %v4793_v24, 2  ;;  %v954_v53 = vrot.slane %v4797_v4, 2  ;;  %v955_v62 = vrot.slane %v4801_v56, 2  ;;  %v957_v33 = vrot.slane %v4805_v3, 2 }
  0x97   : > { %v959_v15 = vrot.slane %v4810_v50, 2  ;;  %v960_v40 = vrot.slane %v4814_v30, 2  ;;  %v962_v51 = vrot.slane %v4818_v32, 2  ;;  %v936_v63 = vsel %vm888_vm1, %v934_v44, %v935_v21 }
  0x98   : > { %v964_v6 = vrot.slane %v4822_v17, 2  ;;  %v965_v5 = vrot.slane %v4826_v36, 2  ;;  %v967_v24 = vrot.slane %v4830_v38, 2  ;;  %v938_v4 = vsel %vm888_vm1, %v935_v21, %v937_v61  ;;  %v8635_v21 = vld [vmem:[#allocation29_spill] sm:$0xff] }
  0x99   : > { %v941_v56 = vsel %vm888_vm1, %v939_v16, %v940_v52  ;;  %v943_v3 = vsel %vm888_vm1, %v940_v52, %v942_v25  ;;  %v946_v50 = vsel %vm888_vm1, %v944_v1, %v945_v48  ;;  %v948_v30 = vsel %vm888_vm1, %v945_v48, %v947_v29 }
  0x9a   : > { %v951_v32 = vsel %vm888_vm1, %v949_v35, %v950_v18  ;;  %v953_v58 = vsel %vm888_vm1, %v950_v18, %v952_v0  ;;  %v956_v17 = vsel %vm888_vm1, %v954_v53, %v955_v62  ;;  %v958_v36 = vsel %vm888_vm1, %v955_v62, %v957_v33  ;;  %v8654_v33 = vld [vmem:[#allocation57_spill] sm:$0xff] }
  0x9b   : > { %v961_v38 = vsel %vm888_vm1, %v959_v15, %v960_v40  ;;  %v963_v46 = vsel %vm888_vm1, %v960_v40, %v962_v51  ;;  %v4913_v55 = vadd.f32 %v4835_v23, %v4540_v22  ;;  %v966_v26 = vsel %vm888_vm1, %v964_v6, %v965_v5  ;;  %v8656_v40 = vld [vmem:[#allocation58_spill] sm:$0xff] }
  0x9c   : > { %v968_v42 = vsel %vm888_vm1, %v965_v5, %v967_v24  ;;  %v4919_v2 = vadd.f32 %v4838_v43, %v4544_v27  ;;  %v4923_v54 = vadd.f32 %v4843_v13, %v4548_v39  ;;  %v4926_v11 = vadd.f32 %v898_v20, %v4554_v60  ;;  %v8636_v27 = vld [vmem:[#allocation33_spill] sm:$0xff]  ;;  %v8660_v5 = vld [vmem:[#allocation60_spill] sm:$0xff] }
  0x9d   : > { %v4929_v44 = vadd.f32 %v901_v37, %v4557_v49  ;;  %v4932_v22 = vadd.f32 %v903_v8, %v4560_v9  ;;  %v4935_v23 = vadd.f32 %v906_v47, %v4563_v41  ;;  %v4938_v61 = vadd.f32 %v908_v14, %v8635_v21  ;;  %v8637_v39 = vld [vmem:[#allocation37_spill] sm:$0xff]  ;;  %v8639_v49 = vld [vmem:[#allocation43_spill] sm:$0xff]  ;;  %v8640_v9 = vld [vmem:[#allocation44_spill] sm:$0xff] }
  0x9e   : > { %v4941_v43 = vadd.f32 %v911_v59, %v8636_v27  ;;  %v4944_v13 = vadd.f32 %v913_v34, %v8637_v39  ;;  %v8638_v60 = vld [vmem:[#allocation41_spill] sm:$0xff]  ;;  %v4950_v37 = vadd.f32 %v918_v7, %v8639_v49  ;;  %v4953_v8 = vadd.f32 %v921_v19, %v8640_v9  ;;  %v8642_v14 = vld [vmem:[#allocation46_spill] sm:$0xff]  ;;  %v8643_v59 = vld [vmem:[#allocation47_spill] sm:$0xff] }
  0x9f   : > { %v4947_v20 = vadd.f32 %v916_v28, %v8638_v60  ;;  %v8641_v41 = vld [vmem:[#allocation45_spill] sm:$0xff]  ;;  %v4959_v16 = vadd.f32 %v926_v57, %v8642_v14  ;;  %v4962_v52 = vadd.f32 %v928_v12, %v8643_v59  ;;  %v8644_v34 = vld [vmem:[#allocation48_spill] sm:$0xff]  ;;  %v8646_v7 = vld [vmem:[#allocation50_spill] sm:$0xff]  ;;  %v4992_v15 = vadd.f32 %v953_v58, %v8654_v33 }
  0xa0   : > { %v4956_v47 = vadd.f32 %v923_v45, %v8641_v41  ;;  %v4965_v25 = vadd.f32 %v931_v31, %v8644_v34  ;;  %v8645_v28 = vld [vmem:[#allocation49_spill] sm:$0xff]  ;;  %v4971_v48 = vadd.f32 %v936_v63, %v8646_v7  ;;  %v8647_v19 = vld [vmem:[#allocation51_spill] sm:$0xff]  ;;  %v8648_v45 = vld [vmem:[#allocation52_spill] sm:$0xff]  ;;  %v4995_v51 = vadd.f32 %v956_v17, %v8656_v40 }
  0xa1   : > { %v4968_v1 = vadd.f32 %v933_v10, %v8645_v28  ;;  %v4974_v29 = vadd.f32 %v938_v4, %v8647_v19  ;;  %v4977_v35 = vadd.f32 %v941_v56, %v8648_v45  ;;  %v8649_v57 = vld [vmem:[#allocation53_spill] sm:$0xff]  ;;  %v8650_v12 = vld [vmem:[#allocation54_spill] sm:$0xff]  ;;  %v8651_v31 = vld [vmem:[#allocation55_spill] sm:$0xff]  ;;  %8655 = vst [vmem:[#allocation4_spill] sm:$0xff] %v4992_v15  ;;  %v5001_v24 = vadd.f32 %v961_v38, %v8660_v5 }
  0xa2   : > { %v4980_v18 = vadd.f32 %v943_v3, %v8649_v57  ;;  %v4983_v0 = vadd.f32 %v946_v50, %v8650_v12  ;;  %v4986_v53 = vadd.f32 %v948_v30, %v8651_v31  ;;  %v8652_v10 = vld [vmem:[#allocation56_spill] sm:$0xff]  ;;  %8657 = vst [vmem:[#allocation5_spill] sm:$0xff] %v4995_v51  ;;  %v8658_v63 = vld [vmem:[#allocation59_spill] sm:$0xff]  ;;  %v8662_v4 = vld [vmem:[#allocation61_spill] sm:$0xff] }
  0xa3   : > { %v4989_v62 = vadd.f32 %v951_v32, %v8652_v10  ;;  %v4998_v6 = vadd.f32 %v958_v36, %v8658_v63  ;;  %8661 = vst [vmem:[#allocation29_spill] sm:$0xff] %v5001_v24  ;;  %v5004_v56 = vadd.f32 %v963_v46, %v8662_v4  ;;  %v8664_v3 = vld [vmem:[#allocation62_spill] sm:$0xff]  ;;  %v8666_v30 = vld [vmem:[#allocation63_spill] sm:$0xff]  ;;  %v8669_v21 = vld [vmem:[#allocation64_spill] sm:$0xff] }
  0xa4   : > { %v5007_v50 = vadd.f32 %v966_v26, %v8664_v3  ;;  %v5010_v32 = vadd.f32 %v968_v42, %v8666_v30  ;;  %v8668_v58 = vld [vmem:[#allocation6_spill] sm:$0xff]  ;;  %v8670_v17 = vld [vmem:[#allocation9_spill] sm:$0xff]  ;;  %v8671_v36 = vld [vmem:[#allocation7_spill] sm:$0xff] }
  0xa5   : > { %8653 = vst [vmem:[#allocation65_spill] sm:$0xff] %v4989_v62  ;;  %v1036_v27 = vmul.f32 %v8669_v21, %v8668_v58  ;;  %v1037_v39 = vmul.f32 %v8669_v21, %v8670_v17  ;;  %v1038_v60 = vmul.f32 %v8671_v36, %v8669_v21  ;;  %v8672_v38 = vld [vmem:[#allocation8_spill] sm:$0xff]  ;;  %v8674_v26 = vld [vmem:[#allocation14_spill] sm:$0xff]  ;;  %v8676_v59 = vld [vmem:[#allocation11_spill] sm:$0xff] }
  0xa6   : > { %8659 = vst [vmem:[#allocation3_spill] sm:$0xff] %v4998_v6  ;;  %v1039_v49 = vmul.f32 %v8672_v38, %v8669_v21  ;;  %v8673_v46 = vld [vmem:[#allocation12_spill] sm:$0xff]  ;;  %v1041_v41 = vmul.f32 %v8669_v21, %v8674_v26  ;;  %v8675_v42 = vld [vmem:[#allocation10_spill] sm:$0xff]  ;;  %v1043_v34 = vmul.f32 %v8676_v59, %v8669_v21  ;;  %v8677_v28 = vld [vmem:[#allocation15_spill] sm:$0xff] }
  0xa7   : > { %8663 = vst [vmem:[#allocation33_spill] sm:$0xff] %v5004_v56  ;;  %v1040_v9 = vmul.f32 %v8669_v21, %v8673_v46  ;;  %v1042_v14 = vmul.f32 %v8675_v42, %v8669_v21  ;;  %v1044_v7 = vmul.f32 %v8669_v21, %v8677_v28  ;;  %v8678_v19 = vld [vmem:[#allocation16_spill] sm:$0xff]  ;;  %v8679_v57 = vld [vmem:[#allocation17_spill] sm:$0xff]  ;;  %v8680_v31 = vld [vmem:[#allocation18_spill] sm:$0xff] }
  0xa8   : > { %8665 = vst [vmem:[#allocation37_spill] sm:$0xff] %v5007_v50  ;;  %v1045_v45 = vmul.f32 %v8669_v21, %v8678_v19  ;;  %v1046_v12 = vmul.f32 %v8679_v57, %v8669_v21  ;;  %v1047_v10 = vmul.f32 %v8680_v31, %v8669_v21  ;;  %v8681_v33 = vld [vmem:[#allocation19_spill] sm:$0xff]  ;;  %v8682_v63 = vld [vmem:[#allocation22_spill] sm:$0xff]  ;;  %v8683_v4 = vld [vmem:[#allocation20_spill] sm:$0xff] }
  0xa9   : > { %8667 = vst [vmem:[#allocation41_spill] sm:$0xff] %v5010_v32  ;;  %v1048_v40 = vmul.f32 %v8669_v21, %v8681_v33  ;;  %v1049_v5 = vmul.f32 %v8669_v21, %v8682_v63  ;;  %v1050_v3 = vmul.f32 %v8683_v4, %v8669_v21  ;;  %v8684_v30 = vld [vmem:[#allocation21_spill] sm:$0xff]  ;;  %v8686_v42 = vld [vmem:[#allocation26_spill] sm:$0xff]  ;;  %v8687_v31 = vld [vmem:[#allocation23_spill] sm:$0xff] }
  0xaa   : > { %v1051_v28 = vmul.f32 %v8684_v30, %v8669_v21  ;;  %v8685_v59 = vld [vmem:[#allocation25_spill] sm:$0xff]  ;;  %v1053_v57 = vmul.f32 %v8669_v21, %v8686_v42  ;;  %v1054_v26 = vmul.f32 %v8687_v31, %v8669_v21  ;;  %v8688_v33 = vld [vmem:[#allocation24_spill] sm:$0xff]  ;;  %v8689_v38 = vld [vmem:[#allocation27_spill] sm:$0xff] }
  0xab   : > { %v1052_v19 = vmul.f32 %v8669_v21, %v8685_v59  ;;  %v1055_v46 = vmul.f32 %v8688_v33, %v8669_v21  ;;  %v1056_v63 = vmul.f32 %v8669_v21, %v8689_v38  ;;  %v8690_v36 = vld [vmem:[#allocation28_spill] sm:$0xff]  ;;  %v8691_v30 = vld [vmem:[#allocation30_spill] sm:$0xff]  ;;  %v8692_v59 = vld [vmem:[#allocation31_spill] sm:$0xff] }
  0xac   : > { %v1057_v4 = vmul.f32 %v8669_v21, %v8690_v36  ;;  %v1058_v17 = vmul.f32 %v8691_v30, %v8669_v21  ;;  %v1059_v58 = vmul.f32 %v8692_v59, %v8669_v21  ;;  %v8693_v32 = vld [vmem:[#allocation32_spill] sm:$0xff]  ;;  %v8695_v33 = vld [vmem:[#allocation34_spill] sm:$0xff]  ;;  %v8696_v38 = vld [vmem:[#allocation35_spill] sm:$0xff] }
  0xad   : > { %v1060_v42 = vmul.f32 %v8669_v21, %v8693_v32  ;;  %v8694_v50 = vld [vmem:[#allocation36_spill] sm:$0xff]  ;;  %v1062_v56 = vmul.f32 %v8695_v33, %v8669_v21  ;;  %v1063_v24 = vmul.f32 %v8696_v38, %v8669_v21  ;;  %v8698_v51 = vld [vmem:[#allocation42_spill] sm:$0xff]  ;;  %v8700_v32 = vld [vmem:[#allocation39_spill] sm:$0xff]  ;;  %v5080_v33 = vadd.f32 %v1037_v39, %v4919_v2 }
  0xae   : > { %v1061_v31 = vmul.f32 %v8669_v21, %v8694_v50  ;;  %v8697_v6 = vld [vmem:[#allocation40_spill] sm:$0xff]  ;;  %v1065_v30 = vmul.f32 %v8669_v21, %v8698_v51  ;;  %v8699_v59 = vld [vmem:[#allocation38_spill] sm:$0xff]  ;;  %v1067_v62 = vmul.f32 %v8700_v32, %v8669_v21  ;;  %v5077_v50 = vadd.f32 %v1036_v27, %v4913_v55 }
  0xaf   : > { %v1064_v36 = vmul.f32 %v8669_v21, %v8697_v6  ;;  %v1066_v15 = vmul.f32 %v8699_v59, %v8669_v21  ;;  %v5083_v38 = vadd.f32 %v1038_v60, %v4923_v54  ;;  %v5086_v6 = vadd.f32 %v1039_v49, %v4926_v11 }
  0xb0   : > { %v5089_v51 = vadd.f32 %v1040_v9, %v4929_v44  ;;  %v5092_v59 = vadd.f32 %v1041_v41, %v4932_v22  ;;  %v5095_v21 = vadd.f32 %v1042_v14, %v4935_v23  ;;  %v5098_v55 = vadd.f32 %v1043_v34, %v4938_v61 }
  0xb1   : > { %v5101_v2 = vadd.f32 %v1044_v7, %v4941_v43  ;;  %v5104_v54 = vadd.f32 %v1045_v45, %v4944_v13  ;;  %v5107_v11 = vadd.f32 %v1046_v12, %v4947_v20  ;;  %v5110_v44 = vadd.f32 %v1047_v10, %v4950_v37  ;;  %v8738_v7 = vld [vmem:[#allocation9_spill] sm:$0xff] }
  0xb2   : > { %8701 = vst [vmem:[#allocation43_spill] sm:$0xff] %v5098_v55  ;;  %v5113_v22 = vadd.f32 %v1048_v40, %v4953_v8  ;;  %v5116_v23 = vadd.f32 %v1049_v5, %v4956_v47  ;;  %v5119_v61 = vadd.f32 %v1050_v3, %v4959_v16  ;;  %v5122_v43 = vadd.f32 %v1051_v28, %v4962_v52  ;;  %v430_v8 = vld [vmem:[%s4002_s12 + $0xc8] sm:$0x1]  ;;  %v8716_v52 = vld [vmem:[#allocation2_spill] sm:$0xff]  ;;  %v8743_v40 = vld [vmem:[#allocation12_spill] sm:$0xff] }
  0xb3   : > { %8702 = vst [vmem:[#allocation44_spill] sm:$0xff] %v5101_v2  ;;  %v5125_v13 = vadd.f32 %v1052_v19, %v4965_v25  ;;  %v5128_v20 = vadd.f32 %v1053_v57, %v4968_v1  ;;  %v5131_v37 = vadd.f32 %v1054_v26, %v4971_v48  ;;  %v5135_v27 = vadd.f32 %v1055_v46, %v4974_v29  ;;  %v8719_v48 = vld [vmem:[#allocation65_spill] sm:$0xff]  ;;  %v8721_v29 = vld [vmem:[#allocation4_spill] sm:$0xff]  ;;  %v8737_v28 = vld [vmem:[#allocation6_spill] sm:$0xff] }
  0xb4   : > { %8703 = vst [vmem:[#allocation45_spill] sm:$0xff] %v5104_v54  ;;  %v5138_v47 = vadd.f32 %v1056_v63, %v4977_v35  ;;  %v5141_v16 = vadd.f32 %v1057_v4, %v4980_v18  ;;  %v5144_v39 = vperm.slane %v8716_v52, 4  ;;  %v5147_v25 = vadd.f32 %v1058_v17, %v4983_v0  ;;  %v8723_v35 = vld [vmem:[#allocation5_spill] sm:$0xff]  ;;  %v8725_v18 = vld [vmem:[#allocation3_spill] sm:$0xff]  ;;  %v8744_v5 = vld [vmem:[#allocation14_spill] sm:$0xff] }
  0xb5   : > { %8704 = vst [vmem:[#allocation46_spill] sm:$0xff] %v5107_v11  ;;  %v5150_v1 = vadd.f32 %v1059_v58, %v4986_v53  ;;  %v5153_v60 = vadd.f32 %v1060_v42, %v8719_v48  ;;  %v5156_v49 = vadd.f32 %v1061_v31, %v8721_v29  ;;  %v5159_v46 = vadd.f32 %v1062_v56, %v8723_v35  ;;  %v8727_v26 = vld [vmem:[#allocation29_spill] sm:$0xff]  ;;  %v8742_v31 = vld [vmem:[#allocation66_spill] sm:$0xff]  ;;  %v8745_v3 = vld [vmem:[#allocation67_spill] sm:$0xff] }
  0xb6   : > { %8705 = vst [vmem:[#allocation47_spill] sm:$0xff] %v5110_v44  ;;  %v5162_v9 = vadd.f32 %v1063_v24, %v8725_v18  ;;  %v5165_v41 = vadd.f32 %v1064_v36, %v8727_v26  ;;  %v8729_v0 = vld [vmem:[#allocation33_spill] sm:$0xff]  ;;  %v5176_v34 = vunpack.c.l.bf16 %v430_v8  ;;  %v5179_v56 = vperm.slane %v8716_v52, 5  ;;  %v8746_v8 = vld [vmem:[#allocation10_spill] sm:$0xff]  ;;  %v8747_v48 = vld [vmem:[#allocation11_spill] sm:$0xff] }
  0xb7   : > { %8706 = vst [vmem:[#allocation48_spill] sm:$0xff] %v5113_v22  ;;  %v5168_v17 = vadd.f32 %v1065_v30, %v8729_v0  ;;  %v8731_v53 = vld [vmem:[#allocation37_spill] sm:$0xff]  ;;  %v1102_v24 = vmul.f32 %v5144_v39, %v8737_v28  ;;  %v1103_v36 = vmul.f32 %v5144_v39, %v8738_v7  ;;  %v1107_v10 = vmul.f32 %v5144_v39, %v8742_v31  ;;  %v8748_v35 = vld [vmem:[#allocation68_spill] sm:$0xff]  ;;  %v8749_v26 = vld [vmem:[#allocation15_spill] sm:$0xff] }
  0xb8   : > { %8707 = vst [vmem:[#allocation49_spill] sm:$0xff] %v5116_v23  ;;  %v5171_v58 = vadd.f32 %v1066_v15, %v8731_v53  ;;  %v8733_v42 = vld [vmem:[#allocation41_spill] sm:$0xff]  ;;  %v8740_v15 = vld [vmem:[#allocation7_spill] sm:$0xff]  ;;  %v5195_v63 = vmul.f32 %v5144_v39, %v8743_v40  ;;  %v5199_v4 = vmul.f32 %v5144_v39, %v8744_v5  ;;  %v5203_v30 = vmul.f32 %v5144_v39, %v8745_v3  ;;  %v8750_v53 = vld [vmem:[#allocation16_spill] sm:$0xff] }
  0xb9   : > { %8708 = vst [vmem:[#allocation50_spill] sm:$0xff] %v5119_v61  ;;  %v5174_v14 = vadd.f32 %v1067_v62, %v8733_v42  ;;  %v8739_v19 = vld [vmem:[#allocation13_spill] sm:$0xff]  ;;  %v1105_v57 = vmul.f32 %v8740_v15, %v5144_v39  ;;  %v8741_v62 = vld [vmem:[#allocation8_spill] sm:$0xff]  ;;  %v5207_v52 = vmul.f32 %v8746_v8, %v5144_v39  ;;  %v5211_v29 = vmul.f32 %v8747_v48, %v5144_v39  ;;  %v8753_v40 = vld [vmem:[#allocation18_spill] sm:$0xff] }
  0xba   : > { %8709 = vst [vmem:[#allocation51_spill] sm:$0xff] %v5122_v43  ;;  %v1104_v45 = vmul.f32 %v5144_v39, %v8739_v19  ;;  %v1106_v12 = vmul.f32 %v8741_v62, %v5144_v39  ;;  %v5215_v18 = vmul.f32 %v5144_v39, %v8748_v35  ;;  %v5219_v0 = vmul.f32 %v5144_v39, %v8749_v26  ;;  %v8751_v3 = vld [vmem:[#allocation69_spill] sm:$0xff]  ;;  %v8754_v31 = vld [vmem:[#allocation70_spill] sm:$0xff]  ;;  %v8755_v62 = vld [vmem:[#allocation19_spill] sm:$0xff] }
  0xbb   : > { %8710 = vst [vmem:[#allocation52_spill] sm:$0xff] %v5125_v13  ;;  %v5223_v42 = vmul.f32 %v5144_v39, %v8750_v53  ;;  %v5227_v8 = vmul.f32 %v5144_v39, %v8751_v3  ;;  %v8752_v5 = vld [vmem:[#allocation17_spill] sm:$0xff]  ;;  %v5235_v35 = vmul.f32 %v8753_v40, %v5144_v39  ;;  %v5239_v26 = vmul.f32 %v5144_v39, %v8754_v31  ;;  %v8756_v15 = vld [vmem:[#allocation22_spill] sm:$0xff]  ;;  %v8757_v19 = vld [vmem:[#allocation71_spill] sm:$0xff] }
  0xbc   : > { %8711 = vst [vmem:[#allocation53_spill] sm:$0xff] %v5128_v20  ;;  %v5231_v48 = vmul.f32 %v8752_v5, %v5144_v39  ;;  %v5243_v53 = vmul.f32 %v5144_v39, %v8755_v62  ;;  %v5247_v3 = vmul.f32 %v5144_v39, %v8756_v15  ;;  %v5251_v5 = vmul.f32 %v5144_v39, %v8757_v19  ;;  %v8758_v7 = vld [vmem:[#allocation20_spill] sm:$0xff]  ;;  %v8775_v20 = vld [vmem:[#allocation77_spill] sm:$0xff]  ;;  %v8776_v13 = vld [vmem:[#allocation34_spill] sm:$0xff] }
  0xbd   : > { %8712 = vst [vmem:[#allocation54_spill] sm:$0xff] %v5131_v37  ;;  %v5255_v40 = vmul.f32 %v8758_v7, %v5144_v39  ;;  %v8760_v28 = vld [vmem:[#allocation72_spill] sm:$0xff]  ;;  %v8777_v43 = vld [vmem:[#allocation35_spill] sm:$0xff]  ;;  %v1198_v61 = vrot.slane %v1102_v24, 1  ;;  %v1199_v23 = vrot.slane %v1103_v36, 1  ;;  %v8778_v22 = vld [vmem:[#allocation78_spill] sm:$0xff] }
  0xbe   : > { %8713 = vst [vmem:[#allocation55_spill] sm:$0xff] %v5135_v27  ;;  %v5263_v62 = vmul.f32 %v5144_v39, %v8760_v28  ;;  %v8773_v27 = vld [vmem:[#allocation32_spill] sm:$0xff]  ;;  %v5335_v44 = vmul.f32 %v5144_v39, %v8778_v22  ;;  %v1204_v11 = vrot.slane %v1106_v12, 1  ;;  %v1206_v54 = vrot.slane %v1107_v10, 1  ;;  %v8782_v36 = vld [vmem:[#allocation38_spill] sm:$0xff] }
  0xbf   : > { %8714 = vst [vmem:[#allocation56_spill] sm:$0xff] %v5138_v47  ;;  %v8772_v47 = vld [vmem:[#allocation76_spill] sm:$0xff]  ;;  %v5359_v12 = vmul.f32 %v5144_v39, %v5176_v34  ;;  %v1208_v10 = vrot.slane %v5195_v63, 1  ;;  %v1213_v22 = vrot.slane %v5207_v52, 1  ;;  %v1214_v63 = vrot.slane %v5211_v29, 1 }
  0xc0   : > { %8715 = vst [vmem:[#allocation57_spill] sm:$0xff] %v5141_v16  ;;  %v8771_v16 = vld [vmem:[#allocation31_spill] sm:$0xff]  ;;  %v8774_v37 = vld [vmem:[#allocation36_spill] sm:$0xff]  ;;  %v1228_v52 = vrot.slane %v5243_v53, 1  ;;  %v1233_v29 = vrot.slane %v5255_v40, 1 }
  0xc1   : > { %8717 = vst [vmem:[#allocation58_spill] sm:$0xff] %v5147_v25  ;;  %v8770_v25 = vld [vmem:[#allocation30_spill] sm:$0xff]  ;;  %v1215_v53 = vsel %vm646_vm0, %v1213_v22, %v1214_v63 }
  0xc2   : > { %8718 = vst [vmem:[#allocation59_spill] sm:$0xff] %v5150_v1  ;;  %v8769_v1 = vld [vmem:[#allocation75_spill] sm:$0xff] }
  0xc3   : > { %8720 = vst [vmem:[#allocation60_spill] sm:$0xff] %v5153_v60  ;;  %v8768_v60 = vld [vmem:[#allocation28_spill] sm:$0xff] }
  0xc4   : > { %8722 = vst [vmem:[#allocation61_spill] sm:$0xff] %v5156_v49  ;;  %v8767_v49 = vld [vmem:[#allocation27_spill] sm:$0xff] }
  0xc5   : > { %8724 = vst [vmem:[#allocation62_spill] sm:$0xff] %v5159_v46  ;;  %v8766_v46 = vld [vmem:[#allocation74_spill] sm:$0xff] }
  0xc6   : > { %8726 = vst [vmem:[#allocation63_spill] sm:$0xff] %v5162_v9  ;;  %v8765_v9 = vld [vmem:[#allocation24_spill] sm:$0xff] }
  0xc7   : > { %8728 = vst [vmem:[#allocation64_spill] sm:$0xff] %v5165_v41  ;;  %v8764_v41 = vld [vmem:[#allocation23_spill] sm:$0xff]  ;;  %v5283_v28 = vmul.f32 %v8765_v9, %v5144_v39  ;;  %v5303_v9 = vmul.f32 %v8770_v25, %v5144_v39  ;;  %v5323_v25 = vmul.f32 %v5144_v39, %v8775_v20  ;;  %v8779_v20 = vld [vmem:[#allocation40_spill] sm:$0xff] }
  0xc8   : > { %8730 = vst [vmem:[#allocation2_spill] sm:$0xff] %v5168_v17  ;;  %v8763_v17 = vld [vmem:[#allocation73_spill] sm:$0xff]  ;;  %v5339_v2 = vmul.f32 %v5144_v39, %v8779_v20  ;;  %v5364_v20 = vsel %vm646_vm0, %v1198_v61, %v1199_v23  ;;  %v1218_v61 = vrot.slane %v5219_v0, 1  ;;  %v1236_v0 = vrot.slane %v5263_v62, 1 }
  0xc9   : > { %8732 = vst [vmem:[#allocation65_spill] sm:$0xff] %v5171_v58  ;;  %v8762_v58 = vld [vmem:[#allocation26_spill] sm:$0xff]  ;;  %v5275_v7 = vmul.f32 %v5144_v39, %v8763_v17  ;;  %v5295_v17 = vmul.f32 %v5144_v39, %v8768_v60  ;;  %v5315_v60 = vmul.f32 %v5144_v39, %v8773_v27  ;;  %v1201_v27 = vrot.slane %v1104_v45, 1 }
  0xca   : > { %8734 = vst [vmem:[#allocation4_spill] sm:$0xff] %v5174_v14  ;;  %v8761_v14 = vld [vmem:[#allocation25_spill] sm:$0xff]  ;;  %v5271_v19 = vmul.f32 %v5144_v39, %v8762_v58  ;;  %v5291_v58 = vmul.f32 %v5144_v39, %v8767_v49  ;;  %v5311_v49 = vmul.f32 %v5144_v39, %v8772_v47  ;;  %v5331_v47 = vmul.f32 %v8777_v43, %v5144_v39  ;;  %v8781_v43 = vld [vmem:[#allocation79_spill] sm:$0xff] }
  0xcb   : > { %8735 = vst [vmem:[#allocation5_spill] sm:$0xff] %v5176_v34  ;;  %v5267_v15 = vmul.f32 %v5144_v39, %v8761_v14  ;;  %v5287_v14 = vmul.f32 %v5144_v39, %v8766_v46  ;;  %v5307_v46 = vmul.f32 %v8771_v16, %v5144_v39  ;;  %v5327_v16 = vmul.f32 %v8776_v13, %v5144_v39  ;;  %v8780_v13 = vld [vmem:[#allocation42_spill] sm:$0xff] }
  0xcc   : > { %8736 = vst [vmem:[#allocation3_spill] sm:$0xff] %v5179_v56  ;;  %v8759_v56 = vld [vmem:[#allocation21_spill] sm:$0xff]  ;;  %v5343_v55 = vmul.f32 %v5144_v39, %v8780_v13  ;;  %v5347_v24 = vmul.f32 %v5144_v39, %v8781_v43  ;;  %v5351_v45 = vmul.f32 %v8782_v36, %v5144_v39  ;;  %v1209_v13 = vrot.slane %v5199_v4, 1 }
  0xcd   : > { %v5259_v31 = vmul.f32 %v8759_v56, %v5144_v39  ;;  %v5279_v56 = vmul.f32 %v8764_v41, %v5144_v39  ;;  %v5299_v41 = vmul.f32 %v5144_v39, %v8769_v1  ;;  %v5319_v1 = vmul.f32 %v5144_v39, %v8774_v37 }
  0xce   : > { %v1203_v37 = vrot.slane %v1105_v57, 1  ;;  %v5355_v57 = vmul.f32 %v8700_v32, %v5144_v39  ;;  %v5367_v43 = vsel %vm646_vm0, %v1199_v23, %v1201_v27  ;;  %v1211_v36 = vrot.slane %v5203_v30, 1 }
  0xcf   : > { %v5375_v39 = vsel %vm646_vm0, %v1204_v11, %v1206_v54  ;;  %v1216_v4 = vrot.slane %v5215_v18, 1  ;;  %v1219_v34 = vrot.slane %v5223_v42, 1  ;;  %v1221_v23 = vrot.slane %v5227_v8, 1 }
  0xd0   : > { %v5372_v32 = vsel %vm646_vm0, %v1203_v37, %v1204_v11  ;;  %v1223_v27 = vrot.slane %v5231_v48, 1  ;;  %v1224_v30 = vrot.slane %v5235_v35, 1  ;;  %v1226_v37 = vrot.slane %v5239_v26, 1 }
  0xd1   : > { %v1229_v54 = vrot.slane %v5247_v3, 1  ;;  %v1231_v11 = vrot.slane %v5251_v5, 1  ;;  %v1234_v18 = vrot.slane %v5259_v31, 1  ;;  %v1210_v8 = vsel %vm646_vm0, %v1208_v10, %v1209_v13 }
  0xd2   : > { %v1212_v48 = vsel %vm646_vm0, %v1209_v13, %v1211_v36  ;;  %v1238_v35 = vrot.slane %v5267_v15, 1  ;;  %v1239_v26 = vrot.slane %v5271_v19, 1  ;;  %v1217_v3 = vsel %vm646_vm0, %v1214_v63, %v1216_v4 }
  0xd3   : > { %v1220_v5 = vsel %vm646_vm0, %v1218_v61, %v1219_v34  ;;  %v1241_v40 = vrot.slane %v5275_v7, 1  ;;  %v1222_v31 = vsel %vm646_vm0, %v1219_v34, %v1221_v23  ;;  %v1225_v62 = vsel %vm646_vm0, %v1223_v27, %v1224_v30 }
  0xd4   : > { %v1227_v42 = vsel %vm646_vm0, %v1224_v30, %v1226_v37  ;;  %v1230_v13 = vsel %vm646_vm0, %v1228_v52, %v1229_v54  ;;  %v1232_v15 = vsel %vm646_vm0, %v1229_v54, %v1231_v11  ;;  %v1235_v19 = vsel %vm646_vm0, %v1233_v29, %v1234_v18 }
  0xd5   : > { %v1237_v22 = vsel %vm646_vm0, %v1234_v18, %v1236_v0  ;;  %v1243_v36 = vrot.slane %v5279_v56, 1  ;;  %v1240_v10 = vsel %vm646_vm0, %v1238_v35, %v1239_v26  ;;  %v1244_v7 = vrot.slane %v5283_v28, 1 }
  0xd6   : > { %v1246_v34 = vrot.slane %v5287_v14, 1  ;;  %v1248_v63 = vrot.slane %v5291_v58, 1  ;;  %v1242_v4 = vsel %vm646_vm0, %v1239_v26, %v1241_v40  ;;  %v1249_v61 = vrot.slane %v5295_v17, 1 }
  0xd7   : > { %v1251_v23 = vrot.slane %v5299_v41, 1  ;;  %v1253_v27 = vrot.slane %v5303_v9, 1  ;;  %v1254_v30 = vrot.slane %v5307_v46, 1  ;;  %v1256_v56 = vrot.slane %v5311_v49, 1 }
  0xd8   : > { %v1258_v37 = vrot.slane %v5315_v60, 1  ;;  %v1259_v28 = vrot.slane %v5319_v1, 1  ;;  %v1261_v14 = vrot.slane %v5323_v25, 1  ;;  %v1263_v58 = vrot.slane %v5327_v16, 1 }
  0xd9   : > { %v1264_v52 = vrot.slane %v5331_v47, 1  ;;  %v1266_v17 = vrot.slane %v5335_v44, 1  ;;  %v1245_v41 = vsel %vm646_vm0, %v1243_v36, %v1244_v7  ;;  %v1268_v9 = vrot.slane %v5339_v2, 1 }
  0xda   : > { %v1269_v46 = vrot.slane %v5343_v55, 1  ;;  %v1271_v49 = vrot.slane %v5347_v24, 1  ;;  %v1247_v60 = vsel %vm646_vm0, %v1244_v7, %v1246_v34  ;;  %v1273_v1 = vrot.slane %v5351_v45, 1  ;;  %v8785_v7 = vld [vmem:[#allocation44_spill] sm:$0xff] }
  0xdb   : > { %v1274_v25 = vrot.slane %v5355_v57, 1  ;;  %v1276_v16 = vrot.slane %v5359_v12, 1  ;;  %v1250_v47 = vsel %vm646_vm0, %v1248_v63, %v1249_v61  ;;  %v1252_v44 = vsel %vm646_vm0, %v1249_v61, %v1251_v23 }
  0xdc   : > { %v1255_v54 = vsel %vm646_vm0, %v1253_v27, %v1254_v30  ;;  %v1257_v2 = vsel %vm646_vm0, %v1254_v30, %v1256_v56  ;;  %v1260_v55 = vsel %vm646_vm0, %v1258_v37, %v1259_v28  ;;  %v1262_v24 = vsel %vm646_vm0, %v1259_v28, %v1261_v14 }
  0xdd   : > { %v1265_v11 = vsel %vm646_vm0, %v1263_v58, %v1264_v52  ;;  %v1267_v45 = vsel %vm646_vm0, %v1264_v52, %v1266_v17  ;;  %v1270_v57 = vsel %vm646_vm0, %v1268_v9, %v1269_v46  ;;  %v1272_v12 = vsel %vm646_vm0, %v1269_v46, %v1271_v49  ;;  %v8819_v17 = vld [vmem:[#allocation61_spill] sm:$0xff]  ;;  %v8821_v9 = vld [vmem:[#allocation62_spill] sm:$0xff]  ;;  %v8823_v49 = vld [vmem:[#allocation63_spill] sm:$0xff] }
  0xde   : > { %v5443_v29 = vadd.f32 %v5364_v20, %v5077_v50  ;;  %v5447_v18 = vadd.f32 %v5367_v43, %v5080_v33  ;;  %v1275_v0 = vsel %vm646_vm0, %v1273_v1, %v1274_v25  ;;  %v1277_v35 = vsel %vm646_vm0, %v1274_v25, %v1276_v16  ;;  %v8783_v43 = vld [vmem:[#allocation43_spill] sm:$0xff]  ;;  %v8825_v1 = vld [vmem:[#allocation64_spill] sm:$0xff]  ;;  %v8827_v16 = vld [vmem:[#allocation2_spill] sm:$0xff] }
  0xdf   : > { %v5453_v26 = vadd.f32 %v5372_v32, %v5083_v38  ;;  %v5457_v40 = vadd.f32 %v5375_v39, %v5086_v6  ;;  %v5460_v36 = vadd.f32 %v1210_v8, %v5089_v51  ;;  %v5463_v50 = vadd.f32 %v1212_v48, %v5092_v59  ;;  %v8787_v32 = vld [vmem:[#allocation45_spill] sm:$0xff]  ;;  %v8789_v6 = vld [vmem:[#allocation46_spill] sm:$0xff]  ;;  %v8791_v51 = vld [vmem:[#allocation47_spill] sm:$0xff] }
  0xe0   : > { %v5466_v33 = vadd.f32 %v1215_v53, %v5095_v21  ;;  %v5469_v20 = vadd.f32 %v1217_v3, %v8783_v43  ;;  %v5472_v34 = vadd.f32 %v1220_v5, %v8785_v7  ;;  %v5475_v38 = vadd.f32 %v1222_v31, %v8787_v32  ;;  %v8793_v59 = vld [vmem:[#allocation48_spill] sm:$0xff]  ;;  %v8795_v21 = vld [vmem:[#allocation49_spill] sm:$0xff]  ;;  %v8797_v3 = vld [vmem:[#allocation50_spill] sm:$0xff] }
  0xe1   : > { %v5478_v39 = vadd.f32 %v1225_v62, %v8789_v6  ;;  %v5481_v8 = vadd.f32 %v1227_v42, %v8791_v51  ;;  %v5484_v48 = vadd.f32 %v1230_v13, %v8793_v59  ;;  %v5487_v53 = vadd.f32 %v1232_v15, %v8795_v21  ;;  %v8799_v5 = vld [vmem:[#allocation51_spill] sm:$0xff]  ;;  %v8801_v31 = vld [vmem:[#allocation52_spill] sm:$0xff]  ;;  %v8803_v62 = vld [vmem:[#allocation53_spill] sm:$0xff] }
  0xe2   : > { %8784 = vst [vmem:[#allocation29_spill] sm:$0xff] %v5469_v20  ;;  %v5490_v63 = vadd.f32 %v1235_v19, %v8797_v3  ;;  %v5493_v61 = vadd.f32 %v1237_v22, %v8799_v5  ;;  %v5496_v23 = vadd.f32 %v1240_v10, %v8801_v31  ;;  %v5499_v27 = vadd.f32 %v1242_v4, %v8803_v62  ;;  %v8805_v42 = vld [vmem:[#allocation54_spill] sm:$0xff]  ;;  %v8807_v13 = vld [vmem:[#allocation55_spill] sm:$0xff]  ;;  %v8809_v15 = vld [vmem:[#allocation56_spill] sm:$0xff] }
  0xe3   : > { %8786 = vst [vmem:[#allocation33_spill] sm:$0xff] %v5472_v34  ;;  %v5502_v30 = vadd.f32 %v1245_v41, %v8805_v42  ;;  %v5505_v56 = vadd.f32 %v1247_v60, %v8807_v13  ;;  %v5508_v37 = vadd.f32 %v1250_v47, %v8809_v15  ;;  %v8811_v19 = vld [vmem:[#allocation57_spill] sm:$0xff]  ;;  %v8813_v22 = vld [vmem:[#allocation58_spill] sm:$0xff]  ;;  %v8815_v10 = vld [vmem:[#allocation59_spill] sm:$0xff]  ;;  %v5523_v41 = vadd.f32 %v1262_v24, %v8819_v17 }
  0xe4   : > { %8788 = vst [vmem:[#allocation37_spill] sm:$0xff] %v5475_v38  ;;  %v5511_v28 = vadd.f32 %v1252_v44, %v8811_v19  ;;  %v5514_v14 = vadd.f32 %v1255_v54, %v8813_v22  ;;  %v5517_v58 = vadd.f32 %v1257_v2, %v8815_v10  ;;  %v8817_v4 = vld [vmem:[#allocation60_spill] sm:$0xff]  ;;  %v5526_v46 = vadd.f32 %v1265_v11, %v8821_v9  ;;  %v8829_v44 = vld [vmem:[#allocation65_spill] sm:$0xff]  ;;  %v8833_v24 = vld [vmem:[#allocation6_spill] sm:$0xff] }
  0xe5   : > { %8790 = vst [vmem:[#allocation41_spill] sm:$0xff] %v5478_v39  ;;  %v5520_v52 = vadd.f32 %v1260_v55, %v8817_v4  ;;  %v5529_v60 = vadd.f32 %v1267_v45, %v8823_v49  ;;  %v5532_v25 = vadd.f32 %v1270_v57, %v8825_v1  ;;  %v5535_v47 = vadd.f32 %v1272_v12, %v8827_v16  ;;  %v8831_v2 = vld [vmem:[#allocation4_spill] sm:$0xff]  ;;  %v8834_v43 = vld [vmem:[#allocation3_spill] sm:$0xff]  ;;  %v8835_v11 = vld [vmem:[#allocation9_spill] sm:$0xff] }
  0xe6   : > { %8792 = vst [vmem:[#allocation43_spill] sm:$0xff] %v5481_v8  ;;  %v5538_v54 = vadd.f32 %v1275_v0, %v8829_v44  ;;  %v5541_v55 = vadd.f32 %v1277_v35, %v8831_v2  ;;  %v1343_v7 = vmul.f32 %v8834_v43, %v8833_v24  ;;  %v1344_v32 = vmul.f32 %v8834_v43, %v8835_v11  ;;  %v8836_v45 = vld [vmem:[#allocation13_spill] sm:$0xff]  ;;  %v8837_v57 = vld [vmem:[#allocation7_spill] sm:$0xff]  ;;  %v8838_v12 = vld [vmem:[#allocation8_spill] sm:$0xff] }
  0xe7   : > { %8794 = vst [vmem:[#allocation44_spill] sm:$0xff] %v5484_v48  ;;  %v1345_v6 = vmul.f32 %v8834_v43, %v8836_v45  ;;  %v1346_v51 = vmul.f32 %v8837_v57, %v8834_v43  ;;  %v1347_v59 = vmul.f32 %v8838_v12, %v8834_v43  ;;  %v8839_v0 = vld [vmem:[#allocation66_spill] sm:$0xff]  ;;  %v8840_v35 = vld [vmem:[#allocation12_spill] sm:$0xff]  ;;  %v8842_v62 = vld [vmem:[#allocation67_spill] sm:$0xff] }
  0xe8   : > { %8796 = vst [vmem:[#allocation45_spill] sm:$0xff] %v5487_v53  ;;  %v1348_v21 = vmul.f32 %v8834_v43, %v8839_v0  ;;  %v5557_v3 = vmul.f32 %v8834_v43, %v8840_v35  ;;  %v8841_v5 = vld [vmem:[#allocation14_spill] sm:$0xff]  ;;  %v5565_v42 = vmul.f32 %v8834_v43, %v8842_v62  ;;  %v8844_v19 = vld [vmem:[#allocation11_spill] sm:$0xff]  ;;  %v8845_v10 = vld [vmem:[#allocation68_spill] sm:$0xff] }
  0xe9   : > { %8798 = vst [vmem:[#allocation46_spill] sm:$0xff] %v5490_v63  ;;  %v5561_v31 = vmul.f32 %v8834_v43, %v8841_v5  ;;  %v8843_v13 = vld [vmem:[#allocation10_spill] sm:$0xff]  ;;  %v5573_v22 = vmul.f32 %v8844_v19, %v8834_v43  ;;  %v5577_v4 = vmul.f32 %v8834_v43, %v8845_v10  ;;  %v8846_v17 = vld [vmem:[#allocation15_spill] sm:$0xff]  ;;  %v8847_v49 = vld [vmem:[#allocation16_spill] sm:$0xff]  ;;  %v1445_v48 = vrot.slane %v1347_v59, 2 }
  0xea   : > { %8800 = vst [vmem:[#allocation47_spill] sm:$0xff] %v5493_v61  ;;  %v5569_v15 = vmul.f32 %v8843_v13, %v8834_v43  ;;  %v5581_v9 = vmul.f32 %v8834_v43, %v8846_v17  ;;  %v5585_v1 = vmul.f32 %v8834_v43, %v8847_v49  ;;  %v8848_v16 = vld [vmem:[#allocation69_spill] sm:$0xff]  ;;  %v8850_v11 = vld [vmem:[#allocation18_spill] sm:$0xff]  ;;  %v8852_v0 = vld [vmem:[#allocation19_spill] sm:$0xff]  ;;  %v1440_v61 = vrot.slane %v1344_v32, 2 }
  0xeb   : > { %8802 = vst [vmem:[#allocation48_spill] sm:$0xff] %v5496_v23  ;;  %v5589_v44 = vmul.f32 %v8834_v43, %v8848_v16  ;;  %v8849_v2 = vld [vmem:[#allocation17_spill] sm:$0xff]  ;;  %v5597_v45 = vmul.f32 %v8850_v11, %v8834_v43  ;;  %v8851_v10 = vld [vmem:[#allocation70_spill] sm:$0xff]  ;;  %v5605_v49 = vmul.f32 %v8834_v43, %v8852_v0  ;;  %v8854_v19 = vld [vmem:[#allocation71_spill] sm:$0xff]  ;;  %v1439_v23 = vrot.slane %v1343_v7, 2 }
  0xec   : > { %8804 = vst [vmem:[#allocation49_spill] sm:$0xff] %v5499_v27  ;;  %v5593_v24 = vmul.f32 %v8849_v2, %v8834_v43  ;;  %v5601_v62 = vmul.f32 %v8834_v43, %v8851_v10  ;;  %v8853_v17 = vld [vmem:[#allocation22_spill] sm:$0xff]  ;;  %v5613_v2 = vmul.f32 %v8834_v43, %v8854_v19  ;;  %v8855_v13 = vld [vmem:[#allocation20_spill] sm:$0xff]  ;;  %v8856_v5 = vld [vmem:[#allocation21_spill] sm:$0xff]  ;;  %v1447_v8 = vrot.slane %v1348_v21, 2 }
  0xed   : > { %8806 = vst [vmem:[#allocation50_spill] sm:$0xff] %v5502_v30  ;;  %v5609_v16 = vmul.f32 %v8834_v43, %v8853_v17  ;;  %v5617_v11 = vmul.f32 %v8855_v13, %v8834_v43  ;;  %v5621_v10 = vmul.f32 %v8856_v5, %v8834_v43  ;;  %v8857_v35 = vld [vmem:[#allocation72_spill] sm:$0xff]  ;;  %v8858_v12 = vld [vmem:[#allocation25_spill] sm:$0xff]  ;;  %v8859_v57 = vld [vmem:[#allocation26_spill] sm:$0xff]  ;;  %v5726_v34 = vsel %vm888_vm1, %v1439_v23, %v1440_v61 }
  0xee   : > { %8808 = vst [vmem:[#allocation51_spill] sm:$0xff] %v5505_v56  ;;  %v5625_v0 = vmul.f32 %v8834_v43, %v8857_v35  ;;  %v5629_v17 = vmul.f32 %v8834_v43, %v8858_v12  ;;  %v5633_v19 = vmul.f32 %v8834_v43, %v8859_v57  ;;  %v8872_v56 = vld [vmem:[#allocation77_spill] sm:$0xff]  ;;  %v8873_v30 = vld [vmem:[#allocation34_spill] sm:$0xff]  ;;  %v8874_v27 = vld [vmem:[#allocation35_spill] sm:$0xff]  ;;  %v1454_v20 = vrot.slane %v5569_v15, 2 }
  0xef   : > { %8810 = vst [vmem:[#allocation52_spill] sm:$0xff] %v5508_v37  ;;  %v8871_v37 = vld [vmem:[#allocation36_spill] sm:$0xff]  ;;  %v8875_v63 = vld [vmem:[#allocation78_spill] sm:$0xff]  ;;  %v8881_v21 = vld [vmem:[#allocation5_spill] sm:$0xff]  ;;  %v1459_v23 = vrot.slane %v5581_v9, 2  ;;  %v1469_v15 = vrot.slane %v5605_v49, 2 }
  0xf0   : > { %8812 = vst [vmem:[#allocation53_spill] sm:$0xff] %v5511_v28  ;;  %v8870_v28 = vld [vmem:[#allocation32_spill] sm:$0xff]  ;;  %v5697_v53 = vmul.f32 %v8834_v43, %v8875_v63  ;;  %v8879_v32 = vld [vmem:[#allocation38_spill] sm:$0xff]  ;;  %v5721_v63 = vmul.f32 %v8834_v43, %v8881_v21  ;;  %v1460_v21 = vrot.slane %v5585_v1, 2  ;;  %v1477_v9 = vrot.slane %v5625_v0, 2 }
  0xf1   : > { %8814 = vst [vmem:[#allocation54_spill] sm:$0xff] %v5514_v14  ;;  %v8869_v14 = vld [vmem:[#allocation76_spill] sm:$0xff] }
  0xf2   : > { %8816 = vst [vmem:[#allocation55_spill] sm:$0xff] %v5517_v58  ;;  %v8868_v58 = vld [vmem:[#allocation31_spill] sm:$0xff] }
  0xf3   : > { %8818 = vst [vmem:[#allocation56_spill] sm:$0xff] %v5520_v52  ;;  %v8867_v52 = vld [vmem:[#allocation30_spill] sm:$0xff] }
  0xf4   : > { %8820 = vst [vmem:[#allocation57_spill] sm:$0xff] %v5523_v41  ;;  %v8866_v41 = vld [vmem:[#allocation75_spill] sm:$0xff] }
  0xf5   : > { %8822 = vst [vmem:[#allocation58_spill] sm:$0xff] %v5526_v46  ;;  %v8865_v46 = vld [vmem:[#allocation28_spill] sm:$0xff] }
  0xf6   : > { %8824 = vst [vmem:[#allocation59_spill] sm:$0xff] %v5529_v60  ;;  %v8864_v60 = vld [vmem:[#allocation27_spill] sm:$0xff] }
  0xf7   : > { %8826 = vst [vmem:[#allocation60_spill] sm:$0xff] %v5532_v25  ;;  %v8863_v25 = vld [vmem:[#allocation74_spill] sm:$0xff]  ;;  %v5653_v57 = vmul.f32 %v8834_v43, %v8864_v60  ;;  %v5673_v60 = vmul.f32 %v8834_v43, %v8869_v14  ;;  %v5693_v14 = vmul.f32 %v8874_v27, %v8834_v43  ;;  %v8878_v27 = vld [vmem:[#allocation79_spill] sm:$0xff] }
  0xf8   : > { %8828 = vst [vmem:[#allocation61_spill] sm:$0xff] %v5535_v47  ;;  %v8862_v47 = vld [vmem:[#allocation24_spill] sm:$0xff]  ;;  %v5649_v12 = vmul.f32 %v8834_v43, %v8863_v25  ;;  %v5669_v25 = vmul.f32 %v8868_v58, %v8834_v43  ;;  %v5689_v58 = vmul.f32 %v8873_v30, %v8834_v43  ;;  %v8877_v30 = vld [vmem:[#allocation42_spill] sm:$0xff]  ;;  %v5709_v7 = vmul.f32 %v8834_v43, %v8878_v27 }
  0xf9   : > { %8830 = vst [vmem:[#allocation62_spill] sm:$0xff] %v5538_v54  ;;  %v8861_v54 = vld [vmem:[#allocation23_spill] sm:$0xff]  ;;  %v5645_v35 = vmul.f32 %v8862_v47, %v8834_v43  ;;  %v5665_v47 = vmul.f32 %v8867_v52, %v8834_v43  ;;  %v5685_v52 = vmul.f32 %v8834_v43, %v8872_v56  ;;  %v8876_v56 = vld [vmem:[#allocation40_spill] sm:$0xff]  ;;  %v5705_v38 = vmul.f32 %v8834_v43, %v8877_v30 }
  0xfa   : > { %8832 = vst [vmem:[#allocation63_spill] sm:$0xff] %v5541_v55  ;;  %v8860_v55 = vld [vmem:[#allocation73_spill] sm:$0xff]  ;;  %v5641_v5 = vmul.f32 %v8861_v54, %v8834_v43  ;;  %v5661_v54 = vmul.f32 %v8834_v43, %v8866_v41  ;;  %v5681_v41 = vmul.f32 %v8834_v43, %v8871_v37  ;;  %v1444_v37 = vrot.slane %v1346_v51, 2  ;;  %v8880_v51 = vld [vmem:[#allocation39_spill] sm:$0xff] }
  0xfb   : > { %v5637_v13 = vmul.f32 %v8834_v43, %v8860_v55  ;;  %v5657_v55 = vmul.f32 %v8834_v43, %v8865_v46  ;;  %v5677_v46 = vmul.f32 %v8834_v43, %v8870_v28  ;;  %v1442_v28 = vrot.slane %v1345_v6, 2 }
  0xfc   : > { %v5701_v39 = vmul.f32 %v8834_v43, %v8876_v56  ;;  %v5713_v6 = vmul.f32 %v8879_v32, %v8834_v43  ;;  %v5717_v59 = vmul.f32 %v8880_v51, %v8834_v43  ;;  %v1449_v56 = vrot.slane %v5557_v3, 2 }
  0xfd   : > { %v1450_v30 = vrot.slane %v5561_v31, 2  ;;  %v5729_v27 = vsel %vm888_vm1, %v1440_v61, %v1442_v28  ;;  %v1452_v32 = vrot.slane %v5565_v42, 2  ;;  %v5734_v51 = vsel %vm888_vm1, %v1444_v37, %v1445_v48 }
  0xfe   : > { %v5737_v43 = vsel %vm888_vm1, %v1445_v48, %v1447_v8  ;;  %v1455_v3 = vrot.slane %v5573_v22, 2  ;;  %v1457_v31 = vrot.slane %v5577_v4, 2  ;;  %v1462_v61 = vrot.slane %v5589_v44, 2 }
  0xff   : > { %v1464_v28 = vrot.slane %v5593_v24, 2  ;;  %v1465_v42 = vrot.slane %v5597_v45, 2  ;;  %v1467_v37 = vrot.slane %v5601_v62, 2  ;;  %v1470_v8 = vrot.slane %v5609_v16, 2 }
 0x100   : > { %v1472_v48 = vrot.slane %v5613_v2, 2  ;;  %v1474_v22 = vrot.slane %v5617_v11, 2  ;;  %v1475_v4 = vrot.slane %v5621_v10, 2  ;;  %v1451_v1 = vsel %vm888_vm1, %v1449_v56, %v1450_v30 }
 0x101   : > { %v1453_v44 = vsel %vm888_vm1, %v1450_v30, %v1452_v32  ;;  %v1479_v24 = vrot.slane %v5629_v17, 2  ;;  %v1480_v62 = vrot.slane %v5633_v19, 2  ;;  %v1456_v49 = vsel %vm888_vm1, %v1454_v20, %v1455_v3 }
 0x102   : > { %v1458_v16 = vsel %vm888_vm1, %v1455_v3, %v1457_v31  ;;  %v1461_v2 = vsel %vm888_vm1, %v1459_v23, %v1460_v21  ;;  %v1482_v11 = vrot.slane %v5637_v13, 2  ;;  %v1463_v10 = vsel %vm888_vm1, %v1460_v21, %v1462_v61 }
 0x103   : > { %v1466_v0 = vsel %vm888_vm1, %v1464_v28, %v1465_v42  ;;  %v1468_v56 = vsel %vm888_vm1, %v1465_v42, %v1467_v37  ;;  %v1471_v30 = vsel %vm888_vm1, %v1469_v15, %v1470_v8  ;;  %v1473_v17 = vsel %vm888_vm1, %v1470_v8, %v1472_v48 }
 0x104   : > { %v1476_v19 = vsel %vm888_vm1, %v1474_v22, %v1475_v4  ;;  %v1478_v20 = vsel %vm888_vm1, %v1475_v4, %v1477_v9  ;;  %v1484_v45 = vrot.slane %v5641_v5, 2  ;;  %v1481_v32 = vsel %vm888_vm1, %v1479_v24, %v1480_v62 }
 0x105   : > { %v1485_v13 = vrot.slane %v5645_v35, 2  ;;  %v1487_v21 = vrot.slane %v5649_v12, 2  ;;  %v1489_v3 = vrot.slane %v5653_v57, 2  ;;  %v1483_v31 = vsel %vm888_vm1, %v1480_v62, %v1482_v11 }
 0x106   : > { %v1490_v23 = vrot.slane %v5657_v55, 2  ;;  %v1492_v61 = vrot.slane %v5661_v54, 2  ;;  %v1494_v28 = vrot.slane %v5665_v47, 2  ;;  %v1495_v42 = vrot.slane %v5669_v25, 2 }
 0x107   : > { %v1497_v5 = vrot.slane %v5673_v60, 2  ;;  %v1499_v37 = vrot.slane %v5677_v46, 2  ;;  %v1500_v35 = vrot.slane %v5681_v41, 2  ;;  %v1502_v12 = vrot.slane %v5685_v52, 2 }
 0x108   : > { %v1504_v57 = vrot.slane %v5689_v58, 2  ;;  %v1505_v15 = vrot.slane %v5693_v14, 2  ;;  %v1507_v55 = vrot.slane %v5697_v53, 2  ;;  %v1486_v54 = vsel %vm888_vm1, %v1484_v45, %v1485_v13 }
 0x109   : > { %v1509_v47 = vrot.slane %v5701_v39, 2  ;;  %v1510_v25 = vrot.slane %v5705_v38, 2  ;;  %v1512_v60 = vrot.slane %v5709_v7, 2  ;;  %v1488_v46 = vsel %vm888_vm1, %v1485_v13, %v1487_v21  ;;  %v8884_v13 = vld [vmem:[#allocation37_spill] sm:$0xff] }
 0x10a   : > { %v1514_v41 = vrot.slane %v5713_v6, 2  ;;  %v1515_v52 = vrot.slane %v5717_v59, 2  ;;  %v1517_v58 = vrot.slane %v5721_v63, 2  ;;  %v1491_v14 = vsel %vm888_vm1, %v1489_v3, %v1490_v23 }
 0x10b   : > { %v1493_v53 = vsel %vm888_vm1, %v1490_v23, %v1492_v61  ;;  %v1496_v8 = vsel %vm888_vm1, %v1494_v28, %v1495_v42  ;;  %v1498_v39 = vsel %vm888_vm1, %v1495_v42, %v1497_v5  ;;  %v1501_v38 = vsel %vm888_vm1, %v1499_v37, %v1500_v35  ;;  %v5871_v37 = vld [vmem:[%s4002_s12 + $0xd4] sm:$0x1] }
 0x10c   : > { %v1503_v7 = vsel %vm888_vm1, %v1500_v35, %v1502_v12  ;;  %v1506_v48 = vsel %vm888_vm1, %v1504_v57, %v1505_v15  ;;  %v1508_v6 = vsel %vm888_vm1, %v1505_v15, %v1507_v55  ;;  %v1511_v59 = vsel %vm888_vm1, %v1509_v47, %v1510_v25  ;;  %8895 = vst [vmem:[#allocation64_spill] sm:$0xff] %v5871_v37  ;;  %v8901_v55 = vld [vmem:[#allocation55_spill] sm:$0xff]  ;;  %v8903_v47 = vld [vmem:[#allocation56_spill] sm:$0xff] }
 0x10d   : > { %v1513_v63 = vsel %vm888_vm1, %v1510_v25, %v1512_v60  ;;  %v5805_v22 = vadd.f32 %v5726_v34, %v5443_v29  ;;  %v5809_v4 = vadd.f32 %v5729_v27, %v5447_v18  ;;  %v1516_v9 = vsel %vm888_vm1, %v1514_v41, %v1515_v52  ;;  %v8882_v34 = vld [vmem:[#allocation29_spill] sm:$0xff]  ;;  %v8907_v41 = vld [vmem:[#allocation58_spill] sm:$0xff] }
 0x10e   : > { %v1518_v24 = vsel %vm888_vm1, %v1515_v52, %v1517_v58  ;;  %v5815_v62 = vadd.f32 %v5734_v51, %v5453_v26  ;;  %v5819_v11 = vadd.f32 %v5737_v43, %v5457_v40  ;;  %v5822_v45 = vadd.f32 %v1451_v1, %v5460_v36  ;;  %v8883_v26 = vld [vmem:[#allocation33_spill] sm:$0xff]  ;;  %v8886_v1 = vld [vmem:[#allocation43_spill] sm:$0xff] }
 0x10f   : > { %v5825_v29 = vadd.f32 %v1453_v44, %v5463_v50  ;;  %v5828_v18 = vadd.f32 %v1456_v49, %v5466_v33  ;;  %v5831_v27 = vadd.f32 %v1458_v16, %v8882_v34  ;;  %v5834_v51 = vadd.f32 %v1461_v2, %v8883_v26  ;;  %v8885_v43 = vld [vmem:[#allocation41_spill] sm:$0xff]  ;;  %v8887_v50 = vld [vmem:[#allocation44_spill] sm:$0xff]  ;;  %v8889_v16 = vld [vmem:[#allocation46_spill] sm:$0xff] }
 0x110   : > { %v5837_v40 = vadd.f32 %v1463_v10, %v8884_v13  ;;  %v5840_v36 = vadd.f32 %v1466_v0, %v8885_v43  ;;  %v5843_v21 = vadd.f32 %v1468_v56, %v8886_v1  ;;  %v5846_v44 = vadd.f32 %v1471_v30, %v8887_v50  ;;  %v8888_v33 = vld [vmem:[#allocation45_spill] sm:$0xff]  ;;  %v8890_v2 = vld [vmem:[#allocation47_spill] sm:$0xff]  ;;  %v8891_v10 = vld [vmem:[#allocation48_spill] sm:$0xff] }
 0x111   : > { %v5849_v49 = vadd.f32 %v1473_v17, %v8888_v33  ;;  %v5852_v3 = vadd.f32 %v1476_v19, %v8889_v16  ;;  %v5855_v23 = vadd.f32 %v1478_v20, %v8890_v2  ;;  %v5858_v61 = vadd.f32 %v1481_v32, %v8891_v10  ;;  %v8892_v0 = vld [vmem:[#allocation49_spill] sm:$0xff]  ;;  %v8893_v56 = vld [vmem:[#allocation50_spill] sm:$0xff]  ;;  %v8894_v30 = vld [vmem:[#allocation51_spill] sm:$0xff] }
 0x112   : > { %v5861_v28 = vadd.f32 %v1483_v31, %v8892_v0  ;;  %v5864_v42 = vadd.f32 %v1486_v54, %v8893_v56  ;;  %v5867_v5 = vadd.f32 %v1488_v46, %v8894_v30  ;;  %v431_v17 = vld [vmem:[%s4002_s12 + $0xcc] sm:$0xff]   ;;  %v8897_v20 = vld [vmem:[#allocation53_spill] sm:$0xff]  ;;  %v8899_v32 = vld [vmem:[#allocation54_spill] sm:$0xff]  ;;  %v5886_v54 = vadd.f32 %v1498_v39, %v8901_v55 }
 0x113   : > { %v8896_v19 = vld [vmem:[#allocation52_spill] sm:$0xff]  ;;  %v5877_v12 = vadd.f32 %v1493_v53, %v8897_v20  ;;  %v5880_v57 = vadd.f32 %v1496_v8, %v8899_v32  ;;  %v3871_v31 = vld [vmem:[%s8292_s2] sm:$0xff]  ;;  %v5889_v25 = vadd.f32 %v1501_v38, %v8903_v47  ;;  %v8905_v60 = vld [vmem:[#allocation57_spill] sm:$0xff]  ;;  %v5895_v52 = vadd.f32 %v1506_v48, %v8907_v41 }
 0x114   : > { %v5874_v35 = vadd.f32 %v1491_v14, %v8896_v19  ;;  %v1585_v15 = vperm.slane %v3871_v31, 6  ;;  %8902 = vst [vmem:[#allocation4_spill] sm:$0xff] %v5886_v54  ;;  %v5892_v46 = vadd.f32 %v1503_v7, %v8905_v60  ;;  %v8909_v58 = vld [vmem:[#allocation59_spill] sm:$0xff]  ;;  %v8911_v53 = vld [vmem:[#allocation60_spill] sm:$0xff]  ;;  %v8913_v34 = vld [vmem:[#allocation61_spill] sm:$0xff]  ;;  %v5912_v7 = vunpack.c.l.bf16 %v431_v17 }
 0x115   : > { %8898 = vst [vmem:[#allocation2_spill] sm:$0xff] %v5877_v12  ;;  %v5898_v14 = vadd.f32 %v1508_v6, %v8909_v58  ;;  %v5901_v8 = vadd.f32 %v1511_v59, %v8911_v53  ;;  %v5904_v26 = vadd.f32 %v1513_v63, %v8913_v34  ;;  %v8915_v39 = vld [vmem:[#allocation62_spill] sm:$0xff]  ;;  %v8917_v38 = vld [vmem:[#allocation63_spill] sm:$0xff]  ;;  %v5914_v1 = vunpack.c.h.bf16 %v431_v17  ;;  %v8922_v33 = vld [vmem:[#allocation8_spill] sm:$0xff] }
 0x116   : > { %8900 = vst [vmem:[#allocation65_spill] sm:$0xff] %v5880_v57  ;;  %v5907_v13 = vadd.f32 %v1516_v9, %v8915_v39  ;;  %v5910_v43 = vadd.f32 %v1518_v24, %v8917_v38  ;;  %v8921_v6 = vld [vmem:[#allocation7_spill] sm:$0xff]  ;;  %v1587_v59 = vmul.f32 %v8922_v33, %v1585_v15  ;;  %v8923_v16 = vld [vmem:[#allocation12_spill] sm:$0xff]  ;;  %v5920_v63 = vperm.slane %v3871_v31, 7  ;;  %v8925_v10 = vld [vmem:[#allocation14_spill] sm:$0xff] }
 0x117   : > { %8904 = vst [vmem:[#allocation6_spill] sm:$0xff] %v5889_v25  ;;  %v1586_v50 = vmul.f32 %v8921_v6, %v1585_v15  ;;  %v1588_v2 = vmul.f32 %v1585_v15, %v8923_v16  ;;  %v1589_v9 = vmul.f32 %v1585_v15, %v8925_v10  ;;  %v8926_v0 = vld [vmem:[#allocation10_spill] sm:$0xff]  ;;  %v8927_v24 = vld [vmem:[#allocation11_spill] sm:$0xff]  ;;  %v8929_v17 = vld [vmem:[#allocation16_spill] sm:$0xff] }
 0x118   : > { %8906 = vst [vmem:[#allocation3_spill] sm:$0xff] %v5892_v46  ;;  %v1590_v56 = vmul.f32 %v8926_v0, %v1585_v15  ;;  %v1591_v30 = vmul.f32 %v8927_v24, %v1585_v15  ;;  %v8928_v19 = vld [vmem:[#allocation15_spill] sm:$0xff]  ;;  %v1593_v32 = vmul.f32 %v1585_v15, %v8929_v17  ;;  %v8930_v55 = vld [vmem:[#allocation17_spill] sm:$0xff]  ;;  %v8931_v60 = vld [vmem:[#allocation18_spill] sm:$0xff] }
 0x119   : > { %8908 = vst [vmem:[#allocation9_spill] sm:$0xff] %v5895_v52  ;;  %v1592_v20 = vmul.f32 %v1585_v15, %v8928_v19  ;;  %v1594_v47 = vmul.f32 %v8930_v55, %v1585_v15  ;;  %v1595_v41 = vmul.f32 %v8931_v60, %v1585_v15  ;;  %v8932_v58 = vld [vmem:[#allocation19_spill] sm:$0xff]  ;;  %v8933_v34 = vld [vmem:[#allocation22_spill] sm:$0xff]  ;;  %v8934_v31 = vld [vmem:[#allocation20_spill] sm:$0xff] }
 0x11a   : > { %8910 = vst [vmem:[#allocation13_spill] sm:$0xff] %v5898_v14  ;;  %v1596_v53 = vmul.f32 %v1585_v15, %v8932_v58  ;;  %v1597_v39 = vmul.f32 %v1585_v15, %v8933_v34  ;;  %v1598_v38 = vmul.f32 %v8934_v31, %v1585_v15  ;;  %v8935_v48 = vld [vmem:[#allocation21_spill] sm:$0xff]  ;;  %v8937_v16 = vld [vmem:[#allocation26_spill] sm:$0xff]  ;;  %v8938_v33 = vld [vmem:[#allocation23_spill] sm:$0xff] }
 0x11b   : > { %8912 = vst [vmem:[#allocation29_spill] sm:$0xff] %v5901_v8  ;;  %v1599_v37 = vmul.f32 %v8935_v48, %v1585_v15  ;;  %v8936_v10 = vld [vmem:[#allocation25_spill] sm:$0xff]  ;;  %v1601_v24 = vmul.f32 %v1585_v15, %v8937_v16  ;;  %v1602_v19 = vmul.f32 %v8938_v33, %v1585_v15  ;;  %v8939_v6 = vld [vmem:[#allocation24_spill] sm:$0xff]  ;;  %v8946_v52 = vld [vmem:[#allocation34_spill] sm:$0xff] }
 0x11c   : > { %8914 = vst [vmem:[#allocation33_spill] sm:$0xff] %v5904_v26  ;;  %v1600_v0 = vmul.f32 %v1585_v15, %v8936_v10  ;;  %v1603_v17 = vmul.f32 %v8939_v6, %v1585_v15  ;;  %v8943_v26 = vld [vmem:[#allocation31_spill] sm:$0xff]  ;;  %v8944_v8 = vld [vmem:[#allocation32_spill] sm:$0xff]  ;;  %v1610_v10 = vmul.f32 %v8946_v52, %v1585_v15  ;;  %v8949_v54 = vld [vmem:[#allocation42_spill] sm:$0xff] }
 0x11d   : > { %8916 = vst [vmem:[#allocation37_spill] sm:$0xff] %v5907_v13  ;;  %v8942_v13 = vld [vmem:[#allocation30_spill] sm:$0xff]  ;;  %v1607_v34 = vmul.f32 %v8943_v26, %v1585_v15  ;;  %v1608_v31 = vmul.f32 %v1585_v15, %v8944_v8  ;;  %v8945_v14 = vld [vmem:[#allocation36_spill] sm:$0xff]  ;;  %v8947_v46 = vld [vmem:[#allocation35_spill] sm:$0xff]  ;;  %v1613_v6 = vmul.f32 %v1585_v15, %v8949_v54  ;;  %v1617_v26 = vmul.f32 %v1585_v15, %v5914_v1 }
 0x11e   : > { %8918 = vst [vmem:[#allocation41_spill] sm:$0xff] %v5910_v43  ;;  %v8941_v43 = vld [vmem:[#allocation28_spill] sm:$0xff]  ;;  %v1606_v58 = vmul.f32 %v8942_v13, %v1585_v15  ;;  %v1609_v48 = vmul.f32 %v1585_v15, %v8945_v14  ;;  %v1611_v16 = vmul.f32 %v8947_v46, %v1585_v15  ;;  %v8950_v57 = vld [vmem:[#allocation38_spill] sm:$0xff]  ;;  %v8951_v12 = vld [vmem:[#allocation39_spill] sm:$0xff]  ;;  %v1616_v13 = vmul.f32 %v1585_v15, %v5912_v7 }
 0x11f   : > { %8919 = vst [vmem:[#allocation43_spill] sm:$0xff] %v5912_v7  ;;  %v1605_v60 = vmul.f32 %v1585_v15, %v8941_v43  ;;  %v8948_v25 = vld [vmem:[#allocation40_spill] sm:$0xff]  ;;  %v1615_v43 = vmul.f32 %v8951_v12, %v1585_v15  ;;  %v5952_v8 = vadd.f32 %v1586_v50, %v5805_v22  ;;  %v5955_v14 = vadd.f32 %v1587_v59, %v5809_v4 }
 0x120   : > { %8920 = vst [vmem:[#allocation44_spill] sm:$0xff] %v5914_v1  ;;  %v1612_v33 = vmul.f32 %v1585_v15, %v8948_v25  ;;  %v5958_v46 = vadd.f32 %v1588_v2, %v5815_v62  ;;  %v5961_v25 = vadd.f32 %v1589_v9, %v5819_v11  ;;  %v5967_v12 = vadd.f32 %v1591_v30, %v5825_v29 }
 0x121   : > { %8924 = vst [vmem:[#allocation45_spill] sm:$0xff] %v5920_v63  ;;  %v8940_v63 = vld [vmem:[#allocation27_spill] sm:$0xff]  ;;  %v5973_v22 = vadd.f32 %v1593_v32, %v5831_v27  ;;  %v5976_v4 = vadd.f32 %v1594_v47, %v5834_v51  ;;  %v5979_v62 = vadd.f32 %v1595_v41, %v5837_v40  ;;  %v5982_v11 = vadd.f32 %v1596_v53, %v5840_v36 }
 0x122   : > { %v1604_v55 = vmul.f32 %v1585_v15, %v8940_v63  ;;  %v1614_v63 = vmul.f32 %v8950_v57, %v1585_v15  ;;  %v5964_v57 = vadd.f32 %v1590_v56, %v5822_v45  ;;  %v5970_v15 = vadd.f32 %v1592_v20, %v5828_v18 }
 0x123   : > { %8953 = vst [vmem:[#allocation47_spill] sm:$0xff] %v5973_v22  ;;  %v5985_v45 = vadd.f32 %v1597_v39, %v5843_v21  ;;  %v5988_v29 = vadd.f32 %v1598_v38, %v5846_v44  ;;  %v5991_v18 = vadd.f32 %v1599_v37, %v5849_v49  ;;  %v5994_v27 = vadd.f32 %v1600_v0, %v5852_v3  ;;  %v8967_v3 = vld [vmem:[#allocation2_spill] sm:$0xff] }
 0x124   : > { %8952 = vst [vmem:[#allocation46_spill] sm:$0xff] %v5970_v15  ;;  %v5997_v51 = vadd.f32 %v1601_v24, %v5855_v23  ;;  %v6000_v40 = vadd.f32 %v1602_v19, %v5858_v61  ;;  %v6003_v36 = vadd.f32 %v1603_v17, %v5861_v28  ;;  %v6006_v21 = vadd.f32 %v1604_v55, %v5864_v42  ;;  %v8969_v23 = vld [vmem:[#allocation65_spill] sm:$0xff]  ;;  %v8971_v61 = vld [vmem:[#allocation4_spill] sm:$0xff]  ;;  %v8973_v28 = vld [vmem:[#allocation6_spill] sm:$0xff] }
 0x125   : > { %8954 = vst [vmem:[#allocation48_spill] sm:$0xff] %v5976_v4  ;;  %v6009_v44 = vadd.f32 %v1605_v60, %v5867_v5  ;;  %v6012_v49 = vadd.f32 %v1606_v58, %v5874_v35  ;;  %v6015_v37 = vadd.f32 %v1607_v34, %v8967_v3  ;;  %v6018_v50 = vadd.f32 %v1608_v31, %v8969_v23  ;;  %v8975_v42 = vld [vmem:[#allocation3_spill] sm:$0xff]  ;;  %v8977_v5 = vld [vmem:[#allocation9_spill] sm:$0xff]  ;;  %v8996_v34 = vld [vmem:[#allocation10_spill] sm:$0xff] }
 0x126   : > { %8955 = vst [vmem:[#allocation49_spill] sm:$0xff] %v5979_v62  ;;  %v6021_v59 = vadd.f32 %v1609_v48, %v8971_v61  ;;  %v6024_v2 = vadd.f32 %v1610_v10, %v8973_v28  ;;  %v6027_v9 = vadd.f32 %v1611_v16, %v8975_v42  ;;  %v6030_v0 = vadd.f32 %v1612_v33, %v8977_v5  ;;  %v8979_v35 = vld [vmem:[#allocation13_spill] sm:$0xff]  ;;  %v8990_v55 = vld [vmem:[#allocation7_spill] sm:$0xff]  ;;  %v8991_v33 = vld [vmem:[#allocation8_spill] sm:$0xff] }
 0x127   : > { %8956 = vst [vmem:[#allocation50_spill] sm:$0xff] %v5982_v11  ;;  %v6033_v56 = vadd.f32 %v1613_v6, %v8979_v35  ;;  %v8981_v24 = vld [vmem:[#allocation29_spill] sm:$0xff]  ;;  %v8992_v6 = vld [vmem:[#allocation66_spill] sm:$0xff]  ;;  %v8997_v31 = vld [vmem:[#allocation11_spill] sm:$0xff] }
 0x128   : > { %8957 = vst [vmem:[#allocation51_spill] sm:$0xff] %v5985_v45  ;;  %v6036_v30 = vadd.f32 %v1614_v63, %v8981_v24  ;;  %v8983_v19 = vld [vmem:[#allocation33_spill] sm:$0xff]  ;;  %v8993_v63 = vld [vmem:[#allocation12_spill] sm:$0xff]  ;;  %v8999_v61 = vld [vmem:[#allocation15_spill] sm:$0xff] }
 0x129   : > { %8958 = vst [vmem:[#allocation52_spill] sm:$0xff] %v5988_v29  ;;  %v6039_v20 = vadd.f32 %v1615_v43, %v8983_v19  ;;  %v8985_v48 = vld [vmem:[#allocation37_spill] sm:$0xff]  ;;  %v8994_v43 = vld [vmem:[#allocation14_spill] sm:$0xff]  ;;  %v8998_v3 = vld [vmem:[#allocation68_spill] sm:$0xff] }
 0x12a   : > { %8959 = vst [vmem:[#allocation53_spill] sm:$0xff] %v5991_v18  ;;  %v6042_v17 = vadd.f32 %v1616_v13, %v8985_v48  ;;  %v8987_v10 = vld [vmem:[#allocation41_spill] sm:$0xff]  ;;  %v8995_v13 = vld [vmem:[#allocation67_spill] sm:$0xff]  ;;  %v9000_v42 = vld [vmem:[#allocation16_spill] sm:$0xff] }
 0x12b   : > { %8960 = vst [vmem:[#allocation54_spill] sm:$0xff] %v5994_v27  ;;  %v6045_v32 = vadd.f32 %v1617_v26, %v8987_v10  ;;  %v8989_v16 = vld [vmem:[#allocation45_spill] sm:$0xff]  ;;  %v9003_v10 = vld [vmem:[#allocation18_spill] sm:$0xff] }
 0x12c   : > { %8961 = vst [vmem:[#allocation55_spill] sm:$0xff] %v5997_v51  ;;  %v1652_v47 = vmul.f32 %v8990_v55, %v8989_v16  ;;  %v1653_v60 = vmul.f32 %v8991_v33, %v8989_v16  ;;  %v1654_v41 = vmul.f32 %v8989_v16, %v8992_v6  ;;  %v1655_v58 = vmul.f32 %v8989_v16, %v8993_v63  ;;  %v9001_v35 = vld [vmem:[#allocation69_spill] sm:$0xff]  ;;  %v9008_v63 = vld [vmem:[#allocation20_spill] sm:$0xff] }
 0x12d   : > { %8962 = vst [vmem:[#allocation56_spill] sm:$0xff] %v6000_v40  ;;  %v6057_v53 = vmul.f32 %v8989_v16, %v8994_v43  ;;  %v6061_v26 = vmul.f32 %v8989_v16, %v8995_v13  ;;  %v6065_v39 = vmul.f32 %v8996_v34, %v8989_v16  ;;  %v6069_v38 = vmul.f32 %v8997_v31, %v8989_v16  ;;  %v9002_v19 = vld [vmem:[#allocation17_spill] sm:$0xff]  ;;  %v9004_v31 = vld [vmem:[#allocation70_spill] sm:$0xff]  ;;  %v9005_v34 = vld [vmem:[#allocation19_spill] sm:$0xff] }
 0x12e   : > { %8963 = vst [vmem:[#allocation57_spill] sm:$0xff] %v6003_v36  ;;  %v6073_v23 = vmul.f32 %v8989_v16, %v8998_v3  ;;  %v6077_v28 = vmul.f32 %v8989_v16, %v8999_v61  ;;  %v6081_v5 = vmul.f32 %v8989_v16, %v9000_v42  ;;  %v6085_v24 = vmul.f32 %v8989_v16, %v9001_v35  ;;  %v9006_v13 = vld [vmem:[#allocation22_spill] sm:$0xff]  ;;  %v9007_v43 = vld [vmem:[#allocation71_spill] sm:$0xff]  ;;  %v9009_v6 = vld [vmem:[#allocation21_spill] sm:$0xff] }
 0x12f   : > { %8964 = vst [vmem:[#allocation58_spill] sm:$0xff] %v6006_v21  ;;  %v6089_v48 = vmul.f32 %v9002_v19, %v8989_v16  ;;  %v6093_v3 = vmul.f32 %v9003_v10, %v8989_v16  ;;  %v6097_v61 = vmul.f32 %v8989_v16, %v9004_v31  ;;  %v6101_v42 = vmul.f32 %v8989_v16, %v9005_v34  ;;  %v9010_v33 = vld [vmem:[#allocation72_spill] sm:$0xff]  ;;  %v9011_v55 = vld [vmem:[#allocation25_spill] sm:$0xff]  ;;  %v9026_v36 = vld [vmem:[#allocation35_spill] sm:$0xff] }
 0x130   : > { %8965 = vst [vmem:[#allocation59_spill] sm:$0xff] %v6009_v44  ;;  %v6105_v35 = vmul.f32 %v8989_v16, %v9006_v13  ;;  %v6109_v19 = vmul.f32 %v8989_v16, %v9007_v43  ;;  %v6113_v10 = vmul.f32 %v9008_v63, %v8989_v16  ;;  %v6117_v31 = vmul.f32 %v9009_v6, %v8989_v16  ;;  %v9024_v44 = vld [vmem:[#allocation36_spill] sm:$0xff]  ;;  %v9025_v21 = vld [vmem:[#allocation77_spill] sm:$0xff]  ;;  %v9027_v40 = vld [vmem:[#allocation78_spill] sm:$0xff] }
 0x131   : > { %8966 = vst [vmem:[#allocation60_spill] sm:$0xff] %v6012_v49  ;;  %v6121_v34 = vmul.f32 %v8989_v16, %v9010_v33  ;;  %v6125_v13 = vmul.f32 %v8989_v16, %v9011_v55  ;;  %v9023_v49 = vld [vmem:[#allocation32_spill] sm:$0xff]  ;;  %v1748_v27 = vrot.slane %v1652_v47, 1  ;;  %v1749_v18 = vrot.slane %v1653_v60, 1  ;;  %v9032_v60 = vld [vmem:[#allocation5_spill] sm:$0xff] }
 0x132   : > { %8968 = vst [vmem:[#allocation61_spill] sm:$0xff] %v6015_v37  ;;  %v9022_v37 = vld [vmem:[#allocation76_spill] sm:$0xff]  ;;  %v6201_v29 = vmul.f32 %v8989_v16, %v8949_v54  ;;  %v1754_v11 = vrot.slane %v6057_v53, 1  ;;  %v6222_v54 = vmul.f32 %v8989_v16, %v5912_v7  ;;  %v1758_v4 = vrot.slane %v6065_v39, 1 }
 0x133   : > { %8970 = vst [vmem:[#allocation62_spill] sm:$0xff] %v6018_v50  ;;  %v9021_v50 = vld [vmem:[#allocation31_spill] sm:$0xff]  ;;  %v9028_v51 = vld [vmem:[#allocation40_spill] sm:$0xff]  ;;  %v1759_v7 = vrot.slane %v6069_v38, 1  ;;  %v1768_v39 = vrot.slane %v6089_v48, 1  ;;  %v1774_v38 = vrot.slane %v6105_v35, 1 }
 0x134   : > { %8972 = vst [vmem:[#allocation63_spill] sm:$0xff] %v6021_v59  ;;  %v9020_v59 = vld [vmem:[#allocation30_spill] sm:$0xff]  ;;  %v9033_v53 = vld [vmem:[#allocation64_spill] sm:$0xff] }
 0x135   : > { %8974 = vst [vmem:[#allocation2_spill] sm:$0xff] %v6024_v2  ;;  %v9019_v2 = vld [vmem:[#allocation75_spill] sm:$0xff] }
 0x136   : > { %8976 = vst [vmem:[#allocation65_spill] sm:$0xff] %v6027_v9  ;;  %v9018_v9 = vld [vmem:[#allocation28_spill] sm:$0xff] }
 0x137   : > { %8978 = vst [vmem:[#allocation4_spill] sm:$0xff] %v6030_v0  ;;  %v9017_v0 = vld [vmem:[#allocation27_spill] sm:$0xff] }
 0x138   : > { %8980 = vst [vmem:[#allocation6_spill] sm:$0xff] %v6033_v56  ;;  %v9016_v56 = vld [vmem:[#allocation74_spill] sm:$0xff] }
 0x139   : > { %8982 = vst [vmem:[#allocation3_spill] sm:$0xff] %v6036_v30  ;;  %v9015_v30 = vld [vmem:[#allocation24_spill] sm:$0xff]  ;;  %v6145_v55 = vmul.f32 %v8989_v16, %v9016_v56  ;;  %v6165_v56 = vmul.f32 %v9021_v50, %v8989_v16  ;;  %v6185_v50 = vmul.f32 %v8946_v52, %v8989_v16  ;;  %v9029_v52 = vld [vmem:[#allocation79_spill] sm:$0xff] }
 0x13a   : > { %8984 = vst [vmem:[#allocation9_spill] sm:$0xff] %v6039_v20  ;;  %v9014_v20 = vld [vmem:[#allocation23_spill] sm:$0xff]  ;;  %v6141_v33 = vmul.f32 %v9015_v30, %v8989_v16  ;;  %v6161_v30 = vmul.f32 %v9020_v59, %v8989_v16  ;;  %v6181_v59 = vmul.f32 %v8989_v16, %v9025_v21  ;;  %v1751_v21 = vrot.slane %v1654_v41, 1 }
 0x13b   : > { %8986 = vst [vmem:[#allocation13_spill] sm:$0xff] %v6042_v17  ;;  %v9013_v17 = vld [vmem:[#allocation73_spill] sm:$0xff]  ;;  %v6137_v6 = vmul.f32 %v9014_v20, %v8989_v16  ;;  %v6157_v20 = vmul.f32 %v8989_v16, %v9019_v2  ;;  %v6177_v2 = vmul.f32 %v8989_v16, %v9024_v44  ;;  %v6197_v44 = vmul.f32 %v8989_v16, %v9028_v51  ;;  %v9031_v51 = vld [vmem:[#allocation39_spill] sm:$0xff] }
 0x13c   : > { %8988 = vst [vmem:[#allocation29_spill] sm:$0xff] %v6045_v32  ;;  %v9012_v32 = vld [vmem:[#allocation26_spill] sm:$0xff]  ;;  %v6133_v63 = vmul.f32 %v8989_v16, %v9013_v17  ;;  %v6153_v17 = vmul.f32 %v8989_v16, %v9018_v9  ;;  %v6173_v9 = vmul.f32 %v8989_v16, %v9023_v49  ;;  %v6193_v49 = vmul.f32 %v8989_v16, %v9027_v40 }
 0x13d   : > { %v6129_v43 = vmul.f32 %v8989_v16, %v9012_v32  ;;  %v6149_v32 = vmul.f32 %v8989_v16, %v9017_v0  ;;  %v6169_v0 = vmul.f32 %v8989_v16, %v9022_v37  ;;  %v6189_v37 = vmul.f32 %v9026_v36, %v8989_v16  ;;  %v9030_v40 = vld [vmem:[#allocation38_spill] sm:$0xff] }
 0x13e   : > { %v6205_v45 = vmul.f32 %v8989_v16, %v9029_v52  ;;  %v1753_v36 = vrot.slane %v1655_v58, 1  ;;  %v6210_v62 = vmul.f32 %v9030_v40, %v8989_v16  ;;  %v6214_v47 = vmul.f32 %v9031_v51, %v8989_v16 }
 0x13f   : > { %v6218_v41 = vmul.f32 %v8989_v16, %v9032_v60  ;;  %v6226_v58 = vmul.f32 %v8989_v16, %v5914_v1  ;;  %v9034_v52 = vunpack.c.l.bf16 %v9033_v53  ;;  %v1756_v51 = vrot.slane %v6061_v26, 1 }
 0x140   : > { %v6236_v60 = vsel %vm646_vm0, %v1748_v27, %v1749_v18  ;;  %v6239_v22 = vsel %vm646_vm0, %v1749_v18, %v1751_v21  ;;  %v1761_v1 = vrot.slane %v6073_v23, 1  ;;  %v6244_v15 = vsel %vm646_vm0, %v1753_v36, %v1754_v11 }
 0x141   : > { %v6231_v40 = vmul.f32 %v8989_v16, %v9034_v52  ;;  %v1763_v52 = vrot.slane %v6077_v28, 1  ;;  %v1764_v16 = vrot.slane %v6081_v5, 1  ;;  %v1766_v26 = vrot.slane %v6085_v24, 1 }
 0x142   : > { %v1769_v27 = vrot.slane %v6093_v3, 1  ;;  %v1771_v18 = vrot.slane %v6097_v61, 1  ;;  %v1773_v21 = vrot.slane %v6101_v42, 1  ;;  %v1776_v23 = vrot.slane %v6109_v19, 1 }
 0x143   : > { %v1778_v36 = vrot.slane %v6113_v10, 1  ;;  %v1779_v28 = vrot.slane %v6117_v31, 1  ;;  %v1781_v5 = vrot.slane %v6121_v34, 1  ;;  %v1783_v24 = vrot.slane %v6125_v13, 1 }
 0x144   : > { %v1784_v48 = vrot.slane %v6129_v43, 1  ;;  %v1786_v3 = vrot.slane %v6133_v63, 1  ;;  %v1757_v61 = vsel %vm646_vm0, %v1754_v11, %v1756_v51  ;;  %v1760_v42 = vsel %vm646_vm0, %v1758_v4, %v1759_v7 }
 0x145   : > { %v1788_v35 = vrot.slane %v6137_v6, 1  ;;  %v1789_v19 = vrot.slane %v6141_v33, 1  ;;  %v1762_v10 = vsel %vm646_vm0, %v1759_v7, %v1761_v1  ;;  %v1765_v31 = vsel %vm646_vm0, %v1763_v52, %v1764_v16 }
 0x146   : > { %v1767_v34 = vsel %vm646_vm0, %v1764_v16, %v1766_v26  ;;  %v1791_v13 = vrot.slane %v6145_v55, 1  ;;  %v1770_v43 = vsel %vm646_vm0, %v1768_v39, %v1769_v27  ;;  %v1772_v63 = vsel %vm646_vm0, %v1769_v27, %v1771_v18 }
 0x147   : > { %v1775_v11 = vsel %vm646_vm0, %v1773_v21, %v1774_v38  ;;  %v1777_v4 = vsel %vm646_vm0, %v1774_v38, %v1776_v23  ;;  %v1780_v51 = vsel %vm646_vm0, %v1778_v36, %v1779_v28  ;;  %v1782_v33 = vsel %vm646_vm0, %v1779_v28, %v1781_v5 }
 0x148   : > { %v1785_v7 = vsel %vm646_vm0, %v1783_v24, %v1784_v48  ;;  %v1787_v1 = vsel %vm646_vm0, %v1784_v48, %v1786_v3  ;;  %v1790_v6 = vsel %vm646_vm0, %v1788_v35, %v1789_v19  ;;  %v1793_v55 = vrot.slane %v6149_v32, 1 }
 0x149   : > { %v1794_v52 = vrot.slane %v6153_v17, 1  ;;  %v1796_v16 = vrot.slane %v6157_v20, 1  ;;  %v1792_v26 = vsel %vm646_vm0, %v1789_v19, %v1791_v13  ;;  %v1798_v39 = vrot.slane %v6161_v30, 1 }
 0x14a   : > { %v1799_v27 = vrot.slane %v6165_v56, 1  ;;  %v1801_v18 = vrot.slane %v6169_v0, 1  ;;  %v1803_v21 = vrot.slane %v6173_v9, 1  ;;  %v1804_v38 = vrot.slane %v6177_v2, 1 }
 0x14b   : > { %v1806_v23 = vrot.slane %v6181_v59, 1  ;;  %v1808_v32 = vrot.slane %v6185_v50, 1  ;;  %v1809_v17 = vrot.slane %v6189_v37, 1  ;;  %v1811_v20 = vrot.slane %v6193_v49, 1 }
 0x14c   : > { %v1813_v36 = vrot.slane %v6197_v44, 1  ;;  %v1814_v30 = vrot.slane %v6201_v29, 1  ;;  %v1816_v56 = vrot.slane %v6205_v45, 1  ;;  %v1818_v0 = vrot.slane %v6210_v62, 1 }
 0x14d   : > { %v1819_v9 = vrot.slane %v6214_v47, 1  ;;  %v1821_v2 = vrot.slane %v6218_v41, 1  ;;  %v1795_v59 = vsel %vm646_vm0, %v1793_v55, %v1794_v52  ;;  %v1823_v50 = vrot.slane %v6222_v54, 1 }
 0x14e   : > { %v1824_v37 = vrot.slane %v6226_v58, 1  ;;  %v1826_v49 = vrot.slane %v6231_v40, 1  ;;  %v1797_v44 = vsel %vm646_vm0, %v1794_v52, %v1796_v16  ;;  %v1800_v29 = vsel %vm646_vm0, %v1798_v39, %v1799_v27  ;;  %v9038_v16 = vld [vmem:[#allocation47_spill] sm:$0xff] }
 0x14f   : > { %v1802_v45 = vsel %vm646_vm0, %v1799_v27, %v1801_v18  ;;  %v1805_v62 = vsel %vm646_vm0, %v1803_v21, %v1804_v38  ;;  %v1807_v47 = vsel %vm646_vm0, %v1804_v38, %v1806_v23  ;;  %v1810_v41 = vsel %vm646_vm0, %v1808_v32, %v1809_v17 }
 0x150   : > { %v1812_v28 = vsel %vm646_vm0, %v1809_v17, %v1811_v20  ;;  %v1815_v54 = vsel %vm646_vm0, %v1813_v36, %v1814_v30  ;;  %v1817_v58 = vsel %vm646_vm0, %v1814_v30, %v1816_v56  ;;  %v1820_v40 = vsel %vm646_vm0, %v1818_v0, %v1819_v9  ;;  %v9064_v17 = vld [vmem:[#allocation60_spill] sm:$0xff]  ;;  %v9066_v20 = vld [vmem:[#allocation61_spill] sm:$0xff]  ;;  %v9068_v36 = vld [vmem:[#allocation62_spill] sm:$0xff] }
 0x151   : > { %v1822_v5 = vsel %vm646_vm0, %v1819_v9, %v1821_v2  ;;  %v6314_v24 = vadd.f32 %v6236_v60, %v5952_v8  ;;  %v1825_v48 = vsel %vm646_vm0, %v1823_v50, %v1824_v37  ;;  %v1827_v3 = vsel %vm646_vm0, %v1824_v37, %v1826_v49  ;;  %v9036_v60 = vld [vmem:[#allocation46_spill] sm:$0xff]  ;;  %v9070_v30 = vld [vmem:[#allocation63_spill] sm:$0xff]  ;;  %v9074_v2 = vld [vmem:[#allocation65_spill] sm:$0xff] }
 0x152   : > { %v6320_v35 = vadd.f32 %v6239_v22, %v5955_v14  ;;  %v6324_v19 = vadd.f32 %v6244_v15, %v5958_v46  ;;  %v6327_v13 = vadd.f32 %v1757_v61, %v5961_v25  ;;  %v6330_v55 = vadd.f32 %v1760_v42, %v5964_v57  ;;  %v9040_v14 = vld [vmem:[#allocation48_spill] sm:$0xff]  ;;  %v9042_v46 = vld [vmem:[#allocation49_spill] sm:$0xff]  ;;  %v9044_v25 = vld [vmem:[#allocation50_spill] sm:$0xff] }
 0x153   : > { %v6333_v8 = vadd.f32 %v1762_v10, %v5967_v12  ;;  %v6336_v52 = vadd.f32 %v1765_v31, %v9036_v60  ;;  %v6339_v39 = vadd.f32 %v1767_v34, %v9038_v16  ;;  %v6342_v22 = vadd.f32 %v1770_v43, %v9040_v14  ;;  %v9046_v57 = vld [vmem:[#allocation51_spill] sm:$0xff]  ;;  %v9048_v12 = vld [vmem:[#allocation52_spill] sm:$0xff]  ;;  %v9050_v31 = vld [vmem:[#allocation53_spill] sm:$0xff] }
 0x154   : > { %v6345_v15 = vadd.f32 %v1772_v63, %v9042_v46  ;;  %v6348_v61 = vadd.f32 %v1775_v11, %v9044_v25  ;;  %v6351_v42 = vadd.f32 %v1777_v4, %v9046_v57  ;;  %v6354_v10 = vadd.f32 %v1780_v51, %v9048_v12  ;;  %v9052_v34 = vld [vmem:[#allocation54_spill] sm:$0xff]  ;;  %v9054_v43 = vld [vmem:[#allocation55_spill] sm:$0xff]  ;;  %v9056_v63 = vld [vmem:[#allocation56_spill] sm:$0xff] }
 0x155   : > { %9035 = vst [vmem:[#allocation33_spill] sm:$0xff] %v6333_v8  ;;  %v6357_v27 = vadd.f32 %v1782_v33, %v9050_v31  ;;  %v6360_v18 = vadd.f32 %v1785_v7, %v9052_v34  ;;  %v6363_v21 = vadd.f32 %v1787_v1, %v9054_v43  ;;  %v6366_v38 = vadd.f32 %v1790_v6, %v9056_v63  ;;  %v9058_v11 = vld [vmem:[#allocation57_spill] sm:$0xff]  ;;  %v9060_v4 = vld [vmem:[#allocation58_spill] sm:$0xff]  ;;  %v6377_v51 = vld [vmem:[%s8292_s2 + $0x8] ss:$0 sm:$0xff] }
 0x156   : > { %9037 = vst [vmem:[#allocation37_spill] sm:$0xff] %v6336_v52  ;;  %v6369_v23 = vadd.f32 %v1792_v26, %v9058_v11  ;;  %v6372_v32 = vadd.f32 %v1795_v59, %v9060_v4  ;;  %v9062_v33 = vld [vmem:[#allocation59_spill] sm:$0xff]  ;;  %v6383_v1 = vadd.f32 %v1800_v29, %v9064_v17  ;;  %v6386_v6 = vadd.f32 %v1802_v45, %v9066_v20  ;;  %v9072_v0 = vld [vmem:[#allocation2_spill] sm:$0xff]  ;;  %v9076_v50 = vld [vmem:[#allocation4_spill] sm:$0xff] }
 0x157   : > { %9039 = vst [vmem:[#allocation41_spill] sm:$0xff] %v6339_v39  ;;  %v6380_v7 = vadd.f32 %v1797_v44, %v9062_v33  ;;  %v6389_v26 = vadd.f32 %v1805_v62, %v9068_v36  ;;  %v6392_v56 = vadd.f32 %v1807_v47, %v9070_v30  ;;  %v6395_v9 = vadd.f32 %v1810_v41, %v9072_v0  ;;  %v9078_v49 = vld [vmem:[#allocation6_spill] sm:$0xff]  ;;  %v9080_v29 = vld [vmem:[#allocation3_spill] sm:$0xff]  ;;  %v9082_v62 = vld [vmem:[#allocation9_spill] sm:$0xff] }
 0x158   : > { %9041 = vst [vmem:[#allocation45_spill] sm:$0xff] %v6342_v22  ;;  %v6398_v59 = vadd.f32 %v1812_v28, %v9074_v2  ;;  %v6401_v37 = vadd.f32 %v1815_v54, %v9076_v50  ;;  %v6404_v44 = vadd.f32 %v1817_v58, %v9078_v49  ;;  %v6407_v45 = vadd.f32 %v1820_v40, %v9080_v29  ;;  %v9084_v47 = vld [vmem:[#allocation13_spill] sm:$0xff]  ;;  %v9088_v28 = vld [vmem:[#allocation7_spill] sm:$0xff]  ;;  %v9089_v54 = vld [vmem:[#allocation8_spill] sm:$0xff] }
 0x159   : > { %9043 = vst [vmem:[#allocation64_spill] sm:$0xff] %v6345_v15  ;;  %v6410_v60 = vadd.f32 %v1822_v5, %v9082_v62  ;;  %v6413_v16 = vadd.f32 %v1825_v48, %v9084_v47  ;;  %v9086_v41 = vld [vmem:[#allocation29_spill] sm:$0xff]  ;;  %v6420_v46 = vmul.f32 %v6377_v51, %v9088_v28  ;;  %v6424_v58 = vmul.f32 %v6377_v51, %v9089_v54  ;;  %v9090_v25 = vld [vmem:[#allocation66_spill] sm:$0xff]  ;;  %v9091_v5 = vld [vmem:[#allocation12_spill] sm:$0xff] }
 0x15a   : > { %9045 = vst [vmem:[#allocation46_spill] sm:$0xff] %v6348_v61  ;;  %v6416_v14 = vadd.f32 %v1827_v3, %v9086_v41  ;;  %v6428_v40 = vmul.f32 %v6377_v51, %v9090_v25  ;;  %v6432_v57 = vmul.f32 %v6377_v51, %v9091_v5  ;;  %v9092_v48 = vld [vmem:[#allocation14_spill] sm:$0xff]  ;;  %v9093_v12 = vld [vmem:[#allocation67_spill] sm:$0xff]  ;;  %v9096_v4 = vld [vmem:[#allocation68_spill] sm:$0xff] }
 0x15b   : > { %9047 = vst [vmem:[#allocation47_spill] sm:$0xff] %v6351_v42  ;;  %v6436_v3 = vmul.f32 %v6377_v51, %v9092_v48  ;;  %v6440_v31 = vmul.f32 %v6377_v51, %v9093_v12  ;;  %v9094_v34 = vld [vmem:[#allocation10_spill] sm:$0xff]  ;;  %v9095_v63 = vld [vmem:[#allocation11_spill] sm:$0xff]  ;;  %v1901_v33 = vmul.f32 %v6377_v51, %v9096_v4  ;;  %v9098_v36 = vld [vmem:[#allocation16_spill] sm:$0xff] }
 0x15c   : > { %9049 = vst [vmem:[#allocation48_spill] sm:$0xff] %v6354_v10  ;;  %v6444_v43 = vmul.f32 %v6377_v51, %v9094_v34  ;;  %v6448_v11 = vmul.f32 %v6377_v51, %v9095_v63  ;;  %v9097_v17 = vld [vmem:[#allocation15_spill] sm:$0xff]  ;;  %v6456_v30 = vmul.f32 %v6377_v51, %v9098_v36  ;;  %v9099_v0 = vld [vmem:[#allocation69_spill] sm:$0xff]  ;;  %v9101_v29 = vld [vmem:[#allocation18_spill] sm:$0xff]  ;;  %v1989_v10 = vrot.slane %v6420_v46, 2 }
 0x15d   : > { %9051 = vst [vmem:[#allocation49_spill] sm:$0xff] %v6357_v27  ;;  %v1902_v20 = vmul.f32 %v6377_v51, %v9097_v17  ;;  %v1904_v2 = vmul.f32 %v6377_v51, %v9099_v0  ;;  %v9100_v50 = vld [vmem:[#allocation17_spill] sm:$0xff]  ;;  %v6464_v62 = vmul.f32 %v6377_v51, %v9101_v29  ;;  %v9102_v47 = vld [vmem:[#allocation70_spill] sm:$0xff]  ;;  %v9103_v28 = vld [vmem:[#allocation19_spill] sm:$0xff]  ;;  %v1992_v42 = vrot.slane %v6428_v40, 2 }
 0x15e   : > { %9053 = vst [vmem:[#allocation50_spill] sm:$0xff] %v6360_v18  ;;  %v1905_v49 = vmul.f32 %v6377_v51, %v9100_v50  ;;  %v6468_v41 = vmul.f32 %v6377_v51, %v9102_v47  ;;  %v6472_v54 = vmul.f32 %v6377_v51, %v9103_v28  ;;  %v9104_v25 = vld [vmem:[#allocation22_spill] sm:$0xff]  ;;  %v9105_v48 = vld [vmem:[#allocation71_spill] sm:$0xff]  ;;  %v9106_v34 = vld [vmem:[#allocation20_spill] sm:$0xff]  ;;  %v1995_v61 = vrot.slane %v6436_v3, 2 }
 0x15f   : > { %9055 = vst [vmem:[#allocation51_spill] sm:$0xff] %v6363_v21  ;;  %v6476_v5 = vmul.f32 %v6377_v51, %v9104_v25  ;;  %v6480_v12 = vmul.f32 %v6377_v51, %v9105_v48  ;;  %v6484_v63 = vmul.f32 %v6377_v51, %v9106_v34  ;;  %v9107_v4 = vld [vmem:[#allocation21_spill] sm:$0xff]  ;;  %v9108_v36 = vld [vmem:[#allocation72_spill] sm:$0xff]  ;;  %v9110_v47 = vld [vmem:[#allocation26_spill] sm:$0xff]  ;;  %v1999_v15 = vrot.slane %v6444_v43, 2 }
 0x160   : > { %9057 = vst [vmem:[#allocation52_spill] sm:$0xff] %v6366_v38  ;;  %v6488_v17 = vmul.f32 %v6377_v51, %v9107_v4  ;;  %v6492_v0 = vmul.f32 %v6377_v51, %v9108_v36  ;;  %v9109_v50 = vld [vmem:[#allocation25_spill] sm:$0xff]  ;;  %v6500_v28 = vmul.f32 %v6377_v51, %v9110_v47  ;;  %v9112_v34 = vld [vmem:[#allocation23_spill] sm:$0xff]  ;;  %v9128_v38 = vld [vmem:[#allocation42_spill] sm:$0xff]  ;;  %v2002_v22 = vrot.slane %v1901_v33, 2 }
 0x161   : > { %9059 = vst [vmem:[#allocation53_spill] sm:$0xff] %v6369_v23  ;;  %v6496_v29 = vmul.f32 %v6377_v51, %v9109_v50  ;;  %v9111_v25 = vld [vmem:[#allocation73_spill] sm:$0xff]  ;;  %v6508_v4 = vmul.f32 %v6377_v51, %v9112_v34  ;;  %v9127_v23 = vld [vmem:[#allocation40_spill] sm:$0xff]  ;;  %v9129_v21 = vld [vmem:[#allocation79_spill] sm:$0xff]  ;;  %v2004_v39 = vrot.slane %v1902_v20, 2  ;;  %v2009_v40 = vrot.slane %v1905_v49, 2 }
 0x162   : > { %9061 = vst [vmem:[#allocation54_spill] sm:$0xff] %v6372_v32  ;;  %v6504_v48 = vmul.f32 %v6377_v51, %v9111_v25  ;;  %v9126_v32 = vld [vmem:[#allocation78_spill] sm:$0xff]  ;;  %v9131_v27 = vld [vmem:[#allocation39_spill] sm:$0xff]  ;;  %v9132_v52 = vld [vmem:[#allocation5_spill] sm:$0xff] }
 0x163   : > { %9063 = vst [vmem:[#allocation55_spill] sm:$0xff] %v6380_v7  ;;  %v9125_v7 = vld [vmem:[#allocation35_spill] sm:$0xff]  ;;  %v9130_v18 = vld [vmem:[#allocation38_spill] sm:$0xff]  ;;  %v6597_v46 = vmul.f32 %v6377_v51, %v9132_v52  ;;  %v2012_v52 = vrot.slane %v6468_v41, 2 }
 0x164   : > { %9065 = vst [vmem:[#allocation56_spill] sm:$0xff] %v6383_v1  ;;  %v9124_v1 = vld [vmem:[#allocation34_spill] sm:$0xff]  ;;  %v9133_v8 = vld [vmem:[#allocation43_spill] sm:$0xff] }
 0x165   : > { %9067 = vst [vmem:[#allocation57_spill] sm:$0xff] %v6386_v6  ;;  %v9123_v6 = vld [vmem:[#allocation77_spill] sm:$0xff]  ;;  %v6602_v3 = vmul.f32 %v6377_v51, %v9133_v8 }
 0x166   : > { %9069 = vst [vmem:[#allocation58_spill] sm:$0xff] %v6389_v26  ;;  %v9122_v26 = vld [vmem:[#allocation36_spill] sm:$0xff] }
 0x167   : > { %9071 = vst [vmem:[#allocation59_spill] sm:$0xff] %v6392_v56  ;;  %v9121_v56 = vld [vmem:[#allocation32_spill] sm:$0xff] }
 0x168   : > { %9073 = vst [vmem:[#allocation60_spill] sm:$0xff] %v6395_v9  ;;  %v9120_v9 = vld [vmem:[#allocation76_spill] sm:$0xff] }
 0x169   : > { %9075 = vst [vmem:[#allocation61_spill] sm:$0xff] %v6398_v59  ;;  %v9119_v59 = vld [vmem:[#allocation31_spill] sm:$0xff] }
 0x16a   : > { %9077 = vst [vmem:[#allocation62_spill] sm:$0xff] %v6401_v37  ;;  %v9118_v37 = vld [vmem:[#allocation30_spill] sm:$0xff] }
 0x16b   : > { %9079 = vst [vmem:[#allocation63_spill] sm:$0xff] %v6404_v44  ;;  %v9117_v44 = vld [vmem:[#allocation75_spill] sm:$0xff] }
 0x16c   : > { %9081 = vst [vmem:[#allocation2_spill] sm:$0xff] %v6407_v45  ;;  %v9116_v45 = vld [vmem:[#allocation28_spill] sm:$0xff]  ;;  %v6528_v34 = vmul.f32 %v6377_v51, %v9117_v44  ;;  %v6548_v44 = vmul.f32 %v6377_v51, %v9122_v26  ;;  %v6568_v26 = vmul.f32 %v6377_v51, %v9127_v23  ;;  %v1990_v23 = vrot.slane %v6424_v58, 2 }
 0x16d   : > { %9083 = vst [vmem:[#allocation65_spill] sm:$0xff] %v6410_v60  ;;  %v9115_v60 = vld [vmem:[#allocation27_spill] sm:$0xff]  ;;  %v6524_v25 = vmul.f32 %v6377_v51, %v9116_v45  ;;  %v6544_v45 = vmul.f32 %v6377_v51, %v9121_v56  ;;  %v6564_v56 = vmul.f32 %v6377_v51, %v9126_v32  ;;  %v6584_v32 = vmul.f32 %v6377_v51, %v9131_v27 }
 0x16e   : > { %9085 = vst [vmem:[#allocation4_spill] sm:$0xff] %v6413_v16  ;;  %v9114_v16 = vld [vmem:[#allocation74_spill] sm:$0xff]  ;;  %v6520_v47 = vmul.f32 %v6377_v51, %v9115_v60  ;;  %v6540_v60 = vmul.f32 %v6377_v51, %v9120_v9  ;;  %v6560_v9 = vmul.f32 %v6377_v51, %v9125_v7  ;;  %v6580_v7 = vmul.f32 %v6377_v51, %v9130_v18 }
 0x16f   : > { %9087 = vst [vmem:[#allocation6_spill] sm:$0xff] %v6416_v14  ;;  %v9113_v14 = vld [vmem:[#allocation24_spill] sm:$0xff]  ;;  %v6516_v50 = vmul.f32 %v6377_v51, %v9114_v16  ;;  %v6536_v16 = vmul.f32 %v6377_v51, %v9119_v59  ;;  %v6556_v59 = vmul.f32 %v6377_v51, %v9124_v1  ;;  %v6576_v1 = vmul.f32 %v6377_v51, %v9129_v21 }
 0x170   : > { %v6512_v36 = vmul.f32 %v6377_v51, %v9113_v14  ;;  %v6532_v14 = vmul.f32 %v6377_v51, %v9118_v37  ;;  %v6552_v37 = vmul.f32 %v6377_v51, %v9123_v6  ;;  %v6572_v6 = vmul.f32 %v6377_v51, %v9128_v38 }
 0x171   : > { %v1994_v38 = vrot.slane %v6432_v57, 2  ;;  %v1997_v21 = vrot.slane %v6440_v31, 2  ;;  %v2000_v18 = vrot.slane %v6448_v11, 2  ;;  %v2005_v27 = vrot.slane %v6456_v30, 2  ;;  %v9134_v31 = vld [vmem:[#allocation44_spill] sm:$0xff] }
 0x172   : > { %v2007_v58 = vrot.slane %v1904_v2, 2  ;;  %v2010_v57 = vrot.slane %v6464_v62, 2  ;;  %v6606_v43 = vmul.f32 %v6377_v51, %v9134_v31  ;;  %v9135_v11 = vunpack.c.l.bf16 %v9033_v53 }
 0x173   : > { %v1991_v20 = vsel %vm888_vm1, %v1989_v10, %v1990_v23  ;;  %v1993_v30 = vsel %vm888_vm1, %v1990_v23, %v1992_v42  ;;  %v1996_v2 = vsel %vm888_vm1, %v1994_v38, %v1995_v61  ;;  %v1998_v8 = vsel %vm888_vm1, %v1995_v61, %v1997_v21 }
 0x174   : > { %v6611_v33 = vmul.f32 %v6377_v51, %v9135_v11  ;;  %v2001_v49 = vsel %vm888_vm1, %v1999_v15, %v2000_v18  ;;  %v6620_v62 = vsel %vm888_vm1, %v2000_v18, %v2002_v22  ;;  %v6623_v53 = vsel %vm888_vm1, %v2004_v39, %v2005_v27 }
 0x175   : > { %v2014_v51 = vrot.slane %v6472_v54, 2  ;;  %v6627_v41 = vsel %vm888_vm1, %v2005_v27, %v2007_v58  ;;  %v6630_v10 = vsel %vm888_vm1, %v2009_v40, %v2010_v57  ;;  %v2015_v42 = vrot.slane %v6476_v5, 2 }
 0x176   : > { %v2017_v61 = vrot.slane %v6480_v12, 2  ;;  %v6635_v15 = vsel %vm888_vm1, %v2010_v57, %v2012_v52  ;;  %v2019_v22 = vrot.slane %v6484_v63, 2  ;;  %v2020_v39 = vrot.slane %v6488_v17, 2 }
 0x177   : > { %v2022_v23 = vrot.slane %v6492_v0, 2  ;;  %v2024_v54 = vrot.slane %v6496_v29, 2  ;;  %v2025_v38 = vrot.slane %v6500_v28, 2  ;;  %v2027_v21 = vrot.slane %v6504_v48, 2 }
 0x178   : > { %v2029_v18 = vrot.slane %v6508_v4, 2  ;;  %v2030_v5 = vrot.slane %v6512_v36, 2  ;;  %v2032_v12 = vrot.slane %v6516_v50, 2  ;;  %v2034_v27 = vrot.slane %v6520_v47, 2 }
 0x179   : > { %v2035_v63 = vrot.slane %v6524_v25, 2  ;;  %v2037_v17 = vrot.slane %v6528_v34, 2  ;;  %v2039_v0 = vrot.slane %v6532_v14, 2  ;;  %v2040_v29 = vrot.slane %v6536_v16, 2 }
 0x17a   : > { %v2042_v28 = vrot.slane %v6540_v60, 2  ;;  %v2016_v48 = vsel %vm888_vm1, %v2014_v51, %v2015_v42  ;;  %v2044_v4 = vrot.slane %v6544_v45, 2  ;;  %v2045_v36 = vrot.slane %v6548_v44, 2 }
 0x17b   : > { %v2047_v50 = vrot.slane %v6552_v37, 2  ;;  %v2018_v47 = vsel %vm888_vm1, %v2015_v42, %v2017_v61  ;;  %v2021_v25 = vsel %vm888_vm1, %v2019_v22, %v2020_v39  ;;  %v2023_v34 = vsel %vm888_vm1, %v2020_v39, %v2022_v23  ;;  %v6689_v42 = vld [vmem:[%s8293_s3] ss:$0 sm:$0xff] }
 0x17c   : > { %v2026_v14 = vsel %vm888_vm1, %v2024_v54, %v2025_v38  ;;  %v2028_v16 = vsel %vm888_vm1, %v2025_v38, %v2027_v21  ;;  %v2031_v60 = vsel %vm888_vm1, %v2029_v18, %v2030_v5  ;;  %v6663_v58 = vsel %vm888_vm1, %v2030_v5, %v2032_v12  ;;  %v9143_v12 = vld [vmem:[#allocation45_spill] sm:$0xff] }
 0x17d   : > { %v6666_v45 = vsel %vm888_vm1, %v2034_v27, %v2035_v63  ;;  %v6669_v44 = vsel %vm888_vm1, %v2035_v63, %v2037_v17  ;;  %v6672_v37 = vsel %vm888_vm1, %v2039_v0, %v2040_v29  ;;  %v6675_v40 = vsel %vm888_vm1, %v2040_v29, %v2042_v28  ;;  %v9145_v17 = vld [vmem:[#allocation64_spill] sm:$0xff]  ;;  %v9146_v29 = vld [vmem:[#allocation46_spill] sm:$0xff] }
 0x17e   : > { %v2049_v57 = vrot.slane %v6556_v59, 2  ;;  %v6679_v31 = vsel %vm888_vm1, %v2044_v4, %v2045_v36  ;;  %v6682_v11 = vsel %vm888_vm1, %v2045_v36, %v2047_v50  ;;  %v2050_v52 = vrot.slane %v6560_v9, 2  ;;  %v9148_v36 = vld [vmem:[#allocation47_spill] sm:$0xff] }
 0x17f   : > { %v2101_v51 = vadd.f32 %v1991_v20, %v6314_v24  ;;  %v2052_v61 = vrot.slane %v6564_v56, 2  ;;  %v2054_v22 = vrot.slane %v6568_v26, 2  ;;  %v2055_v59 = vrot.slane %v6572_v6, 2 }
 0x180   : > { %v2102_v39 = vadd.f32 %v1993_v30, %v6320_v35  ;;  %v2057_v23 = vrot.slane %v6576_v1, 2  ;;  %v2059_v54 = vrot.slane %v6580_v7, 2  ;;  %v2060_v9 = vrot.slane %v6584_v32, 2 }
 0x181   : > { %v2103_v24 = vadd.f32 %v1996_v2, %v6324_v19  ;;  %v2062_v20 = vrot.slane %v6597_v46, 2  ;;  %v2064_v38 = vrot.slane %v6602_v3, 2  ;;  %v2065_v56 = vrot.slane %v6606_v43, 2  ;;  %v9137_v46 = vld [vmem:[#allocation33_spill] sm:$0xff] }
 0x182   : > { %v2104_v26 = vadd.f32 %v1998_v8, %v6327_v13  ;;  %v6704_v6 = vsel %vm888_vm1, %v2049_v57, %v2050_v52  ;;  %v2067_v35 = vrot.slane %v6611_v33, 2  ;;  %v2105_v1 = vadd.f32 %v2001_v49, %v6330_v55  ;;  %v9139_v33 = vld [vmem:[#allocation37_spill] sm:$0xff]  ;;  %v9149_v57 = vld [vmem:[#allocation48_spill] sm:$0xff] }
 0x183   : > { %v6709_v7 = vadd.f32 %v6689_v42, %v2101_v51  ;;  %v6712_v19 = vsel %vm888_vm1, %v2050_v52, %v2052_v61  ;;  %v6715_v32 = vsel %vm888_vm1, %v2054_v22, %v2055_v59  ;;  %v2106_v3 = vadd.f32 %v6620_v62, %v9137_v46  ;;  %v9141_v62 = vld [vmem:[#allocation41_spill] sm:$0xff]  ;;  %v9162_v46 = vld [vmem:[#allocation55_spill] sm:$0xff] }
 0x184   : > { %v6720_v13 = vadd.f32 %v6689_v42, %v2102_v39  ;;  %v6723_v43 = vsel %vm888_vm1, %v2055_v59, %v2057_v23  ;;  %v6726_v55 = vsel %vm888_vm1, %v2059_v54, %v2060_v9  ;;  %v2107_v30 = vadd.f32 %v6623_v53, %v9139_v33  ;;  %v9151_v61 = vld [vmem:[#allocation49_spill] sm:$0xff]  ;;  %v9152_v59 = vld [vmem:[#allocation50_spill] sm:$0xff]  ;;  %v9154_v23 = vld [vmem:[#allocation51_spill] sm:$0xff] }
 0x185   : > { %9136 = vst [vmem:[#allocation3_spill] sm:$0xff] %v6709_v7  ;;  %v6731_v2 = vadd.f32 %v6689_v42, %v2103_v24  ;;  %v6734_v8 = vsel %vm888_vm1, %v2060_v9, %v2062_v20  ;;  %v6737_v49 = vsel %vm888_vm1, %v2064_v38, %v2065_v56  ;;  %v2108_v21 = vadd.f32 %v6627_v41, %v9141_v62  ;;  %v9156_v9 = vld [vmem:[#allocation52_spill] sm:$0xff] }
 0x186   : > { %9138 = vst [vmem:[#allocation9_spill] sm:$0xff] %v6720_v13  ;;  %v6742_v18 = vadd.f32 %v6689_v42, %v2104_v26  ;;  %v6745_v5 = vsel %vm888_vm1, %v2065_v56, %v2067_v35  ;;  %v2109_v53 = vadd.f32 %v6630_v10, %v9143_v12  ;;  %v6750_v27 = vadd.f32 %v6689_v42, %v2105_v1  ;;  %v9160_v26 = vld [vmem:[#allocation54_spill] sm:$0xff] }
 0x187   : > { %9140 = vst [vmem:[#allocation13_spill] sm:$0xff] %v6731_v2  ;;  %v3399_v63 = vmul.f32 -1.442695, %v6709_v7  ;;  %v2110_v0 = vadd.f32 %v6635_v15, %v9145_v17  ;;  %v2111_v28 = vadd.f32 %v2016_v48, %v9146_v29  ;;  %v6757_v41 = vadd.f32 %v6689_v42, %v2106_v3 }
 0x188   : > { %9142 = vst [vmem:[#allocation29_spill] sm:$0xff] %v6742_v18  ;;  %v3400_v4 = vmul.f32 -1.442695, %v6720_v13  ;;  %v2112_v50 = vadd.f32 %v2018_v47, %v9148_v36  ;;  %v2113_v52 = vadd.f32 %v2021_v25, %v9149_v57  ;;  %v6763_v10 = vadd.f32 %v6689_v42, %v2107_v30  ;;  %v9164_v30 = vld [vmem:[#allocation56_spill] sm:$0xff] }
 0x189   : > { %9144 = vst [vmem:[#allocation7_spill] sm:$0xff] %v6750_v27  ;;  %v3401_v51 = vmul.f32 -1.442695, %v6731_v2  ;;  %v2114_v22 = vadd.f32 %v2023_v34, %v9151_v61  ;;  %v2115_v15 = vadd.f32 %v2026_v14, %v9152_v59  ;;  %v6769_v48 = vadd.f32 %v6689_v42, %v2108_v21  ;;  %v9158_v14 = vld [vmem:[#allocation53_spill] sm:$0xff] }
 0x18a   : > { %9147 = vst [vmem:[#allocation8_spill] sm:$0xff] %v6757_v41  ;;  %v3402_v39 = vmul.f32 -1.442695, %v6742_v18  ;;  %v2116_v54 = vadd.f32 %v2028_v16, %v9154_v23  ;;  %v6774_v47 = vadd.f32 %v6689_v42, %v2109_v53  ;;  %3733 = vpow2.f32 %v3399_v63  ;;  %v9166_v53 = vld [vmem:[#allocation57_spill] sm:$0xff] }
 0x18b   : > { %9150 = vst [vmem:[#allocation66_spill] sm:$0xff] %v6763_v10  ;;  %v3403_v25 = vmul.f32 -1.442695, %v6750_v27  ;;  %v2117_v24 = vadd.f32 %v2031_v60, %v9156_v9  ;;  %v6779_v20 = vadd.f32 %v6689_v42, %v2110_v0  ;;  %3735 = vpow2.f32 %v3400_v4 }
 0x18c   : > { %9153 = vst [vmem:[#allocation12_spill] sm:$0xff] %v6769_v48  ;;  %v3404_v34 = vmul.f32 -1.442695, %v6757_v41  ;;  %v2118_v38 = vadd.f32 %v6663_v58, %v9158_v14  ;;  %v6785_v56 = vadd.f32 %v6689_v42, %v2111_v28  ;;  %3737 = vpow2.f32 %v3401_v51 }
 0x18d   : > { %9155 = vst [vmem:[#allocation14_spill] sm:$0xff] %v6774_v47  ;;  %v3405_v16 = vmul.f32 -1.442695, %v6763_v10  ;;  %v2119_v35 = vadd.f32 %v6666_v45, %v9160_v26  ;;  %v6791_v60 = vadd.f32 %v6689_v42, %v2112_v50  ;;  %3739 = vpow2.f32 %v3402_v39 }
 0x18e   : > { %9157 = vst [vmem:[#allocation67_spill] sm:$0xff] %v6779_v20  ;;  %v3406_v1 = vmul.f32 -1.442695, %v6769_v48  ;;  %v2120_v3 = vadd.f32 %v6669_v44, %v9162_v46  ;;  %v6797_v58 = vadd.f32 %v6689_v42, %v2113_v52  ;;  %3741 = vpow2.f32 %v3403_v25 }
 0x18f   : > { %9159 = vst [vmem:[#allocation10_spill] sm:$0xff] %v6785_v56  ;;  %v3407_v33 = vmul.f32 -1.442695, %v6774_v47  ;;  %v2121_v62 = vadd.f32 %v6672_v37, %v9164_v30  ;;  %v6803_v45 = vadd.f32 %v6689_v42, %v2114_v22  ;;  %3743 = vpow2.f32 %v3404_v34  ;;  %v9168_v37 = vld [vmem:[#allocation58_spill] sm:$0xff] }
 0x190   : > { %9161 = vst [vmem:[#allocation11_spill] sm:$0xff] %v6791_v60  ;;  %v3408_v21 = vmul.f32 -1.442695, %v6779_v20  ;;  %v6806_v12 = vpop.eup %3733  ;;  %v2122_v44 = vadd.f32 %v6675_v40, %v9166_v53  ;;  %v6811_v63 = vadd.f32 %v6689_v42, %v2115_v15  ;;  %3745 = vpow2.f32 %v3405_v16  ;;  %v9170_v40 = vld [vmem:[#allocation59_spill] sm:$0xff] }
 0x191   : > { %9163 = vst [vmem:[#allocation68_spill] sm:$0xff] %v6797_v58  ;;  %v3409_v17 = vmul.f32 -1.442695, %v6785_v56  ;;  %v6814_v0 = vpop.eup %3735  ;;  %v2123_v29 = vadd.f32 %v6679_v31, %v9168_v37  ;;  %v6819_v28 = vadd.f32 %v6689_v42, %v2116_v54  ;;  %3747 = vpow2.f32 %v3406_v1  ;;  %v9172_v31 = vld [vmem:[#allocation60_spill] sm:$0xff] }
 0x192   : > { %9165 = vst [vmem:[#allocation15_spill] sm:$0xff] %v6803_v45  ;;  %v3410_v4 = vmul.f32 -1.442695, %v6791_v60  ;;  %v6822_v36 = vpop.eup %3737  ;;  %v2124_v50 = vadd.f32 %v6682_v11, %v9170_v40  ;;  %v6827_v57 = vadd.f32 %v6689_v42, %v2117_v24  ;;  %3749 = vpow2.f32 %v3407_v33  ;;  %v9174_v11 = vld [vmem:[#allocation61_spill] sm:$0xff] }
 0x193   : > { %9167 = vst [vmem:[#allocation16_spill] sm:$0xff] %v6811_v63  ;;  %v3411_v52 = vmul.f32 -1.442695, %v6797_v58  ;;  %v6830_v51 = vpop.eup %3739  ;;  %v2125_v61 = vadd.f32 %v6704_v6, %v9172_v31  ;;  %v6835_v22 = vadd.f32 %v6689_v42, %v2118_v38  ;;  %3751 = vpow2.f32 %v3408_v21  ;;  %v9176_v6 = vld [vmem:[#allocation62_spill] sm:$0xff] }
 0x194   : > { %9169 = vst [vmem:[#allocation69_spill] sm:$0xff] %v6819_v28  ;;  %v3412_v59 = vmul.f32 -1.442695, %v6803_v45  ;;  %v6838_v15 = vpop.eup %3741  ;;  %v2126_v39 = vadd.f32 %v6712_v19, %v9174_v11  ;;  %v6843_v23 = vadd.f32 %v6689_v42, %v2119_v35  ;;  %3753 = vpow2.f32 %v3409_v17  ;;  %v9178_v19 = vld [vmem:[#allocation63_spill] sm:$0xff] }
 0x195   : > { %9171 = vst [vmem:[#allocation17_spill] sm:$0xff] %v6827_v57  ;;  %v3413_v54 = vmul.f32 -1.442695, %v6811_v63  ;;  %v6846_v25 = vpop.eup %3743  ;;  %v2127_v9 = vadd.f32 %v6715_v32, %v9176_v6  ;;  %v6851_v24 = vadd.f32 %v6689_v42, %v2120_v3  ;;  %3755 = vpow2.f32 %v3410_v4  ;;  %v9180_v32 = vld [vmem:[#allocation2_spill] sm:$0xff] }
 0x196   : > { %9173 = vst [vmem:[#allocation18_spill] sm:$0xff] %v6835_v22  ;;  %v3414_v34 = vmul.f32 -1.442695, %v6819_v28  ;;  %v6854_v14 = vpop.eup %3745  ;;  %v2128_v38 = vadd.f32 %v6723_v43, %v9178_v19  ;;  %v6859_v16 = vadd.f32 %v6689_v42, %v2121_v62  ;;  %3757 = vpow2.f32 %v3411_v52  ;;  %v9182_v43 = vld [vmem:[#allocation65_spill] sm:$0xff] }
 0x197   : > { %9175 = vst [vmem:[#allocation70_spill] sm:$0xff] %v6843_v23  ;;  %v3415_v26 = vmul.f32 -1.442695, %v6827_v57  ;;  %v6862_v35 = vpop.eup %3747  ;;  %v2129_v1 = vadd.f32 %v6726_v55, %v9180_v32  ;;  %v6867_v46 = vadd.f32 %v6689_v42, %v2122_v44  ;;  %3759 = vpow2.f32 %v3412_v59  ;;  %v9184_v55 = vld [vmem:[#allocation4_spill] sm:$0xff] }
 0x198   : > { %9177 = vst [vmem:[#allocation19_spill] sm:$0xff] %v6851_v24  ;;  %v3416_v3 = vmul.f32 -1.442695, %v6835_v22  ;;  %v6870_v33 = vpop.eup %3749  ;;  %v2130_v30 = vadd.f32 %v6734_v8, %v9182_v43  ;;  %v6875_v62 = vadd.f32 %v6689_v42, %v2123_v29  ;;  %3761 = vpow2.f32 %v3413_v54  ;;  %v9186_v8 = vld [vmem:[#allocation6_spill] sm:$0xff] }
 0x199   : > { %9179 = vst [vmem:[#allocation22_spill] sm:$0xff] %v6859_v16  ;;  %v3417_v21 = vmul.f32 -1.442695, %v6843_v23  ;;  %v6878_v53 = vpop.eup %3751  ;;  %v2131_v44 = vadd.f32 %v6737_v49, %v9184_v55  ;;  %v6883_v17 = vadd.f32 %v6689_v42, %v2124_v50  ;;  %3763 = vpow2.f32 %v3414_v34 }
 0x19a   : > { %9181 = vst [vmem:[#allocation71_spill] sm:$0xff] %v6867_v46  ;;  %v3418_v37 = vmul.f32 -1.442695, %v6851_v24  ;;  %v6886_v4 = vpop.eup %3753  ;;  %v2132_v29 = vadd.f32 %v6745_v5, %v9186_v8  ;;  %v6891_v40 = vadd.f32 %v6689_v42, %v2125_v61  ;;  %3765 = vpow2.f32 %v3415_v26 }
 0x19b   : > { %9183 = vst [vmem:[#allocation20_spill] sm:$0xff] %v6875_v62  ;;  %v3419_v52 = vmul.f32 -1.442695, %v6859_v16  ;;  %v3756_v31 = vpop.eup %3755  ;;  %v6895_v49 = vadd.f32 %v6689_v42, %v2126_v39  ;;  %v6898_v50 = vadd.f32 %v6689_v42, %v2127_v9  ;;  %3767 = vpow2.f32 %v3416_v3 }
 0x19c   : > { %9185 = vst [vmem:[#allocation21_spill] sm:$0xff] %v6883_v17  ;;  %v3420_v59 = vmul.f32 -1.442695, %v6867_v46  ;;  %v3758_v11 = vpop.eup %3757  ;;  %v6902_v54 = vadd.f32 %v6689_v42, %v2128_v38  ;;  %v6905_v5 = vadd.f32 %v6689_v42, %v2129_v1  ;;  %3769 = vpow2.f32 %v3417_v21 }
 0x19d   : > { %9187 = vst [vmem:[#allocation72_spill] sm:$0xff] %v6891_v40  ;;  %v3421_v61 = vmul.f32 -1.442695, %v6875_v62  ;;  %v3760_v6 = vpop.eup %3759  ;;  %v6909_v39 = vadd.f32 %v6689_v42, %v2130_v30  ;;  %v6912_v9 = vadd.f32 %v6689_v42, %v2131_v44  ;;  %3771 = vpow2.f32 %v3418_v37 }
 0x19e   : > { %9188 = vst [vmem:[#allocation25_spill] sm:$0xff] %v6895_v49  ;;  %v3422_v34 = vmul.f32 -1.442695, %v6883_v17  ;;  %v3762_v19 = vpop.eup %3761  ;;  %v6916_v38 = vadd.f32 %v6689_v42, %v2132_v29  ;;  %3773 = vpow2.f32 %v3419_v52  ;;  %v3423_v26 = vmul.f32 -1.442695, %v6891_v40 }
 0x19f   : > { %9189 = vst [vmem:[#allocation26_spill] sm:$0xff] %v6898_v50  ;;  %v3764_v32 = vpop.eup %3763  ;;  %3775 = vpow2.f32 %v3420_v59  ;;  %v3424_v1 = vmul.f32 -1.442695, %v6895_v49  ;;  %v6921_v3 = vadd.f32 1.0, %v6806_v12  ;;  %v3425_v30 = vmul.f32 -1.442695, %v6898_v50 }
 0x1a0   : > { %9190 = vst [vmem:[#allocation73_spill] sm:$0xff] %v6902_v54  ;;  %v3766_v43 = vpop.eup %3765  ;;  %3777 = vpow2.f32 %v3421_v61  ;;  %v3426_v21 = vmul.f32 -1.442695, %v6902_v54  ;;  %v3427_v55 = vmul.f32 -1.442695, %v6905_v5  ;;  %v6937_v52 = vadd.f32 1.0, %v6814_v0 }
 0x1a1   : > { %9191 = vst [vmem:[#allocation23_spill] sm:$0xff] %v6905_v5  ;;  %v3768_v42 = vpop.eup %3767  ;;  %3779 = vpow2.f32 %v3422_v34  ;;  %v6927_v44 = vmul.f32 -1.442695, %v6909_v39  ;;  %v6930_v37 = vmul.f32 -1.442695, %v6912_v9  ;;  %v2308_v8 = vand.u32 2147483648, %v6921_v3 }
 0x1a2   : > { %9192 = vst [vmem:[#allocation24_spill] sm:$0xff] %v6909_v39  ;;  %v3770_v12 = vpop.eup %3769  ;;  %3781 = vpow2.f32 %v3423_v26  ;;  %v6934_v29 = vmul.f32 -1.442695, %v6916_v38  ;;  %v6940_v59 = vadd.f32 1.0, %v6822_v36  ;;  %v6943_v34 = vadd.f32 1.0, %v6830_v51 }
 0x1a3   : > { %9193 = vst [vmem:[#allocation74_spill] sm:$0xff] %v6912_v9  ;;  %v3772_v61 = vpop.eup %3771  ;;  %3783 = vpow2.f32 %v3424_v1  ;;  %v6946_v9 = vadd.f32 1.0, %v6838_v15  ;;  %v6949_v39 = vadd.f32 1.0, %v6846_v25  ;;  %v2323_v36 = vand.u32 2147483648, %v6937_v52 }
 0x1a4   : > { %9194 = vst [vmem:[#allocation27_spill] sm:$0xff] %v6916_v38  ;;  %v3774_v26 = vpop.eup %3773  ;;  %3785 = vpow2.f32 %v3425_v30  ;;  %v6952_v38 = vadd.f32 1.0, %v6854_v14  ;;  %v6957_v51 = vadd.f32 1.0, %v6862_v35  ;;  %v6959_v1 = vor.u32 1.1754944e-38, %v2308_v8 }
 0x1a5   : > { %v3776_v5 = vpop.eup %3775  ;;  %3787 = vpow2.f32 %v3426_v21  ;;  %v2338_v15 = vand.u32 2147483648, %v6940_v59  ;;  %v6963_v54 = vadd.f32 1.0, %v6870_v33  ;;  %v6966_v14 = vadd.f32 1.0, %v6878_v53 }
 0x1a6   : > { %v3778_v25 = vpop.eup %3777  ;;  %3789 = vrcp.f32 %v6921_v3  ;;  %v6971_v21 = vadd.f32 1.0, %v6886_v4  ;;  %v6973_v35 = vadd.f32 1.0, %v3756_v31  ;;  %v6977_v33 = vadd.f32 1.0, %v3758_v11 }
 0x1a7   : > { %v3780_v0 = vpop.eup %3779  ;;  %3791 = vrcp.f32 %v6937_v52  ;;  %v6979_v49 = vor.u32 1.1754944e-38, %v2323_v36  ;;  %v2353_v53 = vand.u32 2147483648, %v6943_v34  ;;  %v6983_v40 = vadd.f32 1.0, %v3760_v6 }
 0x1a8   : > { %v3782_v50 = vpop.eup %3781  ;;  %3793 = vrcp.f32 %v6940_v59  ;;  %v6985_v4 = vor.u32 1.1754944e-38, %v2338_v15  ;;  %v2368_v31 = vand.u32 2147483648, %v6946_v9  ;;  %v6989_v8 = vadd.f32 1.0, %v3762_v19 }
 0x1a9   : > { %v3784_v30 = vpop.eup %3783  ;;  %3795 = vrcp.f32 %v6943_v34  ;;  %v6991_v11 = vadd.f32 1.0, %v3764_v32  ;;  %v6995_v46 = vadd.f32 1.0, %v3766_v43  ;;  %v2383_v15 = vand.u32 2147483648, %v6949_v39 }
 0x1aa   : > { %v3786_v17 = vpop.eup %3785  ;;  %3797 = vrcp.f32 %v6946_v9  ;;  %v7002_v24 = vadd.f32 1.0, %v3768_v42  ;;  %v7004_v19 = vadd.f32 1.0, %v3770_v12  ;;  %v7006_v32 = vor.u32 1.1754944e-38, %v2353_v53 }
 0x1ab   : > { %v3788_v62 = vpop.eup %3787  ;;  %3799 = vrcp.f32 %v6949_v39  ;;  %v7011_v43 = vor.u32 1.1754944e-38, %v2368_v31  ;;  %v2398_v23 = vand.u32 2147483648, %v6952_v38  ;;  %v7018_v42 = vadd.f32 1.0, %v3772_v61 }
 0x1ac   : > { %v7000_v16 = vpop.eup %3789  ;;  %3801 = vrcp.f32 %v6952_v38  ;;  %v7020_v12 = vadd.f32 1.0, %v3774_v26  ;;  %v7030_v6 = vor.u32 1.1754944e-38, %v2383_v15  ;;  %v2413_v26 = vand.u32 2147483648, %v6957_v51 }
 0x1ad   : > { %v7009_v36 = vpop.eup %3791  ;;  %3803 = vpow2.f32 %v3427_v55  ;;  %v7026_v55 = vadd.f32 1.0, %v3776_v5  ;;  %v2298_v31 = vmul.f32 %v7000_v16, %v6921_v3  ;;  %v7042_v5 = vadd.f32 1.0, %v3780_v0 }
 0x1ae   : > { %v7015_v22 = vpop.eup %3793  ;;  %3805 = vpow2.f32 %v6927_v44  ;;  %9195 = vst [vmem:[#allocation28_spill] sm:$0xff] %v7020_v12  ;;  %v7035_v44 = vadd.f32 1.0, %v3778_v25  ;;  %v2313_v61 = vmul.f32 %v7009_v36, %v6937_v52  ;;  %vm2302_vm2 = vweird.f32 %v6921_v3 }
 0x1af   : > { %v7023_v57 = vpop.eup %3795  ;;  %3807 = vpow2.f32 %v6930_v37  ;;  %9196 = vst [vmem:[#allocation75_spill] sm:$0xff] %v7026_v55  ;;  %v7045_v37 = vor.u32 1.1754944e-38, %v2398_v23  ;;  %v7051_v25 = vadd.f32 1.0, %v3782_v50  ;;  %v7053_v63 = vadd.f32 1.0, %v3784_v30 }
 0x1b0   : > { %v7032_v28 = vpop.eup %3797  ;;  %3809 = vpow2.f32 %v6934_v29  ;;  %9197 = vst [vmem:[#allocation30_spill] sm:$0xff] %v7035_v44  ;;  %vm2317_vm3 = vweird.f32 %v6937_v52  ;;  %v2428_v0 = vand.u32 2147483648, %v6963_v54  ;;  %v2299_v58 = vsub.f32 1.0, %v2298_v31 }
 0x1b1   : > { %v7040_v53 = vpop.eup %3799  ;;  %9198 = vst [vmem:[#allocation31_spill] sm:$0xff] %v7042_v5  ;;  %3811 = vrcp.f32 %v6957_v51  ;;  %v2328_v23 = vmul.f32 %v7015_v22, %v6940_v59  ;;  %vm2332_vm4 = vweird.f32 %v6940_v59  ;;  %v7063_v30 = vadd.f32 1.0, %v3786_v17 }
 0x1b2   : > { %v7049_v29 = vpop.eup %3801  ;;  %9199 = vst [vmem:[#allocation76_spill] sm:$0xff] %v7051_v25  ;;  %3813 = vrcp.f32 %v6963_v54  ;;  %v2314_v60 = vsub.f32 1.0, %v2313_v61  ;;  %v2343_v56 = vmul.f32 %v7023_v57, %v6943_v34  ;;  %vm2347_vm5 = vweird.f32 %v6943_v34 }
 0x1b3   : > { %9200 = vst [vmem:[#allocation32_spill] sm:$0xff] %v7053_v63  ;;  %v3804_v45 = vpop.eup %3803  ;;  %3815 = vrcp.f32 %v6966_v14  ;;  %v7068_v20 = vor.u32 1.1754944e-38, %v2413_v26  ;;  %v2358_v47 = vmul.f32 %v7032_v28, %v6946_v9  ;;  %vm2362_vm6 = vweird.f32 %v6946_v9 }
 0x1b4   : > { %v3806_v50 = vpop.eup %3805  ;;  %9201 = vst [vmem:[#allocation36_spill] sm:$0xff] %v7063_v30  ;;  %v2373_v15 = vmul.f32 %v7040_v53, %v6949_v39  ;;  %v2388_v17 = vmul.f32 %v7049_v29, %v6952_v38  ;;  %3817 = vrcp.f32 %v6971_v21  ;;  %v7080_v30 = vadd.f32 1.0, %v3788_v62 }
 0x1b5   : > { %v3808_v31 = vpop.eup %3807  ;;  %v7082_v26 = vadd.f32 1.0, %v3804_v45  ;;  %v7085_v48 = vor.u32 1.1754944e-38, %v2428_v0  ;;  %v7090_v25 = vadd.f32 1.0, %v3806_v50  ;;  %v2300_v41 = vmul.f32 %v7000_v16, %v2299_v58 }
 0x1b6   : > { %v7078_v61 = vpop.eup %3809  ;;  %9202 = vst [vmem:[#allocation77_spill] sm:$0xff] %v7080_v30  ;;  %v2329_v27 = vsub.f32 1.0, %v2328_v23  ;;  %v7097_v45 = vadd.f32 1.0, %v3808_v31  ;;  %v9206_v0 = vand.u32 2147483647, %v6921_v3  ;;  %v2315_v50 = vmul.f32 %v7009_v36, %v2314_v60 }
 0x1b7   : > { %9203 = vst [vmem:[#allocation34_spill] sm:$0xff] %v7082_v26  ;;  %v7088_v10 = vpop.eup %3811  ;;  %v9209_v63 = vand.u32 2147483647, %v6937_v52  ;;  %v2344_v23 = vsub.f32 1.0, %v2343_v56  ;;  %vm2303_vm11 = vweird.f32 %v7000_v16  ;;  %v2359_v31 = vsub.f32 1.0, %v2358_v47 }
 0x1b8   : > { %9204 = vst [vmem:[#allocation35_spill] sm:$0xff] %v7090_v25  ;;  %v7095_v30 = vpop.eup %3813  ;;  %vm7101_vm9 = vcmp.eq.f32.partialorder %v9206_v0, 8.507059e+37  ;;  %v2374_v0 = vsub.f32 1.0, %v2373_v15  ;;  %vm2318_vm12 = vweird.f32 %v7009_v36  ;;  %vm2333_vm13 = vweird.f32 %v7015_v22  ;;  %vm7130_vm14 = vmor %vm2302_vm2, %vm2303_vm11 }
 0x1b9   : > { %9205 = vst [vmem:[#allocation78_spill] sm:$0xff] %v7097_v45  ;;  %vm7108_vm10 = vcmp.eq.f32.partialorder %v9209_v63, 8.507059e+37  ;;  %v7113_v25 = vpop.eup %3815  ;;  %v2389_v45 = vsub.f32 1.0, %v2388_v17  ;;  %v2403_v60 = vmul.f32 %v7088_v10, %v6957_v51  ;;  %v2458_v63 = vand.u32 2147483648, %v6971_v21  ;;  %vm7144_vm1 = vmor %vm2317_vm3, %vm2318_vm12 }
 0x1ba   : > { %v7121_v18 = vpop.eup %3817  ;;  %v2301_v56 = vadd.f32 %v7000_v16, %v2300_v41  ;;  %v2330_v62 = vmul.f32 %v7015_v22, %v2329_v27  ;;  %v2418_v47 = vmul.f32 %v7095_v30, %v6963_v54  ;;  %3819 = vrcp.f32 %v6973_v35  ;;  %vm7157_vm0 = vmor %vm2332_vm4, %vm2333_vm13 }
 0x1bb   : > { %v2316_v17 = vadd.f32 %v7009_v36, %v2315_v50  ;;  %v2345_v5 = vmul.f32 %v7023_v57, %v2344_v23  ;;  %vm2348_vm15 = vweird.f32 %v7023_v57  ;;  %v2433_v27 = vmul.f32 %v7113_v25, %v6966_v14 }
 0x1bc   : > { %v2360_v3 = vmul.f32 %v7032_v28, %v2359_v31  ;;  %vm2363_vm2 = vweird.f32 %v7032_v28  ;;  %v2375_v50 = vmul.f32 %v7040_v53, %v2374_v0  ;;  %v2390_v23 = vmul.f32 %v7049_v29, %v2389_v45  ;;  %vm7192_vm7 = vmor %vm2347_vm5, %vm2348_vm15 }
 0x1bd   : > { %v9218_v2 = vand.u32 2147483647, %v6940_v59  ;;  %v9221_v0 = vand.u32 2147483647, %v6943_v34  ;;  %v9224_v13 = vand.u32 2147483647, %v6946_v9  ;;  %vm2378_vm4 = vweird.f32 %v7040_v53  ;;  %vm7211_vm5 = vmor %vm2362_vm6, %vm2363_vm2 }
 0x1be   : > { %vm2393_vm13 = vweird.f32 %v7049_v29  ;;  %v2448_v59 = vmul.f32 %v7121_v18, %v6971_v21  ;;  %v2331_v44 = vadd.f32 %v7015_v22, %v2330_v62  ;;  %v2419_v12 = vsub.f32 1.0, %v2418_v47 }
 0x1bf   : > { %vm7163_vm3 = vcmp.eq.f32.partialorder %v9218_v2, 8.507059e+37  ;;  %vm7169_vm12 = vcmp.eq.f32.partialorder %v9221_v0, 8.507059e+37  ;;  %vm7175_vm11 = vcmp.eq.f32.partialorder %v9224_v13, 8.507059e+37  ;;  %v2404_v2 = vsub.f32 1.0, %v2403_v60 }
 0x1c0   : > { %v2305_v0 = vsel %vm7130_vm14, %v7000_v16, %v2301_v56  ;;  %v9229_v60 = vand.u32 2147483647, %v6949_v39  ;;  %3821 = vrcp.f32 %v6977_v33  ;;  %v2320_v16 = vsel %vm7144_vm1, %v7009_v36, %v2316_v17  ;;  %v7223_v36 = vpop.eup %3819 }
 0x1c1   : > { %v2346_v62 = vadd.f32 %v7023_v57, %v2345_v5  ;;  %v9234_v56 = vand.u32 2147483647, %v6952_v38  ;;  %v9235_v47 = vmov 0  ;;  %v2434_v15 = vsub.f32 1.0, %v2433_v27 }
 0x1c2   : > { %vm7198_vm8 = vcmp.eq.f32.partialorder %v9229_v60, 8.507059e+37  ;;  %3823 = vrcp.f32 %v6983_v40  ;;  %v7226_v5 = vadd.f32 1.0, %v7078_v61  ;;  %v2361_v9 = vadd.f32 %v7032_v28, %v2360_v3 }
 0x1c3   : > { %vm7217_vm14 = vcmp.eq.f32.partialorder %v9234_v56, 8.507059e+37  ;;  %v2376_v17 = vadd.f32 %v7040_v53, %v2375_v50  ;;  %vm9238_vm6 = vweird.f32 %v6949_v39  ;;  %v2391_v27 = vadd.f32 %v7049_v29, %v2390_v23 }
 0x1c4   : > { %v9236_v47 = vsel %vm7217_vm14, 4294967295, %v9235_v47  ;;  %9237 = vst [vmem:[#allocation40_spill] sm:$0xff] %v7226_v5  ;;  %vm7234_vm1 = vmor %vm9238_vm6, %vm2378_vm4  ;;  %vm9241_vm2 = vweird.f32 %v6952_v38  ;;  %v2405_v3 = vmul.f32 %v7088_v10, %v2404_v2  ;;  %v9244_v50 = vand.u32 2147483647, %v6957_v51 }
 0x1c5   : > { %vm7243_vm15 = vmor %vm9241_vm2, %vm2393_vm13  ;;  %v9247_v60 = vand.u32 2147483648, %v6966_v14  ;;  %v2449_v23 = vsub.f32 1.0, %v2448_v59  ;;  %v7258_v5 = vor.u32 1.1754944e-38, %v2458_v63  ;;  %v7263_v38 = vsel %vm7101_vm9, %v6959_v1, %v2305_v0 }
 0x1c6   : > { %vm7250_vm14 = vcmp.eq.f32.partialorder %v9244_v50, 8.507059e+37  ;;  %v7268_v2 = vsel %vm7108_vm10, %v6979_v49, %v2320_v16  ;;  %v2335_v50 = vsel %vm7157_vm0, %v7015_v22, %v2331_v44  ;;  %v9248_v59 = vand.u32 2147483647, %v6963_v54  ;;  %v7293_v44 = vpop.eup %3821 }
 0x1c7   : > { %v7256_v56 = vor.u32 1.1754944e-38, %v9247_v60  ;;  %v2420_v60 = vmul.f32 %v7095_v30, %v2419_v12  ;;  %v2350_v1 = vsel %vm7192_vm7, %v7023_v57, %v2346_v62  ;;  %vm2408_vm9 = vweird.f32 %v7088_v10 }
 0x1c8   : > { %vm7276_vm4 = vcmp.eq.f32.partialorder %v9248_v59, 8.507059e+37  ;;  %v2435_v49 = vmul.f32 %v7113_v25, %v2434_v15  ;;  %v9251_v26 = vand.u32 2147483647, %v6966_v14  ;;  %v2463_v12 = vmul.f32 %v7223_v36, %v6973_v35  ;;  %v7305_v0 = vpop.eup %3823 }
 0x1c9   : > { %v2365_v58 = vsel %vm7211_vm5, %v7032_v28, %v2361_v9  ;;  %v2380_v57 = vsel %vm7234_vm1, %v7040_v53, %v2376_v17  ;;  %v2395_v52 = vsel %vm7243_vm15, %v7049_v29, %v2391_v27  ;;  %vm2423_vm7 = vweird.f32 %v7095_v30 }
 0x1ca   : > { %vm7287_vm10 = vcmp.eq.f32.partialorder %v9251_v26, 8.507059e+37  ;;  %v2406_v13 = vadd.f32 %v7088_v10, %v2405_v3  ;;  %vm2438_vm0 = vweird.f32 %v7113_v25  ;;  %v2450_v16 = vmul.f32 %v7121_v18, %v2449_v23 }
 0x1cb   : > { %v9254_v28 = vand.u32 2147483647, %v6971_v21  ;;  %3825 = vrcp.f32 %v6989_v8  ;;  %vm9257_vm5 = vweird.f32 %v6957_v51  ;;  %v2421_v29 = vadd.f32 %v7095_v30, %v2420_v60 }
 0x1cc   : > { %vm7321_vm15 = vmor %vm9257_vm5, %vm2408_vm9  ;;  %vm2453_vm6 = vweird.f32 %v7121_v18  ;;  %v2471_v34 = vand.u32 2147483647, %v6973_v35  ;;  %3827 = vrcp.f32 %v6991_v11  ;;  %vm9260_vm1 = vweird.f32 %v6963_v54 }
 0x1cd   : > { %vm7312_vm13 = vcmp.eq.f32.partialorder %v9254_v28, 8.507059e+37  ;;  %vm7331_vm2 = vmor %vm9260_vm1, %vm2423_vm7  ;;  %v2436_v51 = vadd.f32 %v7113_v25, %v2435_v49  ;;  %v2464_v9 = vsub.f32 1.0, %v2463_v12  ;;  %v2478_v17 = vmul.f32 %v7293_v44, %v6977_v33 }
 0x1ce   : > { %3829 = vrcp.f32 %v6995_v46  ;;  %v7342_v41 = vsel %vm7163_vm3, %v6985_v4, %v2335_v50  ;;  %v7347_v54 = vsel %vm7169_vm12, %v7006_v32, %v2350_v1  ;;  %v7352_v27 = vsel %vm7175_vm11, %v7011_v43, %v2365_v58 }
 0x1cf   : > { %vm9263_vm9 = vweird.f32 %v6966_v14  ;;  %v2493_v4 = vmul.f32 %v7305_v0, %v6983_v40  ;;  %v7367_v32 = vsel %vm7198_vm8, %v7030_v6, %v2380_v57  ;;  %v2410_v7 = vsel %vm7321_vm15, %v7088_v10, %v2406_v13 }
 0x1d0   : > { %vm7358_vm7 = vmor %vm9263_vm9, %vm2438_vm0  ;;  %v2451_v43 = vadd.f32 %v7121_v18, %v2450_v16  ;;  %v2473_v14 = vand.u32 2147483648, %v6973_v35  ;;  %vm9266_vm11 = vnez %v9236_v47  ;;  %v2425_v45 = vsel %vm7331_vm2, %v7095_v30, %v2421_v29 }
 0x1d1   : > { %v7377_v31 = vsel %vm9266_vm11, %v7045_v37, %v2395_v52  ;;  %vm9267_vm8 = vweird.f32 %v6971_v21  ;;  %vm2467_vm12 = vweird.f32 %v6973_v35  ;;  %v2488_v10 = vand.u32 2147483648, %v6977_v33  ;;  %v7392_v55 = vpop.eup %3825 }
 0x1d2   : > { %vm7386_vm3 = vmor %vm9267_vm8, %vm2453_vm6  ;;  %v2440_v37 = vsel %vm7358_vm7, %v7113_v25, %v2436_v51  ;;  %v2465_v30 = vmul.f32 %v7223_v36, %v2464_v9  ;;  %vm7398_vm0 = vcmp.eq.f32.partialorder %v2471_v34, 8.507059e+37  ;;  %v2479_v21 = vsub.f32 1.0, %v2478_v17  ;;  %v7403_v23 = vpop.eup %3827 }
 0x1d3   : > { %v2486_v3 = vand.u32 2147483647, %v6977_v33  ;;  %v7408_v50 = vsel %vm7250_vm14, %v7068_v20, %v2410_v7  ;;  %vm2482_vm5 = vweird.f32 %v6977_v33  ;;  %v2494_v60 = vsub.f32 1.0, %v2493_v4 }
 0x1d4   : > { %3831 = vrcp.f32 %v7002_v24  ;;  %v7412_v25 = vpop.eup %3829  ;;  %v7417_v59 = vsel %vm7276_vm4, %v7085_v48, %v2425_v45  ;;  %v2455_v1 = vsel %vm7386_vm3, %v7121_v18, %v2451_v43  ;;  %vm2468_vm15 = vweird.f32 %v7223_v36 }
 0x1d5   : > { %v2474_v20 = vor.u32 1.1754944e-38, %v2473_v14  ;;  %v7426_v39 = vsel %vm7287_vm10, %v7256_v56, %v2440_v37  ;;  %v2489_v49 = vor.u32 1.1754944e-38, %v2488_v10  ;;  %vm2497_vm14 = vweird.f32 %v6983_v40  ;;  %vm7447_vm10 = vmor %vm2467_vm12, %vm2468_vm15 }
 0x1d6   : > { %v2508_v63 = vmul.f32 %v7392_v55, %v6989_v8  ;;  %v2466_v48 = vadd.f32 %v7223_v36, %v2465_v30  ;;  %v2480_v26 = vmul.f32 %v7293_v44, %v2479_v21  ;;  %vm7433_vm4 = vcmp.eq.f32.partialorder %v2486_v3, 8.507059e+37 }
 0x1d7   : > { %v2501_v12 = vand.u32 2147483647, %v6983_v40  ;;  %v2523_v56 = vmul.f32 %v7403_v23, %v6991_v11  ;;  %v7443_v22 = vsel %vm7312_vm13, %v7258_v5, %v2455_v1  ;;  %v2495_v57 = vmul.f32 %v7305_v0, %v2494_v60 }
 0x1d8   : > { %v2503_v52 = vand.u32 2147483648, %v6983_v40  ;;  %v2538_v13 = vmul.f32 %v7412_v25, %v6995_v46  ;;  %vm2483_vm6 = vweird.f32 %v7293_v44  ;;  %vm2498_vm1 = vweird.f32 %v7305_v0 }
 0x1d9   : > { %v2516_v5 = vand.u32 2147483647, %v6989_v8  ;;  %v2518_v16 = vand.u32 2147483648, %v6989_v8  ;;  %v2509_v28 = vsub.f32 1.0, %v2508_v63  ;;  %v2531_v62 = vand.u32 2147483647, %v6991_v11  ;;  %vm7471_vm13 = vmor %vm2482_vm5, %vm2483_vm6 }
 0x1da   : > { %v7459_v35 = vpop.eup %3831  ;;  %v2533_v53 = vand.u32 2147483648, %v6991_v11  ;;  %3833 = vrcp.f32 %v7004_v19  ;;  %v2470_v29 = vsel %vm7447_vm10, %v7223_v36, %v2466_v48  ;;  %v2481_v34 = vadd.f32 %v7293_v44, %v2480_v26  ;;  %vm7484_vm9 = vmor %vm2497_vm14, %vm2498_vm1  ;;  %v9286_v48 = vld [vmem:[#allocation28_spill] sm:$0xff]  ;;  %v9299_v36 = vld [vmem:[#allocation3_spill] sm:$0xff] }
 0x1db   : > { %v2524_v15 = vsub.f32 1.0, %v2523_v56  ;;  %3835 = vrcp.f32 %v7018_v42  ;;  %v2496_v9 = vadd.f32 %v7305_v0, %v2495_v57  ;;  %vm7476_vm2 = vcmp.eq.f32.partialorder %v2501_v12, 8.507059e+37 }
 0x1dc   : > { %v2504_v61 = vor.u32 1.1754944e-38, %v2503_v52  ;;  %v2539_v4 = vsub.f32 1.0, %v2538_v13  ;;  %vm2512_vm7 = vweird.f32 %v6989_v8  ;;  %v2519_v33 = vor.u32 1.1754944e-38, %v2518_v16 }
 0x1dd   : > { %vm2527_vm11 = vweird.f32 %v6991_v11  ;;  %v2553_v7 = vmul.f32 %v7459_v35, %v7002_v24  ;;  %v7494_v43 = vsel %vm7398_vm0, %v2474_v20, %v2470_v29  ;;  %v2510_v14 = vmul.f32 %v7392_v55, %v2509_v28  ;;  %v9330_v11 = vld [vmem:[#allocation36_spill] sm:$0xff] }
 0x1de   : > { %vm7497_vm8 = vcmp.eq.f32.partialorder %v2516_v5, 8.507059e+37  ;;  %vm2542_vm3 = vweird.f32 %v6995_v46  ;;  %v2546_v45 = vand.u32 2147483647, %v6995_v46  ;;  %v2485_v6 = vsel %vm7471_vm13, %v7293_v44, %v2481_v34  ;;  %v9293_v5 = vld [vmem:[#allocation75_spill] sm:$0xff]  ;;  %v9298_v34 = vld [vmem:[#allocation30_spill] sm:$0xff] }
 0x1df   : > { %v2525_v10 = vmul.f32 %v7403_v23, %v2524_v15  ;;  %vm7507_vm12 = vcmp.eq.f32.partialorder %v2531_v62, 8.507059e+37  ;;  %v2534_v30 = vor.u32 1.1754944e-38, %v2533_v53  ;;  %v2548_v47 = vand.u32 2147483648, %v6995_v46 }
 0x1e0   : > { %v7512_v21 = vpop.eup %3833  ;;  %v2500_v3 = vsel %vm7484_vm9, %v7305_v0, %v2496_v9  ;;  %vm2513_vm0 = vweird.f32 %v7392_v55  ;;  %vm2528_vm5 = vweird.f32 %v7403_v23  ;;  %v2540_v44 = vmul.f32 %v7412_v25, %v2539_v4 }
 0x1e1   : > { %v7520_v60 = vpop.eup %3835  ;;  %v2554_v1 = vsub.f32 1.0, %v2553_v7  ;;  %v2561_v20 = vand.u32 2147483647, %v7002_v24  ;;  %v2563_v63 = vand.u32 2147483648, %v7002_v24  ;;  %3837 = vrcp.f32 %v9286_v48  ;;  %vm7537_vm10 = vmor %vm2512_vm7, %vm2513_vm0 }
 0x1e2   : > { %v7527_v26 = vsel %vm7433_vm4, %v2489_v49, %v2485_v6  ;;  %v2511_v0 = vadd.f32 %v7392_v55, %v2510_v14  ;;  %vm2543_vm15 = vweird.f32 %v7412_v25  ;;  %vm7531_vm14 = vcmp.eq.f32.partialorder %v2546_v45, 8.507059e+37  ;;  %vm7553_vm6 = vmor %vm2527_vm11, %vm2528_vm5  ;;  %v9300_v14 = vld [vmem:[#allocation9_spill] sm:$0xff] }
 0x1e3   : > { %v2526_v58 = vadd.f32 %v7403_v23, %v2525_v10  ;;  %v2549_v57 = vor.u32 1.1754944e-38, %v2548_v47  ;;  %vm2557_vm4 = vweird.f32 %v7002_v24  ;;  %v2568_v49 = vmul.f32 %v7512_v21, %v7004_v19  ;;  %vm7563_vm1 = vmor %vm2542_vm3, %vm2543_vm15  ;;  %v9303_v10 = vld [vmem:[#allocation13_spill] sm:$0xff] }
 0x1e4   : > { %v7547_v18 = vsel %vm7476_vm2, %v2504_v61, %v2500_v3  ;;  %v2541_v52 = vadd.f32 %v7412_v25, %v2540_v44  ;;  %v2583_v13 = vmul.f32 %v7520_v60, %v7018_v42  ;;  %3839 = vrcp.f32 %v9293_v5 }
 0x1e5   : > { %v2555_v28 = vmul.f32 %v7459_v35, %v2554_v1  ;;  %vm7568_vm13 = vcmp.eq.f32.partialorder %v2561_v20, 8.507059e+37  ;;  %v2564_v62 = vor.u32 1.1754944e-38, %v2563_v63  ;;  %v2576_v53 = vand.u32 2147483647, %v7004_v19  ;;  %v9308_v20 = vld [vmem:[#allocation31_spill] sm:$0xff]  ;;  %v9309_v63 = vld [vmem:[#allocation29_spill] sm:$0xff] }
 0x1e6   : > { %v2515_v29 = vsel %vm7537_vm10, %v7392_v55, %v2511_v0  ;;  %vm2558_vm2 = vweird.f32 %v7459_v35  ;;  %v2578_v46 = vand.u32 2147483648, %v7004_v19  ;;  %3841 = vrcp.f32 %v9298_v34 }
 0x1e7   : > { %v7579_v15 = vpop.eup %3837  ;;  %v2530_v51 = vsel %vm7553_vm6, %v7403_v23, %v2526_v58  ;;  %v2569_v9 = vsub.f32 1.0, %v2568_v49  ;;  %v2591_v17 = vand.u32 2147483647, %v7018_v42  ;;  %v2593_v61 = vand.u32 2147483648, %v7018_v42  ;;  %vm7614_vm11 = vmor %vm2557_vm4, %vm2558_vm2 }
 0x1e8   : > { %v2545_v55 = vsel %vm7563_vm1, %v7412_v25, %v2541_v52  ;;  %v2584_v4 = vsub.f32 1.0, %v2583_v13  ;;  %v7591_v7 = vmul.f32 %v7263_v38, %v9299_v36  ;;  %v7595_v45 = vmul.f32 %v7268_v2, %v9300_v14  ;;  %v9310_v52 = vld [vmem:[#allocation7_spill] sm:$0xff] }
 0x1e9   : > { %v7599_v23 = vsel %vm7497_vm8, %v2519_v33, %v2515_v29  ;;  %v2556_v6 = vadd.f32 %v7459_v35, %v2555_v28  ;;  %vm2572_vm9 = vweird.f32 %v7004_v19  ;;  %vm2587_vm7 = vweird.f32 %v7018_v42  ;;  %v9319_v42 = vld [vmem:[#allocation66_spill] sm:$0xff] }
 0x1ea   : > { %v7604_v25 = vpop.eup %3839  ;;  %v7608_v38 = vsel %vm7507_vm12, %v2534_v30, %v2530_v51  ;;  %v2579_v33 = vor.u32 1.1754944e-38, %v2578_v46  ;;  %v2598_v40 = vmul.f32 %v7579_v15, %v9286_v48  ;;  %v7622_v47 = vmul.f32 %v7342_v41, %v9303_v10  ;;  %v9313_v46 = vld [vmem:[#allocation8_spill] sm:$0xff]  ;;  %v9352_v41 = vld [vmem:[#allocation69_spill] sm:$0xff] }
 0x1eb   : > { %v7626_v37 = vsel %vm7531_vm14, %v2549_v57, %v2545_v55  ;;  %v2570_v30 = vmul.f32 %v7512_v21, %v2569_v9  ;;  %vm2573_vm8 = vweird.f32 %v7512_v21  ;;  %vm7630_vm3 = vcmp.eq.f32.partialorder %v2576_v53, 8.507059e+37  ;;  %v9320_v10 = vld [vmem:[#allocation32_spill] sm:$0xff] }
 0x1ec   : > { %v2594_v3 = vor.u32 1.1754944e-38, %v2593_v61  ;;  %v7634_v44 = vpop.eup %3841  ;;  %v2585_v1 = vmul.f32 %v7520_v60, %v2584_v4  ;;  %vm7637_vm12 = vcmp.eq.f32.partialorder %v2591_v17, 8.507059e+37  ;;  %vm2602_vm0 = vweird.f32 %v9286_v48  ;;  %vm7675_vm14 = vmor %vm2572_vm9, %vm2573_vm8  ;;  %v9316_v61 = vld [vmem:[#allocation76_spill] sm:$0xff] }
 0x1ed   : > { %3843 = vrcp.f32 %v9308_v20  ;;  %v7645_v0 = vmul.f32 %v7347_v54, %v9309_v63  ;;  %v2809_v12 = vadd.f32 %v7595_v45, %v7591_v7  ;;  %v2560_v56 = vsel %vm7614_vm11, %v7459_v35, %v2556_v6  ;;  %v9321_v63 = vld [vmem:[#allocation12_spill] sm:$0xff] }
 0x1ee   : > { %v2606_v58 = vand.u32 2147483647, %v9286_v48  ;;  %v2608_v57 = vand.u32 2147483648, %v9286_v48  ;;  %v2613_v49 = vmul.f32 %v7604_v25, %v9293_v5  ;;  %vm2588_vm5 = vweird.f32 %v7520_v60  ;;  %v9329_v48 = vld [vmem:[#allocation67_spill] sm:$0xff] }
 0x1ef   : > { %v2599_v8 = vsub.f32 1.0, %v2598_v40  ;;  %v7659_v54 = vmul.f32 %v7352_v27, %v9310_v52  ;;  %v2810_v13 = vadd.f32 %v2809_v12, %v7622_v47  ;;  %v2571_v16 = vadd.f32 %v7512_v21, %v2570_v30  ;;  %vm7687_vm10 = vmor %vm2587_vm7, %vm2588_vm5 }
 0x1f0   : > { %vm2617_vm15 = vweird.f32 %v9293_v5  ;;  %v2621_v35 = vand.u32 2147483647, %v9293_v5  ;;  %v2628_v28 = vmul.f32 %v7634_v44, %v9298_v34  ;;  %v7669_v53 = vsel %vm7568_vm13, %v2564_v62, %v2560_v56 }
 0x1f1   : > { %v2586_v29 = vadd.f32 %v7520_v60, %v2585_v1  ;;  %v7682_v51 = vmul.f32 %v7367_v32, %v9313_v46  ;;  %v2811_v9 = vadd.f32 %v2810_v13, %v7645_v0  ;;  %v2609_v62 = vor.u32 1.1754944e-38, %v2608_v57  ;;  %v9341_v32 = vld [vmem:[#allocation68_spill] sm:$0xff] }
 0x1f2   : > { %v2614_v19 = vsub.f32 1.0, %v2613_v49  ;;  %v2623_v17 = vand.u32 2147483648, %v9293_v5  ;;  %3845 = vrcp.f32 %v9316_v61  ;;  %v2600_v4 = vmul.f32 %v7579_v15, %v2599_v8 }
 0x1f3   : > { %v7693_v55 = vpop.eup %3843  ;;  %vm2603_vm4 = vweird.f32 %v7579_v15  ;;  %vm7697_vm6 = vcmp.eq.f32.partialorder %v2606_v58, 8.507059e+37  ;;  %v7703_v36 = vmul.f32 %v7377_v31, %v9319_v42  ;;  %v2812_v14 = vadd.f32 %v2811_v9, %v7659_v54 }
 0x1f4   : > { %v2575_v6 = vsel %vm7675_vm14, %v7512_v21, %v2571_v16  ;;  %v2629_v2 = vsub.f32 1.0, %v2628_v28  ;;  %v2636_v40 = vand.u32 2147483647, %v9298_v34  ;;  %3847 = vrcp.f32 %v9320_v10  ;;  %vm7748_vm2 = vmor %vm2602_vm0, %vm2603_vm4 }
 0x1f5   : > { %v2590_v30 = vsel %vm7687_vm10, %v7520_v60, %v2586_v29  ;;  %v2638_v1 = vand.u32 2147483648, %v9298_v34  ;;  %v7717_v31 = vmul.f32 %v7408_v50, %v9321_v63  ;;  %v2813_v12 = vadd.f32 %v2812_v14, %v7682_v51  ;;  %v9324_v50 = vld [vmem:[#allocation14_spill] sm:$0xff] }
 0x1f6   : > { %v2615_v56 = vmul.f32 %v7604_v25, %v2614_v19  ;;  %v2624_v21 = vor.u32 1.1754944e-38, %v2623_v17  ;;  %vm2632_vm1 = vweird.f32 %v9298_v34  ;;  %v2643_v58 = vmul.f32 %v7693_v55, %v9308_v20 }
 0x1f7   : > { %v7726_v57 = vsel %vm7630_vm3, %v2579_v33, %v2575_v6  ;;  %v2601_v60 = vadd.f32 %v7579_v15, %v2600_v4  ;;  %vm7729_vm13 = vcmp.eq.f32.partialorder %v2621_v35, 8.507059e+37  ;;  %v7735_v8 = vmul.f32 %v7417_v59, %v9324_v50  ;;  %v9333_v4 = vld [vmem:[#allocation10_spill] sm:$0xff] }
 0x1f8   : > { %v2814_v52 = vadd.f32 %v2813_v12, %v7703_v36  ;;  %v7738_v13 = vpop.eup %3845  ;;  %v7742_v16 = vsel %vm7637_vm12, %v2594_v3, %v2590_v30  ;;  %vm2618_vm9 = vweird.f32 %v7604_v25  ;;  %v2630_v59 = vmul.f32 %v7634_v44, %v2629_v2  ;;  %v9336_v30 = vld [vmem:[#allocation77_spill] sm:$0xff] }
 0x1f9   : > { %vm2647_vm7 = vweird.f32 %v9308_v20  ;;  %v2653_v24 = vand.u32 2147483648, %v9308_v20  ;;  %vm7756_vm11 = vcmp.eq.f32.partialorder %v2636_v40, 8.507059e+37  ;;  %v2639_v3 = vor.u32 1.1754944e-38, %v2638_v1  ;;  %vm7778_vm3 = vmor %vm2617_vm15, %vm2618_vm9  ;;  %v9337_v1 = vld [vmem:[#allocation11_spill] sm:$0xff] }
 0x1fa   : > { %v2651_v35 = vand.u32 2147483647, %v9308_v20  ;;  %v7763_v28 = vmul.f32 %v7426_v39, %v9329_v48  ;;  %v2815_v27 = vadd.f32 %v2814_v52, %v7717_v31  ;;  %v7766_v29 = vpop.eup %3847  ;;  %v2616_v46 = vadd.f32 %v7604_v25, %v2615_v56  ;;  %v9340_v52 = vld [vmem:[#allocation34_spill] sm:$0xff] }
 0x1fb   : > { %vm2633_vm8 = vweird.f32 %v7634_v44  ;;  %v2644_v9 = vsub.f32 1.0, %v2643_v58  ;;  %3849 = vrcp.f32 %v9330_v11  ;;  %v2605_v19 = vsel %vm7748_vm2, %v7579_v15, %v2601_v60 }
 0x1fc   : > { %v2658_v17 = vmul.f32 %v7738_v13, %v9316_v61  ;;  %v7786_v42 = vmul.f32 %v7443_v22, %v9333_v4  ;;  %v2816_v14 = vadd.f32 %v2815_v27, %v7735_v8  ;;  %v2631_v6 = vadd.f32 %v7634_v44, %v2630_v59  ;;  %vm7796_vm12 = vmor %vm2632_vm1, %vm2633_vm8  ;;  %v9342_v27 = vld [vmem:[#allocation35_spill] sm:$0xff] }
 0x1fd   : > { %v7790_v15 = vor.u32 1.1754944e-38, %v2653_v24  ;;  %v2666_v2 = vand.u32 2147483647, %v9316_v61  ;;  %v2668_v5 = vand.u32 2147483648, %v9316_v61  ;;  %vm2662_vm0 = vweird.f32 %v9316_v61  ;;  %v9357_v61 = vld [vmem:[#allocation18_spill] sm:$0xff] }
 0x1fe   : > { %v2673_v22 = vmul.f32 %v7766_v29, %v9320_v10  ;;  %3851 = vrcp.f32 %v9336_v30  ;;  %v7806_v63 = vmul.f32 %v7494_v43, %v9337_v1  ;;  %v2817_v12 = vadd.f32 %v2816_v14, %v7763_v28  ;;  %v9348_v14 = vld [vmem:[#allocation16_spill] sm:$0xff] }
 0x1ff   : > { %v7811_v34 = vsel %vm7697_vm6, %v2609_v62, %v2605_v19  ;;  %v2620_v56 = vsel %vm7778_vm3, %v7604_v25, %v2616_v46  ;;  %v2645_v58 = vmul.f32 %v7693_v55, %v2644_v9  ;;  %vm7817_vm5 = vcmp.eq.f32.partialorder %v2651_v35, 8.507059e+37  ;;  %v9343_v46 = vld [vmem:[#allocation15_spill] sm:$0xff] }
 0x200   : > { %v2683_v50 = vand.u32 2147483648, %v9320_v10  ;;  %v2659_v43 = vsub.f32 1.0, %v2658_v17  ;;  %vm2677_vm15 = vweird.f32 %v9320_v10  ;;  %3853 = vrcp.f32 %v9340_v52 }
 0x201   : > { %v7826_v62 = vmul.f32 %v7527_v26, %v9341_v32  ;;  %v2818_v33 = vadd.f32 %v2817_v12, %v7786_v42  ;;  %v7829_v25 = vpop.eup %3849  ;;  %v2635_v59 = vsel %vm7796_vm12, %v7634_v44, %v2631_v6  ;;  %vm2648_vm14 = vweird.f32 %v7693_v55  ;;  %v9353_v32 = vld [vmem:[#allocation40_spill] sm:$0xff] }
 0x202   : > { %v7835_v24 = vor.u32 1.1754944e-38, %v2668_v5  ;;  %v2681_v35 = vand.u32 2147483647, %v9320_v10  ;;  %v2674_v48 = vsub.f32 1.0, %v2673_v22  ;;  %3855 = vrcp.f32 %v9342_v27  ;;  %vm7856_vm4 = vmor %vm2647_vm7, %vm2648_vm14  ;;  %v9349_v22 = vld [vmem:[#allocation78_spill] sm:$0xff] }
 0x203   : > { %v7841_v26 = vmul.f32 %v7547_v18, %v9343_v46  ;;  %v2819_v9 = vadd.f32 %v2818_v33, %v7806_v63  ;;  %v7846_v19 = vsel %vm7729_vm13, %v2624_v21, %v2620_v56  ;;  %v2646_v44 = vadd.f32 %v7693_v55, %v2645_v58 }
 0x204   : > { %vm2663_vm10 = vweird.f32 %v7738_v13  ;;  %v7850_v39 = vor.u32 1.1754944e-38, %v2683_v50  ;;  %v7852_v17 = vpop.eup %3851  ;;  %v2660_v18 = vmul.f32 %v7738_v13, %v2659_v43  ;;  %vm7861_vm6 = vcmp.eq.f32.partialorder %v2666_v2, 8.507059e+37 }
 0x205   : > { %v2688_v21 = vmul.f32 %v7829_v25, %v9330_v11  ;;  %v7869_v6 = vmul.f32 %v7599_v23, %v9348_v14  ;;  %v2820_v5 = vadd.f32 %v2819_v9, %v7826_v62  ;;  %v7874_v20 = vsel %vm7756_vm11, %v2639_v3, %v2635_v59  ;;  %vm7912_vm9 = vmor %vm2662_vm0, %vm2663_vm10 }
 0x206   : > { %v2696_v40 = vand.u32 2147483647, %v9330_v11  ;;  %v2698_v2 = vand.u32 2147483648, %v9330_v11  ;;  %3857 = vrcp.f32 %v9349_v22  ;;  %v7879_v1 = vpop.eup %3853  ;;  %v2675_v12 = vmul.f32 %v7766_v29, %v2674_v48 }
 0x207   : > { %vm2678_vm1 = vweird.f32 %v7766_v29  ;;  %vm7883_vm13 = vcmp.eq.f32.partialorder %v2681_v35, 8.507059e+37  ;;  %vm2692_vm2 = vweird.f32 %v9330_v11  ;;  %v7890_v3 = vmul.f32 %v7608_v38, %v9352_v41  ;;  %v9354_v38 = vld [vmem:[#allocation17_spill] sm:$0xff] }
 0x208   : > { %v2821_v56 = vadd.f32 %v2820_v5, %v7841_v26  ;;  %v2650_v58 = vsel %vm7856_vm4, %v7693_v55, %v2646_v44  ;;  %v2703_v50 = vmul.f32 %v7852_v17, %v9336_v30  ;;  %v2713_v43 = vand.u32 2147483648, %v9336_v30  ;;  %v7900_v33 = vpop.eup %3855  ;;  %vm7937_vm11 = vmor %vm2677_vm15, %vm2678_vm1 }
 0x209   : > { %3859 = vrcp.f32 %v9353_v32  ;;  %v2661_v59 = vadd.f32 %v7738_v13, %v2660_v18  ;;  %v2689_v35 = vsub.f32 1.0, %v2688_v21  ;;  %v7905_v48 = vmul.f32 %v7626_v37, %v9354_v38 }
 0x20a   : > { %v2822_v46 = vadd.f32 %v2821_v56, %v7869_v6  ;;  %v7916_v9 = vor.u32 1.1754944e-38, %v2698_v2  ;;  %vm2707_vm7 = vweird.f32 %v9336_v30  ;;  %v2711_v44 = vand.u32 2147483647, %v9336_v30  ;;  %v9362_v56 = vld [vmem:[#allocation70_spill] sm:$0xff]  ;;  %v9389_v30 = vld [vmem:[#allocation73_spill] sm:$0xff] }
 0x20b   : > { %v2718_v37 = vmul.f32 %v7879_v1, %v9340_v52  ;;  %v2655_v4 = vsel %vm7817_vm5, %v7790_v15, %v2650_v58  ;;  %v2676_v18 = vadd.f32 %v7766_v29, %v2675_v12  ;;  %v7928_v21 = vmul.f32 %v7669_v53, %v9357_v61  ;;  %v9366_v2 = vld [vmem:[#allocation22_spill] sm:$0xff] }
 0x20c   : > { %v2823_v14 = vadd.f32 %v2822_v46, %v7890_v3  ;;  %v7931_v5 = vpop.eup %3857  ;;  %vm2693_vm8 = vweird.f32 %v7829_v25  ;;  %v2704_v15 = vsub.f32 1.0, %v2703_v50  ;;  %v7942_v60 = vor.u32 1.1754944e-38, %v2713_v43 }
 0x20d   : > { %v2733_v53 = vmul.f32 %v7900_v33, %v9342_v27  ;;  %v2665_v12 = vsel %vm7912_vm9, %v7738_v13, %v2661_v59  ;;  %v2690_v41 = vmul.f32 %v7829_v25, %v2689_v35  ;;  %vm7950_vm3 = vcmp.eq.f32.partialorder %v2696_v40, 8.507059e+37  ;;  %vm7998_vm15 = vmor %vm2692_vm2, %vm2693_vm8 }
 0x20e   : > { %v7956_v58 = vmul.f32 %v7726_v57, %v9362_v56  ;;  %v2824_v50 = vadd.f32 %v2823_v14, %v7905_v48  ;;  %v2719_v38 = vsub.f32 1.0, %v2718_v37  ;;  %vm2722_vm12 = vweird.f32 %v9340_v52  ;;  %v9363_v57 = vld [vmem:[#allocation19_spill] sm:$0xff] }
 0x20f   : > { %v7959_v43 = vpop.eup %3859  ;;  %v2726_v46 = vand.u32 2147483647, %v9340_v52  ;;  %v2728_v13 = vand.u32 2147483648, %v9340_v52  ;;  %v2680_v40 = vsel %vm7937_vm11, %v7766_v29, %v2676_v18  ;;  %v2748_v59 = vmul.f32 %v7931_v5, %v9349_v22 }
 0x210   : > { %v7971_v35 = vmul.f32 %v7742_v16, %v9363_v57  ;;  %v2825_v55 = vadd.f32 %v2824_v50, %v7928_v21  ;;  %v2670_v37 = vsel %vm7861_vm6, %v7835_v24, %v2665_v12  ;;  %v2705_v61 = vmul.f32 %v7852_v17, %v2704_v15  ;;  %v9371_v12 = vld [vmem:[#allocation71_spill] sm:$0xff] }
 0x211   : > { %vm2708_vm0 = vweird.f32 %v7852_v17  ;;  %v2734_v14 = vsub.f32 1.0, %v2733_v53  ;;  %v2691_v29 = vadd.f32 %v7829_v25, %v2690_v41  ;;  %vm7980_vm5 = vcmp.eq.f32.partialorder %v2711_v44, 8.507059e+37 }
 0x212   : > { %v2763_v16 = vmul.f32 %v7959_v43, %v9353_v32  ;;  %v7988_v56 = vmul.f32 %v7811_v34, %v9366_v2  ;;  %v2826_v24 = vadd.f32 %v2825_v55, %v7956_v58  ;;  %v2685_v49 = vsel %vm7883_vm13, %v7850_v39, %v2680_v40  ;;  %vm8025_vm6 = vmor %vm2707_vm7, %vm2708_vm0 }
 0x213   : > { %v2720_v15 = vmul.f32 %v7879_v1, %v2719_v38  ;;  %v2729_v53 = vor.u32 1.1754944e-38, %v2728_v13  ;;  %vm2737_vm14 = vweird.f32 %v9342_v27  ;;  %vm8004_vm10 = vcmp.eq.f32.partialorder %v2726_v46, 8.507059e+37 }
 0x214   : > { %v2741_v23 = vand.u32 2147483647, %v9342_v27  ;;  %v2749_v39 = vsub.f32 1.0, %v2748_v59  ;;  %v8011_v41 = vmul.f32 %v7846_v19, %v9371_v12  ;;  %v2827_v11 = vadd.f32 %v2826_v24, %v7971_v35  ;;  %v9374_v59 = vld [vmem:[#allocation20_spill] sm:$0xff] }
 0x215   : > { %v2706_v50 = vadd.f32 %v7852_v17, %v2705_v61  ;;  %vm2723_vm4 = vweird.f32 %v7879_v1  ;;  %v2735_v38 = vmul.f32 %v7900_v33, %v2734_v14  ;;  %v2743_v46 = vand.u32 2147483648, %v9342_v27 }
 0x216   : > { %v2695_v13 = vsel %vm7998_vm15, %v7829_v25, %v2691_v29  ;;  %v2764_v40 = vsub.f32 1.0, %v2763_v16  ;;  %v8031_v57 = vmul.f32 %v7874_v20, %v9374_v59  ;;  %v2828_v55 = vadd.f32 %v2827_v11, %v7988_v56  ;;  %vm8040_vm2 = vmor %vm2722_vm12, %vm2723_vm4  ;;  %v9379_v29 = vld [vmem:[#allocation21_spill] sm:$0xff] }
 0x217   : > { %v2721_v61 = vadd.f32 %v7879_v1, %v2720_v15  ;;  %vm2738_vm1 = vweird.f32 %v7900_v33  ;;  %vm2752_vm13 = vweird.f32 %v9349_v22  ;;  %v2756_v25 = vand.u32 2147483647, %v9349_v22  ;;  %v9383_v11 = vld [vmem:[#allocation25_spill] sm:$0xff] }
 0x218   : > { %vm8044_vm9 = vcmp.eq.f32.partialorder %v2741_v23, 8.507059e+37  ;;  %v2750_v20 = vmul.f32 %v7931_v5, %v2749_v39  ;;  %v8050_v16 = vmul.f32 %v2655_v4, %v9379_v29  ;;  %v2829_v2 = vadd.f32 %v2828_v55, %v8011_v41  ;;  %vm8062_vm7 = vmor %vm2737_vm14, %vm2738_vm1  ;;  %v9382_v39 = vld [vmem:[#allocation72_spill] sm:$0xff]  ;;  %v2870_v55 = vld [vmem:[%s8295_s5] sm:$0x1] }
 0x219   : > { %v2700_v24 = vsel %vm7950_vm3, %v7916_v9, %v2695_v13  ;;  %v2710_v52 = vsel %vm8025_vm6, %v7852_v17, %v2706_v50  ;;  %v2736_v44 = vadd.f32 %v7900_v33, %v2735_v38  ;;  %v2744_v15 = vor.u32 1.1754944e-38, %v2743_v46 }
 0x21a   : > { %vm2753_vm11 = vweird.f32 %v7931_v5  ;;  %v2765_v4 = vmul.f32 %v7959_v43, %v2764_v40  ;;  %v8069_v10 = vmul.f32 %v2670_v37, %v9382_v39  ;;  %v2830_v9 = vadd.f32 %v2829_v2, %v8031_v57  ;;  %v9386_v40 = vld [vmem:[#allocation26_spill] sm:$0xff]  ;;  %v9390_v2 = vld [vmem:[#allocation23_spill] sm:$0xff] }
 0x21b   : > { %v2725_v17 = vsel %vm8040_vm2, %v7879_v1, %v2721_v61  ;;  %v2758_v12 = vand.u32 2147483648, %v9349_v22  ;;  %vm2767_vm8 = vweird.f32 %v9353_v32  ;;  %v2751_v27 = vadd.f32 %v7931_v5, %v2750_v20  ;;  %vm8091_vm12 = vmor %vm2752_vm13, %vm2753_vm11 }
 0x21c   : > { %vm2768_vm3 = vweird.f32 %v7959_v43  ;;  %v8080_v50 = vmul.f32 %v2685_v49, %v9383_v11  ;;  %v2831_v37 = vadd.f32 %v2830_v9, %v8050_v16  ;;  %v2715_v38 = vsel %vm7980_vm5, %v7942_v60, %v2710_v52 }
 0x21d   : > { %v2740_v1 = vsel %vm8062_vm7, %v7900_v33, %v2736_v44  ;;  %v2771_v13 = vand.u32 2147483647, %v9353_v32  ;;  %v2773_v49 = vand.u32 2147483648, %v9353_v32  ;;  %v2766_v19 = vadd.f32 %v7959_v43, %v2765_v4  ;;  %vm8108_vm0 = vmor %vm2767_vm8, %vm2768_vm3  ;;  %v9391_v44 = vld [vmem:[#allocation24_spill] sm:$0xff] }
 0x21e   : > { %v8099_v59 = vmul.f32 %v2700_v24, %v9386_v40  ;;  %v2832_v60 = vadd.f32 %v2831_v37, %v8069_v10  ;;  %v3880_v18 = vmov 256.0   ;;  %v2730_v22 = vsel %vm8004_vm10, %v2729_v53, %v2725_v17  ;;  %v9393_v17 = vld [vmem:[#allocation27_spill] sm:$0xff] }
 0x21f   : > { %3861 = vrcp.f32 %v3880_v18  ;;  %v2759_v33 = vor.u32 1.1754944e-38, %v2758_v12  ;;  %v2755_v61 = vsel %vm8091_vm12, %v7931_v5, %v2751_v27  ;;  %vm2757_vm5 = vcmp.eq.f32.partialorder %v2756_v25, 8.507059e+37 }
 0x220   : > { %v8116_v20 = vmul.f32 %v2715_v38, %v9389_v30  ;;  %v2833_v34 = vadd.f32 %v2832_v60, %v8080_v50  ;;  %v2745_v53 = vsel %vm8044_vm9, %v2744_v15, %v2740_v1  ;;  %v2774_v29 = vor.u32 1.1754944e-38, %v2773_v49  ;;  %v9392_v15 = vld [vmem:[#allocation74_spill] sm:$0xff] }
 0x221   : > { %v2770_v32 = vsel %vm8108_vm0, %v7959_v43, %v2766_v19  ;;  %vm2772_vm15 = vcmp.eq.f32.partialorder %v2771_v13, 8.507059e+37  ;;  %v8125_v24 = vmul.f32 %v2730_v22, %v9390_v2  ;;  %v2760_v25 = vsel %vm2757_vm5, %v2759_v33, %v2755_v61  ;;  %v2911_v61 = vld [vmem:[%s8296_s6] sm:$0xff] }
 0x222   : > { %v2834_v5 = vadd.f32 %v2833_v34, %v8099_v59  ;;  %v8129_v23 = vmul.f32 %v2745_v53, %v9391_v44  ;;  %v2775_v14 = vsel %vm2772_vm15, %v2774_v29, %v2770_v32  ;;  %v8133_v39 = vmul.f32 %v2760_v25, %v9392_v15  ;;  %2932 = vmatpush.msrb.mxu0 %v2911_v61 }
 0x223   : > { %v8137_v12 = vmul.f32 %v2775_v14, %v9393_v17  ;;  %vm2913_vm13 = vcmask 64512  }
 0x224   : > { %v2835_v4 = vadd.f32 %v2834_v5, %v8116_v20 }
 0x225   : > { %v3862_v52 = vpop.eup %3861 }
 0x226   : > { %v2836_v9 = vadd.f32 %v2835_v4, %v8125_v24  ;;  %v2847_v43 = vmul.f32 256.0, %v3862_v52  ;;  %vm2851_vm14 = vweird.f32 %v3862_v52 }
 0x228   : > { %v2837_v27 = vadd.f32 %v2836_v9, %v8129_v23  ;;  %v2848_v37 = vsub.f32 1.0, %v2847_v43 }
 0x22a   : > { %v2838_v11 = vadd.f32 %v2837_v27, %v8133_v39  ;;  %v2849_v46 = vmul.f32 %v3862_v52, %v2848_v37  ;;  %v3477_v27 = vld [vmem:[%s8298_s8 + $0x38] sm:$0xff]  ;;  %v3475_v37 = vld [vmem:[%s8298_s8 + $0x28] sm:$0xff] }
 0x22b   : > { %3696 = vmatpush.bf16.msra.mxu1 %v3477_v27  ;;  %3697 = vmatpush.bf16.msra.mxu2 %v3477_v27 }
 0x22c   : > { %v2839_v38 = vadd.f32 %v2838_v11, %v8137_v12  ;;  %v2850_v19 = vadd.f32 %v3862_v52, %v2849_v46  ;;  %3698 = vmatpush.bf16.msra.mxu3 %v3477_v27  ;;  %v3476_v11 = vld [vmem:[%s8298_s8 + $0x30] sm:$0xff] }
 0x22d   : > { %v3472_v46 = vld [vmem:[%s8298_s8 + $0x10] sm:$0xff] }
 0x22e   : > { %v2840_v1 = vrot.slane %v2839_v38, 4  ;;  %v2852_v18 = vsel %vm2851_vm14, %v3862_v52, %v2850_v19  ;;  %v3470_v19 = vld [vmem:[%s8298_s8] sm:$0xff] }
 0x22f   : > { %3699 = vmatpush.bf16.msra.mxu1 %v3476_v11  ;;  %3700 = vmatpush.bf16.msra.mxu2 %v3476_v11 }
 0x230   : > { %v2841_v13 = vadd.f32 %v2840_v1, %v2839_v38  ;;  %3701 = vmatpush.bf16.msra.mxu3 %v3476_v11  ;;  %v3474_v38 = vld [vmem:[%s8298_s8 + $0x20] sm:$0xff]  ;;  %v3473_v1 = vld [vmem:[%s8298_s8 + $0x18] sm:$0xff] }
 0x232   : > { %v2842_v49 = vrot.slane %v2841_v13, 2 }
 0x233   : > { %3702 = vmatpush.bf16.msra.mxu1 %v3475_v37  ;;  %3703 = vmatpush.bf16.msra.mxu2 %v3475_v37 }
 0x234   : > { %v2843_v40 = vadd.f32 %v2842_v49, %v2841_v13  ;;  %3704 = vmatpush.bf16.msra.mxu3 %v3475_v37  ;;  %v3471_v13 = vld [vmem:[%s8298_s8 + $0x8] sm:$0xff]  ;;  %v2912_v49 = vld [vmem:[%s8297_s7] sm:$0x1] }
 0x236   : > { %v2844_v60 = vrot.slane %v2843_v40, 1 }
 0x237   : > { %3705 = vmatpush.bf16.msra.mxu1 %v3474_v38  ;;  %3706 = vmatpush.bf16.msra.mxu2 %v3474_v38 }
 0x238   : > { %v2845_v22 = vadd.f32 %v2844_v60, %v2843_v40  ;;  %3707 = vmatpush.bf16.msra.mxu3 %v3474_v38 }
 0x23a   : > { %v2853_v33 = vmul.f32 %v2852_v18, %v2845_v22 }
 0x23b   : > { %3708 = vmatpush.bf16.msra.mxu1 %v3473_v1  ;;  %3709 = vmatpush.bf16.msra.mxu2 %v3473_v1 }
 0x23c   : > { %2887 = vmatmul.f32.vlgmr.msra.gmra.mxu0 %v2853_v33  ;;  %3710 = vmatpush.bf16.msra.mxu3 %v3473_v1 }
 0x23d   : > { %3073 = vmatpush.bf16.msra.mxu0 %v3477_v27 }
 0x23f   : > { %3711 = vmatpush.bf16.msra.mxu1 %v3472_v46  ;;  %3712 = vmatpush.bf16.msra.mxu2 %v3472_v46 }
 0x240   : > { %3713 = vmatpush.bf16.msra.mxu3 %v3472_v46 }
 0x241   : > { %3074 = vmatpush.bf16.msra.mxu0 %v3476_v11 }
 0x243   : > { %3714 = vmatpush.bf16.msra.mxu1 %v3471_v13  ;;  %3715 = vmatpush.bf16.msra.mxu2 %v3471_v13 }
 0x244   : > { %3716 = vmatpush.bf16.msra.mxu3 %v3471_v13 }
 0x245   : > { %3075 = vmatpush.bf16.msra.mxu0 %v3475_v37 }
 0x247   : > { %3717 = vmatpush.bf16.msra.mxu1 %v3470_v19  ;;  %3718 = vmatpush.bf16.msra.mxu2 %v3470_v19 }
 0x248   : > { %3719 = vmatpush.bf16.msra.mxu3 %v3470_v19 }
 0x249   : > { %3076 = vmatpush.bf16.msra.mxu0 %v3474_v38 }
 0x24d   : > { %3077 = vmatpush.bf16.msra.mxu0 %v3473_v1 }
 0x251   : > { %3078 = vmatpush.bf16.msra.mxu0 %v3472_v46 }
 0x255   : > { %3079 = vmatpush.bf16.msra.mxu0 %v3471_v13 }
 0x259   : > { %3080 = vmatpush.bf16.msra.mxu0 %v3470_v19 }
 0x2b9   : > { %v2888_v30 = vpop.f32.mrf.mxu0 }
 0x2ba   : > { %v2889_v34 = vadd.f32 %v2888_v30, %v2870_v55 }
 0x2bc   : > { %v3431_v53 = vmul.f32 -1.442695, %v2889_v34 }
 0x2be   : > { %3863 = vpow2.f32 %v3431_v53 }
 0x2c4   : > { %v3864_v29 = vpop.eup %3863 }
 0x2c5   : > { %v2894_v32 = vadd.f32 1.0, %v3864_v29 }
 0x2c7   : > { %3865 = vrcp.f32 %v2894_v32  ;;  %v2906_v52 = vand.u32 2147483648, %v2894_v32  ;;  %v2904_v4 = vand.u32 2147483647, %v2894_v32  ;;  %vm2900_vm4 = vweird.f32 %v2894_v32 }
 0x2c9   : > { %v2907_v15 = vor.u32 1.1754944e-38, %v2906_v52  ;;  %vm2905_vm1 = vcmp.eq.f32.partialorder %v2904_v4, 8.507059e+37 }
 0x2cd   : > { %v3866_v2 = vpop.eup %3865 }
 0x2ce   : > { %v2896_v5 = vmul.f32 %v3866_v2, %v2894_v32  ;;  %vm2901_vm10 = vweird.f32 %v3866_v2 }
 0x2cf   : > { %vm2902_vm6 = vmor %vm2900_vm4, %vm2901_vm10 }
 0x2d0   : > { %v2897_v25 = vsub.f32 1.0, %v2896_v5 }
 0x2d2   : > { %v2898_v44 = vmul.f32 %v3866_v2, %v2897_v25 }
 0x2d4   : > { %v2899_v14 = vadd.f32 %v3866_v2, %v2898_v44 }
 0x2d6   : > { %v2903_v9 = vsel %vm2902_vm6, %v3866_v2, %v2899_v14 }
 0x2d7   : > { %v2908_v43 = vsel %vm2905_vm1, %v2907_v15, %v2903_v9 }
 0x2d8   : > { %v2910_v17 = vmul.f32 %v2908_v43, %v2889_v34 }
 0x2da   : > { %3432 = vmatmul.msk.f32.vlgmr.msrb.gmra.mxu0 %vm2913_vm13, %v2910_v17 }
 0x357   : > { %v2934_v40 = vpop.f32.mrf.mxu0 }
 0x358   : > { %v2935_v60 = vadd.f32 %v2934_v40, %v2912_v49 }
 0x35a   : > { %v3433_v18 = vmul.f32 -1.442695, %v2935_v60 }
 0x35c   : > { %3867 = vpow2.f32 %v3433_v18 }
 0x362   : > { %v3868_v22 = vpop.eup %3867 }
 0x363   : > { %v2940_v33 = vadd.f32 1.0, %v3868_v22 }
 0x365   : > { %3869 = vrcp.f32 %v2940_v33  ;;  %v2952_v34 = vand.u32 2147483648, %v2940_v33  ;;  %v2950_v29 = vand.u32 2147483647, %v2940_v33  ;;  %vm2946_vm9 = vweird.f32 %v2940_v33 }
 0x367   : > { %v2953_v2 = vor.u32 1.1754944e-38, %v2952_v34  ;;  %vm2951_vm11 = vcmp.eq.f32.partialorder %v2950_v29, 8.507059e+37 }
 0x36b   : > { %v3870_v55 = vpop.eup %3869 }
 0x36c   : > { %v2942_v61 = vmul.f32 %v3870_v55, %v2940_v33  ;;  %vm2947_vm2 = vweird.f32 %v3870_v55 }
 0x36d   : > { %vm2948_vm7 = vmor %vm2946_vm9, %vm2947_vm2 }
 0x36e   : > { %v2943_v30 = vsub.f32 1.0, %v2942_v61 }
 0x370   : > { %v2944_v53 = vmul.f32 %v3870_v55, %v2943_v30 }
 0x372   : > { %v2945_v32 = vadd.f32 %v3870_v55, %v2944_v53 }
 0x374   : > { %v2949_v5 = vsel %vm2948_vm7, %v3870_v55, %v2945_v32 }
 0x375   : > { %v2954_v25 = vsel %vm2951_vm11, %v2953_v2, %v2949_v5 }
 0x376   : > { %v2956_v52 = vperm.slane %v2954_v25, 0 }
 0x378   : > { %v2957_v44 = vmul.f32 %v2956_v52, %v7591_v7  ;;  %v2958_v4 = vmul.f32 %v2956_v52, %v7595_v45  ;;  %v2961_v14 = vmul.f32 %v2956_v52, %v7659_v54  ;;  %v2962_v15 = vmul.f32 %v2956_v52, %v7682_v51 }
 0x379   : > { %v2971_v9 = vmul.f32 %v2956_v52, %v7869_v6  ;;  %v2972_v43 = vmul.f32 %v2956_v52, %v7890_v3  ;;  %v2979_v17 = vmul.f32 %v2956_v52, %v8031_v57  ;;  %v2980_v27 = vmul.f32 %v2956_v52, %v8050_v16 }
 0x37a   : > { %v2989_v11 = vpack.c.bf16 %v2958_v4, %v2957_v44  ;;  %v2991_v37 = vpack.c.bf16 %v2962_v15, %v2961_v14  ;;  %v2959_v7 = vmul.f32 %v2956_v52, %v7622_v47  ;;  %v2960_v45 = vmul.f32 %v2956_v52, %v7645_v0  ;;  %v3672_v4 = vld [vmem:[%s8211_s30 + $0x38] sm:$0xff]  }
 0x37b   : > { %v2996_v38 = vpack.c.bf16 %v2972_v43, %v2971_v9  ;;  %v3000_v1 = vpack.c.bf16 %v2980_v27, %v2979_v17  ;;  %v2963_v54 = vmul.f32 %v2956_v52, %v7703_v36  ;;  %v2964_v51 = vmul.f32 %v2956_v52, %v7717_v31  ;;  %v3676_v14 = vld [vmem:[%s8211_s30 + $0x58] sm:$0xff]  }
 0x37c   : > { %3081 = vmatmul.bf16.vlgmr.msra.gmra.mxu0 %v2989_v11  ;;  %3091 = vmatmul.bf16.vlgmr.msra.gmra.mxu1 %v2991_v37  ;;  %v2973_v6 = vmul.f32 %v2956_v52, %v7905_v48  ;;  %v2974_v3 = vmul.f32 %v2956_v52, %v7928_v21  ;;  %v2981_v57 = vmul.f32 %v2956_v52, %v8069_v10  ;;  %v3544_v27 = vunpack.c.l.bf16 %v3672_v4 }
 0x37d   : > { %3116 = vmatmul.bf16.vlgmr.msra.gmra.mxu2 %v2996_v38  ;;  %3136 = vmatmul.bf16.vlgmr.msra.gmra.mxu3 %v3000_v1  ;;  %v2982_v16 = vmul.f32 %v2956_v52, %v8080_v50  ;;  %v2990_v46 = vpack.c.bf16 %v2960_v45, %v2959_v7  ;;  %v2992_v13 = vpack.c.bf16 %v2964_v51, %v2963_v54  ;;  %v3560_v11 = vunpack.c.l.bf16 %v3676_v14 }
 0x37e   : > { %v2997_v49 = vpack.c.bf16 %v2974_v3, %v2973_v6  ;;  %v2965_v47 = vmul.f32 %v2956_v52, %v7735_v8  ;;  %v2966_v0 = vmul.f32 %v2956_v52, %v7763_v28  ;;  %v2975_v36 = vmul.f32 %v2956_v52, %v7956_v58 }
 0x37f   : > { %v3001_v19 = vpack.c.bf16 %v2982_v16, %v2981_v57  ;;  %v2976_v31 = vmul.f32 %v2956_v52, %v7971_v35  ;;  %v2983_v48 = vmul.f32 %v2956_v52, %v8099_v59  ;;  %v2984_v21 = vmul.f32 %v2956_v52, %v8116_v20 }
 0x380   : > { %v2993_v10 = vpack.c.bf16 %v2966_v0, %v2965_v47  ;;  %v2967_v60 = vmul.f32 %v2956_v52, %v7786_v42  ;;  %v2968_v8 = vmul.f32 %v2956_v52, %v7806_v63  ;;  %v2977_v28 = vmul.f32 %v2956_v52, %v7988_v56  ;;  %v3666_v0 = vld [vmem:[%s8211_s30 + $0x8] sm:$0xff]  }
 0x381   : > { %v2998_v50 = vpack.c.bf16 %v2976_v31, %v2975_v36  ;;  %v3002_v40 = vpack.c.bf16 %v2984_v21, %v2983_v48  ;;  %v2978_v58 = vmul.f32 %v2956_v52, %v8011_v41  ;;  %v2985_v35 = vmul.f32 %v2956_v52, %v8125_v24  ;;  %v3668_v36 = vld [vmem:[%s8211_s30 + $0x18] sm:$0xff]  }
 0x382   : > { %v2986_v59 = vmul.f32 %v2956_v52, %v8129_v23  ;;  %v2994_v20 = vpack.c.bf16 %v2968_v8, %v2967_v60  ;;  %v2969_v33 = vmul.f32 %v2956_v52, %v7826_v62  ;;  %v2970_v42 = vmul.f32 %v2956_v52, %v7841_v26  ;;  %v8216_v26 = vld [vmem:[%s8299_s9] ss:$0 sm:$0xff] }
 0x383   : > { %v2999_v18 = vpack.c.bf16 %v2978_v58, %v2977_v28  ;;  %v2987_v63 = vmul.f32 %v2956_v52, %v8133_v39  ;;  %v2988_v56 = vmul.f32 %v2956_v52, %v8137_v12  ;;  %v3515_v23 = vld [vmem:[%s8211_s30] sm:$0xff]   ;;  %v3667_v39 = vld [vmem:[%s8211_s30 + $0x10] sm:$0xff]   ;;  %v3545_v45 = vunpack.c.h.bf16 %v3672_v4 }
 0x384   : > { %v3003_v22 = vpack.c.bf16 %v2986_v59, %v2985_v35  ;;  %v2995_v41 = vpack.c.bf16 %v2970_v42, %v2969_v33  ;;  %v3516_v12 = vunpack.c.l.bf16 %v3515_v23  ;;  %v3524_v61 = vunpack.c.l.bf16 %v3667_v39  ;;  %v3677_v33 = vld [vmem:[%s8211_s30 + $0x60] sm:$0xff]  }
 0x385   : > { %v3004_v55 = vpack.c.bf16 %v2988_v56, %v2987_v63  ;;  %v3517_v32 = vunpack.c.h.bf16 %v3515_v23  ;;  %v3525_v2 = vunpack.c.h.bf16 %v3667_v39  ;;  %v3561_v54 = vunpack.c.h.bf16 %v3676_v14 }
 0x386   : > { %v3520_v21 = vunpack.c.l.bf16 %v3666_v0  ;;  %v3521_v28 = vunpack.c.h.bf16 %v3666_v0  ;;  %v3529_v58 = vunpack.c.h.bf16 %v3668_v36 }
 0x38c   : > { %3086 = vmatmul.bf16.gmra.mxu0 %v2990_v46  ;;  %3096 = vmatmul.bf16.gmra.mxu1 %v2992_v13 }
 0x38d   : > { %3121 = vmatmul.bf16.gmra.mxu2 %v2997_v49  ;;  %3141 = vmatmul.bf16.gmra.mxu3 %v3001_v19 }
 0x39c   : > { %3101 = vmatmul.bf16.gmra.mxu1 %v2993_v10  ;;  %v3528_v10 = vunpack.c.l.bf16 %v3668_v36 }
 0x39d   : > { %3126 = vmatmul.bf16.gmra.mxu2 %v2998_v50  ;;  %3146 = vmatmul.bf16.gmra.mxu3 %v3002_v40 }
 0x3ac   : > { %3106 = vmatmul.bf16.gmra.mxu1 %v2994_v20 }
 0x3ad   : > { %3131 = vmatmul.bf16.gmra.mxu2 %v2999_v18  ;;  %3151 = vmatmul.bf16.gmra.mxu3 %v3003_v22  ;;  %v3673_v22 = vld [vmem:[%s8211_s30 + $0x40] sm:$0xff]  }
 0x3bc   : > { %3111 = vmatmul.bf16.gmra.mxu1 %v2995_v41 }
 0x3bd   : > { %3156 = vmatmul.bf16.gmra.mxu3 %v3004_v55  ;;  %v3548_v55 = vunpack.c.l.bf16 %v3673_v22 }
 0x3f9   : > { %v3082_v24 = vpop.f32.mrf.mxu0  ;;  %v3092_v62 = vpop.f32.mrf.mxu1 }
 0x3fa   : > { %v3083_v30 = vadd.f32 %v8216_v26, %v3082_v24  ;;  %v3093_v34 = vadd.f32 %v8216_v26, %v3092_v62  ;;  %v3564_v24 = vunpack.c.l.bf16 %v3677_v33 }
 0x3fc   : > { %v3226_v15 = vadd.f32 %v3516_v12, %v3083_v30  ;;  %v3230_v9 = vadd.f32 %v3524_v61, %v3093_v34  ;;  %v3549_v61 = vunpack.c.h.bf16 %v3673_v22  ;;  %v3565_v30 = vunpack.c.h.bf16 %v3677_v33  ;;  %v3675_v22 = vld [vmem:[%s8211_s30 + $0x50] sm:$0xff]  }
 0x3fd   : > { %v3679_v33 = vld [vmem:[%s8211_s30 + $0x70] sm:$0xff]  }
 0x400   : > { %v3117_v53 = vpop.f32.mrf.mxu2  ;;  %v3137_v29 = vpop.f32.mrf.mxu3 }
 0x401   : > { %v3084_v5 = vpop.f32.mrf.mxu0  ;;  %v3094_v25 = vpop.f32.mrf.mxu1  ;;  %v3118_v1 = vadd.f32 %v8216_v26, %v3117_v53  ;;  %v3138_v7 = vadd.f32 %v8216_v26, %v3137_v29 }
 0x402   : > { %v3085_v52 = vadd.f32 %v8216_v26, %v3084_v5  ;;  %v3095_v44 = vadd.f32 %v8216_v26, %v3094_v25 }
 0x403   : > { %v3240_v13 = vadd.f32 %v3544_v27, %v3118_v1  ;;  %v3248_v49 = vadd.f32 %v3560_v11, %v3138_v7  ;;  %v3674_v1 = vld [vmem:[%s8211_s30 + $0x48] sm:$0xff]  }
 0x404   : > { %v3227_v43 = vadd.f32 %v3517_v32, %v3085_v52  ;;  %v3231_v17 = vadd.f32 %v3525_v2, %v3095_v44  ;;  %v3678_v7 = vld [vmem:[%s8211_s30 + $0x68] sm:$0xff]  }
 0x406   : > { %v3581_v37 = vpack.c.bf16 %v3227_v43, %v3226_v15  ;;  %v3591_v38 = vpack.c.bf16 %v3231_v17, %v3230_v9  ;;  %v3669_v15 = vld [vmem:[%s8211_s30 + $0x20] sm:$0xff]  }
 0x407   : > { %v3532_v43 = vunpack.c.l.bf16 %v3669_v15  ;;  %v3533_v11 = vunpack.c.h.bf16 %v3669_v15 }
 0x408   : > { %3582 = vst [vmem:[%s8229_s16] sm:$0xff] %v3581_v37   ;;  %v3119_v51 = vpop.f32.mrf.mxu2  ;;  %v3139_v6 = vpop.f32.mrf.mxu3 }
 0x409   : > { %3682 = vst [vmem:[%s8229_s16 + $0x10] sm:$0xff] %v3591_v38   ;;  %v3120_v3 = vadd.f32 %v8216_v26, %v3119_v51  ;;  %v3140_v57 = vadd.f32 %v8216_v26, %v3139_v6  ;;  %v3087_v16 = vpop.f32.mrf.mxu0  ;;  %v3097_v46 = vpop.f32.mrf.mxu1  ;;  %v3552_v51 = vunpack.c.l.bf16 %v3674_v1  ;;  %v3568_v6 = vunpack.c.l.bf16 %v3678_v7 }
 0x40a   : > { %v3088_v50 = vadd.f32 %v8216_v26, %v3087_v16  ;;  %v3098_v40 = vadd.f32 %v8216_v26, %v3097_v46  ;;  %v3553_v46 = vunpack.c.h.bf16 %v3674_v1 }
 0x40b   : > { %v3241_v19 = vadd.f32 %v3545_v45, %v3120_v3  ;;  %v3249_v47 = vadd.f32 %v3561_v54, %v3140_v57 }
 0x40c   : > { %v3228_v42 = vadd.f32 %v3520_v21, %v3088_v50  ;;  %v3232_v63 = vadd.f32 %v3528_v10, %v3098_v40 }
 0x40d   : > { %v3616_v31 = vpack.c.bf16 %v3241_v19, %v3240_v13  ;;  %v3636_v48 = vpack.c.bf16 %v3249_v47, %v3248_v49  ;;  %v3569_v13 = vunpack.c.h.bf16 %v3678_v7 }
 0x40f   : > { %3687 = vst [vmem:[%s8229_s16 + $0x38] sm:$0xff] %v3616_v31  }
 0x410   : > { %3691 = vst [vmem:[%s8229_s16 + $0x58] sm:$0xff] %v3636_v48   ;;  %v3122_v60 = vpop.f32.mrf.mxu2  ;;  %v3142_v8 = vpop.f32.mrf.mxu3 }
 0x411   : > { %v3089_v35 = vpop.f32.mrf.mxu0  ;;  %v3099_v59 = vpop.f32.mrf.mxu1  ;;  %v3123_v39 = vadd.f32 %v8216_v26, %v3122_v60  ;;  %v3143_v12 = vadd.f32 %v8216_v26, %v3142_v8  ;;  %v3670_v60 = vld [vmem:[%s8211_s30 + $0x28] sm:$0xff]  }
 0x412   : > { %v3090_v20 = vadd.f32 %v8216_v26, %v3089_v35  ;;  %v3100_v18 = vadd.f32 %v8216_v26, %v3099_v59  ;;  %v3537_v59 = vunpack.c.h.bf16 %v3670_v60 }
 0x413   : > { %v3242_v5 = vadd.f32 %v3548_v55, %v3123_v39  ;;  %v3250_v25 = vadd.f32 %v3564_v24, %v3143_v12  ;;  %v3573_v39 = vunpack.c.h.bf16 %v3679_v33 }
 0x414   : > { %v3229_v56 = vadd.f32 %v3521_v28, %v3090_v20  ;;  %v3233_v41 = vadd.f32 %v3529_v58, %v3100_v18  ;;  %v3536_v28 = vunpack.c.l.bf16 %v3670_v60 }
 0x416   : > { %v3586_v62 = vpack.c.bf16 %v3229_v56, %v3228_v42  ;;  %v3596_v23 = vpack.c.bf16 %v3233_v41, %v3232_v63  ;;  %v3556_v56 = vunpack.c.l.bf16 %v3675_v22  ;;  %v3572_v41 = vunpack.c.l.bf16 %v3679_v33 }
 0x418   : > { %3681 = vst [vmem:[%s8229_s16 + $0x8] sm:$0xff] %v3586_v62   ;;  %v3124_v34 = vpop.f32.mrf.mxu2  ;;  %v3144_v53 = vpop.f32.mrf.mxu3 }
 0x419   : > { %3683 = vst [vmem:[%s8229_s16 + $0x18] sm:$0xff] %v3596_v23   ;;  %v3125_v29 = vadd.f32 %v8216_v26, %v3124_v34  ;;  %v3145_v32 = vadd.f32 %v8216_v26, %v3144_v53  ;;  %v3102_v2 = vpop.f32.mrf.mxu1  ;;  %v3557_v23 = vunpack.c.h.bf16 %v3675_v22 }
 0x41a   : > { %v3103_v9 = vadd.f32 %v8216_v26, %v3102_v2 }
 0x41b   : > { %v3243_v52 = vadd.f32 %v3549_v61, %v3125_v29  ;;  %v3251_v44 = vadd.f32 %v3565_v30, %v3145_v32 }
 0x41c   : > { %v3234_v45 = vadd.f32 %v3532_v43, %v3103_v9 }
 0x41d   : > { %v3621_v4 = vpack.c.bf16 %v3243_v52, %v3242_v5  ;;  %v3641_v14 = vpack.c.bf16 %v3251_v44, %v3250_v25  ;;  %v3671_v44 = vld [vmem:[%s8211_s30 + $0x30] sm:$0xff]  }
 0x41e   : > { %v3541_v9 = vunpack.c.h.bf16 %v3671_v44 }
 0x41f   : > { %3688 = vst [vmem:[%s8229_s16 + $0x40] sm:$0xff] %v3621_v4  }
 0x420   : > { %3692 = vst [vmem:[%s8229_s16 + $0x60] sm:$0xff] %v3641_v14   ;;  %v3127_v17 = vpop.f32.mrf.mxu2  ;;  %v3147_v27 = vpop.f32.mrf.mxu3  ;;  %v3540_v14 = vunpack.c.l.bf16 %v3671_v44 }
 0x421   : > { %v3104_v37 = vpop.f32.mrf.mxu1  ;;  %v3128_v57 = vadd.f32 %v8216_v26, %v3127_v17  ;;  %v3148_v16 = vadd.f32 %v8216_v26, %v3147_v27 }
 0x422   : > { %v3105_v38 = vadd.f32 %v8216_v26, %v3104_v37 }
 0x423   : > { %v3244_v31 = vadd.f32 %v3552_v51, %v3128_v57  ;;  %v3252_v48 = vadd.f32 %v3568_v6, %v3148_v16 }
 0x424   : > { %v3235_v54 = vadd.f32 %v3533_v11, %v3105_v38  ;;  %v3680_v11 = vld [vmem:[%s8211_s30 + $0x78] sm:$0xff]  }
 0x425   : > { %v3576_v7 = vunpack.c.l.bf16 %v3680_v11 }
 0x426   : > { %v3601_v3 = vpack.c.bf16 %v3235_v54, %v3234_v45  ;;  %v3577_v45 = vunpack.c.h.bf16 %v3680_v11 }
 0x428   : > { %3684 = vst [vmem:[%s8229_s16 + $0x20] sm:$0xff] %v3601_v3   ;;  %v3129_v49 = vpop.f32.mrf.mxu2  ;;  %v3149_v19 = vpop.f32.mrf.mxu3 }
 0x429   : > { %v3130_v47 = vadd.f32 %v8216_v26, %v3129_v49  ;;  %v3150_v0 = vadd.f32 %v8216_v26, %v3149_v19  ;;  %v3107_v36 = vpop.f32.mrf.mxu1 }
 0x42a   : > { %v3108_v8 = vadd.f32 %v8216_v26, %v3107_v36 }
 0x42b   : > { %v3245_v21 = vadd.f32 %v3553_v46, %v3130_v47  ;;  %v3253_v10 = vadd.f32 %v3569_v13, %v3150_v0 }
 0x42c   : > { %v3236_v42 = vadd.f32 %v3536_v28, %v3108_v8 }
 0x42d   : > { %v3626_v50 = vpack.c.bf16 %v3245_v21, %v3244_v31  ;;  %v3646_v40 = vpack.c.bf16 %v3253_v10, %v3252_v48 }
 0x42f   : > { %3689 = vst [vmem:[%s8229_s16 + $0x48] sm:$0xff] %v3626_v50  }
 0x430   : > { %3693 = vst [vmem:[%s8229_s16 + $0x68] sm:$0xff] %v3646_v40   ;;  %v3132_v58 = vpop.f32.mrf.mxu2  ;;  %v3152_v35 = vpop.f32.mrf.mxu3 }
 0x431   : > { %v3109_v20 = vpop.f32.mrf.mxu1  ;;  %v3133_v24 = vadd.f32 %v8216_v26, %v3132_v58  ;;  %v3153_v62 = vadd.f32 %v8216_v26, %v3152_v35 }
 0x432   : > { %v3110_v18 = vadd.f32 %v8216_v26, %v3109_v20 }
 0x433   : > { %v3246_v29 = vadd.f32 %v3556_v56, %v3133_v24  ;;  %v3254_v32 = vadd.f32 %v3572_v41, %v3153_v62 }
 0x434   : > { %v3237_v63 = vadd.f32 %v3537_v59, %v3110_v18 }
 0x436   : > { %v3606_v55 = vpack.c.bf16 %v3237_v63, %v3236_v42 }
 0x438   : > { %3685 = vst [vmem:[%s8229_s16 + $0x28] sm:$0xff] %v3606_v55   ;;  %v3134_v12 = vpop.f32.mrf.mxu2  ;;  %v3154_v61 = vpop.f32.mrf.mxu3 }
 0x439   : > { %v3135_v30 = vadd.f32 %v8216_v26, %v3134_v12  ;;  %v3155_v34 = vadd.f32 %v8216_v26, %v3154_v61  ;;  %v3112_v53 = vpop.f32.mrf.mxu1 }
 0x43a   : > { %v3113_v4 = vadd.f32 %v8216_v26, %v3112_v53 }
 0x43b   : > { %v3247_v2 = vadd.f32 %v3557_v23, %v3135_v30  ;;  %v3255_v5 = vadd.f32 %v3573_v39, %v3155_v34 }
 0x43c   : > { %v3238_v27 = vadd.f32 %v3540_v14, %v3113_v4 }
 0x43d   : > { %v3631_v25 = vpack.c.bf16 %v3247_v2, %v3246_v29  ;;  %v3651_v52 = vpack.c.bf16 %v3255_v5, %v3254_v32 }
 0x43f   : > { %3690 = vst [vmem:[%s8229_s16 + $0x50] sm:$0xff] %v3631_v25  }
 0x440   : > { %3694 = vst [vmem:[%s8229_s16 + $0x70] sm:$0xff] %v3651_v52   ;;  %v3157_v15 = vpop.f32.mrf.mxu3 }
 0x441   : > { %v3114_v43 = vpop.f32.mrf.mxu1  ;;  %v3158_v1 = vadd.f32 %v8216_v26, %v3157_v15 }
 0x442   : > { %v3115_v17 = vadd.f32 %v8216_v26, %v3114_v43 }
 0x443   : > { %v3256_v6 = vadd.f32 %v3576_v7, %v3158_v1 }
 0x444   : > { %v3239_v37 = vadd.f32 %v3541_v9, %v3115_v17 }
 0x446   : > { %v3611_v38 = vpack.c.bf16 %v3239_v37, %v3238_v27 }
 0x448   : > { %3686 = vst [vmem:[%s8229_s16 + $0x30] sm:$0xff] %v3611_v38   ;;  %v3159_v54 = vpop.f32.mrf.mxu3 }
 0x449   : > { %v3160_v51 = vadd.f32 %v8216_v26, %v3159_v54 }
 0x44b   : > { %v3257_v3 = vadd.f32 %v3577_v45, %v3160_v51 }
 0x44d   : > { %v3656_v57 = vpack.c.bf16 %v3257_v3, %v3256_v6 }
 0x44f   : > { %3695 = vst [vmem:[%s8229_s16 + $0x78] sm:$0xff] %v3656_v57  }
 0x450 PF: > { %s20_s13 = sadd.s32 1, %s3878_s13  }
 0x451   : > { %p17_p4 = scmp.ge.s32.totalorder %s20_s13, 4  }
 0x453   :  { %19 = sbr.rel (!%p17_p4) target bundleno = 1 (0x1), region = 93 }

</bundles_post_ra>
